<compile_context>
chip_gen: v6e
topology: v6e:2x2x1
jax: 0.10.0
libtpu: 0.0.40
codegen_flags: <defaults>
</compile_context>

<pallas_src>
import functools

import jax
import jax.numpy as jnp
from jax.experimental import pallas as pl
from jax.experimental.pallas import tpu as pltpu


def _round_up(x, m):
    return ((x + m - 1) // m) * m


@functools.lru_cache(maxsize=None)
def _compiler_params():
    """Per-generation compiler params: 'parallel' grid + VMEM limit sized to the part."""
    try:
        cap = int(pltpu.get_tpu_info().vmem_capacity_bytes)
    except Exception:  # API drift / no TPU info -> conservative default
        cap = 64 * 1024 * 1024
    # 32 MiB on 64-MiB-VMEM parts (v7x), 64 MiB on 128-MiB parts (v5e/v6e).
    limit = min(cap // 2, 64 * 1024 * 1024)
    return pltpu.CompilerParams(
        dimension_semantics=("parallel",),
        vmem_limit_bytes=int(limit),
    )


# ---------------------------------------------------------------------------
# Kernel 1: transposed conv GEMM   out^T = relu(W^T @ patches^T + b)
#   w_ref : (Cout, K)  bf16        x_ref : (K, tm)  bf16 (M = B*Ho*Wo in lanes)
#   b_ref : (Cout, 1)  f32         o_ref : (Cout, tm) bf16   -> lane-dense stores
# ---------------------------------------------------------------------------
def _cm_conv_kernel(w_ref, b_ref, x_ref, o_ref):
    acc = jnp.dot(w_ref[...], x_ref[...], preferred_element_type=jnp.float32)
    o_ref[...] = jnp.maximum(acc + b_ref[...], 0.0).astype(o_ref.dtype)


def _pick_tile_m(m, cap=2048):
    """Lane-dim (M) tile: whole array if tiny, else ~half of M (>=2 grid steps for
    v7x megacore), rounded to 128 lanes and capped."""
    if m <= 256:
        return m
    half = _round_up((m + 1) // 2, 128)
    return min(cap, half)


def conv_cm(patches_t, w_t, b):
    """patches_t: (K, M) bf16, w_t: (Cout, K) bf16, b: (Cout, 1) f32 -> (Cout, M) bf16."""
    K, M = patches_t.shape
    N = w_t.shape[0]
    tm = _pick_tile_m(M)
    return pl.pallas_call(
        _cm_conv_kernel,
        out_shape=jax.ShapeDtypeStruct((N, M), jnp.bfloat16),
        grid=(pl.cdiv(M, tm),),
        in_specs=[
            pl.BlockSpec((N, K), lambda i: (0, 0)),
            pl.BlockSpec((N, 1), lambda i: (0, 0)),
            pl.BlockSpec((K, tm), lambda i: (0, i)),
        ],
        out_specs=pl.BlockSpec((N, tm), lambda i: (0, i)),
        compiler_params=_compiler_params(),
    )(w_t, b, patches_t)


# ---------------------------------------------------------------------------
# Kernel 2: fused tail = conv5 + conv6 (dense over the 3x3 map) + all heads.
#   p5_ref : (bt, 9, 576)  conv5 patches (9 output positions, 3*3*64 features)
#   per position r: z_r = relu(p5[:, r, :] @ W5 + b5)           (bt, 128)
#   feat = relu(sum_r z_r @ W6[r] + b6)                         (bt, 256)
#   h    = relu(feat @ [Wv1 | Wfc | 0] + b1)                    (bt, 256)  (200 padded)
#   out  = h @ W2_blockdiag + b2                                (bt, 8)
#   col0 = v, cols1:7 = softplus(.) + 1, col7 unused (padding)
# ---------------------------------------------------------------------------
def _tail_kernel(p5_ref, w5_ref, b5_ref, w6_ref, b6_ref,
                 w1_ref, b1_ref, w2_ref, b2_ref, o_ref):
    p5 = p5_ref[...]                                            # (bt, 9, 576) bf16
    bt = p5.shape[0]
    feat = jnp.zeros((bt, w6_ref.shape[2]), jnp.float32)
    for r in range(9):                                          # static unroll, 2D matmuls only
        z = jnp.dot(p5[:, r, :], w5_ref[...], preferred_element_type=jnp.float32)
        z = jnp.maximum(z + b5_ref[...], 0.0)
        feat = feat + jnp.dot(z.astype(jnp.bfloat16), w6_ref[r],
                              preferred_element_type=jnp.float32)
    feat = jnp.maximum(feat + b6_ref[...], 0.0)
    h = jnp.dot(feat.astype(jnp.bfloat16), w1_ref[...], preferred_element_type=jnp.float32)
    h = jnp.maximum(h + b1_ref[...], 0.0)
    out = jnp.dot(h.astype(jnp.bfloat16), w2_ref[...], preferred_element_type=jnp.float32)
    out = out + b2_ref[...]
    # numerically-stable softplus, then +1 (matches nn.Softplus() followed by +1)
    sp = jnp.maximum(out, 0.0) + jnp.log1p(jnp.exp(-jnp.abs(out))) + 1.0
    col = jax.lax.broadcasted_iota(jnp.int32, out.shape, 1)
    o_ref[...] = jnp.where(col >= 1, sp, out).astype(o_ref.dtype)


def fused_tail(p5, w5, b5, w6, b6, w1, b1, w2, b2):
    B = p5.shape[0]
    if B <= 8:
        bt = B                                   # tiny batch: single aligned block
    else:
        bt = min(512, _round_up((B + 1) // 2, 8))  # >= 2 grid steps, 8-aligned blocks
    N2 = w2.shape[1]
    return pl.pallas_call(
        _tail_kernel,
        out_shape=jax.ShapeDtypeStruct((B, N2), jnp.float32),
        grid=(pl.cdiv(B, bt),),
        in_specs=[
            pl.BlockSpec((bt, 9, p5.shape[2]), lambda i: (i, 0, 0)),
            pl.BlockSpec(w5.shape, lambda i: (0, 0)),
            pl.BlockSpec(b5.shape, lambda i: (0, 0)),
            pl.BlockSpec(w6.shape, lambda i: (0, 0, 0)),
            pl.BlockSpec(b6.shape, lambda i: (0, 0)),
            pl.BlockSpec(w1.shape, lambda i: (0, 0)),
            pl.BlockSpec(b1.shape, lambda i: (0, 0)),
            pl.BlockSpec(w2.shape, lambda i: (0, 0)),
            pl.BlockSpec(b2.shape, lambda i: (0, 0)),
        ],
        out_specs=pl.BlockSpec((bt, N2), lambda i: (i, 0)),
        compiler_params=_compiler_params(),
    )(p5, w5, b5, w6, b6, w1, b1, w2, b2)


# ---------------------------------------------------------------------------
# XLA-side patch builders (channels-first, no padding, no M inflation of layout)
# ---------------------------------------------------------------------------
def _im2col_cm(x_cm, kh, kw, stride):
    """x_cm: (C, B, H, W) -> (K, M) with K = kh*kw*C ordered (i, j, c), M = B*Ho*Wo."""
    C, B, H, W = x_cm.shape
    Ho = (H - kh) // stride + 1
    Wo = (W - kw) // stride + 1
    taps = []
    for i in range(kh):
        for j in range(kw):
            taps.append(x_cm[:, :, i:i + stride * Ho:stride, j:j + stride * Wo:stride])
    p = jnp.stack(taps, axis=0)                  # (kh*kw, C, B, Ho, Wo)
    return p.reshape(kh * kw * C, B * Ho * Wo), Ho, Wo


def _conv5_patches(x_cm):
    """x_cm: (64, B, 5, 5) -> (B, 9, 576): positions (p, q) row-major, features (i, j, c)."""
    C, B, H, W = x_cm.shape
    assert (C, H, W) == (64, 5, 5), (C, H, W)
    taps = []
    for i in range(3):
        for j in range(3):
            taps.append(x_cm[:, :, i:i + 3, j:j + 3])   # (C, B, 3, 3)
    p = jnp.stack(taps, axis=0)                         # (9, C, B, 3, 3)
    p = p.transpose(2, 3, 4, 0, 1)                      # (B, 3, 3, 9, C)
    return p.reshape(B, 9, 9 * C)


# ---------------------------------------------------------------------------
# Deterministic parameter initialization (mirrors the PyTorch module's shapes)
# ---------------------------------------------------------------------------
_CONV_CFG = [  # (cin, cout, kernel, stride) — strides stay STATIC (never traced)
    (4, 8, 4, 2),
    (8, 16, 3, 2),
    (16, 32, 3, 2),
    (32, 64, 3, 2),
    (64, 128, 3, 1),
    (128, 256, 3, 1),
]


def init_params(key):
    gain = 2.0 ** 0.5  # calculate_gain('relu')
    conv_w, conv_b = [], []
    for (cin, cout, k, _s) in _CONV_CFG:
        key, sub = jax.random.split(key)
        fan_in, fan_out = cin * k * k, cout * k * k
        bound = gain * (6.0 / (fan_in + fan_out)) ** 0.5   # xavier_uniform_
        conv_w.append(jax.random.uniform(sub, (k, k, cin, cout), jnp.float32, -bound, bound))
        conv_b.append(jnp.full((cout,), 0.1, jnp.float32))  # constant_(bias, 0.1)

    def linear(k_, fin, fout):
        k1, k2 = jax.random.split(k_)
        bound = 1.0 / (fin ** 0.5)  # PyTorch default Linear init bound
        return (jax.random.uniform(k1, (fin, fout), jnp.float32, -bound, bound),
                jax.random.uniform(k2, (fout,), jnp.float32, -bound, bound))

    keys = jax.random.split(key, 5)
    w_v1, b_v1 = linear(keys[0], 256, 100)
    w_v2, b_v2 = linear(keys[1], 100, 1)
    w_fc, b_fc = linear(keys[2], 256, 100)
    w_al, b_al = linear(keys[3], 100, 3)
    w_be, b_be = linear(keys[4], 100, 3)

    params = {}
    # conv1-4: pre-transposed (Cout, K) bf16 weights, (Cout, 1) f32 biases.
    params["conv_wt"] = [w.reshape(-1, w.shape[-1]).T.astype(jnp.bfloat16) for w in conv_w[:4]]
    params["conv_b"] = [b.reshape(-1, 1) for b in conv_b[:4]]
    # conv5 as (576, 128); conv6 as (9, 128, 256) (one (128,256) slice per 3x3 position).
    params["w5"] = conv_w[4].reshape(-1, 128).astype(jnp.bfloat16)
    params["b5"] = conv_b[4].reshape(1, 128)
    params["w6"] = conv_w[5].reshape(9, 128, 256).astype(jnp.bfloat16)
    params["b6"] = conv_b[5].reshape(1, 256)
    # Heads fused into two lane-aligned GEMM stages (hidden padded 200 -> 256):
    #   stage 1: [v1 | fc | 0]                       -> (256, 256)
    #   stage 2: block-diag [v2 ; alpha ; beta ; 0]  -> (256, 8)
    w1 = jnp.zeros((256, 256), jnp.float32).at[:, :100].set(w_v1).at[:, 100:200].set(w_fc)
    b1 = jnp.zeros((256,), jnp.float32).at[:100].set(b_v1).at[100:200].set(b_fc)
    w2 = jnp.zeros((256, 8), jnp.float32)
    w2 = w2.at[:100, 0:1].set(w_v2).at[100:200, 1:4].set(w_al).at[100:200, 4:7].set(w_be)
    b2 = jnp.zeros((8,), jnp.float32).at[0:1].set(b_v2).at[1:4].set(b_al).at[4:7].set(b_be)
    params["w1"] = w1.astype(jnp.bfloat16)
    params["b1"] = b1.reshape(1, 256)
    params["w2"] = w2.astype(jnp.bfloat16)
    params["b2"] = b2.reshape(1, 8)
    return params


# ---------------------------------------------------------------------------
# Full forward pass:  ((alpha, beta), v)
# ---------------------------------------------------------------------------
def net_forward(params, x_nchw):
    B = x_nchw.shape[0]
    # NCHW -> channels-first-flat (C, B, H, W) bf16; activations stay channels-first
    # so the transposed GEMMs keep the large M dim in the lane axis end-to-end.
    x = jnp.transpose(x_nchw, (1, 0, 2, 3)).astype(jnp.bfloat16)
    for li in range(4):
        _cin, cout, k, s = _CONV_CFG[li]
        patches_t, ho, wo = _im2col_cm(x, k, k, s)
        y = conv_cm(patches_t, params["conv_wt"][li], params["conv_b"][li])  # (cout, M) bf16
        x = y.reshape(cout, B, ho, wo)
    assert x.shape == (64, B, 5, 5), x.shape  # forced by the module with 96x96 input
    p5 = _conv5_patches(x)                    # (B, 9, 576) bf16
    head = fused_tail(p5, params["w5"], params["b5"], params["w6"], params["b6"],
                      params["w1"], params["b1"], params["w2"], params["b2"])
    v = head[:, 0:1]
    alpha = head[:, 1:4]
    beta = head[:, 4:7]
    return (alpha, beta), v


if __name__ == "__main__":
    key = jax.random.PRNGKey(0)
    pkey, xkey = jax.random.split(key)
    params = init_params(pkey)

    # input implied by the module: img_stack=4 channels, 96x96 spatial (-> 1x1x256 feats)
    x = jax.random.normal(xkey, (2, 4, 96, 96), dtype=jnp.float32)

    fwd = jax.jit(net_forward)
    (alpha, beta), v = fwd(params, x)
    jax.block_until_ready((alpha, beta, v))

    assert alpha.shape == (2, 3) and beta.shape == (2, 3) and v.shape == (2, 1)
    assert bool(jnp.all(alpha >= 1.0)) and bool(jnp.all(beta >= 1.0))
    assert bool(jnp.all(jnp.isfinite(alpha))) and bool(jnp.all(jnp.isfinite(v)))
    print("KERNEL_OK")
</pallas_src>

<mosaic_0001>
module attributes {stable_mosaic.version = 11 : i64} {
  func.func @_cm_conv_kernel(%arg0: i32, %arg1: memref<8x64xbf16, #tpu.memory_space<vmem>>, %arg2: memref<8x1xf32, #tpu.memory_space<vmem>>, %arg3: memref<64x2048xbf16, #tpu.memory_space<vmem>>, %arg4: memref<8x2048xbf16, #tpu.memory_space<vmem>>) attributes {dimension_semantics = [#tpu.dimension_semantics<parallel>], iteration_bounds = array<i64: 3>, scalar_prefetch = 0 : i64, scratch_operands = 0 : i64, tpu.core_type = #tpu.core_type<tc>, window_params = [{pipeline_mode = #tpu.pipeline_mode<synchronous>, transform_indices = @transform_0, window_bounds = array<i64: 8, 64>}, {pipeline_mode = #tpu.pipeline_mode<synchronous>, transform_indices = @transform_1, window_bounds = array<i64: 8, 1>}, {transform_indices = @transform_2, window_bounds = array<i64: 64, 2048>}, {transform_indices = @transform_3, window_bounds = array<i64: 8, 2048>}]} {
    %c0 = arith.constant 0 : index
    %c0_0 = arith.constant 0 : index
    %0 = vector.load %arg1[%c0, %c0_0] : memref<8x64xbf16, #tpu.memory_space<vmem>>, vector<8x64xbf16>
    %c0_1 = arith.constant 0 : index
    %c0_2 = arith.constant 0 : index
    %1 = vector.load %arg3[%c0_1, %c0_2] : memref<64x2048xbf16, #tpu.memory_space<vmem>>, vector<64x2048xbf16>
    %cst = arith.constant dense<0.000000e+00> : vector<8x2048xf32>
    %2 = tpu.matmul %0, %1, %cst {dimension_numbers = #tpu.dot_dimension_numbers<[1], [0], [0], [1], [0, 0, 1, 1], [], []>} : vector<8x64xbf16>, vector<64x2048xbf16>, vector<8x2048xf32> -> vector<8x2048xf32>
    %c0_3 = arith.constant 0 : index
    %c0_4 = arith.constant 0 : index
    %3 = vector.load %arg2[%c0_3, %c0_4] : memref<8x1xf32, #tpu.memory_space<vmem>>, vector<8x1xf32>
    %4 = vector.broadcast %3 : vector<8x1xf32> to vector<8x2048xf32>
    %5 = arith.addf %2, %4 : vector<8x2048xf32>
    %cst_5 = arith.constant 0.000000e+00 : f32
    %6 = vector.broadcast %cst_5 : f32 to vector<8x2048xf32>
    %7 = arith.maximumf %5, %6 : vector<8x2048xf32>
    %8 = arith.truncf %7 : vector<8x2048xf32> to vector<8x2048xbf16>
    %c0_6 = arith.constant 0 : index
    %c0_7 = arith.constant 0 : index
    %9 = vector.load %arg4[%c0_6, %c0_7] : memref<8x2048xbf16, #tpu.memory_space<vmem>>, vector<8x2048xbf16>
    tpu.vector_store %arg4[%c0_6, %c0_7], %8 {strides = array<i32>} : memref<8x2048xbf16, #tpu.memory_space<vmem>>, vector<8x2048xbf16>,
    return
  }
  func.func @transform_0(%arg0: i32) -> (i32, i32) {
    %c0_i32 = arith.constant 0 : i32
    %c0_i32_0 = arith.constant 0 : i32
    %c0_i32_1 = arith.constant 0 : i32
    return %c0_i32, %c0_i32_0 : i32, i32
  }
  func.func @transform_1(%arg0: i32) -> (i32, i32) {
    %c0_i32 = arith.constant 0 : i32
    %c0_i32_0 = arith.constant 0 : i32
    %c0_i32_1 = arith.constant 0 : i32
    return %c0_i32, %c0_i32_0 : i32, i32
  }
  func.func @transform_2(%arg0: i32) -> (i32, i32) {
    %c0_i32 = arith.constant 0 : i32
    %c0_i32_0 = arith.constant 0 : i32
    return %c0_i32, %arg0 : i32, i32
  }
  func.func @transform_3(%arg0: i32) -> (i32, i32) {
    %c0_i32 = arith.constant 0 : i32
    %c0_i32_0 = arith.constant 0 : i32
    return %c0_i32, %arg0 : i32, i32
  }
}

module attributes {stable_mosaic.version = 11 : i64} {
  func.func @_cm_conv_kernel(%arg0: i32, %arg1: memref<16x72xbf16, #tpu.memory_space<vmem>>, %arg2: memref<16x1xf32, #tpu.memory_space<vmem>>, %arg3: memref<72x640xbf16, #tpu.memory_space<vmem>>, %arg4: memref<16x640xbf16, #tpu.memory_space<vmem>>) attributes {dimension_semantics = [#tpu.dimension_semantics<parallel>], iteration_bounds = array<i64: 2>, scalar_prefetch = 0 : i64, scratch_operands = 0 : i64, tpu.core_type = #tpu.core_type<tc>, window_params = [{pipeline_mode = #tpu.pipeline_mode<synchronous>, transform_indices = @transform_0, window_bounds = array<i64: 16, 72>}, {pipeline_mode = #tpu.pipeline_mode<synchronous>, transform_indices = @transform_1, window_bounds = array<i64: 16, 1>}, {transform_indices = @transform_2, window_bounds = array<i64: 72, 640>}, {transform_indices = @transform_3, window_bounds = array<i64: 16, 640>}]} {
    %c0 = arith.constant 0 : index
    %c0_0 = arith.constant 0 : index
    %0 = vector.load %arg1[%c0, %c0_0] : memref<16x72xbf16, #tpu.memory_space<vmem>>, vector<16x72xbf16>
    %c0_1 = arith.constant 0 : index
    %c0_2 = arith.constant 0 : index
    %1 = vector.load %arg3[%c0_1, %c0_2] : memref<72x640xbf16, #tpu.memory_space<vmem>>, vector<72x640xbf16>
    %cst = arith.constant dense<0.000000e+00> : vector<16x640xf32>
    %2 = tpu.matmul %0, %1, %cst {dimension_numbers = #tpu.dot_dimension_numbers<[1], [0], [0], [1], [0, 0, 1, 1], [], []>} : vector<16x72xbf16>, vector<72x640xbf16>, vector<16x640xf32> -> vector<16x640xf32>
    %c0_3 = arith.constant 0 : index
    %c0_4 = arith.constant 0 : index
    %3 = vector.load %arg2[%c0_3, %c0_4] : memref<16x1xf32, #tpu.memory_space<vmem>>, vector<16x1xf32>
    %4 = vector.broadcast %3 : vector<16x1xf32> to vector<16x640xf32>
    %5 = arith.addf %2, %4 : vector<16x640xf32>
    %cst_5 = arith.constant 0.000000e+00 : f32
    %6 = vector.broadcast %cst_5 : f32 to vector<16x640xf32>
    %7 = arith.maximumf %5, %6 : vector<16x640xf32>
    %8 = arith.truncf %7 : vector<16x640xf32> to vector<16x640xbf16>
    %c0_6 = arith.constant 0 : index
    %c0_7 = arith.constant 0 : index
    %9 = vector.load %arg4[%c0_6, %c0_7] : memref<16x640xbf16, #tpu.memory_space<vmem>>, vector<16x640xbf16>
    tpu.vector_store %arg4[%c0_6, %c0_7], %8 {strides = array<i32>} : memref<16x640xbf16, #tpu.memory_space<vmem>>, vector<16x640xbf16>,
    return
  }
  func.func @transform_0(%arg0: i32) -> (i32, i32) {
    %c0_i32 = arith.constant 0 : i32
    %c0_i32_0 = arith.constant 0 : i32
    %c0_i32_1 = arith.constant 0 : i32
    return %c0_i32, %c0_i32_0 : i32, i32
  }
  func.func @transform_1(%arg0: i32) -> (i32, i32) {
    %c0_i32 = arith.constant 0 : i32
    %c0_i32_0 = arith.constant 0 : i32
    %c0_i32_1 = arith.constant 0 : i32
    return %c0_i32, %c0_i32_0 : i32, i32
  }
  func.func @transform_2(%arg0: i32) -> (i32, i32) {
    %c0_i32 = arith.constant 0 : i32
    %c0_i32_0 = arith.constant 0 : i32
    return %c0_i32, %arg0 : i32, i32
  }
  func.func @transform_3(%arg0: i32) -> (i32, i32) {
    %c0_i32 = arith.constant 0 : i32
    %c0_i32_0 = arith.constant 0 : i32
    return %c0_i32, %arg0 : i32, i32
  }
}

module attributes {stable_mosaic.version = 11 : i64} {
  func.func @_cm_conv_kernel(%arg0: i32, %arg1: memref<32x144xbf16, #tpu.memory_space<vmem>>, %arg2: memref<32x1xf32, #tpu.memory_space<vmem>>, %arg3: memref<144x242xbf16, #tpu.memory_space<vmem>>, %arg4: memref<32x242xbf16, #tpu.memory_space<vmem>>) attributes {dimension_semantics = [#tpu.dimension_semantics<parallel>], iteration_bounds = array<i64: 1>, scalar_prefetch = 0 : i64, scratch_operands = 0 : i64, tpu.core_type = #tpu.core_type<tc>, window_params = [{pipeline_mode = #tpu.pipeline_mode<synchronous>, transform_indices = @transform_0, window_bounds = array<i64: 32, 144>}, {pipeline_mode = #tpu.pipeline_mode<synchronous>, transform_indices = @transform_1, window_bounds = array<i64: 32, 1>}, {transform_indices = @transform_2, window_bounds = array<i64: 144, 242>}, {transform_indices = @transform_3, window_bounds = array<i64: 32, 242>}]} {
    %c0 = arith.constant 0 : index
    %c0_0 = arith.constant 0 : index
    %0 = vector.load %arg1[%c0, %c0_0] : memref<32x144xbf16, #tpu.memory_space<vmem>>, vector<32x144xbf16>
    %c0_1 = arith.constant 0 : index
    %c0_2 = arith.constant 0 : index
    %1 = vector.load %arg3[%c0_1, %c0_2] : memref<144x242xbf16, #tpu.memory_space<vmem>>, vector<144x242xbf16>
    %cst = arith.constant dense<0.000000e+00> : vector<32x242xf32>
    %2 = tpu.matmul %0, %1, %cst {dimension_numbers = #tpu.dot_dimension_numbers<[1], [0], [0], [1], [0, 0, 1, 1], [], []>} : vector<32x144xbf16>, vector<144x242xbf16>, vector<32x242xf32> -> vector<32x242xf32>
    %c0_3 = arith.constant 0 : index
    %c0_4 = arith.constant 0 : index
    %3 = vector.load %arg2[%c0_3, %c0_4] : memref<32x1xf32, #tpu.memory_space<vmem>>, vector<32x1xf32>
    %4 = vector.broadcast %3 : vector<32x1xf32> to vector<32x242xf32>
    %5 = arith.addf %2, %4 : vector<32x242xf32>
    %cst_5 = arith.constant 0.000000e+00 : f32
    %6 = vector.broadcast %cst_5 : f32 to vector<32x242xf32>
    %7 = arith.maximumf %5, %6 : vector<32x242xf32>
    %8 = arith.truncf %7 : vector<32x242xf32> to vector<32x242xbf16>
    %c0_6 = arith.constant 0 : index
    %c0_7 = arith.constant 0 : index
    %9 = vector.load %arg4[%c0_6, %c0_7] : memref<32x242xbf16, #tpu.memory_space<vmem>>, vector<32x242xbf16>
    tpu.vector_store %arg4[%c0_6, %c0_7], %8 {strides = array<i32>} : memref<32x242xbf16, #tpu.memory_space<vmem>>, vector<32x242xbf16>,
    return
  }
  func.func @transform_0(%arg0: i32) -> (i32, i32) {
    %c0_i32 = arith.constant 0 : i32
    %c0_i32_0 = arith.constant 0 : i32
    %c0_i32_1 = arith.constant 0 : i32
    return %c0_i32, %c0_i32_0 : i32, i32
  }
  func.func @transform_1(%arg0: i32) -> (i32, i32) {
    %c0_i32 = arith.constant 0 : i32
    %c0_i32_0 = arith.constant 0 : i32
    %c0_i32_1 = arith.constant 0 : i32
    return %c0_i32, %c0_i32_0 : i32, i32
  }
  func.func @transform_2(%arg0: i32) -> (i32, i32) {
    %c0_i32 = arith.constant 0 : i32
    %c0_i32_0 = arith.constant 0 : i32
    return %c0_i32, %arg0 : i32, i32
  }
  func.func @transform_3(%arg0: i32) -> (i32, i32) {
    %c0_i32 = arith.constant 0 : i32
    %c0_i32_0 = arith.constant 0 : i32
    return %c0_i32, %arg0 : i32, i32
  }
}

module attributes {stable_mosaic.version = 11 : i64} {
  func.func @_cm_conv_kernel(%arg0: i32, %arg1: memref<64x288xbf16, #tpu.memory_space<vmem>>, %arg2: memref<64x1xf32, #tpu.memory_space<vmem>>, %arg3: memref<288x50xbf16, #tpu.memory_space<vmem>>, %arg4: memref<64x50xbf16, #tpu.memory_space<vmem>>) attributes {dimension_semantics = [#tpu.dimension_semantics<parallel>], iteration_bounds = array<i64: 1>, scalar_prefetch = 0 : i64, scratch_operands = 0 : i64, tpu.core_type = #tpu.core_type<tc>, window_params = [{pipeline_mode = #tpu.pipeline_mode<synchronous>, transform_indices = @transform_0, window_bounds = array<i64: 64, 288>}, {pipeline_mode = #tpu.pipeline_mode<synchronous>, transform_indices = @transform_1, window_bounds = array<i64: 64, 1>}, {transform_indices = @transform_2, window_bounds = array<i64: 288, 50>}, {transform_indices = @transform_3, window_bounds = array<i64: 64, 50>}]} {
    %c0 = arith.constant 0 : index
    %c0_0 = arith.constant 0 : index
    %0 = vector.load %arg1[%c0, %c0_0] : memref<64x288xbf16, #tpu.memory_space<vmem>>, vector<64x288xbf16>
    %c0_1 = arith.constant 0 : index
    %c0_2 = arith.constant 0 : index
    %1 = vector.load %arg3[%c0_1, %c0_2] : memref<288x50xbf16, #tpu.memory_space<vmem>>, vector<288x50xbf16>
    %cst = arith.constant dense<0.000000e+00> : vector<64x50xf32>
    %2 = tpu.matmul %0, %1, %cst {dimension_numbers = #tpu.dot_dimension_numbers<[1], [0], [0], [1], [0, 0, 1, 1], [], []>} : vector<64x288xbf16>, vector<288x50xbf16>, vector<64x50xf32> -> vector<64x50xf32>
    %c0_3 = arith.constant 0 : index
    %c0_4 = arith.constant 0 : index
    %3 = vector.load %arg2[%c0_3, %c0_4] : memref<64x1xf32, #tpu.memory_space<vmem>>, vector<64x1xf32>
    %4 = vector.broadcast %3 : vector<64x1xf32> to vector<64x50xf32>
    %5 = arith.addf %2, %4 : vector<64x50xf32>
    %cst_5 = arith.constant 0.000000e+00 : f32
    %6 = vector.broadcast %cst_5 : f32 to vector<64x50xf32>
    %7 = arith.maximumf %5, %6 : vector<64x50xf32>
    %8 = arith.truncf %7 : vector<64x50xf32> to vector<64x50xbf16>
    %c0_6 = arith.constant 0 : index
    %c0_7 = arith.constant 0 : index
    %9 = vector.load %arg4[%c0_6, %c0_7] : memref<64x50xbf16, #tpu.memory_space<vmem>>, vector<64x50xbf16>
    tpu.vector_store %arg4[%c0_6, %c0_7], %8 {strides = array<i32>} : memref<64x50xbf16, #tpu.memory_space<vmem>>, vector<64x50xbf16>,
    return
  }
  func.func @transform_0(%arg0: i32) -> (i32, i32) {
    %c0_i32 = arith.constant 0 : i32
    %c0_i32_0 = arith.constant 0 : i32
    %c0_i32_1 = arith.constant 0 : i32
    return %c0_i32, %c0_i32_0 : i32, i32
  }
  func.func @transform_1(%arg0: i32) -> (i32, i32) {
    %c0_i32 = arith.constant 0 : i32
    %c0_i32_0 = arith.constant 0 : i32
    %c0_i32_1 = arith.constant 0 : i32
    return %c0_i32, %c0_i32_0 : i32, i32
  }
  func.func @transform_2(%arg0: i32) -> (i32, i32) {
    %c0_i32 = arith.constant 0 : i32
    %c0_i32_0 = arith.constant 0 : i32
    return %c0_i32, %arg0 : i32, i32
  }
  func.func @transform_3(%arg0: i32) -> (i32, i32) {
    %c0_i32 = arith.constant 0 : i32
    %c0_i32_0 = arith.constant 0 : i32
    return %c0_i32, %arg0 : i32, i32
  }
}

module attributes {stable_mosaic.version = 11 : i64} {
  func.func @_tail_kernel(%arg0: i32, %arg1: memref<2x9x576xbf16, #tpu.memory_space<vmem>>, %arg2: memref<576x128xbf16, #tpu.memory_space<vmem>>, %arg3: memref<1x128xf32, #tpu.memory_space<vmem>>, %arg4: memref<9x128x256xbf16, #tpu.memory_space<vmem>>, %arg5: memref<1x256xf32, #tpu.memory_space<vmem>>, %arg6: memref<256x256xbf16, #tpu.memory_space<vmem>>, %arg7: memref<1x256xf32, #tpu.memory_space<vmem>>, %arg8: memref<256x8xbf16, #tpu.memory_space<vmem>>, %arg9: memref<1x8xf32, #tpu.memory_space<vmem>>, %arg10: memref<2x8xf32, #tpu.memory_space<vmem>>) attributes {dimension_semantics = [#tpu.dimension_semantics<parallel>], iteration_bounds = array<i64: 1>, scalar_prefetch = 0 : i64, scratch_operands = 0 : i64, tpu.core_type = #tpu.core_type<tc>, window_params = [{transform_indices = @transform_0, window_bounds = array<i64: 2, 9, 576>}, {pipeline_mode = #tpu.pipeline_mode<synchronous>, transform_indices = @transform_1, window_bounds = array<i64: 576, 128>}, {pipeline_mode = #tpu.pipeline_mode<synchronous>, transform_indices = @transform_2, window_bounds = array<i64: 1, 128>}, {pipeline_mode = #tpu.pipeline_mode<synchronous>, transform_indices = @transform_3, window_bounds = array<i64: 9, 128, 256>}, {pipeline_mode = #tpu.pipeline_mode<synchronous>, transform_indices = @transform_4, window_bounds = array<i64: 1, 256>}, {pipeline_mode = #tpu.pipeline_mode<synchronous>, transform_indices = @transform_5, window_bounds = array<i64: 256, 256>}, {pipeline_mode = #tpu.pipeline_mode<synchronous>, transform_indices = @transform_6, window_bounds = array<i64: 1, 256>}, {pipeline_mode = #tpu.pipeline_mode<synchronous>, transform_indices = @transform_7, window_bounds = array<i64: 256, 8>}, {pipeline_mode = #tpu.pipeline_mode<synchronous>, transform_indices = @transform_8, window_bounds = array<i64: 1, 8>}, {transform_indices = @transform_9, window_bounds = array<i64: 2, 8>}]} {
    %c0 = arith.constant 0 : index
    %c0_0 = arith.constant 0 : index
    %c0_1 = arith.constant 0 : index
    %0 = vector.load %arg1[%c0, %c0_0, %c0_1] : memref<2x9x576xbf16, #tpu.memory_space<vmem>>, vector<2x9x576xbf16>
    %cst = arith.constant 0.000000e+00 : f32
    %1 = vector.broadcast %cst : f32 to vector<2x256xf32>
    %2 = vector.extract_strided_slice %0 {offsets = [0, 0, 0], sizes = [2, 1, 576], strides = [1, 1, 1]} : vector<2x9x576xbf16> to vector<2x1x576xbf16>
    %3 = vector.shape_cast %2 : vector<2x1x576xbf16> to vector<2x576xbf16>
    %c0_2 = arith.constant 0 : index
    %c0_3 = arith.constant 0 : index
    %4 = vector.load %arg2[%c0_2, %c0_3] : memref<576x128xbf16, #tpu.memory_space<vmem>>, vector<576x128xbf16>
    %cst_4 = arith.constant dense<0.000000e+00> : vector<2x128xf32>
    %5 = tpu.matmul %3, %4, %cst_4 {dimension_numbers = #tpu.dot_dimension_numbers<[1], [0], [0], [1], [0, 0, 1, 1], [], []>} : vector<2x576xbf16>, vector<576x128xbf16>, vector<2x128xf32> -> vector<2x128xf32>
    %c0_5 = arith.constant 0 : index
    %c0_6 = arith.constant 0 : index
    %6 = vector.load %arg3[%c0_5, %c0_6] : memref<1x128xf32, #tpu.memory_space<vmem>>, vector<1x128xf32>
    %7 = vector.broadcast %6 : vector<1x128xf32> to vector<2x128xf32>
    %8 = arith.addf %5, %7 : vector<2x128xf32>
    %cst_7 = arith.constant 0.000000e+00 : f32
    %9 = vector.broadcast %cst_7 : f32 to vector<2x128xf32>
    %10 = arith.maximumf %8, %9 : vector<2x128xf32>
    %11 = arith.truncf %10 : vector<2x128xf32> to vector<2x128xbf16>
    %c0_8 = arith.constant 0 : index
    %c0_9 = arith.constant 0 : index
    %c0_10 = arith.constant 0 : index
    %12 = vector.load %arg4[%c0_8, %c0_9, %c0_10] : memref<9x128x256xbf16, #tpu.memory_space<vmem>>, vector<1x128x256xbf16>
    %13 = vector.shape_cast %12 : vector<1x128x256xbf16> to vector<128x256xbf16>
    %cst_11 = arith.constant dense<0.000000e+00> : vector<2x256xf32>
    %14 = tpu.matmul %11, %13, %cst_11 {dimension_numbers = #tpu.dot_dimension_numbers<[1], [0], [0], [1], [0, 0, 1, 1], [], []>} : vector<2x128xbf16>, vector<128x256xbf16>, vector<2x256xf32> -> vector<2x256xf32>
    %15 = arith.addf %1, %14 : vector<2x256xf32>
    %16 = vector.extract_strided_slice %0 {offsets = [0, 1, 0], sizes = [2, 1, 576], strides = [1, 1, 1]} : vector<2x9x576xbf16> to vector<2x1x576xbf16>
    %17 = vector.shape_cast %16 : vector<2x1x576xbf16> to vector<2x576xbf16>
    %c0_12 = arith.constant 0 : index
    %c0_13 = arith.constant 0 : index
    %18 = vector.load %arg2[%c0_12, %c0_13] : memref<576x128xbf16, #tpu.memory_space<vmem>>, vector<576x128xbf16>
    %cst_14 = arith.constant dense<0.000000e+00> : vector<2x128xf32>
    %19 = tpu.matmul %17, %18, %cst_14 {dimension_numbers = #tpu.dot_dimension_numbers<[1], [0], [0], [1], [0, 0, 1, 1], [], []>} : vector<2x576xbf16>, vector<576x128xbf16>, vector<2x128xf32> -> vector<2x128xf32>
    %c0_15 = arith.constant 0 : index
    %c0_16 = arith.constant 0 : index
    %20 = vector.load %arg3[%c0_15, %c0_16] : memref<1x128xf32, #tpu.memory_space<vmem>>, vector<1x128xf32>
    %21 = vector.broadcast %20 : vector<1x128xf32> to vector<2x128xf32>
    %22 = arith.addf %19, %21 : vector<2x128xf32>
    %cst_17 = arith.constant 0.000000e+00 : f32
    %23 = vector.broadcast %cst_17 : f32 to vector<2x128xf32>
    %24 = arith.maximumf %22, %23 : vector<2x128xf32>
    %25 = arith.truncf %24 : vector<2x128xf32> to vector<2x128xbf16>
    %c1 = arith.constant 1 : index
    %c0_18 = arith.constant 0 : index
    %c0_19 = arith.constant 0 : index
    %26 = vector.load %arg4[%c1, %c0_18, %c0_19] : memref<9x128x256xbf16, #tpu.memory_space<vmem>>, vector<1x128x256xbf16>
    %27 = vector.shape_cast %26 : vector<1x128x256xbf16> to vector<128x256xbf16>
    %cst_20 = arith.constant dense<0.000000e+00> : vector<2x256xf32>
    %28 = tpu.matmul %25, %27, %cst_20 {dimension_numbers = #tpu.dot_dimension_numbers<[1], [0], [0], [1], [0, 0, 1, 1], [], []>} : vector<2x128xbf16>, vector<128x256xbf16>, vector<2x256xf32> -> vector<2x256xf32>
    %29 = arith.addf %15, %28 : vector<2x256xf32>
    %30 = vector.extract_strided_slice %0 {offsets = [0, 2, 0], sizes = [2, 1, 576], strides = [1, 1, 1]} : vector<2x9x576xbf16> to vector<2x1x576xbf16>
    %31 = vector.shape_cast %30 : vector<2x1x576xbf16> to vector<2x576xbf16>
    %c0_21 = arith.constant 0 : index
    %c0_22 = arith.constant 0 : index
    %32 = vector.load %arg2[%c0_21, %c0_22] : memref<576x128xbf16, #tpu.memory_space<vmem>>, vector<576x128xbf16>
    %cst_23 = arith.constant dense<0.000000e+00> : vector<2x128xf32>
    %33 = tpu.matmul %31, %32, %cst_23 {dimension_numbers = #tpu.dot_dimension_numbers<[1], [0], [0], [1], [0, 0, 1, 1], [], []>} : vector<2x576xbf16>, vector<576x128xbf16>, vector<2x128xf32> -> vector<2x128xf32>
    %c0_24 = arith.constant 0 : index
    %c0_25 = arith.constant 0 : index
    %34 = vector.load %arg3[%c0_24, %c0_25] : memref<1x128xf32, #tpu.memory_space<vmem>>, vector<1x128xf32>
    %35 = vector.broadcast %34 : vector<1x128xf32> to vector<2x128xf32>
    %36 = arith.addf %33, %35 : vector<2x128xf32>
    %cst_26 = arith.constant 0.000000e+00 : f32
    %37 = vector.broadcast %cst_26 : f32 to vector<2x128xf32>
    %38 = arith.maximumf %36, %37 : vector<2x128xf32>
    %39 = arith.truncf %38 : vector<2x128xf32> to vector<2x128xbf16>
    %c2 = arith.constant 2 : index
    %c0_27 = arith.constant 0 : index
    %c0_28 = arith.constant 0 : index
    %40 = vector.load %arg4[%c2, %c0_27, %c0_28] : memref<9x128x256xbf16, #tpu.memory_space<vmem>>, vector<1x128x256xbf16>
    %41 = vector.shape_cast %40 : vector<1x128x256xbf16> to vector<128x256xbf16>
    %cst_29 = arith.constant dense<0.000000e+00> : vector<2x256xf32>
    %42 = tpu.matmul %39, %41, %cst_29 {dimension_numbers = #tpu.dot_dimension_numbers<[1], [0], [0], [1], [0, 0, 1, 1], [], []>} : vector<2x128xbf16>, vector<128x256xbf16>, vector<2x256xf32> -> vector<2x256xf32>
    %43 = arith.addf %29, %42 : vector<2x256xf32>
    %44 = vector.extract_strided_slice %0 {offsets = [0, 3, 0], sizes = [2, 1, 576], strides = [1, 1, 1]} : vector<2x9x576xbf16> to vector<2x1x576xbf16>
    %45 = vector.shape_cast %44 : vector<2x1x576xbf16> to vector<2x576xbf16>
    %c0_30 = arith.constant 0 : index
    %c0_31 = arith.constant 0 : index
    %46 = vector.load %arg2[%c0_30, %c0_31] : memref<576x128xbf16, #tpu.memory_space<vmem>>, vector<576x128xbf16>
    %cst_32 = arith.constant dense<0.000000e+00> : vector<2x128xf32>
    %47 = tpu.matmul %45, %46, %cst_32 {dimension_numbers = #tpu.dot_dimension_numbers<[1], [0], [0], [1], [0, 0, 1, 1], [], []>} : vector<2x576xbf16>, vector<576x128xbf16>, vector<2x128xf32> -> vector<2x128xf32>
    %c0_33 = arith.constant 0 : index
    %c0_34 = arith.constant 0 : index
    %48 = vector.load %arg3[%c0_33, %c0_34] : memref<1x128xf32, #tpu.memory_space<vmem>>, vector<1x128xf32>
    %49 = vector.broadcast %48 : vector<1x128xf32> to vector<2x128xf32>
    %50 = arith.addf %47, %49 : vector<2x128xf32>
    %cst_35 = arith.constant 0.000000e+00 : f32
    %51 = vector.broadcast %cst_35 : f32 to vector<2x128xf32>
    %52 = arith.maximumf %50, %51 : vector<2x128xf32>
    %53 = arith.truncf %52 : vector<2x128xf32> to vector<2x128xbf16>
    %c3 = arith.constant 3 : index
    %c0_36 = arith.constant 0 : index
    %c0_37 = arith.constant 0 : index
    %54 = vector.load %arg4[%c3, %c0_36, %c0_37] : memref<9x128x256xbf16, #tpu.memory_space<vmem>>, vector<1x128x256xbf16>
    %55 = vector.shape_cast %54 : vector<1x128x256xbf16> to vector<128x256xbf16>
    %cst_38 = arith.constant dense<0.000000e+00> : vector<2x256xf32>
    %56 = tpu.matmul %53, %55, %cst_38 {dimension_numbers = #tpu.dot_dimension_numbers<[1], [0], [0], [1], [0, 0, 1, 1], [], []>} : vector<2x128xbf16>, vector<128x256xbf16>, vector<2x256xf32> -> vector<2x256xf32>
    %57 = arith.addf %43, %56 : vector<2x256xf32>
    %58 = vector.extract_strided_slice %0 {offsets = [0, 4, 0], sizes = [2, 1, 576], strides = [1, 1, 1]} : vector<2x9x576xbf16> to vector<2x1x576xbf16>
    %59 = vector.shape_cast %58 : vector<2x1x576xbf16> to vector<2x576xbf16>
    %c0_39 = arith.constant 0 : index
    %c0_40 = arith.constant 0 : index
    %60 = vector.load %arg2[%c0_39, %c0_40] : memref<576x128xbf16, #tpu.memory_space<vmem>>, vector<576x128xbf16>
    %cst_41 = arith.constant dense<0.000000e+00> : vector<2x128xf32>
    %61 = tpu.matmul %59, %60, %cst_41 {dimension_numbers = #tpu.dot_dimension_numbers<[1], [0], [0], [1], [0, 0, 1, 1], [], []>} : vector<2x576xbf16>, vector<576x128xbf16>, vector<2x128xf32> -> vector<2x128xf32>
    %c0_42 = arith.constant 0 : index
    %c0_43 = arith.constant 0 : index
    %62 = vector.load %arg3[%c0_42, %c0_43] : memref<1x128xf32, #tpu.memory_space<vmem>>, vector<1x128xf32>
    %63 = vector.broadcast %62 : vector<1x128xf32> to vector<2x128xf32>
    %64 = arith.addf %61, %63 : vector<2x128xf32>
    %cst_44 = arith.constant 0.000000e+00 : f32
    %65 = vector.broadcast %cst_44 : f32 to vector<2x128xf32>
    %66 = arith.maximumf %64, %65 : vector<2x128xf32>
    %67 = arith.truncf %66 : vector<2x128xf32> to vector<2x128xbf16>
    %c4 = arith.constant 4 : index
    %c0_45 = arith.constant 0 : index
    %c0_46 = arith.constant 0 : index
    %68 = vector.load %arg4[%c4, %c0_45, %c0_46] : memref<9x128x256xbf16, #tpu.memory_space<vmem>>, vector<1x128x256xbf16>
    %69 = vector.shape_cast %68 : vector<1x128x256xbf16> to vector<128x256xbf16>
    %cst_47 = arith.constant dense<0.000000e+00> : vector<2x256xf32>
    %70 = tpu.matmul %67, %69, %cst_47 {dimension_numbers = #tpu.dot_dimension_numbers<[1], [0], [0], [1], [0, 0, 1, 1], [], []>} : vector<2x128xbf16>, vector<128x256xbf16>, vector<2x256xf32> -> vector<2x256xf32>
    %71 = arith.addf %57, %70 : vector<2x256xf32>
    %72 = vector.extract_strided_slice %0 {offsets = [0, 5, 0], sizes = [2, 1, 576], strides = [1, 1, 1]} : vector<2x9x576xbf16> to vector<2x1x576xbf16>
    %73 = vector.shape_cast %72 : vector<2x1x576xbf16> to vector<2x576xbf16>
    %c0_48 = arith.constant 0 : index
    %c0_49 = arith.constant 0 : index
    %74 = vector.load %arg2[%c0_48, %c0_49] : memref<576x128xbf16, #tpu.memory_space<vmem>>, vector<576x128xbf16>
    %cst_50 = arith.constant dense<0.000000e+00> : vector<2x128xf32>
    %75 = tpu.matmul %73, %74, %cst_50 {dimension_numbers = #tpu.dot_dimension_numbers<[1], [0], [0], [1], [0, 0, 1, 1], [], []>} : vector<2x576xbf16>, vector<576x128xbf16>, vector<2x128xf32> -> vector<2x128xf32>
    %c0_51 = arith.constant 0 : index
    %c0_52 = arith.constant 0 : index
    %76 = vector.load %arg3[%c0_51, %c0_52] : memref<1x128xf32, #tpu.memory_space<vmem>>, vector<1x128xf32>
    %77 = vector.broadcast %76 : vector<1x128xf32> to vector<2x128xf32>
    %78 = arith.addf %75, %77 : vector<2x128xf32>
    %cst_53 = arith.constant 0.000000e+00 : f32
    %79 = vector.broadcast %cst_53 : f32 to vector<2x128xf32>
    %80 = arith.maximumf %78, %79 : vector<2x128xf32>
    %81 = arith.truncf %80 : vector<2x128xf32> to vector<2x128xbf16>
    %c5 = arith.constant 5 : index
    %c0_54 = arith.constant 0 : index
    %c0_55 = arith.constant 0 : index
    %82 = vector.load %arg4[%c5, %c0_54, %c0_55] : memref<9x128x256xbf16, #tpu.memory_space<vmem>>, vector<1x128x256xbf16>
    %83 = vector.shape_cast %82 : vector<1x128x256xbf16> to vector<128x256xbf16>
    %cst_56 = arith.constant dense<0.000000e+00> : vector<2x256xf32>
    %84 = tpu.matmul %81, %83, %cst_56 {dimension_numbers = #tpu.dot_dimension_numbers<[1], [0], [0], [1], [0, 0, 1, 1], [], []>} : vector<2x128xbf16>, vector<128x256xbf16>, vector<2x256xf32> -> vector<2x256xf32>
    %85 = arith.addf %71, %84 : vector<2x256xf32>
    %86 = vector.extract_strided_slice %0 {offsets = [0, 6, 0], sizes = [2, 1, 576], strides = [1, 1, 1]} : vector<2x9x576xbf16> to vector<2x1x576xbf16>
    %87 = vector.shape_cast %86 : vector<2x1x576xbf16> to vector<2x576xbf16>
    %c0_57 = arith.constant 0 : index
    %c0_58 = arith.constant 0 : index
    %88 = vector.load %arg2[%c0_57, %c0_58] : memref<576x128xbf16, #tpu.memory_space<vmem>>, vector<576x128xbf16>
    %cst_59 = arith.constant dense<0.000000e+00> : vector<2x128xf32>
    %89 = tpu.matmul %87, %88, %cst_59 {dimension_numbers = #tpu.dot_dimension_numbers<[1], [0], [0], [1], [0, 0, 1, 1], [], []>} : vector<2x576xbf16>, vector<576x128xbf16>, vector<2x128xf32> -> vector<2x128xf32>
    %c0_60 = arith.constant 0 : index
    %c0_61 = arith.constant 0 : index
    %90 = vector.load %arg3[%c0_60, %c0_61] : memref<1x128xf32, #tpu.memory_space<vmem>>, vector<1x128xf32>
    %91 = vector.broadcast %90 : vector<1x128xf32> to vector<2x128xf32>
    %92 = arith.addf %89, %91 : vector<2x128xf32>
    %cst_62 = arith.constant 0.000000e+00 : f32
    %93 = vector.broadcast %cst_62 : f32 to vector<2x128xf32>
    %94 = arith.maximumf %92, %93 : vector<2x128xf32>
    %95 = arith.truncf %94 : vector<2x128xf32> to vector<2x128xbf16>
    %c6 = arith.constant 6 : index
    %c0_63 = arith.constant 0 : index
    %c0_64 = arith.constant 0 : index
    %96 = vector.load %arg4[%c6, %c0_63, %c0_64] : memref<9x128x256xbf16, #tpu.memory_space<vmem>>, vector<1x128x256xbf16>
    %97 = vector.shape_cast %96 : vector<1x128x256xbf16> to vector<128x256xbf16>
    %cst_65 = arith.constant dense<0.000000e+00> : vector<2x256xf32>
    %98 = tpu.matmul %95, %97, %cst_65 {dimension_numbers = #tpu.dot_dimension_numbers<[1], [0], [0], [1], [0, 0, 1, 1], [], []>} : vector<2x128xbf16>, vector<128x256xbf16>, vector<2x256xf32> -> vector<2x256xf32>
    %99 = arith.addf %85, %98 : vector<2x256xf32>
    %100 = vector.extract_strided_slice %0 {offsets = [0, 7, 0], sizes = [2, 1, 576], strides = [1, 1, 1]} : vector<2x9x576xbf16> to vector<2x1x576xbf16>
    %101 = vector.shape_cast %100 : vector<2x1x576xbf16> to vector<2x576xbf16>
    %c0_66 = arith.constant 0 : index
    %c0_67 = arith.constant 0 : index
    %102 = vector.load %arg2[%c0_66, %c0_67] : memref<576x128xbf16, #tpu.memory_space<vmem>>, vector<576x128xbf16>
    %cst_68 = arith.constant dense<0.000000e+00> : vector<2x128xf32>
    %103 = tpu.matmul %101, %102, %cst_68 {dimension_numbers = #tpu.dot_dimension_numbers<[1], [0], [0], [1], [0, 0, 1, 1], [], []>} : vector<2x576xbf16>, vector<576x128xbf16>, vector<2x128xf32> -> vector<2x128xf32>
    %c0_69 = arith.constant 0 : index
    %c0_70 = arith.constant 0 : index
    %104 = vector.load %arg3[%c0_69, %c0_70] : memref<1x128xf32, #tpu.memory_space<vmem>>, vector<1x128xf32>
    %105 = vector.broadcast %104 : vector<1x128xf32> to vector<2x128xf32>
    %106 = arith.addf %103, %105 : vector<2x128xf32>
    %cst_71 = arith.constant 0.000000e+00 : f32
    %107 = vector.broadcast %cst_71 : f32 to vector<2x128xf32>
    %108 = arith.maximumf %106, %107 : vector<2x128xf32>
    %109 = arith.truncf %108 : vector<2x128xf32> to vector<2x128xbf16>
    %c7 = arith.constant 7 : index
    %c0_72 = arith.constant 0 : index
    %c0_73 = arith.constant 0 : index
    %110 = vector.load %arg4[%c7, %c0_72, %c0_73] : memref<9x128x256xbf16, #tpu.memory_space<vmem>>, vector<1x128x256xbf16>
    %111 = vector.shape_cast %110 : vector<1x128x256xbf16> to vector<128x256xbf16>
    %cst_74 = arith.constant dense<0.000000e+00> : vector<2x256xf32>
    %112 = tpu.matmul %109, %111, %cst_74 {dimension_numbers = #tpu.dot_dimension_numbers<[1], [0], [0], [1], [0, 0, 1, 1], [], []>} : vector<2x128xbf16>, vector<128x256xbf16>, vector<2x256xf32> -> vector<2x256xf32>
    %113 = arith.addf %99, %112 : vector<2x256xf32>
    %114 = vector.extract_strided_slice %0 {offsets = [0, 8, 0], sizes = [2, 1, 576], strides = [1, 1, 1]} : vector<2x9x576xbf16> to vector<2x1x576xbf16>
    %115 = vector.shape_cast %114 : vector<2x1x576xbf16> to vector<2x576xbf16>
    %c0_75 = arith.constant 0 : index
    %c0_76 = arith.constant 0 : index
    %116 = vector.load %arg2[%c0_75, %c0_76] : memref<576x128xbf16, #tpu.memory_space<vmem>>, vector<576x128xbf16>
    %cst_77 = arith.constant dense<0.000000e+00> : vector<2x128xf32>
    %117 = tpu.matmul %115, %116, %cst_77 {dimension_numbers = #tpu.dot_dimension_numbers<[1], [0], [0], [1], [0, 0, 1, 1], [], []>} : vector<2x576xbf16>, vector<576x128xbf16>, vector<2x128xf32> -> vector<2x128xf32>
    %c0_78 = arith.constant 0 : index
    %c0_79 = arith.constant 0 : index
    %118 = vector.load %arg3[%c0_78, %c0_79] : memref<1x128xf32, #tpu.memory_space<vmem>>, vector<1x128xf32>
    %119 = vector.broadcast %118 : vector<1x128xf32> to vector<2x128xf32>
    %120 = arith.addf %117, %119 : vector<2x128xf32>
    %cst_80 = arith.constant 0.000000e+00 : f32
    %121 = vector.broadcast %cst_80 : f32 to vector<2x128xf32>
    %122 = arith.maximumf %120, %121 : vector<2x128xf32>
    %123 = arith.truncf %122 : vector<2x128xf32> to vector<2x128xbf16>
    %c8 = arith.constant 8 : index
    %c0_81 = arith.constant 0 : index
    %c0_82 = arith.constant 0 : index
    %124 = vector.load %arg4[%c8, %c0_81, %c0_82] : memref<9x128x256xbf16, #tpu.memory_space<vmem>>, vector<1x128x256xbf16>
    %125 = vector.shape_cast %124 : vector<1x128x256xbf16> to vector<128x256xbf16>
    %cst_83 = arith.constant dense<0.000000e+00> : vector<2x256xf32>
    %126 = tpu.matmul %123, %125, %cst_83 {dimension_numbers = #tpu.dot_dimension_numbers<[1], [0], [0], [1], [0, 0, 1, 1], [], []>} : vector<2x128xbf16>, vector<128x256xbf16>, vector<2x256xf32> -> vector<2x256xf32>
    %127 = arith.addf %113, %126 : vector<2x256xf32>
    %c0_84 = arith.constant 0 : index
    %c0_85 = arith.constant 0 : index
    %128 = vector.load %arg5[%c0_84, %c0_85] : memref<1x256xf32, #tpu.memory_space<vmem>>, vector<1x256xf32>
    %129 = vector.broadcast %128 : vector<1x256xf32> to vector<2x256xf32>
    %130 = arith.addf %127, %129 : vector<2x256xf32>
    %cst_86 = arith.constant 0.000000e+00 : f32
    %131 = vector.broadcast %cst_86 : f32 to vector<2x256xf32>
    %132 = arith.maximumf %130, %131 : vector<2x256xf32>
    %133 = arith.truncf %132 : vector<2x256xf32> to vector<2x256xbf16>
    %c0_87 = arith.constant 0 : index
    %c0_88 = arith.constant 0 : index
    %134 = vector.load %arg6[%c0_87, %c0_88] : memref<256x256xbf16, #tpu.memory_space<vmem>>, vector<256x256xbf16>
    %cst_89 = arith.constant dense<0.000000e+00> : vector<2x256xf32>
    %135 = tpu.matmul %133, %134, %cst_89 {dimension_numbers = #tpu.dot_dimension_numbers<[1], [0], [0], [1], [0, 0, 1, 1], [], []>} : vector<2x256xbf16>, vector<256x256xbf16>, vector<2x256xf32> -> vector<2x256xf32>
    %c0_90 = arith.constant 0 : index
    %c0_91 = arith.constant 0 : index
    %136 = vector.load %arg7[%c0_90, %c0_91] : memref<1x256xf32, #tpu.memory_space<vmem>>, vector<1x256xf32>
    %137 = vector.broadcast %136 : vector<1x256xf32> to vector<2x256xf32>
    %138 = arith.addf %135, %137 : vector<2x256xf32>
    %cst_92 = arith.constant 0.000000e+00 : f32
    %139 = vector.broadcast %cst_92 : f32 to vector<2x256xf32>
    %140 = arith.maximumf %138, %139 : vector<2x256xf32>
    %141 = arith.truncf %140 : vector<2x256xf32> to vector<2x256xbf16>
    %c0_93 = arith.constant 0 : index
    %c0_94 = arith.constant 0 : index
    %142 = vector.load %arg8[%c0_93, %c0_94] : memref<256x8xbf16, #tpu.memory_space<vmem>>, vector<256x8xbf16>
    %cst_95 = arith.constant dense<0.000000e+00> : vector<2x8xf32>
    %143 = tpu.matmul %141, %142, %cst_95 {dimension_numbers = #tpu.dot_dimension_numbers<[1], [0], [0], [1], [0, 0, 1, 1], [], []>} : vector<2x256xbf16>, vector<256x8xbf16>, vector<2x8xf32> -> vector<2x8xf32>
    %c0_96 = arith.constant 0 : index
    %c0_97 = arith.constant 0 : index
    %144 = vector.load %arg9[%c0_96, %c0_97] : memref<1x8xf32, #tpu.memory_space<vmem>>, vector<1x8xf32>
    %145 = vector.broadcast %144 : vector<1x8xf32> to vector<2x8xf32>
    %146 = arith.addf %143, %145 : vector<2x8xf32>
    %cst_98 = arith.constant 0.000000e+00 : f32
    %147 = vector.broadcast %cst_98 : f32 to vector<2x8xf32>
    %148 = arith.maximumf %146, %147 : vector<2x8xf32>
    %149 = math.absf %146 : vector<2x8xf32>
    %cst_99 = arith.constant 0.000000e+00 : f32
    %150 = vector.broadcast %cst_99 : f32 to vector<2x8xf32>
    %151 = arith.subf %150, %149 : vector<2x8xf32>
    %152 = math.exp %151 : vector<2x8xf32>
    %153 = math.log1p %152 : vector<2x8xf32>
    %154 = arith.addf %148, %153 : vector<2x8xf32>
    %cst_100 = arith.constant 1.000000e+00 : f32
    %155 = vector.broadcast %cst_100 : f32 to vector<2x8xf32>
    %156 = arith.addf %154, %155 : vector<2x8xf32>
    %157 = tpu.iota {dimensions = array<i32: 1>} : vector<2x8xi32>
    %c1_i32 = arith.constant 1 : i32
    %158 = vector.broadcast %c1_i32 : i32 to vector<2x8xi32>
    %159 = arith.cmpi sge, %157, %158 : vector<2x8xi32>
    %160 = arith.select %159, %156, %146 : vector<2x8xi1>, vector<2x8xf32>
    %c0_101 = arith.constant 0 : index
    %c0_102 = arith.constant 0 : index
    %161 = vector.load %arg10[%c0_101, %c0_102] : memref<2x8xf32, #tpu.memory_space<vmem>>, vector<2x8xf32>
    tpu.vector_store %arg10[%c0_101, %c0_102], %160 {strides = array<i32>} : memref<2x8xf32, #tpu.memory_space<vmem>>, vector<2x8xf32>,
    return
  }
  func.func @transform_0(%arg0: i32) -> (i32, i32, i32) {
    %c0_i32 = arith.constant 0 : i32
    %c0_i32_0 = arith.constant 0 : i32
    %c0_i32_1 = arith.constant 0 : i32
    return %arg0, %c0_i32, %c0_i32_0 : i32, i32, i32
  }
  func.func @transform_1(%arg0: i32) -> (i32, i32) {
    %c0_i32 = arith.constant 0 : i32
    %c0_i32_0 = arith.constant 0 : i32
    %c0_i32_1 = arith.constant 0 : i32
    return %c0_i32, %c0_i32_0 : i32, i32
  }
  func.func @transform_2(%arg0: i32) -> (i32, i32) {
    %c0_i32 = arith.constant 0 : i32
    %c0_i32_0 = arith.constant 0 : i32
    %c0_i32_1 = arith.constant 0 : i32
    return %c0_i32, %c0_i32_0 : i32, i32
  }
  func.func @transform_3(%arg0: i32) -> (i32, i32, i32) {
    %c0_i32 = arith.constant 0 : i32
    %c0_i32_0 = arith.constant 0 : i32
    %c0_i32_1 = arith.constant 0 : i32
    %c0_i32_2 = arith.constant 0 : i32
    return %c0_i32, %c0_i32_0, %c0_i32_1 : i32, i32, i32
  }
  func.func @transform_4(%arg0: i32) -> (i32, i32) {
    %c0_i32 = arith.constant 0 : i32
    %c0_i32_0 = arith.constant 0 : i32
    %c0_i32_1 = arith.constant 0 : i32
    return %c0_i32, %c0_i32_0 : i32, i32
  }
  func.func @transform_5(%arg0: i32) -> (i32, i32) {
    %c0_i32 = arith.constant 0 : i32
    %c0_i32_0 = arith.constant 0 : i32
    %c0_i32_1 = arith.constant 0 : i32
    return %c0_i32, %c0_i32_0 : i32, i32
  }
  func.func @transform_6(%arg0: i32) -> (i32, i32) {
    %c0_i32 = arith.constant 0 : i32
    %c0_i32_0 = arith.constant 0 : i32
    %c0_i32_1 = arith.constant 0 : i32
    return %c0_i32, %c0_i32_0 : i32, i32
  }
  func.func @transform_7(%arg0: i32) -> (i32, i32) {
    %c0_i32 = arith.constant 0 : i32
    %c0_i32_0 = arith.constant 0 : i32
    %c0_i32_1 = arith.constant 0 : i32
    return %c0_i32, %c0_i32_0 : i32, i32
  }
  func.func @transform_8(%arg0: i32) -> (i32, i32) {
    %c0_i32 = arith.constant 0 : i32
    %c0_i32_0 = arith.constant 0 : i32
    %c0_i32_1 = arith.constant 0 : i32
    return %c0_i32, %c0_i32_0 : i32, i32
  }
  func.func @transform_9(%arg0: i32) -> (i32, i32) {
    %c0_i32 = arith.constant 0 : i32
    %c0_i32_0 = arith.constant 0 : i32
    return %arg0, %c0_i32 : i32, i32
  }
}

</mosaic_0001>

<bundles_post_ra>
// kernel: net_forward.5
= control target key start
LH: loop header
LB: loop body
LE: loop exit
PB: predicated region body
PF: predicated region fallthrough
CT: control target
= control target key end

     0   :  { %s2848_s12 = smov 0   ;;  %s2850_s13 = smov 0   ;;  %s3933_s0 = inlined_call_operand.vmem [shape: bf16[8,64], index: 0, kind: input, shape index: {}]   ;;  %s3934_s1 = inlined_call_operand.vmem [shape: f32[8,1], index: 1, kind: input, shape index: {}]   ;;  %s3935_s2 = inlined_call_operand.vmem [shape: bf16[64,4418], index: 2, kind: input, shape index: {}]   ;;  %s3936_s3 = inlined_call_operand.vmem [shape: bf16[8,4418], index: 3, kind: output, shape index: {}]  }
   0x1   :  { %s2852_s14 = smov 0  }
   0x2 LB: > { %s2864_s15 = sadd.s32 4294967295, %s2693_s14   ;;  %s2867_s16 = sadd.s32 1, %s2693_s14   ;;  %s2693_s14 = sphi %s2852_s14, %s3966_s14   ;;  %s2689_s13 = sphi %s2850_s13, %s3965_s13   ;;  %s2685_s12 = sphi %s2848_s12, %s3964_s12  }
   0x3   : > { %s59_s17 = ssub.s32 %s2693_s14, %s2867_s16  ;;  %s62_s18 = sadd.s32 1, %s2689_s13 }
   0x4   : > { %p60_p0 = scmp.eq.s32.totalorder %s59_s17, 0  ;;  %p69_p1 = scmp.ne.s32.totalorder %s2689_s13, %s2685_s12 }
   0x5   : > { %p70_p2 = scmp.eq.s32.totalorder %s2693_s14, 0  ;;  %p99_p3 = scmp.eq.s32.totalorder %s2864_s15, 2 }
   0x6   : > { %s2877_s19 = scalar_select %p60_p0, %s2689_s13, %s62_s18  }
   0x7   : > { %p71_p4 = por %p70_p2, %p69_p1  ;;  %p2879_p5 = por %p99_p3, %p69_p1 }
   0x8   : > { %p2095_p6 = scmp.ge.s32.totalorder %s2693_s14, 3 }
   0xa   : > { %127 = sbr.rel (%p2095_p6) target bundleno = 178 (0xb2), region = 24 }
   0xf   : > { %130 = sbr.rel (!%p71_p4) target bundleno = 178 (0xb2), region = 28  ;;  %s132_s21 = sand.u32 (%p71_p4), 1, %s2689_s13  }
  0x10   : > { %s2097_s22 = sshll.u32 (%p71_p4), %s2693_s14, 4  ;;  %s2096_s23 = sshll.u32 (%p71_p4), %s132_s21, 9 }
  0x11   : > { %s136_s24 = ssub.s32 (%p71_p4), 35, %s2097_s22  ;;  %s2239_s25 = sshll.u32 (%p71_p4), %s2693_s14, 6 }
  0x12   : > { %p137_p7 = scmp.lt.s32.totalorder (%p71_p4), %s136_s24, 16  ;;  %s2890_s28 = scalar_lea.vmem (%p71_p4), %s3935_s2, %s2239_s25  }
  0x13   : > { %s2894_s4 = scalar_lea.vmem (%p71_p4), [#allocation2], %s2096_s23  }
  0x14   : > { %s3968_s24 = smov (!%p137_p7, %s136_s24), 16 }
  0x15   : > { %s2098_s29 = sshll.u32 %s3968_s24, 9  ;;  %s2892_s30 = sshll.u32 %s3968_s24, 2 }
  0x16   : > { %p2102_p8 = scmp.eq.s32.totalorder %s2098_s29, 0 }
  0x17   : > { %p147_p9 = scmp.lt.u32.totalorder (!%p2102_p8), %s2892_s30, 8 }
  0x18   : > { %146 = sbr.rel (%p2102_p8) target bundleno = 178 (0xb2), region = 32 }
  0x1d   : > { %150 = sbr.rel (%p147_p9) target bundleno = 163 (0xa3), region = 36  ;;  %s2898_s5 = sand.u32 (!%p147_p9), 7, %s2892_s30  }
  0x1e   : > { %p181_p10 = scmp.eq.s32.totalorder (!%p147_p9), %s2898_s5, 0  ;;  %p2103_p11 = scmp.ne.s32.totalorder (!%p147_p9), %s2898_s5, 0 }
  0x22   : > { %184 = sbr.rel (%p2103_p11) target bundleno = 93 (0x5d), region = 51  ;;  %s185_s6 = sshrl.u32 (!%p2103_p11), %s2892_s30, 3 }
  0x23   : > { %s2905_s7 = sshrl.u32 (!%p2103_p11), %s185_s6, 3 }
  0x24   : > { %p2104_p12 = scmp.le.s32.totalorder (!%p2103_p11), %s2905_s7, 0 }
  0x27   : > { %1965 = sbr.rel (%p2104_p12) target bundleno = 77 (0x4d), region = 229  ;;  %s3938_s8 = smov (!%p2104_p12), %s2894_s4 }
  0x28   : > { %s3939_s9 = smov (!%p2104_p12), %s2890_s28  ;;  %s2914_s10 = smov (!%p2104_p12), 0  }
  0x29   : > { %s2916_s11 = smov (!%p2104_p12), 0  }
  0x2c LB: >> { %v198_v0 = vld [vmem:[%s2701_s9] sm:$0xff]  ;;  %v200_v1 = vld [vmem:[%s2701_s9 + $0x8] sm:$0xff]  ;;  %v202_v2 = vld [vmem:[%s2701_s9 + $0x10] sm:$0xff]  ;;  %s326_s17 = sadd.s32 1, %s2705_s10  ;;  %s192_s11 = sadd.s32 1, %s2709_s11   ;;  %s2709_s11 = sphi %s2916_s11, %s192_s11   ;;  %s2705_s10 = sphi %s2914_s10, %s3942_s10   ;;  %s2701_s9 = sphi %s3939_s9, %s3941_s9   ;;  %s2697_s8 = sphi %s3938_s8, %s3940_s8  }
  0x2d   : >> { %199 = vst [vmem:[%s2697_s8] sm:$0xff] %v198_v0  ;;  %201 = vst [vmem:[%s2697_s8 + $0x8] sm:$0xff] %v200_v1  ;;  %v204_v3 = vld [vmem:[%s2701_s9 + $0x18] sm:$0xff]  ;;  %v206_v4 = vld [vmem:[%s2701_s9 + $0x20] sm:$0xff]  ;;  %p327_p13 = scmp.ge.s32.totalorder %s326_s17, %s2905_s7  ;;  %p191_p0 = scmp.ge.s32.totalorder %s192_s11, %s2905_s7 }
  0x2e   : >> { %203 = vst [vmem:[%s2697_s8 + $0x10] sm:$0xff] %v202_v2  ;;  %v208_v5 = vld [vmem:[%s2701_s9 + $0x28] sm:$0xff]  ;;  %205 = vst [vmem:[%s2697_s8 + $0x18] sm:$0xff] %v204_v3  ;;  %v210_v6 = vld [vmem:[%s2701_s9 + $0x30] sm:$0xff] }
  0x2f   : >> { %207 = vst [vmem:[%s2697_s8 + $0x20] sm:$0xff] %v206_v4  ;;  %209 = vst [vmem:[%s2697_s8 + $0x28] sm:$0xff] %v208_v5  ;;  %v212_v7 = vld [vmem:[%s2701_s9 + $0x38] sm:$0xff]  ;;  %v214_v8 = vld [vmem:[%s2701_s9 + $0x8c] sm:$0xff]  ;;  %s3970_s17 = smov (%p327_p13, %s326_s17), 0 }
  0x30   : >> { %211 = vst [vmem:[%s2697_s8 + $0x30] sm:$0xff] %v210_v6  ;;  %213 = vst [vmem:[%s2697_s8 + $0x38] sm:$0xff] %v212_v7  ;;  %v216_v9 = vld [vmem:[%s2701_s9 + $0x94] sm:$0xff]  ;;  %v218_v10 = vld [vmem:[%s2701_s9 + $0x9c] sm:$0xff]  ;;  %s2105_s18 = sshll.u32 %s3970_s17, 6  ;;  %s3942_s10 = smov %s3970_s17 }
  0x31   : >> { %215 = vst [vmem:[%s2697_s8 + $0x40] sm:$0xff] %v214_v8  ;;  %v220_v11 = vld [vmem:[%s2701_s9 + $0xa4] sm:$0xff]  ;;  %217 = vst [vmem:[%s2697_s8 + $0x48] sm:$0xff] %v216_v9  ;;  %v222_v12 = vld [vmem:[%s2701_s9 + $0xac] sm:$0xff]  ;;  %s2972_s21 = scalar_lea.vmem %s2890_s28, %s2105_s18   ;;  %s2975_s22 = scalar_lea.vmem %s2894_s4, %s2105_s18 [#allocation2]  }
  0x32   : >> { %219 = vst [vmem:[%s2697_s8 + $0x50] sm:$0xff] %v218_v10  ;;  %221 = vst [vmem:[%s2697_s8 + $0x58] sm:$0xff] %v220_v11  ;;  %v224_v13 = vld [vmem:[%s2701_s9 + $0xb4] sm:$0xff]  ;;  %v226_v14 = vld [vmem:[%s2701_s9 + $0xbc] sm:$0xff] }
  0x33   : >> { %223 = vst [vmem:[%s2697_s8 + $0x60] sm:$0xff] %v222_v12  ;;  %225 = vst [vmem:[%s2697_s8 + $0x68] sm:$0xff] %v224_v13  ;;  %v228_v15 = vld [vmem:[%s2701_s9 + $0xc4] sm:$0xff]  ;;  %v230_v16 = vld [vmem:[%s2701_s9 + $0x118] sm:$0xff] }
  0x34   : >> { %227 = vst [vmem:[%s2697_s8 + $0x70] sm:$0xff] %v226_v14  ;;  %v232_v17 = vld [vmem:[%s2701_s9 + $0x120] sm:$0xff]  ;;  %229 = vst [vmem:[%s2697_s8 + $0x78] sm:$0xff] %v228_v15  ;;  %v234_v18 = vld [vmem:[%s2701_s9 + $0x128] sm:$0xff] }
  0x35   : >> { %231 = vst [vmem:[%s2697_s8 + $0x80] sm:$0xff] %v230_v16  ;;  %233 = vst [vmem:[%s2697_s8 + $0x88] sm:$0xff] %v232_v17  ;;  %v236_v19 = vld [vmem:[%s2701_s9 + $0x130] sm:$0xff]  ;;  %v238_v20 = vld [vmem:[%s2701_s9 + $0x138] sm:$0xff] }
  0x36   : >> { %235 = vst [vmem:[%s2697_s8 + $0x90] sm:$0xff] %v234_v18  ;;  %237 = vst [vmem:[%s2697_s8 + $0x98] sm:$0xff] %v236_v19  ;;  %v240_v21 = vld [vmem:[%s2701_s9 + $0x140] sm:$0xff]  ;;  %v242_v22 = vld [vmem:[%s2701_s9 + $0x148] sm:$0xff] }
  0x37   : >> { %239 = vst [vmem:[%s2697_s8 + $0xa0] sm:$0xff] %v238_v20  ;;  %v244_v23 = vld [vmem:[%s2701_s9 + $0x150] sm:$0xff]  ;;  %241 = vst [vmem:[%s2697_s8 + $0xa8] sm:$0xff] %v240_v21  ;;  %v246_v24 = vld [vmem:[%s2701_s9 + $0x1a4] sm:$0xff] }
  0x38   : >> { %243 = vst [vmem:[%s2697_s8 + $0xb0] sm:$0xff] %v242_v22  ;;  %245 = vst [vmem:[%s2697_s8 + $0xb8] sm:$0xff] %v244_v23  ;;  %v248_v25 = vld [vmem:[%s2701_s9 + $0x1ac] sm:$0xff]  ;;  %v250_v26 = vld [vmem:[%s2701_s9 + $0x1b4] sm:$0xff] }
  0x39   : >> { %247 = vst [vmem:[%s2697_s8 + $0xc0] sm:$0xff] %v246_v24  ;;  %249 = vst [vmem:[%s2697_s8 + $0xc8] sm:$0xff] %v248_v25  ;;  %v252_v27 = vld [vmem:[%s2701_s9 + $0x1bc] sm:$0xff]  ;;  %v254_v28 = vld [vmem:[%s2701_s9 + $0x1c4] sm:$0xff] }
  0x3a   : >> { %251 = vst [vmem:[%s2697_s8 + $0xd0] sm:$0xff] %v250_v26  ;;  %v256_v29 = vld [vmem:[%s2701_s9 + $0x1cc] sm:$0xff]  ;;  %253 = vst [vmem:[%s2697_s8 + $0xd8] sm:$0xff] %v252_v27  ;;  %v258_v30 = vld [vmem:[%s2701_s9 + $0x1d4] sm:$0xff] }
  0x3b   : >> { %255 = vst [vmem:[%s2697_s8 + $0xe0] sm:$0xff] %v254_v28  ;;  %257 = vst [vmem:[%s2697_s8 + $0xe8] sm:$0xff] %v256_v29  ;;  %v260_v31 = vld [vmem:[%s2701_s9 + $0x1dc] sm:$0xff]  ;;  %v262_v32 = vld [vmem:[%s2701_s9 + $0x230] sm:$0xff] }
  0x3c   : >> { %259 = vst [vmem:[%s2697_s8 + $0xf0] sm:$0xff] %v258_v30  ;;  %261 = vst [vmem:[%s2697_s8 + $0xf8] sm:$0xff] %v260_v31  ;;  %v264_v33 = vld [vmem:[%s2701_s9 + $0x238] sm:$0xff]  ;;  %v266_v34 = vld [vmem:[%s2701_s9 + $0x240] sm:$0xff] }
  0x3d   : >> { %263 = vst [vmem:[%s2697_s8 + $0x100] sm:$0xff] %v262_v32  ;;  %v268_v35 = vld [vmem:[%s2701_s9 + $0x248] sm:$0xff]  ;;  %265 = vst [vmem:[%s2697_s8 + $0x108] sm:$0xff] %v264_v33  ;;  %v270_v36 = vld [vmem:[%s2701_s9 + $0x250] sm:$0xff] }
  0x3e   : >> { %267 = vst [vmem:[%s2697_s8 + $0x110] sm:$0xff] %v266_v34  ;;  %269 = vst [vmem:[%s2697_s8 + $0x118] sm:$0xff] %v268_v35  ;;  %v272_v37 = vld [vmem:[%s2701_s9 + $0x258] sm:$0xff]  ;;  %v274_v38 = vld [vmem:[%s2701_s9 + $0x260] sm:$0xff] }
  0x3f   : >> { %271 = vst [vmem:[%s2697_s8 + $0x120] sm:$0xff] %v270_v36  ;;  %273 = vst [vmem:[%s2697_s8 + $0x128] sm:$0xff] %v272_v37  ;;  %v276_v39 = vld [vmem:[%s2701_s9 + $0x268] sm:$0xff]  ;;  %v278_v40 = vld [vmem:[%s2701_s9 + $0x2bc] sm:$0xff] }
  0x40   : >> { %275 = vst [vmem:[%s2697_s8 + $0x130] sm:$0xff] %v274_v38  ;;  %v280_v41 = vld [vmem:[%s2701_s9 + $0x2c4] sm:$0xff]  ;;  %277 = vst [vmem:[%s2697_s8 + $0x138] sm:$0xff] %v276_v39  ;;  %v282_v42 = vld [vmem:[%s2701_s9 + $0x2cc] sm:$0xff] }
  0x41   : >> { %279 = vst [vmem:[%s2697_s8 + $0x140] sm:$0xff] %v278_v40  ;;  %281 = vst [vmem:[%s2697_s8 + $0x148] sm:$0xff] %v280_v41  ;;  %v284_v43 = vld [vmem:[%s2701_s9 + $0x2d4] sm:$0xff]  ;;  %v286_v44 = vld [vmem:[%s2701_s9 + $0x2dc] sm:$0xff] }
  0x42   : >> { %283 = vst [vmem:[%s2697_s8 + $0x150] sm:$0xff] %v282_v42  ;;  %285 = vst [vmem:[%s2697_s8 + $0x158] sm:$0xff] %v284_v43  ;;  %v288_v45 = vld [vmem:[%s2701_s9 + $0x2e4] sm:$0xff]  ;;  %v290_v46 = vld [vmem:[%s2701_s9 + $0x2ec] sm:$0xff] }
  0x43   : >> { %287 = vst [vmem:[%s2697_s8 + $0x160] sm:$0xff] %v286_v44  ;;  %v292_v47 = vld [vmem:[%s2701_s9 + $0x2f4] sm:$0xff]  ;;  %289 = vst [vmem:[%s2697_s8 + $0x168] sm:$0xff] %v288_v45  ;;  %v294_v48 = vld [vmem:[%s2701_s9 + $0x348] sm:$0xff] }
  0x44   : >> { %291 = vst [vmem:[%s2697_s8 + $0x170] sm:$0xff] %v290_v46  ;;  %293 = vst [vmem:[%s2697_s8 + $0x178] sm:$0xff] %v292_v47  ;;  %v296_v49 = vld [vmem:[%s2701_s9 + $0x350] sm:$0xff]  ;;  %v298_v50 = vld [vmem:[%s2701_s9 + $0x358] sm:$0xff] }
  0x45   : >> { %295 = vst [vmem:[%s2697_s8 + $0x180] sm:$0xff] %v294_v48  ;;  %297 = vst [vmem:[%s2697_s8 + $0x188] sm:$0xff] %v296_v49  ;;  %v300_v51 = vld [vmem:[%s2701_s9 + $0x360] sm:$0xff]  ;;  %v302_v52 = vld [vmem:[%s2701_s9 + $0x368] sm:$0xff] }
  0x46   : >> { %299 = vst [vmem:[%s2697_s8 + $0x190] sm:$0xff] %v298_v50  ;;  %v304_v53 = vld [vmem:[%s2701_s9 + $0x370] sm:$0xff]  ;;  %301 = vst [vmem:[%s2697_s8 + $0x198] sm:$0xff] %v300_v51  ;;  %v306_v54 = vld [vmem:[%s2701_s9 + $0x378] sm:$0xff] }
  0x47   : >> { %303 = vst [vmem:[%s2697_s8 + $0x1a0] sm:$0xff] %v302_v52  ;;  %305 = vst [vmem:[%s2697_s8 + $0x1a8] sm:$0xff] %v304_v53  ;;  %v308_v55 = vld [vmem:[%s2701_s9 + $0x380] sm:$0xff]  ;;  %v310_v56 = vld [vmem:[%s2701_s9 + $0x3d4] sm:$0xff] }
  0x48   : >> { %307 = vst [vmem:[%s2697_s8 + $0x1b0] sm:$0xff] %v306_v54  ;;  %309 = vst [vmem:[%s2697_s8 + $0x1b8] sm:$0xff] %v308_v55  ;;  %v312_v57 = vld [vmem:[%s2701_s9 + $0x3dc] sm:$0xff]  ;;  %v314_v58 = vld [vmem:[%s2701_s9 + $0x3e4] sm:$0xff]  ;;  %194 = sbr.rel (!%p191_p0) target bundleno = 44 (0x2c), region = 235 }
  0x49   : >> { %311 = vst [vmem:[%s2697_s8 + $0x1c0] sm:$0xff] %v310_v56  ;;  %v316_v59 = vld [vmem:[%s2701_s9 + $0x3ec] sm:$0xff]  ;;  %313 = vst [vmem:[%s2697_s8 + $0x1c8] sm:$0xff] %v312_v57  ;;  %v318_v60 = vld [vmem:[%s2701_s9 + $0x3f4] sm:$0xff] }
  0x4a   : >> { %315 = vst [vmem:[%s2697_s8 + $0x1d0] sm:$0xff] %v314_v58  ;;  %317 = vst [vmem:[%s2697_s8 + $0x1d8] sm:$0xff] %v316_v59  ;;  %v320_v61 = vld [vmem:[%s2701_s9 + $0x3fc] sm:$0xff]  ;;  %v322_v62 = vld [vmem:[%s2701_s9 + $0x404] sm:$0xff] }
  0x4b   : >> { %319 = vst [vmem:[%s2697_s8 + $0x1e0] sm:$0xff] %v318_v60  ;;  %321 = vst [vmem:[%s2697_s8 + $0x1e8] sm:$0xff] %v320_v61  ;;  %v324_v63 = vld [vmem:[%s2701_s9 + $0x40c] sm:$0xff]  ;;  %s3941_s9 = smov %s2972_s21 }
  0x4c   : >> { %323 = vst [vmem:[%s2697_s8 + $0x1f0] sm:$0xff] %v322_v62  ;;  %325 = vst [vmem:[%s2697_s8 + $0x1f8] sm:$0xff] %v324_v63  ;;  %s3940_s8 = smov %s2975_s22 }
  0x4d PF: > { %s3081_s23 = sand.u32 7, %s185_s6   ;;  %s2240_s24 = sshll.u32 %s2905_s7, 10 }
  0x4e   : > { %s337_s25 = sshra.s32 %s2240_s24, 4  ;;  %p2110_p1 = scmp.le.s32.totalorder %s3081_s23, 0 }
  0x4f   : > { %s3085_s26 = scalar_lea.vmem %s2890_s28, %s337_s25   ;;  %s3088_s27 = scalar_lea.vmem %s2894_s4, %s337_s25 [#allocation2]  }
  0x50   : > { %1979 = sbr.rel (%p2110_p1) target bundleno = 93 (0x5d), region = 240  ;;  %s3943_s29 = smov (!%p2110_p1), %s3088_s27 }
  0x51   : > { %s3944_s8 = smov (!%p2110_p1), %s3085_s26  ;;  %s3097_s9 = smov (!%p2110_p1), 0  }
  0x52   : > { %s3099_s10 = smov (!%p2110_p1), 0  }
  0x55 LB: >> { %v353_v0 = vld [vmem:[%s2717_s8] sm:$0xff]  ;;  %v355_v1 = vld [vmem:[%s2717_s8 + $0x8c] sm:$0xff]  ;;  %v357_v2 = vld [vmem:[%s2717_s8 + $0x118] sm:$0xff]  ;;  %s369_s6 = sadd.s32 1, %s2721_s9  ;;  %s347_s10 = sadd.s32 1, %s2725_s10   ;;  %s2725_s10 = sphi %s3099_s10, %s347_s10   ;;  %s2721_s9 = sphi %s3097_s9, %s3945_s9   ;;  %s2717_s8 = sphi %s3944_s8, %s374_s8   ;;  %s2713_s29 = sphi %s3943_s29, %s375_s29  }
  0x56   : >> { %354 = vst [vmem:[%s2713_s29] sm:$0xff] %v353_v0  ;;  %356 = vst [vmem:[%s2713_s29 + $0x40] sm:$0xff] %v355_v1  ;;  %v359_v3 = vld [vmem:[%s2717_s8 + $0x1a4] sm:$0xff]  ;;  %v361_v4 = vld [vmem:[%s2717_s8 + $0x230] sm:$0xff]  ;;  %p370_p2 = scmp.ge.s32.totalorder %s369_s6, %s3081_s23  ;;  %p346_p3 = scmp.ge.s32.totalorder %s347_s10, %s3081_s23 }
  0x57   : >> { %358 = vst [vmem:[%s2713_s29 + $0x80] sm:$0xff] %v357_v2  ;;  %v363_v5 = vld [vmem:[%s2717_s8 + $0x2bc] sm:$0xff]  ;;  %360 = vst [vmem:[%s2713_s29 + $0xc0] sm:$0xff] %v359_v3  ;;  %v365_v6 = vld [vmem:[%s2717_s8 + $0x348] sm:$0xff] }
  0x58   : >> { %362 = vst [vmem:[%s2713_s29 + $0x100] sm:$0xff] %v361_v4  ;;  %364 = vst [vmem:[%s2713_s29 + $0x140] sm:$0xff] %v363_v5  ;;  %v367_v7 = vld [vmem:[%s2717_s8 + $0x3d4] sm:$0xff]  ;;  %s3972_s6 = smov (%p370_p2, %s369_s6), 0  ;;  %349 = sbr.rel (!%p346_p3) target bundleno = 85 (0x55), region = 246 }
  0x59   : >> { %366 = vst [vmem:[%s2713_s29 + $0x180] sm:$0xff] %v365_v6  ;;  %368 = vst [vmem:[%s2713_s29 + $0x1c0] sm:$0xff] %v367_v7  ;;  %s2111_s7 = sshll.u32 %s3972_s6, 3  ;;  %s3945_s9 = smov %s3972_s6 }
  0x5a   : >> { %s374_s8 = scalar_lea.vmem %s3085_s26, %s2111_s7   ;;  %s375_s29 = scalar_lea.vmem %s3088_s27, %s2111_s7 [#allocation2]  }
  0x5d PF: > { %378 = sbr.rel (%p181_p10) target bundleno = 163 (0xa3), region = 69  ;;  %s380_s11 = ssub.s32 (!%p181_p10), %s2892_s30, %s2898_s5 }
  0x5e   : > { %s384_s17 = sshrl.u32 (!%p181_p10), %s2892_s30, 3  ;;  %s3123_s18 = scalar_lea.vmem (!%p181_p10), %s2890_s28, %s380_s11 }
  0x5f   : > { %s3126_s21 = scalar_lea.vmem (!%p181_p10), %s2894_s4, %s380_s11 [#allocation2]  ;;  %s3130_s22 = sshrl.u32 (!%p181_p10), %s384_s17, 3 }
  0x60   : > { %p2113_p4 = scmp.le.s32.totalorder (!%p181_p10), %s3130_s22, 0 }
  0x62   : > { %1993 = sbr.rel (%p2113_p4) target bundleno = 136 (0x88), region = 251  ;;  %s3946_s23 = smov (!%p2113_p4), %s2894_s4 }
  0x63   : > { %s3947_s24 = smov (!%p2113_p4), %s2890_s28  ;;  %s3139_s25 = smov (!%p2113_p4), 0  }
  0x64   : > { %s3141_s26 = smov (!%p2113_p4), 0  }
  0x67 LB: >> { %v397_v8 = vld [vmem:[%s2733_s24] sm:$0xff]  ;;  %v399_v9 = vld [vmem:[%s2733_s24 + $0x8] sm:$0xff]  ;;  %v401_v10 = vld [vmem:[%s2733_s24 + $0x10] sm:$0xff]  ;;  %s525_s27 = sadd.s32 1, %s2737_s25  ;;  %s391_s26 = sadd.s32 1, %s2741_s26   ;;  %s2741_s26 = sphi %s3141_s26, %s391_s26   ;;  %s2737_s25 = sphi %s3139_s25, %s3950_s25   ;;  %s2733_s24 = sphi %s3947_s24, %s3949_s24   ;;  %s2729_s23 = sphi %s3946_s23, %s3948_s23  }
  0x68   : >> { %398 = vst [vmem:[%s2729_s23] sm:$0xff] %v397_v8  ;;  %400 = vst [vmem:[%s2729_s23 + $0x8] sm:$0xff] %v399_v9  ;;  %v403_v11 = vld [vmem:[%s2733_s24 + $0x18] sm:$0xff]  ;;  %v405_v12 = vld [vmem:[%s2733_s24 + $0x20] sm:$0xff]  ;;  %p526_p6 = scmp.ge.s32.totalorder %s525_s27, %s3130_s22  ;;  %p390_p7 = scmp.ge.s32.totalorder %s391_s26, %s3130_s22 }
  0x69   : >> { %402 = vst [vmem:[%s2729_s23 + $0x10] sm:$0xff] %v401_v10  ;;  %v407_v13 = vld [vmem:[%s2733_s24 + $0x28] sm:$0xff]  ;;  %404 = vst [vmem:[%s2729_s23 + $0x18] sm:$0xff] %v403_v11  ;;  %v409_v14 = vld [vmem:[%s2733_s24 + $0x30] sm:$0xff] }
  0x6a   : >> { %406 = vst [vmem:[%s2729_s23 + $0x20] sm:$0xff] %v405_v12  ;;  %408 = vst [vmem:[%s2729_s23 + $0x28] sm:$0xff] %v407_v13  ;;  %v411_v15 = vld [vmem:[%s2733_s24 + $0x38] sm:$0xff]  ;;  %v413_v16 = vld [vmem:[%s2733_s24 + $0x8c] sm:$0xff]  ;;  %s3974_s27 = smov (%p526_p6, %s525_s27), 0 }
  0x6b   : >> { %410 = vst [vmem:[%s2729_s23 + $0x30] sm:$0xff] %v409_v14  ;;  %412 = vst [vmem:[%s2729_s23 + $0x38] sm:$0xff] %v411_v15  ;;  %v415_v17 = vld [vmem:[%s2733_s24 + $0x94] sm:$0xff]  ;;  %v417_v18 = vld [vmem:[%s2733_s24 + $0x9c] sm:$0xff]  ;;  %s2114_s29 = sshll.u32 %s3974_s27, 6  ;;  %s3950_s25 = smov %s3974_s27 }
  0x6c   : >> { %414 = vst [vmem:[%s2729_s23 + $0x40] sm:$0xff] %v413_v16  ;;  %v419_v19 = vld [vmem:[%s2733_s24 + $0xa4] sm:$0xff]  ;;  %416 = vst [vmem:[%s2729_s23 + $0x48] sm:$0xff] %v415_v17  ;;  %v421_v20 = vld [vmem:[%s2733_s24 + $0xac] sm:$0xff]  ;;  %s3197_s8 = scalar_lea.vmem %s2890_s28, %s2114_s29   ;;  %s3200_s9 = scalar_lea.vmem %s2894_s4, %s2114_s29 [#allocation2]  }
  0x6d   : >> { %418 = vst [vmem:[%s2729_s23 + $0x50] sm:$0xff] %v417_v18  ;;  %420 = vst [vmem:[%s2729_s23 + $0x58] sm:$0xff] %v419_v19  ;;  %v423_v21 = vld [vmem:[%s2733_s24 + $0xb4] sm:$0xff]  ;;  %v425_v22 = vld [vmem:[%s2733_s24 + $0xbc] sm:$0xff] }
  0x6e   : >> { %422 = vst [vmem:[%s2729_s23 + $0x60] sm:$0xff] %v421_v20  ;;  %424 = vst [vmem:[%s2729_s23 + $0x68] sm:$0xff] %v423_v21  ;;  %v427_v23 = vld [vmem:[%s2733_s24 + $0xc4] sm:$0xff]  ;;  %v429_v24 = vld [vmem:[%s2733_s24 + $0x118] sm:$0xff] }
  0x6f   : >> { %426 = vst [vmem:[%s2729_s23 + $0x70] sm:$0xff] %v425_v22  ;;  %v431_v25 = vld [vmem:[%s2733_s24 + $0x120] sm:$0xff]  ;;  %428 = vst [vmem:[%s2729_s23 + $0x78] sm:$0xff] %v427_v23  ;;  %v433_v26 = vld [vmem:[%s2733_s24 + $0x128] sm:$0xff] }
  0x70   : >> { %430 = vst [vmem:[%s2729_s23 + $0x80] sm:$0xff] %v429_v24  ;;  %432 = vst [vmem:[%s2729_s23 + $0x88] sm:$0xff] %v431_v25  ;;  %v435_v27 = vld [vmem:[%s2733_s24 + $0x130] sm:$0xff]  ;;  %v437_v28 = vld [vmem:[%s2733_s24 + $0x138] sm:$0xff] }
  0x71   : >> { %434 = vst [vmem:[%s2729_s23 + $0x90] sm:$0xff] %v433_v26  ;;  %436 = vst [vmem:[%s2729_s23 + $0x98] sm:$0xff] %v435_v27  ;;  %v439_v29 = vld [vmem:[%s2733_s24 + $0x140] sm:$0xff]  ;;  %v441_v30 = vld [vmem:[%s2733_s24 + $0x148] sm:$0xff] }
  0x72   : >> { %438 = vst [vmem:[%s2729_s23 + $0xa0] sm:$0xff] %v437_v28  ;;  %v443_v31 = vld [vmem:[%s2733_s24 + $0x150] sm:$0xff]  ;;  %440 = vst [vmem:[%s2729_s23 + $0xa8] sm:$0xff] %v439_v29  ;;  %v445_v32 = vld [vmem:[%s2733_s24 + $0x1a4] sm:$0xff] }
  0x73   : >> { %442 = vst [vmem:[%s2729_s23 + $0xb0] sm:$0xff] %v441_v30  ;;  %444 = vst [vmem:[%s2729_s23 + $0xb8] sm:$0xff] %v443_v31  ;;  %v447_v33 = vld [vmem:[%s2733_s24 + $0x1ac] sm:$0xff]  ;;  %v449_v34 = vld [vmem:[%s2733_s24 + $0x1b4] sm:$0xff] }
  0x74   : >> { %446 = vst [vmem:[%s2729_s23 + $0xc0] sm:$0xff] %v445_v32  ;;  %448 = vst [vmem:[%s2729_s23 + $0xc8] sm:$0xff] %v447_v33  ;;  %v451_v35 = vld [vmem:[%s2733_s24 + $0x1bc] sm:$0xff]  ;;  %v453_v36 = vld [vmem:[%s2733_s24 + $0x1c4] sm:$0xff] }
  0x75   : >> { %450 = vst [vmem:[%s2729_s23 + $0xd0] sm:$0xff] %v449_v34  ;;  %v455_v37 = vld [vmem:[%s2733_s24 + $0x1cc] sm:$0xff]  ;;  %452 = vst [vmem:[%s2729_s23 + $0xd8] sm:$0xff] %v451_v35  ;;  %v457_v38 = vld [vmem:[%s2733_s24 + $0x1d4] sm:$0xff] }
  0x76   : >> { %454 = vst [vmem:[%s2729_s23 + $0xe0] sm:$0xff] %v453_v36  ;;  %456 = vst [vmem:[%s2729_s23 + $0xe8] sm:$0xff] %v455_v37  ;;  %v459_v39 = vld [vmem:[%s2733_s24 + $0x1dc] sm:$0xff]  ;;  %v461_v40 = vld [vmem:[%s2733_s24 + $0x230] sm:$0xff] }
  0x77   : >> { %458 = vst [vmem:[%s2729_s23 + $0xf0] sm:$0xff] %v457_v38  ;;  %460 = vst [vmem:[%s2729_s23 + $0xf8] sm:$0xff] %v459_v39  ;;  %v463_v41 = vld [vmem:[%s2733_s24 + $0x238] sm:$0xff]  ;;  %v465_v42 = vld [vmem:[%s2733_s24 + $0x240] sm:$0xff] }
  0x78   : >> { %462 = vst [vmem:[%s2729_s23 + $0x100] sm:$0xff] %v461_v40  ;;  %v467_v43 = vld [vmem:[%s2733_s24 + $0x248] sm:$0xff]  ;;  %464 = vst [vmem:[%s2729_s23 + $0x108] sm:$0xff] %v463_v41  ;;  %v469_v44 = vld [vmem:[%s2733_s24 + $0x250] sm:$0xff] }
  0x79   : >> { %466 = vst [vmem:[%s2729_s23 + $0x110] sm:$0xff] %v465_v42  ;;  %468 = vst [vmem:[%s2729_s23 + $0x118] sm:$0xff] %v467_v43  ;;  %v471_v45 = vld [vmem:[%s2733_s24 + $0x258] sm:$0xff]  ;;  %v473_v46 = vld [vmem:[%s2733_s24 + $0x260] sm:$0xff] }
  0x7a   : >> { %470 = vst [vmem:[%s2729_s23 + $0x120] sm:$0xff] %v469_v44  ;;  %472 = vst [vmem:[%s2729_s23 + $0x128] sm:$0xff] %v471_v45  ;;  %v475_v47 = vld [vmem:[%s2733_s24 + $0x268] sm:$0xff]  ;;  %v477_v48 = vld [vmem:[%s2733_s24 + $0x2bc] sm:$0xff] }
  0x7b   : >> { %474 = vst [vmem:[%s2729_s23 + $0x130] sm:$0xff] %v473_v46  ;;  %v479_v49 = vld [vmem:[%s2733_s24 + $0x2c4] sm:$0xff]  ;;  %476 = vst [vmem:[%s2729_s23 + $0x138] sm:$0xff] %v475_v47  ;;  %v481_v50 = vld [vmem:[%s2733_s24 + $0x2cc] sm:$0xff] }
  0x7c   : >> { %478 = vst [vmem:[%s2729_s23 + $0x140] sm:$0xff] %v477_v48  ;;  %480 = vst [vmem:[%s2729_s23 + $0x148] sm:$0xff] %v479_v49  ;;  %v483_v51 = vld [vmem:[%s2733_s24 + $0x2d4] sm:$0xff]  ;;  %v485_v52 = vld [vmem:[%s2733_s24 + $0x2dc] sm:$0xff] }
  0x7d   : >> { %482 = vst [vmem:[%s2729_s23 + $0x150] sm:$0xff] %v481_v50  ;;  %484 = vst [vmem:[%s2729_s23 + $0x158] sm:$0xff] %v483_v51  ;;  %v487_v53 = vld [vmem:[%s2733_s24 + $0x2e4] sm:$0xff]  ;;  %v489_v54 = vld [vmem:[%s2733_s24 + $0x2ec] sm:$0xff] }
  0x7e   : >> { %486 = vst [vmem:[%s2729_s23 + $0x160] sm:$0xff] %v485_v52  ;;  %v491_v55 = vld [vmem:[%s2733_s24 + $0x2f4] sm:$0xff]  ;;  %488 = vst [vmem:[%s2729_s23 + $0x168] sm:$0xff] %v487_v53  ;;  %v493_v56 = vld [vmem:[%s2733_s24 + $0x348] sm:$0xff] }
  0x7f   : >> { %490 = vst [vmem:[%s2729_s23 + $0x170] sm:$0xff] %v489_v54  ;;  %492 = vst [vmem:[%s2729_s23 + $0x178] sm:$0xff] %v491_v55  ;;  %v495_v57 = vld [vmem:[%s2733_s24 + $0x350] sm:$0xff]  ;;  %v497_v58 = vld [vmem:[%s2733_s24 + $0x358] sm:$0xff] }
  0x80   : >> { %494 = vst [vmem:[%s2729_s23 + $0x180] sm:$0xff] %v493_v56  ;;  %496 = vst [vmem:[%s2729_s23 + $0x188] sm:$0xff] %v495_v57  ;;  %v499_v59 = vld [vmem:[%s2733_s24 + $0x360] sm:$0xff]  ;;  %v501_v60 = vld [vmem:[%s2733_s24 + $0x368] sm:$0xff] }
  0x81   : >> { %498 = vst [vmem:[%s2729_s23 + $0x190] sm:$0xff] %v497_v58  ;;  %v503_v61 = vld [vmem:[%s2733_s24 + $0x370] sm:$0xff]  ;;  %500 = vst [vmem:[%s2729_s23 + $0x198] sm:$0xff] %v499_v59  ;;  %v505_v62 = vld [vmem:[%s2733_s24 + $0x378] sm:$0xff] }
  0x82   : >> { %502 = vst [vmem:[%s2729_s23 + $0x1a0] sm:$0xff] %v501_v60  ;;  %504 = vst [vmem:[%s2729_s23 + $0x1a8] sm:$0xff] %v503_v61  ;;  %v507_v63 = vld [vmem:[%s2733_s24 + $0x380] sm:$0xff]  ;;  %v509_v0 = vld [vmem:[%s2733_s24 + $0x3d4] sm:$0xff] }
  0x83   : >> { %506 = vst [vmem:[%s2729_s23 + $0x1b0] sm:$0xff] %v505_v62  ;;  %508 = vst [vmem:[%s2729_s23 + $0x1b8] sm:$0xff] %v507_v63  ;;  %v511_v1 = vld [vmem:[%s2733_s24 + $0x3dc] sm:$0xff]  ;;  %v513_v2 = vld [vmem:[%s2733_s24 + $0x3e4] sm:$0xff]  ;;  %393 = sbr.rel (!%p390_p7) target bundleno = 103 (0x67), region = 257 }
  0x84   : >> { %510 = vst [vmem:[%s2729_s23 + $0x1c0] sm:$0xff] %v509_v0  ;;  %v515_v3 = vld [vmem:[%s2733_s24 + $0x3ec] sm:$0xff]  ;;  %512 = vst [vmem:[%s2729_s23 + $0x1c8] sm:$0xff] %v511_v1  ;;  %v517_v4 = vld [vmem:[%s2733_s24 + $0x3f4] sm:$0xff] }
  0x85   : >> { %514 = vst [vmem:[%s2729_s23 + $0x1d0] sm:$0xff] %v513_v2  ;;  %516 = vst [vmem:[%s2729_s23 + $0x1d8] sm:$0xff] %v515_v3  ;;  %v519_v5 = vld [vmem:[%s2733_s24 + $0x3fc] sm:$0xff]  ;;  %v521_v6 = vld [vmem:[%s2733_s24 + $0x404] sm:$0xff] }
  0x86   : >> { %518 = vst [vmem:[%s2729_s23 + $0x1e0] sm:$0xff] %v517_v4  ;;  %520 = vst [vmem:[%s2729_s23 + $0x1e8] sm:$0xff] %v519_v5  ;;  %v523_v7 = vld [vmem:[%s2733_s24 + $0x40c] sm:$0xff]  ;;  %s3949_s24 = smov %s3197_s8 }
  0x87   : >> { %522 = vst [vmem:[%s2729_s23 + $0x1f0] sm:$0xff] %v521_v6  ;;  %524 = vst [vmem:[%s2729_s23 + $0x1f8] sm:$0xff] %v523_v7  ;;  %s3948_s23 = smov %s3200_s9 }
  0x88 PF: > { %s3306_s10 = sand.u32 7, %s384_s17   ;;  %s2242_s6 = sshll.u32 %s3130_s22, 10 }
  0x89   : > { %s536_s7 = sshra.s32 %s2242_s6, 4  ;;  %p2119_p8 = scmp.le.s32.totalorder %s3306_s10, 0 }
  0x8a   : > { %s3310_s11 = scalar_lea.vmem %s2890_s28, %s536_s7   ;;  %s3313_s29 = scalar_lea.vmem %s2894_s4, %s536_s7 [#allocation2]  }
  0x8b   : > { %2007 = sbr.rel (%p2119_p8) target bundleno = 152 (0x98), region = 262  ;;  %s3951_s23 = smov (!%p2119_p8), %s3313_s29 }
  0x8c   : > { %s3952_s24 = smov (!%p2119_p8), %s3310_s11  ;;  %s3322_s25 = smov (!%p2119_p8), 0  }
  0x8d   : > { %s3324_s26 = smov (!%p2119_p8), 0  }
  0x90 LB: >> { %v552_v8 = vld [vmem:[%s2749_s24] sm:$0xff]  ;;  %v554_v9 = vld [vmem:[%s2749_s24 + $0x8c] sm:$0xff]  ;;  %v556_v10 = vld [vmem:[%s2749_s24 + $0x118] sm:$0xff]  ;;  %s568_s17 = sadd.s32 1, %s2753_s25  ;;  %s546_s26 = sadd.s32 1, %s2757_s26   ;;  %s2757_s26 = sphi %s3324_s26, %s546_s26   ;;  %s2753_s25 = sphi %s3322_s25, %s3953_s25   ;;  %s2749_s24 = sphi %s3952_s24, %s573_s24   ;;  %s2745_s23 = sphi %s3951_s23, %s574_s23  }
  0x91   : >> { %553 = vst [vmem:[%s2745_s23] sm:$0xff] %v552_v8  ;;  %555 = vst [vmem:[%s2745_s23 + $0x40] sm:$0xff] %v554_v9  ;;  %v558_v11 = vld [vmem:[%s2749_s24 + $0x1a4] sm:$0xff]  ;;  %v560_v12 = vld [vmem:[%s2749_s24 + $0x230] sm:$0xff]  ;;  %p569_p9 = scmp.ge.s32.totalorder %s568_s17, %s3306_s10  ;;  %p545_p10 = scmp.ge.s32.totalorder %s546_s26, %s3306_s10 }
  0x92   : >> { %557 = vst [vmem:[%s2745_s23 + $0x80] sm:$0xff] %v556_v10  ;;  %v562_v13 = vld [vmem:[%s2749_s24 + $0x2bc] sm:$0xff]  ;;  %559 = vst [vmem:[%s2745_s23 + $0xc0] sm:$0xff] %v558_v11  ;;  %v564_v14 = vld [vmem:[%s2749_s24 + $0x348] sm:$0xff] }
  0x93   : >> { %561 = vst [vmem:[%s2745_s23 + $0x100] sm:$0xff] %v560_v12  ;;  %563 = vst [vmem:[%s2745_s23 + $0x140] sm:$0xff] %v562_v13  ;;  %v566_v15 = vld [vmem:[%s2749_s24 + $0x3d4] sm:$0xff]  ;;  %s3976_s17 = smov (%p569_p9, %s568_s17), 0  ;;  %548 = sbr.rel (!%p545_p10) target bundleno = 144 (0x90), region = 268 }
  0x94   : >> { %565 = vst [vmem:[%s2745_s23 + $0x180] sm:$0xff] %v564_v14  ;;  %567 = vst [vmem:[%s2745_s23 + $0x1c0] sm:$0xff] %v566_v15  ;;  %s2120_s22 = sshll.u32 %s3976_s17, 3  ;;  %s3953_s25 = smov %s3976_s17 }
  0x95   : >> { %s573_s24 = scalar_lea.vmem %s3310_s11, %s2120_s22   ;;  %s574_s23 = scalar_lea.vmem %s3313_s29, %s2120_s22 [#allocation2]  }
  0x98 PF: > { %s2823_s27 = smov 1  }
  0x99   : > { %s575_s8 = sshll.u32 %s2823_s27, %s2898_s5 }
  0x9a   : > { %s2122_s9 = sadd.s32 4294967295, %s575_s8 }
  0x9b   : > { %v585_v16 = vld [vmem:[%s3123_s18] sm:%s2122_s9]  ;;  %v587_v17 = vld [vmem:[%s3123_s18 + $0x8c] sm:%s2122_s9] }
  0x9c   : > { %586 = vst [vmem:[%s3126_s21] sm:%s2122_s9] %v585_v16  ;;  %588 = vst [vmem:[%s3126_s21 + $0x40] sm:%s2122_s9] %v587_v17 }
  0x9d   : > { %v589_v18 = vld [vmem:[%s3123_s18 + $0x118] sm:%s2122_s9]  ;;  %v591_v19 = vld [vmem:[%s3123_s18 + $0x1a4] sm:%s2122_s9] }
  0x9e   : > { %590 = vst [vmem:[%s3126_s21 + $0x80] sm:%s2122_s9] %v589_v18  ;;  %592 = vst [vmem:[%s3126_s21 + $0xc0] sm:%s2122_s9] %v591_v19 }
  0x9f   : > { %v593_v20 = vld [vmem:[%s3123_s18 + $0x230] sm:%s2122_s9]  ;;  %v595_v21 = vld [vmem:[%s3123_s18 + $0x2bc] sm:%s2122_s9] }
  0xa0   : > { %594 = vst [vmem:[%s3126_s21 + $0x100] sm:%s2122_s9] %v593_v20  ;;  %596 = vst [vmem:[%s3126_s21 + $0x140] sm:%s2122_s9] %v595_v21 }
  0xa1   : > { %v597_v22 = vld [vmem:[%s3123_s18 + $0x348] sm:%s2122_s9]  ;;  %v599_v23 = vld [vmem:[%s3123_s18 + $0x3d4] sm:%s2122_s9] }
  0xa2   : > { %598 = vst [vmem:[%s3126_s21 + $0x180] sm:%s2122_s9] %v597_v22  ;;  %600 = vst [vmem:[%s3126_s21 + $0x1c0] sm:%s2122_s9] %v599_v23 }
  0xa3 PF: > { %p2123_p11 = scmp.ge.u32.totalorder %s2892_s30, 8 }
  0xa4   : > { %s2824_s5 = smov (!%p2123_p11), 1  }
  0xa5   : > { %153 = sbr.rel (%p2123_p11) target bundleno = 178 (0xb2), region = 40  ;;  %s154_s18 = sshll.u32 (!%p2123_p11), %s2824_s5, %s2892_s30 }
  0xa6   : > { %s2124_s21 = sadd.s32 (!%p2123_p11), 4294967295, %s154_s18 }
  0xaa   : > { %v164_v24 = vld [vmem:[%s2890_s28] sm:%s2124_s21]  ;;  %v166_v25 = vld [vmem:[%s2890_s28 + $0x8c] sm:%s2124_s21] }
  0xab   : > { %165 = vst [vmem:[%s2894_s4] sm:%s2124_s21] %v164_v24  ;;  %167 = vst [vmem:[%s2894_s4 + $0x40] sm:%s2124_s21] %v166_v25 }
  0xac   : > { %v168_v26 = vld [vmem:[%s2890_s28 + $0x118] sm:%s2124_s21]  ;;  %v170_v27 = vld [vmem:[%s2890_s28 + $0x1a4] sm:%s2124_s21] }
  0xad   : > { %169 = vst [vmem:[%s2894_s4 + $0x80] sm:%s2124_s21] %v168_v26  ;;  %171 = vst [vmem:[%s2894_s4 + $0xc0] sm:%s2124_s21] %v170_v27 }
  0xae   : > { %v172_v28 = vld [vmem:[%s2890_s28 + $0x230] sm:%s2124_s21]  ;;  %v174_v29 = vld [vmem:[%s2890_s28 + $0x2bc] sm:%s2124_s21] }
  0xaf   : > { %173 = vst [vmem:[%s2894_s4 + $0x100] sm:%s2124_s21] %v172_v28  ;;  %175 = vst [vmem:[%s2894_s4 + $0x140] sm:%s2124_s21] %v174_v29 }
  0xb0   : > { %v176_v30 = vld [vmem:[%s2890_s28 + $0x348] sm:%s2124_s21]  ;;  %v178_v31 = vld [vmem:[%s2890_s28 + $0x3d4] sm:%s2124_s21] }
  0xb1   : > { %177 = vst [vmem:[%s2894_s4 + $0x180] sm:%s2124_s21] %v176_v30  ;;  %179 = vst [vmem:[%s2894_s4 + $0x1c0] sm:%s2124_s21] %v178_v31 }
  0xb2 PF: > { %p2125_p12 = scmp.ge.s32.totalorder %s2693_s14, 1  ;;  %p603_p13 = scmp.lt.s32.totalorder %s2693_s14, 4 }
  0xb4   : > { %p604_p0 = pnand %p2125_p12, %p603_p13 }
  0xb5   : > { %s610_s30 = sand.u32 (!%p604_p0), 1, %s2685_s12  }
  0xb6   : > { %607 = sbr.rel (%p604_p0) target bundleno = 604 (0x25c), region = 94  ;;  %s2126_s28 = sshll.u32 (!%p604_p0), %s610_s30, 9 }
  0xb7   : > { %s3388_s4 = scalar_lea.vmem (!%p604_p0), [#allocation2], %s2126_s28  ;;  %s2127_s11 = sshll.u32 (!%p604_p0), %s610_s30, 6 }
  0xb8   : > { %s3489_s29 = scalar_lea.vmem (!%p604_p0), [#allocation3], %s2127_s11  }
  0xbb   : > { %v708_v32 = vld [vmem:[%s3934_s1] sm:$0xff]  ;;  %v2825_v33 = vmov 0   ;;  %v693_v36 = vld [vmem:[%s3388_s4 + $0x188] sm:$0xff]  ;;  %v694_v0 = vld [vmem:[%s3388_s4 + $0x190] sm:$0xff]  ;;  %vm1034_vm0 = vcmask 523264   ;;  %s2209_s12 = sshll.u32 (%p2879_p5), %s2864_s15, 4 }
  0xbc   : > { %1070 = vmatprep.mubr.bf16.mxu0 %v2825_v33  ;;  %1111 = vmatprep.mubr.bf16.mxu1 %v2825_v33  ;;  %v692_v34 = vld [vmem:[%s3388_s4 + $0x180] sm:$0xff]  ;;  %v701_v38 = vld [vmem:[%s3388_s4 + $0x1c8] sm:$0xff]  ;;  %v702_v1 = vld [vmem:[%s3388_s4 + $0x1d0] sm:$0xff]  ;;  %s2252_s23 = sshll.u32 (%p2879_p5), %s2864_s15, 6  ;;  %s1462_s24 = ssub.s32 (%p2879_p5), 35, %s2209_s12 }
  0xbd   : > { %2542 = vset.pattern.permute.xlu0 %v2825_v33  ;;  %v700_v35 = vld [vmem:[%s3388_s4 + $0x1c0] sm:$0xff]  ;;  %v2179_v42 = vcombine.high %v693_v36, %v701_v38  ;;  %v2178_v43 = vcombine.low %v693_v36, %v701_v38  ;;  %v677_v45 = vld [vmem:[%s3388_s4 + $0x108] sm:$0xff]  ;;  %v695_v2 = vld [vmem:[%s3388_s4 + $0x198] sm:$0xff]  ;;  %v2181_v6 = vcombine.high %v694_v0, %v702_v1  ;;  %v2180_v13 = vcombine.low %v694_v0, %v702_v1  ;;  %s3518_s17 = scalar_lea.vmem (%p2879_p5), %s3936_s3, %s2252_s23   ;;  %p1463_p1 = scmp.lt.s32.totalorder (%p2879_p5), %s1462_s24, 16 }
  0xbe   : > { %711 = vperm.xlu0 %2542, %v708_v32   ;;  %v2177_v37 = vcombine.high %v692_v34, %v700_v35  ;;  %v2176_v39 = vcombine.low %v692_v34, %v700_v35  ;;  %v676_v40 = vld [vmem:[%s3388_s4 + $0x100] sm:$0xff]  ;;  %v685_v46 = vld [vmem:[%s3388_s4 + $0x148] sm:$0xff]  ;;  %v703_v3 = vld [vmem:[%s3388_s4 + $0x1d8] sm:$0xff] }
  0xbf   : > { %v684_v41 = vld [vmem:[%s3388_s4 + $0x140] sm:$0xff]  ;;  %v2163_v48 = vcombine.high %v677_v45, %v685_v46  ;;  %v661_v50 = vld [vmem:[%s3388_s4 + $0x88] sm:$0xff]  ;;  %1087 = vmatprep.subr.bf16.mxu1 %v2179_v42  ;;  %v2162_v53 = vcombine.low %v677_v45, %v685_v46  ;;  %v2183_v7 = vcombine.high %v695_v2, %v703_v3  ;;  %v678_v8 = vld [vmem:[%s3388_s4 + $0x110] sm:$0xff]  ;;  %v2182_v14 = vcombine.low %v695_v2, %v703_v3 }
  0xc0   : > { %v2161_v44 = vcombine.high %v676_v40, %v684_v41  ;;  %v660_v47 = vld [vmem:[%s3388_s4 + $0x80] sm:$0xff]  ;;  %1046 = vmatprep.subr.bf16.mxu0 %v2177_v37  ;;  %v669_v51 = vld [vmem:[%s3388_s4 + $0xc8] sm:$0xff]  ;;  %v2160_v52 = vcombine.low %v676_v40, %v684_v41  ;;  %1088 = vmatpush1.bf16.msra.mxu1 %v2178_v43  ;;  %v686_v9 = vld [vmem:[%s3388_s4 + $0x150] sm:$0xff] }
  0xc1   : > { %v668_v49 = vld [vmem:[%s3388_s4 + $0xc0] sm:$0xff]  ;;  %1047 = vmatpush1.bf16.msra.mxu0 %v2176_v39  ;;  %1089 = vmatprep.subr.bf16.mxu1 %v2163_v48  ;;  %v2147_v55 = vcombine.high %v661_v50, %v669_v51  ;;  %v645_v58 = vld [vmem:[%s3388_s4 + $0x8] sm:$0xff]  ;;  %v2146_v61 = vcombine.low %v661_v50, %v669_v51  ;;  %v679_v10 = vld [vmem:[%s3388_s4 + $0x118] sm:$0xff]  ;;  %v2165_v15 = vcombine.high %v678_v8, %v686_v9 }
  0xc2   : > { %1048 = vmatprep.subr.bf16.mxu0 %v2161_v44  ;;  %v2145_v54 = vcombine.high %v660_v47, %v668_v49  ;;  %v644_v56 = vld [vmem:[%s3388_s4] sm:$0xff]  ;;  %v653_v59 = vld [vmem:[%s3388_s4 + $0x48] sm:$0xff]  ;;  %v2144_v60 = vcombine.low %v660_v47, %v668_v49  ;;  %v687_v11 = vld [vmem:[%s3388_s4 + $0x158] sm:$0xff]  ;;  %v2164_v21 = vcombine.low %v678_v8, %v686_v9 }
  0xc3   : > { %v652_v57 = vld [vmem:[%s3388_s4 + $0x40] sm:$0xff]  ;;  %v2131_v63 = vcombine.high %v645_v58, %v653_v59  ;;  %v2130_v5 = vcombine.low %v645_v58, %v653_v59  ;;  %v2167_v16 = vcombine.high %v679_v10, %v687_v11  ;;  %v662_v17 = vld [vmem:[%s3388_s4 + $0x90] sm:$0xff]  ;;  %v663_v19 = vld [vmem:[%s3388_s4 + $0x98] sm:$0xff]  ;;  %v2166_v22 = vcombine.low %v679_v10, %v687_v11 }
  0xc4   : > { %1090 = vmatpush1.bf16.msra.mxu1 %v2162_v53  ;;  %v2129_v62 = vcombine.high %v644_v56, %v652_v57  ;;  %v2128_v4 = vcombine.low %v644_v56, %v652_v57  ;;  %v3417_v12 = vld [vmem:[%s3933_s0] sm:$0xf]  ;;  %v670_v18 = vld [vmem:[%s3388_s4 + $0xd0] sm:$0xff]  ;;  %v671_v20 = vld [vmem:[%s3388_s4 + $0xd8] sm:$0xff] }
  0xc5   : > { %1049 = vmatpush1.bf16.msra.mxu0 %v2160_v52  ;;  %1091 = vmatprep.subr.bf16.mxu1 %v2147_v55  ;;  %v2149_v23 = vcombine.high %v662_v17, %v670_v18  ;;  %v2151_v24 = vcombine.high %v663_v19, %v671_v20  ;;  %v646_v25 = vld [vmem:[%s3388_s4 + $0x10] sm:$0xff]  ;;  %v647_v27 = vld [vmem:[%s3388_s4 + $0x18] sm:$0xff]  ;;  %v2148_v29 = vcombine.low %v662_v17, %v670_v18  ;;  %v696_v34 = vld [vmem:[%s3388_s4 + $0x1a0] sm:$0xff] }
  0xc6   : > { %1050 = vmatprep.subr.bf16.mxu0 %v2145_v54  ;;  %v654_v26 = vld [vmem:[%s3388_s4 + $0x50] sm:$0xff]  ;;  %v655_v28 = vld [vmem:[%s3388_s4 + $0x58] sm:$0xff]  ;;  %v2150_v30 = vcombine.low %v663_v19, %v671_v20  ;;  %v704_v35 = vld [vmem:[%s3388_s4 + $0x1e0] sm:$0xff] }
  0xc7   : > { %v2133_v31 = vcombine.high %v646_v25, %v654_v26  ;;  %v2135_v32 = vcombine.high %v647_v27, %v655_v28  ;;  %v697_v36 = vld [vmem:[%s3388_s4 + $0x1a8] sm:$0xff]  ;;  %v2132_v38 = vcombine.low %v646_v25, %v654_v26  ;;  %v2134_v39 = vcombine.low %v647_v27, %v655_v28  ;;  %v680_v42 = vld [vmem:[%s3388_s4 + $0x120] sm:$0xff]  ;;  %v698_v2 = vld [vmem:[%s3388_s4 + $0x1b0] sm:$0xff] }
  0xc8   : > { %1092 = vmatpush1.bf16.msra.mxu1 %v2146_v61  ;;  %v705_v37 = vld [vmem:[%s3388_s4 + $0x1e8] sm:$0xff]  ;;  %v2185_v40 = vcombine.high %v696_v34, %v704_v35  ;;  %v688_v43 = vld [vmem:[%s3388_s4 + $0x160] sm:$0xff]  ;;  %v2184_v46 = vcombine.low %v696_v34, %v704_v35  ;;  %v706_v3 = vld [vmem:[%s3388_s4 + $0x1f0] sm:$0xff] }
  0xc9   : > { %1051 = vmatpush1.bf16.msra.mxu0 %v2144_v60  ;;  %1093 = vmatprep.subr.bf16.mxu1 %v2131_v63  ;;  %v2187_v41 = vcombine.high %v697_v36, %v705_v37  ;;  %v681_v44 = vld [vmem:[%s3388_s4 + $0x128] sm:$0xff]  ;;  %v2186_v47 = vcombine.low %v697_v36, %v705_v37  ;;  %v2169_v48 = vcombine.high %v680_v42, %v688_v43  ;;  %v664_v50 = vld [vmem:[%s3388_s4 + $0xa0] sm:$0xff]  ;;  %v682_v10 = vld [vmem:[%s3388_s4 + $0x130] sm:$0xff] }
  0xca   : > { %1052 = vmatprep.subr.bf16.mxu0 %v2129_v62  ;;  %v689_v45 = vld [vmem:[%s3388_s4 + $0x168] sm:$0xff]  ;;  %v672_v51 = vld [vmem:[%s3388_s4 + $0xe0] sm:$0xff]  ;;  %v2168_v54 = vcombine.low %v680_v42, %v688_v43  ;;  %v2189_v8 = vcombine.high %v698_v2, %v706_v3  ;;  %v690_v11 = vld [vmem:[%s3388_s4 + $0x170] sm:$0xff] }
  0xcb   : > { %v2171_v49 = vcombine.high %v681_v44, %v689_v45  ;;  %v665_v52 = vld [vmem:[%s3388_s4 + $0xa8] sm:$0xff]  ;;  %v2170_v55 = vcombine.low %v681_v44, %v689_v45  ;;  %v2153_v56 = vcombine.high %v664_v50, %v672_v51  ;;  %v648_v58 = vld [vmem:[%s3388_s4 + $0x20] sm:$0xff]  ;;  %v2152_v62 = vcombine.low %v664_v50, %v672_v51  ;;  %v666_v19 = vld [vmem:[%s3388_s4 + $0xb0] sm:$0xff] }
  0xcc   : > { %1094 = vmatpush1.bf16.msra.mxu1 %v2130_v5  ;;  %v673_v53 = vld [vmem:[%s3388_s4 + $0xe8] sm:$0xff]  ;;  %v656_v59 = vld [vmem:[%s3388_s4 + $0x60] sm:$0xff]  ;;  %v707_v5 = vld [vmem:[%s3388_s4 + $0x1f8] sm:$0xff]  ;;  %v2173_v17 = vcombine.high %v682_v10, %v690_v11 }
  0xcd   : > { %1053 = vmatpush1.bf16.msra.mxu0 %v2128_v4  ;;  %1169 = vmatprep.subr.bf16.mxu1 %v2183_v7  ;;  %v2155_v57 = vcombine.high %v665_v52, %v673_v53  ;;  %v649_v60 = vld [vmem:[%s3388_s4 + $0x28] sm:$0xff]  ;;  %v2154_v63 = vcombine.low %v665_v52, %v673_v53  ;;  %v2137_v0 = vcombine.high %v648_v58, %v656_v59  ;;  %v699_v4 = vld [vmem:[%s3388_s4 + $0x1b8] sm:$0xff]  ;;  %v674_v20 = vld [vmem:[%s3388_s4 + $0xf0] sm:$0xff] }
  0xce   : > { %1128 = vmatprep.subr.bf16.mxu0 %v2181_v6  ;;  %v657_v61 = vld [vmem:[%s3388_s4 + $0x68] sm:$0xff]  ;;  %v2136_v6 = vcombine.low %v648_v58, %v656_v59  ;;  %v2191_v9 = vcombine.high %v699_v4, %v707_v5  ;;  %v2157_v25 = vcombine.high %v666_v19, %v674_v20  ;;  %v650_v27 = vld [vmem:[%s3388_s4 + $0x30] sm:$0xff] }
  0xcf   : > { %2193 = vmatmul.mubr.msk.bf16.vlgmr.msra.gmra.mxu1 %vm1034_vm0, %v3417_v12  ;;  %v2139_v1 = vcombine.high %v649_v60, %v657_v61  ;;  %v2138_v7 = vcombine.low %v649_v60, %v657_v61  ;;  %v658_v28 = vld [vmem:[%s3388_s4 + $0x70] sm:$0xff] }
  0xd0   : > { %2192 = vmatmul.mubr.msk.bf16.vlgmr.msra.gmra.mxu0 %vm1034_vm0, %v3417_v12  ;;  %1170 = vmatpush1.bf16.msra.mxu1 %v2182_v14  ;;  %v691_v14 = vld [vmem:[%s3388_s4 + $0x178] sm:$0xff]  ;;  %v2141_v34 = vcombine.high %v650_v27, %v658_v28  ;;  %v2140_v36 = vcombine.low %v650_v27, %v658_v28 }
  0xd1   : > { %1129 = vmatpush1.bf16.msra.mxu0 %v2180_v13  ;;  %1171 = vmatprep.subr.bf16.mxu1 %v2167_v16  ;;  %v683_v13 = vld [vmem:[%s3388_s4 + $0x138] sm:$0xff]  ;;  %v2190_v16 = vcombine.low %v699_v4, %v707_v5 }
  0xd2   : > { %1130 = vmatprep.subr.bf16.mxu0 %v2165_v15  ;;  %1152 = vmatprep.mubr.bf16.mxu0 %v2825_v33  ;;  %v2188_v15 = vcombine.low %v698_v2, %v706_v3  ;;  %v2175_v18 = vcombine.high %v683_v13, %v691_v14 }
  0xd3   : > { %1193 = vmatprep.mubr.bf16.mxu1 %v2825_v33 }
  0xd4   : > { %1172 = vmatpush1.bf16.msra.mxu1 %v2166_v22  ;;  %v675_v22 = vld [vmem:[%s3388_s4 + $0xf8] sm:$0xff] }
  0xd5   : > { %1131 = vmatpush1.bf16.msra.mxu0 %v2164_v21  ;;  %1173 = vmatprep.subr.bf16.mxu1 %v2151_v24  ;;  %v667_v21 = vld [vmem:[%s3388_s4 + $0xb8] sm:$0xff]  ;;  %v2174_v24 = vcombine.low %v683_v13, %v691_v14 }
  0xd6   : > { %1132 = vmatprep.subr.bf16.mxu0 %v2149_v23  ;;  %v2172_v23 = vcombine.low %v682_v10, %v690_v11  ;;  %v2159_v26 = vcombine.high %v667_v21, %v675_v22 }
  0xd8   : > { %1174 = vmatpush1.bf16.msra.mxu1 %v2150_v30  ;;  %v659_v30 = vld [vmem:[%s3388_s4 + $0x78] sm:$0xff] }
  0xd9   : > { %1133 = vmatpush1.bf16.msra.mxu0 %v2148_v29  ;;  %1175 = vmatprep.subr.bf16.mxu1 %v2135_v32  ;;  %v651_v29 = vld [vmem:[%s3388_s4 + $0x38] sm:$0xff]  ;;  %v2158_v32 = vcombine.low %v667_v21, %v675_v22 }
  0xda   : > { %1134 = vmatprep.subr.bf16.mxu0 %v2133_v31  ;;  %v2156_v31 = vcombine.low %v666_v19, %v674_v20  ;;  %v2143_v35 = vcombine.high %v651_v29, %v659_v30  ;;  %v2142_v37 = vcombine.low %v651_v29, %v659_v30 }
  0xdc   : > { %1176 = vmatpush1.bf16.msra.mxu1 %v2134_v39 }
  0xdd   : > { %1135 = vmatpush1.bf16.msra.mxu0 %v2132_v38  ;;  %1251 = vmatprep.subr.bf16.mxu1 %v2187_v41 }
  0xde   : > { %1210 = vmatprep.subr.bf16.mxu0 %v2185_v40 }
  0xdf   : > { %2195 = vmatmul.mubr.msk.bf16.vlgmr.msra.gmra.mxu1 %vm1034_vm0, %v3417_v12 }
  0xe0   : > { %2194 = vmatmul.mubr.msk.bf16.vlgmr.msra.gmra.mxu0 %vm1034_vm0, %v3417_v12  ;;  %1252 = vmatpush1.bf16.msra.mxu1 %v2186_v47 }
  0xe1   : > { %1211 = vmatpush1.bf16.msra.mxu0 %v2184_v46  ;;  %1253 = vmatprep.subr.bf16.mxu1 %v2171_v49 }
  0xe2   : > { %1212 = vmatprep.subr.bf16.mxu0 %v2169_v48  ;;  %1234 = vmatprep.mubr.bf16.mxu0 %v2825_v33 }
  0xe3   : > { %1275 = vmatprep.mubr.bf16.mxu1 %v2825_v33 }
  0xe4   : > { %1254 = vmatpush1.bf16.msra.mxu1 %v2170_v55 }
  0xe5   : > { %1213 = vmatpush1.bf16.msra.mxu0 %v2168_v54  ;;  %1255 = vmatprep.subr.bf16.mxu1 %v2155_v57 }
  0xe6   : > { %1214 = vmatprep.subr.bf16.mxu0 %v2153_v56 }
  0xe8   : > { %1256 = vmatpush1.bf16.msra.mxu1 %v2154_v63 }
  0xe9   : > { %1215 = vmatpush1.bf16.msra.mxu0 %v2152_v62  ;;  %1257 = vmatprep.subr.bf16.mxu1 %v2139_v1 }
  0xea   : > { %1216 = vmatprep.subr.bf16.mxu0 %v2137_v0 }
  0xec   : > { %1258 = vmatpush1.bf16.msra.mxu1 %v2138_v7 }
  0xed   : > { %1217 = vmatpush1.bf16.msra.mxu0 %v2136_v6  ;;  %1333 = vmatprep.subr.bf16.mxu1 %v2191_v9 }
  0xee   : > { %1292 = vmatprep.subr.bf16.mxu0 %v2189_v8 }
  0xef   : > { %2197 = vmatmul.mubr.msk.bf16.vlgmr.msra.gmra.mxu1 %vm1034_vm0, %v3417_v12 }
  0xf0   : > { %2196 = vmatmul.mubr.msk.bf16.vlgmr.msra.gmra.mxu0 %vm1034_vm0, %v3417_v12  ;;  %1334 = vmatpush1.bf16.msra.mxu1 %v2190_v16 }
  0xf1   : > { %1293 = vmatpush1.bf16.msra.mxu0 %v2188_v15  ;;  %1335 = vmatprep.subr.bf16.mxu1 %v2175_v18 }
  0xf2   : > { %1294 = vmatprep.subr.bf16.mxu0 %v2173_v17  ;;  %1316 = vmatprep.mubr.bf16.mxu0 %v2825_v33 }
  0xf3   : > { %1357 = vmatprep.mubr.bf16.mxu1 %v2825_v33 }
  0xf4   : > { %1336 = vmatpush1.bf16.msra.mxu1 %v2174_v24 }
  0xf5   : > { %1295 = vmatpush1.bf16.msra.mxu0 %v2172_v23  ;;  %1337 = vmatprep.subr.bf16.mxu1 %v2159_v26 }
  0xf6   : > { %1296 = vmatprep.subr.bf16.mxu0 %v2157_v25 }
  0xf8   : > { %1338 = vmatpush1.bf16.msra.mxu1 %v2158_v32 }
  0xf9   : > { %1297 = vmatpush1.bf16.msra.mxu0 %v2156_v31  ;;  %1339 = vmatprep.subr.bf16.mxu1 %v2143_v35 }
  0xfa   : > { %1298 = vmatprep.subr.bf16.mxu0 %v2141_v34 }
  0xfc   : > { %1340 = vmatpush1.bf16.msra.mxu1 %v2142_v37 }
  0xfd   : > { %1299 = vmatpush1.bf16.msra.mxu0 %v2140_v36 }
  0xff   : > { %2199 = vmatmul.mubr.msk.bf16.vlgmr.msra.gmra.mxu1 %vm1034_vm0, %v3417_v12 }
 0x100   : > { %2198 = vmatmul.mubr.msk.bf16.vlgmr.msra.gmra.mxu0 %vm1034_vm0, %v3417_v12 }
 0x139   : > { %v3481_v33 = vpop.permute.xlu0 %711 }
 0x18f   : > { %v1113_v39 = vpop.f32.mrf.mxu1 }
 0x190   : > { %v1072_v38 = vpop.f32.mrf.mxu0  ;;  %v1114_v42 = vadd.f32 %v1113_v39, %v3481_v33 }
 0x191   : > { %v1073_v40 = vadd.f32 %v1072_v38, %v3481_v33  ;;  %v1115_v45 = vpop.f32.mrf.mxu1 }
 0x192   : > { %v1074_v41 = vpop.f32.mrf.mxu0  ;;  %v1116_v46 = vadd.f32 %v1115_v45, %v3481_v33  ;;  %v1368_v47 = vmax.f32 %v1114_v42, 0.0 }
 0x193   : > { %v1075_v43 = vadd.f32 %v1074_v41, %v3481_v33  ;;  %v1366_v44 = vmax.f32 %v1073_v40, 0.0  ;;  %v1117_v49 = vpop.f32.mrf.mxu1 }
 0x194   : > { %v1076_v48 = vpop.f32.mrf.mxu0  ;;  %v1369_v50 = vmax.f32 %v1116_v46, 0.0 }
 0x195   : > { %v1367_v12 = vmax.f32 %v1075_v43, 0.0  ;;  %v1118_v53 = vpop.f32.mrf.mxu1 }
 0x196   : > { %v1077_v51 = vpop.f32.mrf.mxu0  ;;  %v2245_v54 = vpack.c.bf16 %v1369_v50, %v1368_v47 }
 0x197   : > { %v2244_v52 = vpack.c.bf16 %v1367_v12, %v1366_v44 }
 0x198   : > { %1447 = vst [vmem:[%s3489_s29 + $0x8] sm:$0xff] %v2245_v54 }
 0x199   : > { %1446 = vst [vmem:[%s3489_s29] sm:$0xff] %v2244_v52 }
 0x19f   : > { %v1195_v57 = vpop.f32.mrf.mxu1 }
 0x1a0   : > { %v1154_v55 = vpop.f32.mrf.mxu0  ;;  %v1196_v58 = vadd.f32 %v1195_v57, %v3481_v33 }
 0x1a1   : > { %v1155_v56 = vadd.f32 %v1154_v55, %v3481_v33  ;;  %v1197_v62 = vpop.f32.mrf.mxu1 }
 0x1a2   : > { %v1156_v59 = vpop.f32.mrf.mxu0  ;;  %v1372_v63 = vmax.f32 %v1196_v58, 0.0  ;;  %v1198_v0 = vadd.f32 %v1197_v62, %v3481_v33 }
 0x1a3   : > { %v1370_v60 = vmax.f32 %v1155_v56, 0.0  ;;  %v1157_v61 = vadd.f32 %v1156_v59, %v3481_v33  ;;  %v1199_v3 = vpop.f32.mrf.mxu1 }
 0x1a4   : > { %v1158_v1 = vpop.f32.mrf.mxu0  ;;  %v1373_v4 = vmax.f32 %v1198_v0, 0.0 }
 0x1a5   : > { %v1371_v2 = vmax.f32 %v1157_v61, 0.0  ;;  %v1200_v7 = vpop.f32.mrf.mxu1 }
 0x1a6   : > { %v1159_v5 = vpop.f32.mrf.mxu0  ;;  %v2247_v8 = vpack.c.bf16 %v1373_v4, %v1372_v63 }
 0x1a7   : > { %v2246_v6 = vpack.c.bf16 %v1371_v2, %v1370_v60 }
 0x1a8   : > { %1449 = vst [vmem:[%s3489_s29 + $0x18] sm:$0xff] %v2247_v8 }
 0x1a9   : > { %1448 = vst [vmem:[%s3489_s29 + $0x10] sm:$0xff] %v2246_v6 }
 0x1af   : > { %v1277_v11 = vpop.f32.mrf.mxu1 }
 0x1b0   : > { %v1236_v9 = vpop.f32.mrf.mxu0  ;;  %v1278_v13 = vadd.f32 %v1277_v11, %v3481_v33 }
 0x1b1   : > { %v1237_v10 = vadd.f32 %v1236_v9, %v3481_v33  ;;  %v1279_v17 = vpop.f32.mrf.mxu1 }
 0x1b2   : > { %v1238_v14 = vpop.f32.mrf.mxu0  ;;  %v1376_v18 = vmax.f32 %v1278_v13, 0.0  ;;  %v1280_v19 = vadd.f32 %v1279_v17, %v3481_v33 }
 0x1b3   : > { %v1374_v15 = vmax.f32 %v1237_v10, 0.0  ;;  %v1239_v16 = vadd.f32 %v1238_v14, %v3481_v33  ;;  %v1281_v22 = vpop.f32.mrf.mxu1 }
 0x1b4   : > { %v1240_v20 = vpop.f32.mrf.mxu0  ;;  %v1377_v23 = vmax.f32 %v1280_v19, 0.0 }
 0x1b5   : > { %v1375_v21 = vmax.f32 %v1239_v16, 0.0  ;;  %v1282_v26 = vpop.f32.mrf.mxu1 }
 0x1b6   : > { %v1241_v24 = vpop.f32.mrf.mxu0  ;;  %v2249_v27 = vpack.c.bf16 %v1377_v23, %v1376_v18 }
 0x1b7   : > { %v2248_v25 = vpack.c.bf16 %v1375_v21, %v1374_v15 }
 0x1b8   : > { %1451 = vst [vmem:[%s3489_s29 + $0x28] sm:$0xff] %v2249_v27 }
 0x1b9   : > { %1450 = vst [vmem:[%s3489_s29 + $0x20] sm:$0xff] %v2248_v25 }
 0x1bf   : > { %v1359_v30 = vpop.f32.mrf.mxu1 }
 0x1c0   : > { %v1318_v28 = vpop.f32.mrf.mxu0  ;;  %v1360_v31 = vadd.f32 %v1359_v30, %v3481_v33 }
 0x1c1   : > { %v1319_v29 = vadd.f32 %v1318_v28, %v3481_v33  ;;  %v1361_v35 = vpop.f32.mrf.mxu1 }
 0x1c2   : > { %v1320_v32 = vpop.f32.mrf.mxu0  ;;  %v1362_v36 = vadd.f32 %v1361_v35, %v3481_v33  ;;  %v1380_v41 = vmax.f32 %v1360_v31, 0.0 }
 0x1c3   : > { %v1321_v34 = vadd.f32 %v1320_v32, %v3481_v33  ;;  %v1378_v38 = vmax.f32 %v1319_v29, 0.0  ;;  %v1363_v40 = vpop.f32.mrf.mxu1 }
 0x1c4   : > { %v1322_v37 = vpop.f32.mrf.mxu0  ;;  %v1381_v42 = vmax.f32 %v1362_v36, 0.0 }
 0x1c5   : > { %v1379_v39 = vmax.f32 %v1321_v34, 0.0  ;;  %v1364_v45 = vpop.f32.mrf.mxu1  ;;  %1460 = sbr.rel (!%p2879_p5) target bundleno = 604 (0x25c), region = 102 }
 0x1c6   : > { %v1323_v43 = vpop.f32.mrf.mxu0  ;;  %v2251_v46 = vpack.c.bf16 %v1381_v42, %v1380_v41 }
 0x1c7   : > { %v2250_v44 = vpack.c.bf16 %v1379_v39, %v1378_v38 }
 0x1c8   : > { %1453 = vst [vmem:[%s3489_s29 + $0x38] sm:$0xff] %v2251_v46 }
 0x1c9   : > { %1452 = vst [vmem:[%s3489_s29 + $0x30] sm:$0xff] %v2250_v44 }
 0x1ca   : > { %s3978_s24 = smov (!%p1463_p1, %s1462_s24), 16 }
 0x1cb   : > { %s2210_s22 = sshll.u32 %s3978_s24, 6  ;;  %s3520_s27 = sshll.u32 %s3978_s24, 2 }
 0x1cc   : > { %p2214_p2 = scmp.eq.s32.totalorder %s2210_s22, 0 }
 0x1cd   : > { %p1473_p3 = scmp.lt.u32.totalorder (!%p2214_p2), %s3520_s27, 8 }
 0x1ce   : > { %1472 = sbr.rel (%p2214_p2) target bundleno = 604 (0x25c), region = 106 }
 0x1d3   : > { %1476 = sbr.rel (%p1473_p3) target bundleno = 595 (0x253), region = 110  ;;  %s3524_s20 = sand.u32 (!%p1473_p3), 7, %s3520_s27  }
 0x1d4   : > { %p1493_p5 = scmp.eq.s32.totalorder (!%p1473_p3), %s3524_s20, 0  ;;  %p2215_p4 = scmp.ne.s32.totalorder (!%p1473_p3), %s3524_s20, 0 }
 0x1d8   : > { %1496 = sbr.rel (%p2215_p4) target bundleno = 531 (0x213), region = 125  ;;  %s1497_s15 = sshrl.u32 (!%p2215_p4), %s3520_s27, 3 }
 0x1d9   : > { %s3531_s8 = sshrl.u32 (!%p2215_p4), %s1497_s15, 6 }
 0x1da   : > { %p2216_p6 = scmp.le.s32.totalorder (!%p2215_p4), %s3531_s8, 0 }
 0x1dd   : > { %2021 = sbr.rel (%p2216_p6) target bundleno = 515 (0x203), region = 273  ;;  %s3954_s9 = smov (!%p2216_p6), %s3518_s17 }
 0x1de   : > { %s3955_s5 = smov (!%p2216_p6), %s3489_s29  ;;  %s3540_s18 = smov (!%p2216_p6), 0  }
 0x1df   : > { %s3542_s21 = smov (!%p2216_p6), 0  }
 0x1e2 LB: >> { %v1510_v33 = vld [vmem:[%s2765_s5] sm:$0xff]  ;;  %v1512_v47 = vld [vmem:[%s2765_s5 + $0x8] sm:$0xff]  ;;  %v1514_v48 = vld [vmem:[%s2765_s5 + $0x10] sm:$0xff]  ;;  %s1638_s30 = sadd.s32 1, %s2769_s18  ;;  %s1504_s21 = sadd.s32 1, %s2773_s21   ;;  %s2773_s21 = sphi %s3542_s21, %s1504_s21   ;;  %s2769_s18 = sphi %s3540_s18, %s3958_s18   ;;  %s2765_s5 = sphi %s3955_s5, %s3957_s5   ;;  %s2761_s9 = sphi %s3954_s9, %s3956_s9  }
 0x1e3   : >> { %1511 = vst [vmem:[%s2761_s9] sm:$0xff] %v1510_v33  ;;  %1513 = vst [vmem:[%s2761_s9 + $0x8] sm:$0xff] %v1512_v47  ;;  %v1516_v12 = vld [vmem:[%s2765_s5 + $0x18] sm:$0xff]  ;;  %v1518_v49 = vld [vmem:[%s2765_s5 + $0x20] sm:$0xff]  ;;  %p1639_p7 = scmp.ge.s32.totalorder %s1638_s30, %s3531_s8  ;;  %p1503_p8 = scmp.ge.s32.totalorder %s1504_s21, %s3531_s8 }
 0x1e4   : >> { %1515 = vst [vmem:[%s2761_s9 + $0x10] sm:$0xff] %v1514_v48  ;;  %v1520_v50 = vld [vmem:[%s2765_s5 + $0x28] sm:$0xff]  ;;  %1517 = vst [vmem:[%s2761_s9 + $0x18] sm:$0xff] %v1516_v12  ;;  %v1522_v51 = vld [vmem:[%s2765_s5 + $0x30] sm:$0xff] }
 0x1e5   : >> { %1519 = vst [vmem:[%s2761_s9 + $0x20] sm:$0xff] %v1518_v49  ;;  %1521 = vst [vmem:[%s2761_s9 + $0x28] sm:$0xff] %v1520_v50  ;;  %v1524_v52 = vld [vmem:[%s2765_s5 + $0x38] sm:$0xff]  ;;  %v1526_v53 = vld [vmem:[%s2765_s5 + $0x40] sm:$0xff]  ;;  %s3980_s30 = smov (%p1639_p7, %s1638_s30), 0 }
 0x1e6   : >> { %1523 = vst [vmem:[%s2761_s9 + $0x30] sm:$0xff] %v1522_v51  ;;  %1525 = vst [vmem:[%s2761_s9 + $0x38] sm:$0xff] %v1524_v52  ;;  %v1528_v54 = vld [vmem:[%s2765_s5 + $0x48] sm:$0xff]  ;;  %v1530_v55 = vld [vmem:[%s2765_s5 + $0x50] sm:$0xff]  ;;  %s2217_s10 = sshll.u32 %s3980_s30, 9  ;;  %s3958_s18 = smov %s3980_s30 }
 0x1e7   : >> { %1527 = vst [vmem:[%s2761_s9 + $0x40] sm:$0xff] %v1526_v53  ;;  %v1532_v56 = vld [vmem:[%s2765_s5 + $0x58] sm:$0xff]  ;;  %1529 = vst [vmem:[%s2761_s9 + $0x48] sm:$0xff] %v1528_v54  ;;  %v1534_v57 = vld [vmem:[%s2765_s5 + $0x60] sm:$0xff]  ;;  %s3598_s6 = scalar_lea.vmem %s3489_s29, %s2217_s10 [#allocation3]   ;;  %s3601_s28 = scalar_lea.vmem %s3518_s17, %s2217_s10  }
 0x1e8   : >> { %1531 = vst [vmem:[%s2761_s9 + $0x50] sm:$0xff] %v1530_v55  ;;  %1533 = vst [vmem:[%s2761_s9 + $0x58] sm:$0xff] %v1532_v56  ;;  %v1536_v58 = vld [vmem:[%s2765_s5 + $0x68] sm:$0xff]  ;;  %v1538_v59 = vld [vmem:[%s2765_s5 + $0x70] sm:$0xff] }
 0x1e9   : >> { %1535 = vst [vmem:[%s2761_s9 + $0x60] sm:$0xff] %v1534_v57  ;;  %1537 = vst [vmem:[%s2761_s9 + $0x68] sm:$0xff] %v1536_v58  ;;  %v1540_v60 = vld [vmem:[%s2765_s5 + $0x78] sm:$0xff]  ;;  %v1542_v61 = vld [vmem:[%s2765_s5 + $0x80] sm:$0xff] }
 0x1ea   : >> { %1539 = vst [vmem:[%s2761_s9 + $0x70] sm:$0xff] %v1538_v59  ;;  %v1544_v62 = vld [vmem:[%s2765_s5 + $0x88] sm:$0xff]  ;;  %1541 = vst [vmem:[%s2761_s9 + $0x78] sm:$0xff] %v1540_v60  ;;  %v1546_v63 = vld [vmem:[%s2765_s5 + $0x90] sm:$0xff] }
 0x1eb   : >> { %1543 = vst [vmem:[%s2761_s9 + $0x80] sm:$0xff] %v1542_v61  ;;  %1545 = vst [vmem:[%s2761_s9 + $0x88] sm:$0xff] %v1544_v62  ;;  %v1548_v0 = vld [vmem:[%s2765_s5 + $0x98] sm:$0xff]  ;;  %v1550_v1 = vld [vmem:[%s2765_s5 + $0xa0] sm:$0xff] }
 0x1ec   : >> { %1547 = vst [vmem:[%s2761_s9 + $0x90] sm:$0xff] %v1546_v63  ;;  %1549 = vst [vmem:[%s2761_s9 + $0x98] sm:$0xff] %v1548_v0  ;;  %v1552_v2 = vld [vmem:[%s2765_s5 + $0xa8] sm:$0xff]  ;;  %v1554_v3 = vld [vmem:[%s2765_s5 + $0xb0] sm:$0xff] }
 0x1ed   : >> { %1551 = vst [vmem:[%s2761_s9 + $0xa0] sm:$0xff] %v1550_v1  ;;  %v1556_v4 = vld [vmem:[%s2765_s5 + $0xb8] sm:$0xff]  ;;  %1553 = vst [vmem:[%s2761_s9 + $0xa8] sm:$0xff] %v1552_v2  ;;  %v1558_v5 = vld [vmem:[%s2765_s5 + $0xc0] sm:$0xff] }
 0x1ee   : >> { %1555 = vst [vmem:[%s2761_s9 + $0xb0] sm:$0xff] %v1554_v3  ;;  %1557 = vst [vmem:[%s2761_s9 + $0xb8] sm:$0xff] %v1556_v4  ;;  %v1560_v6 = vld [vmem:[%s2765_s5 + $0xc8] sm:$0xff]  ;;  %v1562_v7 = vld [vmem:[%s2765_s5 + $0xd0] sm:$0xff] }
 0x1ef   : >> { %1559 = vst [vmem:[%s2761_s9 + $0xc0] sm:$0xff] %v1558_v5  ;;  %1561 = vst [vmem:[%s2761_s9 + $0xc8] sm:$0xff] %v1560_v6  ;;  %v1564_v8 = vld [vmem:[%s2765_s5 + $0xd8] sm:$0xff]  ;;  %v1566_v9 = vld [vmem:[%s2765_s5 + $0xe0] sm:$0xff] }
 0x1f0   : >> { %1563 = vst [vmem:[%s2761_s9 + $0xd0] sm:$0xff] %v1562_v7  ;;  %v1568_v10 = vld [vmem:[%s2765_s5 + $0xe8] sm:$0xff]  ;;  %1565 = vst [vmem:[%s2761_s9 + $0xd8] sm:$0xff] %v1564_v8  ;;  %v1570_v11 = vld [vmem:[%s2765_s5 + $0xf0] sm:$0xff] }
 0x1f1   : >> { %1567 = vst [vmem:[%s2761_s9 + $0xe0] sm:$0xff] %v1566_v9  ;;  %1569 = vst [vmem:[%s2761_s9 + $0xe8] sm:$0xff] %v1568_v10  ;;  %v1572_v13 = vld [vmem:[%s2765_s5 + $0xf8] sm:$0xff]  ;;  %v1574_v14 = vld [vmem:[%s2765_s5 + $0x100] sm:$0xff] }
 0x1f2   : >> { %1571 = vst [vmem:[%s2761_s9 + $0xf0] sm:$0xff] %v1570_v11  ;;  %1573 = vst [vmem:[%s2761_s9 + $0xf8] sm:$0xff] %v1572_v13  ;;  %v1576_v15 = vld [vmem:[%s2765_s5 + $0x108] sm:$0xff]  ;;  %v1578_v16 = vld [vmem:[%s2765_s5 + $0x110] sm:$0xff] }
 0x1f3   : >> { %1575 = vst [vmem:[%s2761_s9 + $0x100] sm:$0xff] %v1574_v14  ;;  %v1580_v17 = vld [vmem:[%s2765_s5 + $0x118] sm:$0xff]  ;;  %1577 = vst [vmem:[%s2761_s9 + $0x108] sm:$0xff] %v1576_v15  ;;  %v1582_v18 = vld [vmem:[%s2765_s5 + $0x120] sm:$0xff] }
 0x1f4   : >> { %1579 = vst [vmem:[%s2761_s9 + $0x110] sm:$0xff] %v1578_v16  ;;  %1581 = vst [vmem:[%s2761_s9 + $0x118] sm:$0xff] %v1580_v17  ;;  %v1584_v19 = vld [vmem:[%s2765_s5 + $0x128] sm:$0xff]  ;;  %v1586_v20 = vld [vmem:[%s2765_s5 + $0x130] sm:$0xff] }
 0x1f5   : >> { %1583 = vst [vmem:[%s2761_s9 + $0x120] sm:$0xff] %v1582_v18  ;;  %1585 = vst [vmem:[%s2761_s9 + $0x128] sm:$0xff] %v1584_v19  ;;  %v1588_v21 = vld [vmem:[%s2765_s5 + $0x138] sm:$0xff]  ;;  %v1590_v22 = vld [vmem:[%s2765_s5 + $0x140] sm:$0xff] }
 0x1f6   : >> { %1587 = vst [vmem:[%s2761_s9 + $0x130] sm:$0xff] %v1586_v20  ;;  %v1592_v23 = vld [vmem:[%s2765_s5 + $0x148] sm:$0xff]  ;;  %1589 = vst [vmem:[%s2761_s9 + $0x138] sm:$0xff] %v1588_v21  ;;  %v1594_v24 = vld [vmem:[%s2765_s5 + $0x150] sm:$0xff] }
 0x1f7   : >> { %1591 = vst [vmem:[%s2761_s9 + $0x140] sm:$0xff] %v1590_v22  ;;  %1593 = vst [vmem:[%s2761_s9 + $0x148] sm:$0xff] %v1592_v23  ;;  %v1596_v25 = vld [vmem:[%s2765_s5 + $0x158] sm:$0xff]  ;;  %v1598_v26 = vld [vmem:[%s2765_s5 + $0x160] sm:$0xff] }
 0x1f8   : >> { %1595 = vst [vmem:[%s2761_s9 + $0x150] sm:$0xff] %v1594_v24  ;;  %1597 = vst [vmem:[%s2761_s9 + $0x158] sm:$0xff] %v1596_v25  ;;  %v1600_v27 = vld [vmem:[%s2765_s5 + $0x168] sm:$0xff]  ;;  %v1602_v28 = vld [vmem:[%s2765_s5 + $0x170] sm:$0xff] }
 0x1f9   : >> { %1599 = vst [vmem:[%s2761_s9 + $0x160] sm:$0xff] %v1598_v26  ;;  %v1604_v29 = vld [vmem:[%s2765_s5 + $0x178] sm:$0xff]  ;;  %1601 = vst [vmem:[%s2761_s9 + $0x168] sm:$0xff] %v1600_v27  ;;  %v1606_v30 = vld [vmem:[%s2765_s5 + $0x180] sm:$0xff] }
 0x1fa   : >> { %1603 = vst [vmem:[%s2761_s9 + $0x170] sm:$0xff] %v1602_v28  ;;  %1605 = vst [vmem:[%s2761_s9 + $0x178] sm:$0xff] %v1604_v29  ;;  %v1608_v31 = vld [vmem:[%s2765_s5 + $0x188] sm:$0xff]  ;;  %v1610_v32 = vld [vmem:[%s2765_s5 + $0x190] sm:$0xff] }
 0x1fb   : >> { %1607 = vst [vmem:[%s2761_s9 + $0x180] sm:$0xff] %v1606_v30  ;;  %1609 = vst [vmem:[%s2761_s9 + $0x188] sm:$0xff] %v1608_v31  ;;  %v1612_v34 = vld [vmem:[%s2765_s5 + $0x198] sm:$0xff]  ;;  %v1614_v35 = vld [vmem:[%s2765_s5 + $0x1a0] sm:$0xff] }
 0x1fc   : >> { %1611 = vst [vmem:[%s2761_s9 + $0x190] sm:$0xff] %v1610_v32  ;;  %v1616_v36 = vld [vmem:[%s2765_s5 + $0x1a8] sm:$0xff]  ;;  %1613 = vst [vmem:[%s2761_s9 + $0x198] sm:$0xff] %v1612_v34  ;;  %v1618_v37 = vld [vmem:[%s2765_s5 + $0x1b0] sm:$0xff] }
 0x1fd   : >> { %1615 = vst [vmem:[%s2761_s9 + $0x1a0] sm:$0xff] %v1614_v35  ;;  %1617 = vst [vmem:[%s2761_s9 + $0x1a8] sm:$0xff] %v1616_v36  ;;  %v1620_v38 = vld [vmem:[%s2765_s5 + $0x1b8] sm:$0xff]  ;;  %v1622_v39 = vld [vmem:[%s2765_s5 + $0x1c0] sm:$0xff] }
 0x1fe   : >> { %1619 = vst [vmem:[%s2761_s9 + $0x1b0] sm:$0xff] %v1618_v37  ;;  %1621 = vst [vmem:[%s2761_s9 + $0x1b8] sm:$0xff] %v1620_v38  ;;  %v1624_v40 = vld [vmem:[%s2765_s5 + $0x1c8] sm:$0xff]  ;;  %v1626_v41 = vld [vmem:[%s2765_s5 + $0x1d0] sm:$0xff]  ;;  %1506 = sbr.rel (!%p1503_p8) target bundleno = 482 (0x1e2), region = 279 }
 0x1ff   : >> { %1623 = vst [vmem:[%s2761_s9 + $0x1c0] sm:$0xff] %v1622_v39  ;;  %v1628_v42 = vld [vmem:[%s2765_s5 + $0x1d8] sm:$0xff]  ;;  %1625 = vst [vmem:[%s2761_s9 + $0x1c8] sm:$0xff] %v1624_v40  ;;  %v1630_v43 = vld [vmem:[%s2765_s5 + $0x1e0] sm:$0xff] }
 0x200   : >> { %1627 = vst [vmem:[%s2761_s9 + $0x1d0] sm:$0xff] %v1626_v41  ;;  %1629 = vst [vmem:[%s2761_s9 + $0x1d8] sm:$0xff] %v1628_v42  ;;  %v1632_v44 = vld [vmem:[%s2765_s5 + $0x1e8] sm:$0xff]  ;;  %v1634_v45 = vld [vmem:[%s2765_s5 + $0x1f0] sm:$0xff] }
 0x201   : >> { %1631 = vst [vmem:[%s2761_s9 + $0x1e0] sm:$0xff] %v1630_v43  ;;  %1633 = vst [vmem:[%s2761_s9 + $0x1e8] sm:$0xff] %v1632_v44  ;;  %v1636_v46 = vld [vmem:[%s2765_s5 + $0x1f8] sm:$0xff]  ;;  %s3957_s5 = smov %s3598_s6 }
 0x202   : >> { %1635 = vst [vmem:[%s2761_s9 + $0x1f0] sm:$0xff] %v1634_v45  ;;  %1637 = vst [vmem:[%s2761_s9 + $0x1f8] sm:$0xff] %v1636_v46  ;;  %s3956_s9 = smov %s3601_s28 }
 0x203 PF: > { %s3707_s4 = sand.u32 63, %s1497_s15   ;;  %s2253_s14 = sshll.u32 %s3531_s8, 13 }
 0x204   : > { %s1649_s7 = sshra.s32 %s2253_s14, 4  ;;  %p2222_p9 = scmp.le.s32.totalorder %s3707_s4, 0 }
 0x205   : > { %s1650_s11 = scalar_lea.vmem %s3489_s29, %s1649_s7 [#allocation3]   ;;  %s1653_s12 = scalar_lea.vmem %s3518_s17, %s1649_s7  }
 0x206   : > { %2035 = sbr.rel (%p2222_p9) target bundleno = 531 (0x213), region = 284  ;;  %s2775_s23 = smov (!%p2222_p9), %s1653_s12  }
 0x207   : > { %s2779_s24 = smov (!%p2222_p9), %s1650_s11   ;;  %s2783_s25 = smov (!%p2222_p9), 0  }
 0x208   : > { %s2787_s26 = smov (!%p2222_p9), 0  }
 0x20b LB: >> { %v1665_v33 = vld [vmem:[%s2781_s24] sm:$0xff]  ;;  %s1667_s22 = sadd.s32 1, %s2785_s25  ;;  %s1659_s26 = sadd.s32 1, %s2789_s26   ;;  %s2789_s26 = sphi %s2787_s26, %s1659_s26   ;;  %s2785_s25 = sphi %s2783_s25, %s2784_s25   ;;  %s2781_s24 = sphi %s2779_s24, %s1672_s24   ;;  %s2777_s23 = sphi %s2775_s23, %s1673_s23  }
 0x20c   : >> { %1666 = vst [vmem:[%s2777_s23] sm:$0xff] %v1665_v33  ;;  %p1668_p10 = scmp.ge.s32.totalorder %s1667_s22, %s3707_s4  ;;  %p1658_p11 = scmp.ge.s32.totalorder %s1659_s26, %s3707_s4 }
 0x20e   : >> { %s3982_s22 = smov (%p1668_p10, %s1667_s22), 0  ;;  %1661 = sbr.rel (!%p1658_p11) target bundleno = 523 (0x20b), region = 290 }
 0x20f   : >> { %s2223_s15 = sshll.u32 %s3982_s22, 3  ;;  %s2784_s25 = smov %s3982_s22  }
 0x210   : >> { %s1672_s24 = scalar_lea.vmem %s1650_s11, %s2223_s15 [#allocation3]   ;;  %s1673_s23 = scalar_lea.vmem %s1653_s12, %s2223_s15  }
 0x213 PF: > { %1676 = sbr.rel (%p1493_p5) target bundleno = 595 (0x253), region = 143  ;;  %s3719_s8 = ssub.s32 (!%p1493_p5), %s3520_s27, %s3524_s20 }
 0x214   : > { %s1682_s9 = sshrl.u32 (!%p1493_p5), %s3520_s27, 3  ;;  %s1679_s5 = scalar_lea.vmem (!%p1493_p5), %s3489_s29, %s3719_s8 [#allocation3] }
 0x215   : > { %s1681_s18 = scalar_lea.vmem (!%p1493_p5), %s3518_s17, %s3719_s8  ;;  %s3728_s21 = sshrl.u32 (!%p1493_p5), %s1682_s9, 6 }
 0x216   : > { %p2225_p12 = scmp.le.s32.totalorder (!%p1493_p5), %s3728_s21, 0 }
 0x218   : > { %2049 = sbr.rel (%p2225_p12) target bundleno = 574 (0x23e), region = 295  ;;  %s3959_s30 = smov (!%p2225_p12), %s3518_s17 }
 0x219   : > { %s3960_s10 = smov (!%p2225_p12), %s3489_s29  ;;  %s3737_s6 = smov (!%p2225_p12), 0  }
 0x21a   : > { %s3739_s28 = smov (!%p2225_p12), 0  }
 0x21d LB: >> { %v1695_v47 = vld [vmem:[%s2797_s10] sm:$0xff]  ;;  %v1697_v48 = vld [vmem:[%s2797_s10 + $0x8] sm:$0xff]  ;;  %v1699_v12 = vld [vmem:[%s2797_s10 + $0x10] sm:$0xff]  ;;  %s1823_s4 = sadd.s32 1, %s2801_s6  ;;  %s1689_s28 = sadd.s32 1, %s2805_s28   ;;  %s2805_s28 = sphi %s3739_s28, %s1689_s28   ;;  %s2801_s6 = sphi %s3737_s6, %s3963_s6   ;;  %s2797_s10 = sphi %s3960_s10, %s3962_s10   ;;  %s2793_s30 = sphi %s3959_s30, %s3961_s30  }
 0x21e   : >> { %1696 = vst [vmem:[%s2793_s30] sm:$0xff] %v1695_v47  ;;  %1698 = vst [vmem:[%s2793_s30 + $0x8] sm:$0xff] %v1697_v48  ;;  %v1701_v49 = vld [vmem:[%s2797_s10 + $0x18] sm:$0xff]  ;;  %v1703_v50 = vld [vmem:[%s2797_s10 + $0x20] sm:$0xff]  ;;  %p1824_p13 = scmp.ge.s32.totalorder %s1823_s4, %s3728_s21  ;;  %p1688_p0 = scmp.ge.s32.totalorder %s1689_s28, %s3728_s21 }
 0x21f   : >> { %1700 = vst [vmem:[%s2793_s30 + $0x10] sm:$0xff] %v1699_v12  ;;  %v1705_v51 = vld [vmem:[%s2797_s10 + $0x28] sm:$0xff]  ;;  %1702 = vst [vmem:[%s2793_s30 + $0x18] sm:$0xff] %v1701_v49  ;;  %v1707_v52 = vld [vmem:[%s2797_s10 + $0x30] sm:$0xff] }
 0x220   : >> { %1704 = vst [vmem:[%s2793_s30 + $0x20] sm:$0xff] %v1703_v50  ;;  %1706 = vst [vmem:[%s2793_s30 + $0x28] sm:$0xff] %v1705_v51  ;;  %v1709_v53 = vld [vmem:[%s2797_s10 + $0x38] sm:$0xff]  ;;  %v1711_v54 = vld [vmem:[%s2797_s10 + $0x40] sm:$0xff]  ;;  %s3984_s4 = smov (%p1824_p13, %s1823_s4), 0 }
 0x221   : >> { %1708 = vst [vmem:[%s2793_s30 + $0x30] sm:$0xff] %v1707_v52  ;;  %1710 = vst [vmem:[%s2793_s30 + $0x38] sm:$0xff] %v1709_v53  ;;  %v1713_v55 = vld [vmem:[%s2797_s10 + $0x48] sm:$0xff]  ;;  %v1715_v56 = vld [vmem:[%s2797_s10 + $0x50] sm:$0xff]  ;;  %s2226_s14 = sshll.u32 %s3984_s4, 9  ;;  %s3963_s6 = smov %s3984_s4 }
 0x222   : >> { %1712 = vst [vmem:[%s2793_s30 + $0x40] sm:$0xff] %v1711_v54  ;;  %v1717_v57 = vld [vmem:[%s2797_s10 + $0x58] sm:$0xff]  ;;  %1714 = vst [vmem:[%s2793_s30 + $0x48] sm:$0xff] %v1713_v55  ;;  %v1719_v58 = vld [vmem:[%s2797_s10 + $0x60] sm:$0xff]  ;;  %s3795_s7 = scalar_lea.vmem %s3489_s29, %s2226_s14 [#allocation3]   ;;  %s3798_s11 = scalar_lea.vmem %s3518_s17, %s2226_s14  }
 0x223   : >> { %1716 = vst [vmem:[%s2793_s30 + $0x50] sm:$0xff] %v1715_v56  ;;  %1718 = vst [vmem:[%s2793_s30 + $0x58] sm:$0xff] %v1717_v57  ;;  %v1721_v59 = vld [vmem:[%s2797_s10 + $0x68] sm:$0xff]  ;;  %v1723_v60 = vld [vmem:[%s2797_s10 + $0x70] sm:$0xff] }
 0x224   : >> { %1720 = vst [vmem:[%s2793_s30 + $0x60] sm:$0xff] %v1719_v58  ;;  %1722 = vst [vmem:[%s2793_s30 + $0x68] sm:$0xff] %v1721_v59  ;;  %v1725_v61 = vld [vmem:[%s2797_s10 + $0x78] sm:$0xff]  ;;  %v1727_v62 = vld [vmem:[%s2797_s10 + $0x80] sm:$0xff] }
 0x225   : >> { %1724 = vst [vmem:[%s2793_s30 + $0x70] sm:$0xff] %v1723_v60  ;;  %v1729_v63 = vld [vmem:[%s2797_s10 + $0x88] sm:$0xff]  ;;  %1726 = vst [vmem:[%s2793_s30 + $0x78] sm:$0xff] %v1725_v61  ;;  %v1731_v0 = vld [vmem:[%s2797_s10 + $0x90] sm:$0xff] }
 0x226   : >> { %1728 = vst [vmem:[%s2793_s30 + $0x80] sm:$0xff] %v1727_v62  ;;  %1730 = vst [vmem:[%s2793_s30 + $0x88] sm:$0xff] %v1729_v63  ;;  %v1733_v1 = vld [vmem:[%s2797_s10 + $0x98] sm:$0xff]  ;;  %v1735_v2 = vld [vmem:[%s2797_s10 + $0xa0] sm:$0xff] }
 0x227   : >> { %1732 = vst [vmem:[%s2793_s30 + $0x90] sm:$0xff] %v1731_v0  ;;  %1734 = vst [vmem:[%s2793_s30 + $0x98] sm:$0xff] %v1733_v1  ;;  %v1737_v3 = vld [vmem:[%s2797_s10 + $0xa8] sm:$0xff]  ;;  %v1739_v4 = vld [vmem:[%s2797_s10 + $0xb0] sm:$0xff] }
 0x228   : >> { %1736 = vst [vmem:[%s2793_s30 + $0xa0] sm:$0xff] %v1735_v2  ;;  %v1741_v5 = vld [vmem:[%s2797_s10 + $0xb8] sm:$0xff]  ;;  %1738 = vst [vmem:[%s2793_s30 + $0xa8] sm:$0xff] %v1737_v3  ;;  %v1743_v6 = vld [vmem:[%s2797_s10 + $0xc0] sm:$0xff] }
 0x229   : >> { %1740 = vst [vmem:[%s2793_s30 + $0xb0] sm:$0xff] %v1739_v4  ;;  %1742 = vst [vmem:[%s2793_s30 + $0xb8] sm:$0xff] %v1741_v5  ;;  %v1745_v7 = vld [vmem:[%s2797_s10 + $0xc8] sm:$0xff]  ;;  %v1747_v8 = vld [vmem:[%s2797_s10 + $0xd0] sm:$0xff] }
 0x22a   : >> { %1744 = vst [vmem:[%s2793_s30 + $0xc0] sm:$0xff] %v1743_v6  ;;  %1746 = vst [vmem:[%s2793_s30 + $0xc8] sm:$0xff] %v1745_v7  ;;  %v1749_v9 = vld [vmem:[%s2797_s10 + $0xd8] sm:$0xff]  ;;  %v1751_v10 = vld [vmem:[%s2797_s10 + $0xe0] sm:$0xff] }
 0x22b   : >> { %1748 = vst [vmem:[%s2793_s30 + $0xd0] sm:$0xff] %v1747_v8  ;;  %v1753_v11 = vld [vmem:[%s2797_s10 + $0xe8] sm:$0xff]  ;;  %1750 = vst [vmem:[%s2793_s30 + $0xd8] sm:$0xff] %v1749_v9  ;;  %v1755_v13 = vld [vmem:[%s2797_s10 + $0xf0] sm:$0xff] }
 0x22c   : >> { %1752 = vst [vmem:[%s2793_s30 + $0xe0] sm:$0xff] %v1751_v10  ;;  %1754 = vst [vmem:[%s2793_s30 + $0xe8] sm:$0xff] %v1753_v11  ;;  %v1757_v14 = vld [vmem:[%s2797_s10 + $0xf8] sm:$0xff]  ;;  %v1759_v15 = vld [vmem:[%s2797_s10 + $0x100] sm:$0xff] }
 0x22d   : >> { %1756 = vst [vmem:[%s2793_s30 + $0xf0] sm:$0xff] %v1755_v13  ;;  %1758 = vst [vmem:[%s2793_s30 + $0xf8] sm:$0xff] %v1757_v14  ;;  %v1761_v16 = vld [vmem:[%s2797_s10 + $0x108] sm:$0xff]  ;;  %v1763_v17 = vld [vmem:[%s2797_s10 + $0x110] sm:$0xff] }
 0x22e   : >> { %1760 = vst [vmem:[%s2793_s30 + $0x100] sm:$0xff] %v1759_v15  ;;  %v1765_v18 = vld [vmem:[%s2797_s10 + $0x118] sm:$0xff]  ;;  %1762 = vst [vmem:[%s2793_s30 + $0x108] sm:$0xff] %v1761_v16  ;;  %v1767_v19 = vld [vmem:[%s2797_s10 + $0x120] sm:$0xff] }
 0x22f   : >> { %1764 = vst [vmem:[%s2793_s30 + $0x110] sm:$0xff] %v1763_v17  ;;  %1766 = vst [vmem:[%s2793_s30 + $0x118] sm:$0xff] %v1765_v18  ;;  %v1769_v20 = vld [vmem:[%s2797_s10 + $0x128] sm:$0xff]  ;;  %v1771_v21 = vld [vmem:[%s2797_s10 + $0x130] sm:$0xff] }
 0x230   : >> { %1768 = vst [vmem:[%s2793_s30 + $0x120] sm:$0xff] %v1767_v19  ;;  %1770 = vst [vmem:[%s2793_s30 + $0x128] sm:$0xff] %v1769_v20  ;;  %v1773_v22 = vld [vmem:[%s2797_s10 + $0x138] sm:$0xff]  ;;  %v1775_v23 = vld [vmem:[%s2797_s10 + $0x140] sm:$0xff] }
 0x231   : >> { %1772 = vst [vmem:[%s2793_s30 + $0x130] sm:$0xff] %v1771_v21  ;;  %v1777_v24 = vld [vmem:[%s2797_s10 + $0x148] sm:$0xff]  ;;  %1774 = vst [vmem:[%s2793_s30 + $0x138] sm:$0xff] %v1773_v22  ;;  %v1779_v25 = vld [vmem:[%s2797_s10 + $0x150] sm:$0xff] }
 0x232   : >> { %1776 = vst [vmem:[%s2793_s30 + $0x140] sm:$0xff] %v1775_v23  ;;  %1778 = vst [vmem:[%s2793_s30 + $0x148] sm:$0xff] %v1777_v24  ;;  %v1781_v26 = vld [vmem:[%s2797_s10 + $0x158] sm:$0xff]  ;;  %v1783_v27 = vld [vmem:[%s2797_s10 + $0x160] sm:$0xff] }
 0x233   : >> { %1780 = vst [vmem:[%s2793_s30 + $0x150] sm:$0xff] %v1779_v25  ;;  %1782 = vst [vmem:[%s2793_s30 + $0x158] sm:$0xff] %v1781_v26  ;;  %v1785_v28 = vld [vmem:[%s2797_s10 + $0x168] sm:$0xff]  ;;  %v1787_v29 = vld [vmem:[%s2797_s10 + $0x170] sm:$0xff] }
 0x234   : >> { %1784 = vst [vmem:[%s2793_s30 + $0x160] sm:$0xff] %v1783_v27  ;;  %v1789_v30 = vld [vmem:[%s2797_s10 + $0x178] sm:$0xff]  ;;  %1786 = vst [vmem:[%s2793_s30 + $0x168] sm:$0xff] %v1785_v28  ;;  %v1791_v31 = vld [vmem:[%s2797_s10 + $0x180] sm:$0xff] }
 0x235   : >> { %1788 = vst [vmem:[%s2793_s30 + $0x170] sm:$0xff] %v1787_v29  ;;  %1790 = vst [vmem:[%s2793_s30 + $0x178] sm:$0xff] %v1789_v30  ;;  %v1793_v32 = vld [vmem:[%s2797_s10 + $0x188] sm:$0xff]  ;;  %v1795_v34 = vld [vmem:[%s2797_s10 + $0x190] sm:$0xff] }
 0x236   : >> { %1792 = vst [vmem:[%s2793_s30 + $0x180] sm:$0xff] %v1791_v31  ;;  %1794 = vst [vmem:[%s2793_s30 + $0x188] sm:$0xff] %v1793_v32  ;;  %v1797_v35 = vld [vmem:[%s2797_s10 + $0x198] sm:$0xff]  ;;  %v1799_v36 = vld [vmem:[%s2797_s10 + $0x1a0] sm:$0xff] }
 0x237   : >> { %1796 = vst [vmem:[%s2793_s30 + $0x190] sm:$0xff] %v1795_v34  ;;  %v1801_v37 = vld [vmem:[%s2797_s10 + $0x1a8] sm:$0xff]  ;;  %1798 = vst [vmem:[%s2793_s30 + $0x198] sm:$0xff] %v1797_v35  ;;  %v1803_v38 = vld [vmem:[%s2797_s10 + $0x1b0] sm:$0xff] }
 0x238   : >> { %1800 = vst [vmem:[%s2793_s30 + $0x1a0] sm:$0xff] %v1799_v36  ;;  %1802 = vst [vmem:[%s2793_s30 + $0x1a8] sm:$0xff] %v1801_v37  ;;  %v1805_v39 = vld [vmem:[%s2797_s10 + $0x1b8] sm:$0xff]  ;;  %v1807_v40 = vld [vmem:[%s2797_s10 + $0x1c0] sm:$0xff] }
 0x239   : >> { %1804 = vst [vmem:[%s2793_s30 + $0x1b0] sm:$0xff] %v1803_v38  ;;  %1806 = vst [vmem:[%s2793_s30 + $0x1b8] sm:$0xff] %v1805_v39  ;;  %v1809_v41 = vld [vmem:[%s2797_s10 + $0x1c8] sm:$0xff]  ;;  %v1811_v42 = vld [vmem:[%s2797_s10 + $0x1d0] sm:$0xff]  ;;  %1691 = sbr.rel (!%p1688_p0) target bundleno = 541 (0x21d), region = 301 }
 0x23a   : >> { %1808 = vst [vmem:[%s2793_s30 + $0x1c0] sm:$0xff] %v1807_v40  ;;  %v1813_v43 = vld [vmem:[%s2797_s10 + $0x1d8] sm:$0xff]  ;;  %1810 = vst [vmem:[%s2793_s30 + $0x1c8] sm:$0xff] %v1809_v41  ;;  %v1815_v44 = vld [vmem:[%s2797_s10 + $0x1e0] sm:$0xff] }
 0x23b   : >> { %1812 = vst [vmem:[%s2793_s30 + $0x1d0] sm:$0xff] %v1811_v42  ;;  %1814 = vst [vmem:[%s2793_s30 + $0x1d8] sm:$0xff] %v1813_v43  ;;  %v1817_v45 = vld [vmem:[%s2797_s10 + $0x1e8] sm:$0xff]  ;;  %v1819_v46 = vld [vmem:[%s2797_s10 + $0x1f0] sm:$0xff] }
 0x23c   : >> { %1816 = vst [vmem:[%s2793_s30 + $0x1e0] sm:$0xff] %v1815_v44  ;;  %1818 = vst [vmem:[%s2793_s30 + $0x1e8] sm:$0xff] %v1817_v45  ;;  %v1821_v33 = vld [vmem:[%s2797_s10 + $0x1f8] sm:$0xff]  ;;  %s3962_s10 = smov %s3795_s7 }
 0x23d   : >> { %1820 = vst [vmem:[%s2793_s30 + $0x1f0] sm:$0xff] %v1819_v46  ;;  %1822 = vst [vmem:[%s2793_s30 + $0x1f8] sm:$0xff] %v1821_v33  ;;  %s3961_s30 = smov %s3798_s11 }
 0x23e PF: > { %s3904_s12 = sand.u32 63, %s1682_s9   ;;  %s2255_s23 = sshll.u32 %s3728_s21, 13 }
 0x23f   : > { %s1834_s24 = sshra.s32 %s2255_s23, 4  ;;  %p2231_p1 = scmp.le.s32.totalorder %s3904_s12, 0 }
 0x240   : > { %s1835_s25 = scalar_lea.vmem %s3489_s29, %s1834_s24 [#allocation3]   ;;  %s1838_s26 = scalar_lea.vmem %s3518_s17, %s1834_s24  }
 0x241   : > { %2063 = sbr.rel (%p2231_p1) target bundleno = 590 (0x24e), region = 306  ;;  %s2807_s22 = smov (!%p2231_p1), %s1838_s26  }
 0x242   : > { %s2811_s15 = smov (!%p2231_p1), %s1835_s25   ;;  %s2815_s4 = smov (!%p2231_p1), 0  }
 0x243   : > { %s2819_s28 = smov (!%p2231_p1), 0  }
 0x246 LB: >> { %v1850_v47 = vld [vmem:[%s2813_s15] sm:$0xff]  ;;  %s1852_s9 = sadd.s32 1, %s2817_s4  ;;  %s1844_s28 = sadd.s32 1, %s2821_s28   ;;  %s2821_s28 = sphi %s2819_s28, %s1844_s28   ;;  %s2817_s4 = sphi %s2815_s4, %s2816_s4   ;;  %s2813_s15 = sphi %s2811_s15, %s1857_s15   ;;  %s2809_s22 = sphi %s2807_s22, %s1858_s22  }
 0x247   : >> { %1851 = vst [vmem:[%s2809_s22] sm:$0xff] %v1850_v47  ;;  %p1853_p2 = scmp.ge.s32.totalorder %s1852_s9, %s3904_s12  ;;  %p1843_p3 = scmp.ge.s32.totalorder %s1844_s28, %s3904_s12 }
 0x249   : >> { %s3986_s9 = smov (%p1853_p2, %s1852_s9), 0  ;;  %1846 = sbr.rel (!%p1843_p3) target bundleno = 582 (0x246), region = 312 }
 0x24a   : >> { %s2232_s21 = sshll.u32 %s3986_s9, 3  ;;  %s2816_s4 = smov %s3986_s9  }
 0x24b   : >> { %s1857_s15 = scalar_lea.vmem %s1835_s25, %s2232_s21 [#allocation3]   ;;  %s1858_s22 = scalar_lea.vmem %s1838_s26, %s2232_s21  }
 0x24e PF: > { %s2826_s30 = smov 1  }
 0x24f   : > { %s1859_s10 = sshll.u32 %s2826_s30, %s3524_s20 }
 0x250   : > { %s2234_s6 = sadd.s32 4294967295, %s1859_s10 }
 0x251   : > { %v1869_v48 = vld [vmem:[%s1679_s5] sm:%s2234_s6] }
 0x252   : > { %1870 = vst [vmem:[%s1681_s18] sm:%s2234_s6] %v1869_v48 }
 0x253 PF: > { %p2235_p5 = scmp.ge.u32.totalorder %s3520_s27, 8 }
 0x254   : > { %s2827_s14 = smov (!%p2235_p5), 1  }
 0x255   : > { %1479 = sbr.rel (%p2235_p5) target bundleno = 604 (0x25c), region = 114  ;;  %s1480_s7 = sshll.u32 (!%p2235_p5), %s2827_s14, %s3520_s27 }
 0x256   : > { %s2236_s11 = sadd.s32 (!%p2235_p5), 4294967295, %s1480_s7 }
 0x25a   : > { %v1490_v12 = vld [vmem:[%s3489_s29] sm:%s2236_s11] }
 0x25b   : > { %1491 = vst [vmem:[%s3518_s17] sm:%s2236_s11] %v1490_v12 }
 0x25c PF: > { %p10_p4 = scmp.ge.s32.totalorder %s2867_s16, 5   ;;  %s3964_s12 = smov %s2689_s13 }
 0x25d   : > { %s3965_s13 = smov %s2877_s19  ;;  %s3966_s14 = smov %s2867_s16 }
 0x25e   :  { %12 = sbr.rel (!%p10_p4) target bundleno = 2 (0x2), region = 323 }

// kernel: net_forward.6
= control target key start
LH: loop header
LB: loop body
LE: loop exit
PB: predicated region body
PF: predicated region fallthrough
CT: control target
= control target key end

     0   :  { %s2452_s12 = smov 0   ;;  %s2454_s13 = smov 0   ;;  %s3522_s0 = inlined_call_operand.vmem [shape: bf16[16,72], index: 0, kind: input, shape index: {}]   ;;  %s3523_s1 = inlined_call_operand.vmem [shape: f32[16,1], index: 1, kind: input, shape index: {}]   ;;  %s3524_s2 = inlined_call_operand.vmem [shape: bf16[72,1058], index: 2, kind: input, shape index: {}]   ;;  %s3525_s3 = inlined_call_operand.vmem [shape: bf16[16,1058], index: 3, kind: output, shape index: {}]  }
   0x1   :  { %s2456_s14 = smov 0  }
   0x2 LB: > { %s2468_s15 = sadd.s32 4294967295, %s2295_s14   ;;  %s2471_s16 = sadd.s32 1, %s2295_s14   ;;  %s2295_s14 = sphi %s2456_s14, %s3555_s14   ;;  %s2291_s13 = sphi %s2454_s13, %s3554_s13   ;;  %s2287_s12 = sphi %s2452_s12, %s3553_s12  }
   0x3   : > { %s59_s17 = ssub.s32 %s2295_s14, %s2471_s16  ;;  %s62_s18 = sadd.s32 1, %s2291_s13 }
   0x4   : > { %p60_p0 = scmp.eq.s32.totalorder %s59_s17, 0  ;;  %p69_p1 = scmp.ne.s32.totalorder %s2291_s13, %s2287_s12 }
   0x5   : > { %p70_p2 = scmp.eq.s32.totalorder %s2295_s14, 0  ;;  %p99_p3 = scmp.eq.s32.totalorder %s2468_s15, 1 }
   0x6   : > { %s2481_s19 = scalar_select %p60_p0, %s2291_s13, %s62_s18  }
   0x7   : > { %p71_p4 = por %p70_p2, %p69_p1  ;;  %p2483_p5 = por %p99_p3, %p69_p1 }
   0x8   : > { %p1690_p6 = scmp.ge.s32.totalorder %s2295_s14, 2 }
   0xa   : > { %127 = sbr.rel (%p1690_p6) target bundleno = 192 (0xc0), region = 24 }
   0xf   : > { %130 = sbr.rel (!%p71_p4) target bundleno = 192 (0xc0), region = 28  ;;  %s132_s21 = sand.u32 (%p71_p4), 1, %s2291_s13  }
  0x10   : > { %s135_s22 = smul.u32 (%p71_p4), 5, %s2295_s14 }
  0x11   : > { %s1820_s23 = smul.u32 (%p71_p4), 180, %s132_s21 }
  0x12   : > { %s136_s24 = ssub.s32 (%p71_p4), 9, %s135_s22  ;;  %s1784_s25 = smul.u32 (%p71_p4), 20, %s2295_s14 }
  0x13   : > { %p137_p7 = scmp.lt.s32.totalorder (%p71_p4), %s136_s24, 5  ;;  %s2498_s4 = scalar_lea.vmem (%p71_p4), [#allocation2], %s1820_s23  }
  0x14   : > { %s2494_s28 = scalar_lea.vmem %s3524_s2, %s1784_s25  }
  0x15   : > { %s3557_s24 = smov (!%p137_p7, %s136_s24), 5 }
  0x16   : > { %s139_s29 = smul.u32 576, %s3557_s24  ;;  %s2496_s30 = sshll.u32 %s3557_s24, 2 }
  0x18   : > { %p1694_p8 = scmp.eq.s32.totalorder %s139_s29, 0 }
  0x19   : > { %p147_p9 = scmp.lt.u32.totalorder (!%p1694_p8), %s2496_s30, 8 }
  0x1a   : > { %146 = sbr.rel (%p1694_p8) target bundleno = 192 (0xc0), region = 32 }
  0x1f   : > { %150 = sbr.rel (%p147_p9) target bundleno = 175 (0xaf), region = 36  ;;  %s2502_s5 = sand.u32 (!%p147_p9), 7, %s2496_s30  }
  0x20   : > { %p183_p10 = scmp.eq.s32.totalorder (!%p147_p9), %s2502_s5, 0  ;;  %p1695_p11 = scmp.ne.s32.totalorder (!%p147_p9), %s2502_s5, 0 }
  0x24   : > { %186 = sbr.rel (%p1695_p11) target bundleno = 99 (0x63), region = 51  ;;  %s187_s6 = sshrl.u32 (!%p1695_p11), %s2496_s30, 3 }
  0x25   : > { %s2509_s7 = sshrl.u32 (!%p1695_p11), %s187_s6, 3 }
  0x26   : > { %p1696_p12 = scmp.le.s32.totalorder (!%p1695_p11), %s2509_s7, 0 }
  0x29   : > { %1560 = sbr.rel (%p1696_p12) target bundleno = 83 (0x53), region = 229  ;;  %s3527_s8 = smov (!%p1696_p12), %s2498_s4 }
  0x2a   : > { %s3528_s9 = smov (!%p1696_p12), %s2494_s28  ;;  %s2518_s10 = smov (!%p1696_p12), 0  }
  0x2b   : > { %s2520_s11 = smov (!%p1696_p12), 0  }
  0x2e LB: >> { %v212_v0 = vld [vmem:[%s2303_s9 + $0x30] sm:$0xff]  ;;  %v214_v1 = vld [vmem:[%s2303_s9 + $0x38] sm:$0xff]  ;;  %v246_v5 = vld [vmem:[%s2303_s9 + $0x80] sm:$0xff]  ;;  %s344_s17 = sadd.s32 1, %s2307_s10  ;;  %s194_s11 = sadd.s32 1, %s2311_s11   ;;  %s2311_s11 = sphi %s2520_s11, %s194_s11   ;;  %s2307_s10 = sphi %s2518_s10, %s3531_s10   ;;  %s2303_s9 = sphi %s3528_s9, %s3530_s9   ;;  %s2299_s8 = sphi %s3527_s8, %s3529_s8  }
  0x2f   : >> { %v228_v2 = vld [vmem:[%s2303_s9 + $0x54] sm:$0xff]  ;;  %213 = vst [vmem:[%s2299_s8 + $0x30] sm:$0xff] %v212_v0  ;;  %215 = vst [vmem:[%s2299_s8 + $0x38] sm:$0xff] %v214_v1  ;;  %v230_v3 = vld [vmem:[%s2303_s9 + $0x5c] sm:$0xff]  ;;  %p345_p13 = scmp.ge.s32.totalorder %s344_s17, %s2509_s7  ;;  %p193_p0 = scmp.ge.s32.totalorder %s194_s11, %s2509_s7 }
  0x30   : >> { %229 = vst [vmem:[%s2299_s8 + $0x44] sm:$0xff] %v228_v2  ;;  %v244_v4 = vld [vmem:[%s2303_s9 + $0x78] sm:$0xff]  ;;  %231 = vst [vmem:[%s2299_s8 + $0x4c] sm:$0xff] %v230_v3  ;;  %v262_v7 = vld [vmem:[%s2303_s9 + $0xa4] sm:$0xff] }
  0x31   : >> { %245 = vst [vmem:[%s2299_s8 + $0x58] sm:$0xff] %v244_v4  ;;  %247 = vst [vmem:[%s2299_s8 + $0x60] sm:$0xff] %v246_v5  ;;  %v260_v6 = vld [vmem:[%s2303_s9 + $0x9c] sm:$0xff]  ;;  %v278_v9 = vld [vmem:[%s2303_s9 + $0xc8] sm:$0xff]  ;;  %s3559_s17 = smov (%p345_p13, %s344_s17), 0 }
  0x32   : >> { %v276_v8 = vld [vmem:[%s2303_s9 + $0xc0] sm:$0xff]  ;;  %261 = vst [vmem:[%s2299_s8 + $0x6c] sm:$0xff] %v260_v6  ;;  %263 = vst [vmem:[%s2299_s8 + $0x74] sm:$0xff] %v262_v7  ;;  %v294_v11 = vld [vmem:[%s2303_s9 + $0xec] sm:$0xff]  ;;  %s1697_s18 = sshll.u32 %s3559_s17, 6  ;;  %s3531_s10 = smov %s3559_s17 }
  0x33   : >> { %277 = vst [vmem:[%s2299_s8 + $0x80] sm:$0xff] %v276_v8  ;;  %v292_v10 = vld [vmem:[%s2303_s9 + $0xe4] sm:$0xff]  ;;  %279 = vst [vmem:[%s2299_s8 + $0x88] sm:$0xff] %v278_v9  ;;  %v226_v15 = vld [vmem:[%s2303_s9 + $0x4c] sm:$0xff]  ;;  %s2591_s21 = scalar_lea.vmem %s2494_s28, %s1697_s18   ;;  %s2594_s22 = scalar_lea.vmem %s2498_s4, %s1697_s18 [#allocation2]  }
  0x34   : >> { %293 = vst [vmem:[%s2299_s8 + $0x94] sm:$0xff] %v292_v10  ;;  %295 = vst [vmem:[%s2299_s8 + $0x9c] sm:$0xff] %v294_v11  ;;  %v208_v12 = vld [vmem:[%s2303_s9 + $0x20] sm:$0xff]  ;;  %v210_v13 = vld [vmem:[%s2303_s9 + $0x28] sm:$0xff] }
  0x35   : >> { %v224_v14 = vld [vmem:[%s2303_s9 + $0x44] sm:$0xff]  ;;  %209 = vst [vmem:[%s2299_s8 + $0x20] sm:$0xff] %v208_v12  ;;  %211 = vst [vmem:[%s2299_s8 + $0x28] sm:$0xff] %v210_v13  ;;  %v242_v17 = vld [vmem:[%s2303_s9 + $0x70] sm:$0xff] }
  0x36   : >> { %225 = vst [vmem:[%s2299_s8 + $0x34] sm:$0xff] %v224_v14  ;;  %v240_v16 = vld [vmem:[%s2303_s9 + $0x68] sm:$0xff]  ;;  %227 = vst [vmem:[%s2299_s8 + $0x3c] sm:$0xff] %v226_v15  ;;  %v258_v19 = vld [vmem:[%s2303_s9 + $0x94] sm:$0xff] }
  0x37   : >> { %241 = vst [vmem:[%s2299_s8 + $0x48] sm:$0xff] %v240_v16  ;;  %243 = vst [vmem:[%s2299_s8 + $0x50] sm:$0xff] %v242_v17  ;;  %v256_v18 = vld [vmem:[%s2303_s9 + $0x8c] sm:$0xff]  ;;  %v274_v21 = vld [vmem:[%s2303_s9 + $0xb8] sm:$0xff] }
  0x38   : >> { %v272_v20 = vld [vmem:[%s2303_s9 + $0xb0] sm:$0xff]  ;;  %257 = vst [vmem:[%s2299_s8 + $0x5c] sm:$0xff] %v256_v18  ;;  %259 = vst [vmem:[%s2299_s8 + $0x64] sm:$0xff] %v258_v19  ;;  %v290_v23 = vld [vmem:[%s2303_s9 + $0xdc] sm:$0xff] }
  0x39   : >> { %273 = vst [vmem:[%s2299_s8 + $0x70] sm:$0xff] %v272_v20  ;;  %v288_v22 = vld [vmem:[%s2303_s9 + $0xd4] sm:$0xff]  ;;  %275 = vst [vmem:[%s2299_s8 + $0x78] sm:$0xff] %v274_v21  ;;  %v306_v25 = vld [vmem:[%s2303_s9 + $0x100] sm:$0xff] }
  0x3a   : >> { %289 = vst [vmem:[%s2299_s8 + $0x84] sm:$0xff] %v288_v22  ;;  %291 = vst [vmem:[%s2299_s8 + $0x8c] sm:$0xff] %v290_v23  ;;  %v304_v24 = vld [vmem:[%s2303_s9 + $0xf8] sm:$0xff]  ;;  %v308_v26 = vld [vmem:[%s2303_s9 + $0x108] sm:$0xff] }
  0x3b   : >> { %305 = vst [vmem:[%s2299_s8 + $0x98] sm:$0xff] %v304_v24  ;;  %307 = vst [vmem:[%s2299_s8 + $0xa0] sm:$0xff] %v306_v25  ;;  %v310_v27 = vld [vmem:[%s2303_s9 + $0x110] sm:$0xff]  ;;  %v206_v29 = vld [vmem:[%s2303_s9 + $0x18] sm:$0xff] }
  0x3c   : >> { %309 = vst [vmem:[%s2299_s8 + $0xa8] sm:$0xff] %v308_v26  ;;  %v204_v28 = vld [vmem:[%s2303_s9 + $0x10] sm:$0xff]  ;;  %311 = vst [vmem:[%s2299_s8 + $0xb0] sm:$0xff] %v310_v27  ;;  %v222_v31 = vld [vmem:[%s2303_s9 + $0x3c] sm:$0xff] }
  0x3d   : >> { %205 = vst [vmem:[%s2299_s8 + $0x10] sm:$0xff] %v204_v28  ;;  %207 = vst [vmem:[%s2299_s8 + $0x18] sm:$0xff] %v206_v29  ;;  %v220_v30 = vld [vmem:[%s2303_s9 + $0x34] sm:$0xff]  ;;  %v238_v33 = vld [vmem:[%s2303_s9 + $0x60] sm:$0xff] }
  0x3e   : >> { %v236_v32 = vld [vmem:[%s2303_s9 + $0x58] sm:$0xff]  ;;  %221 = vst [vmem:[%s2299_s8 + $0x24] sm:$0xff] %v220_v30  ;;  %223 = vst [vmem:[%s2299_s8 + $0x2c] sm:$0xff] %v222_v31  ;;  %v254_v35 = vld [vmem:[%s2303_s9 + $0x84] sm:$0xff] }
  0x3f   : >> { %237 = vst [vmem:[%s2299_s8 + $0x38] sm:$0xff] %v236_v32  ;;  %v252_v34 = vld [vmem:[%s2303_s9 + $0x7c] sm:$0xff]  ;;  %239 = vst [vmem:[%s2299_s8 + $0x40] sm:$0xff] %v238_v33  ;;  %v270_v37 = vld [vmem:[%s2303_s9 + $0xa8] sm:$0xff] }
  0x40   : >> { %253 = vst [vmem:[%s2299_s8 + $0x4c] sm:$0xff] %v252_v34  ;;  %255 = vst [vmem:[%s2299_s8 + $0x54] sm:$0xff] %v254_v35  ;;  %v268_v36 = vld [vmem:[%s2303_s9 + $0xa0] sm:$0xff]  ;;  %v286_v39 = vld [vmem:[%s2303_s9 + $0xcc] sm:$0xff] }
  0x41   : >> { %v284_v38 = vld [vmem:[%s2303_s9 + $0xc4] sm:$0xff]  ;;  %269 = vst [vmem:[%s2299_s8 + $0x60] sm:$0xff] %v268_v36  ;;  %271 = vst [vmem:[%s2299_s8 + $0x68] sm:$0xff] %v270_v37  ;;  %v302_v41 = vld [vmem:[%s2303_s9 + $0xf0] sm:$0xff] }
  0x42   : >> { %285 = vst [vmem:[%s2299_s8 + $0x74] sm:$0xff] %v284_v38  ;;  %v300_v40 = vld [vmem:[%s2303_s9 + $0xe8] sm:$0xff]  ;;  %287 = vst [vmem:[%s2299_s8 + $0x7c] sm:$0xff] %v286_v39  ;;  %v318_v43 = vld [vmem:[%s2303_s9 + $0x114] sm:$0xff] }
  0x43   : >> { %301 = vst [vmem:[%s2299_s8 + $0x88] sm:$0xff] %v300_v40  ;;  %303 = vst [vmem:[%s2299_s8 + $0x90] sm:$0xff] %v302_v41  ;;  %v316_v42 = vld [vmem:[%s2303_s9 + $0x10c] sm:$0xff]  ;;  %v320_v44 = vld [vmem:[%s2303_s9 + $0x11c] sm:$0xff] }
  0x44   : >> { %317 = vst [vmem:[%s2299_s8 + $0x9c] sm:$0xff] %v316_v42  ;;  %319 = vst [vmem:[%s2299_s8 + $0xa4] sm:$0xff] %v318_v43  ;;  %v322_v45 = vld [vmem:[%s2303_s9 + $0x124] sm:$0xff]  ;;  %v324_v46 = vld [vmem:[%s2303_s9 + $0x12c] sm:$0xff] }
  0x45   : >> { %321 = vst [vmem:[%s2299_s8 + $0xac] sm:$0xff] %v320_v44  ;;  %v326_v47 = vld [vmem:[%s2303_s9 + $0x134] sm:$0xff]  ;;  %323 = vst [vmem:[%s2299_s8 + $0xb4] sm:$0xff] %v322_v45  ;;  %v200_v48 = vld [vmem:[%s2303_s9] sm:$0xff] }
  0x46   : >> { %325 = vst [vmem:[%s2299_s8 + $0xbc] sm:$0xff] %v324_v46  ;;  %327 = vst [vmem:[%s2299_s8 + $0xc4] sm:$0xff] %v326_v47  ;;  %v202_v49 = vld [vmem:[%s2303_s9 + $0x8] sm:$0xff]  ;;  %v234_v53 = vld [vmem:[%s2303_s9 + $0x50] sm:$0xff] }
  0x47   : >> { %v216_v50 = vld [vmem:[%s2303_s9 + $0x24] sm:$0xff]  ;;  %201 = vst [vmem:[%s2299_s8] sm:$0xff] %v200_v48  ;;  %203 = vst [vmem:[%s2299_s8 + $0x8] sm:$0xff] %v202_v49  ;;  %v218_v51 = vld [vmem:[%s2303_s9 + $0x2c] sm:$0xff] }
  0x48   : >> { %217 = vst [vmem:[%s2299_s8 + $0x14] sm:$0xff] %v216_v50  ;;  %v232_v52 = vld [vmem:[%s2303_s9 + $0x48] sm:$0xff]  ;;  %219 = vst [vmem:[%s2299_s8 + $0x1c] sm:$0xff] %v218_v51  ;;  %v250_v55 = vld [vmem:[%s2303_s9 + $0x74] sm:$0xff] }
  0x49   : >> { %233 = vst [vmem:[%s2299_s8 + $0x28] sm:$0xff] %v232_v52  ;;  %235 = vst [vmem:[%s2299_s8 + $0x30] sm:$0xff] %v234_v53  ;;  %v248_v54 = vld [vmem:[%s2303_s9 + $0x6c] sm:$0xff]  ;;  %v266_v57 = vld [vmem:[%s2303_s9 + $0x98] sm:$0xff] }
  0x4a   : >> { %v264_v56 = vld [vmem:[%s2303_s9 + $0x90] sm:$0xff]  ;;  %249 = vst [vmem:[%s2299_s8 + $0x3c] sm:$0xff] %v248_v54  ;;  %251 = vst [vmem:[%s2299_s8 + $0x44] sm:$0xff] %v250_v55  ;;  %v282_v59 = vld [vmem:[%s2303_s9 + $0xbc] sm:$0xff] }
  0x4b   : >> { %265 = vst [vmem:[%s2299_s8 + $0x50] sm:$0xff] %v264_v56  ;;  %v280_v58 = vld [vmem:[%s2303_s9 + $0xb4] sm:$0xff]  ;;  %267 = vst [vmem:[%s2299_s8 + $0x58] sm:$0xff] %v266_v57  ;;  %v298_v61 = vld [vmem:[%s2303_s9 + $0xe0] sm:$0xff] }
  0x4c   : >> { %281 = vst [vmem:[%s2299_s8 + $0x64] sm:$0xff] %v280_v58  ;;  %283 = vst [vmem:[%s2299_s8 + $0x6c] sm:$0xff] %v282_v59  ;;  %v296_v60 = vld [vmem:[%s2303_s9 + $0xd8] sm:$0xff]  ;;  %v314_v63 = vld [vmem:[%s2303_s9 + $0x104] sm:$0xff] }
  0x4d   : >> { %v312_v62 = vld [vmem:[%s2303_s9 + $0xfc] sm:$0xff]  ;;  %297 = vst [vmem:[%s2299_s8 + $0x78] sm:$0xff] %v296_v60  ;;  %299 = vst [vmem:[%s2299_s8 + $0x80] sm:$0xff] %v298_v61  ;;  %v330_v1 = vld [vmem:[%s2303_s9 + $0x128] sm:$0xff] }
  0x4e   : >> { %313 = vst [vmem:[%s2299_s8 + $0x8c] sm:$0xff] %v312_v62  ;;  %v328_v0 = vld [vmem:[%s2303_s9 + $0x120] sm:$0xff]  ;;  %315 = vst [vmem:[%s2299_s8 + $0x94] sm:$0xff] %v314_v63  ;;  %v332_v2 = vld [vmem:[%s2303_s9 + $0x130] sm:$0xff]  ;;  %196 = sbr.rel (!%p193_p0) target bundleno = 46 (0x2e), region = 235 }
  0x4f   : >> { %329 = vst [vmem:[%s2299_s8 + $0xa0] sm:$0xff] %v328_v0  ;;  %331 = vst [vmem:[%s2299_s8 + $0xa8] sm:$0xff] %v330_v1  ;;  %v334_v3 = vld [vmem:[%s2303_s9 + $0x138] sm:$0xff]  ;;  %v336_v4 = vld [vmem:[%s2303_s9 + $0x140] sm:$0xff] }
  0x50   : >> { %333 = vst [vmem:[%s2299_s8 + $0xb0] sm:$0xff] %v332_v2  ;;  %335 = vst [vmem:[%s2299_s8 + $0xb8] sm:$0xff] %v334_v3  ;;  %v338_v5 = vld [vmem:[%s2303_s9 + $0x148] sm:$0xff]  ;;  %v340_v6 = vld [vmem:[%s2303_s9 + $0x150] sm:$0xff] }
  0x51   : >> { %337 = vst [vmem:[%s2299_s8 + $0xc0] sm:$0xff] %v336_v4  ;;  %v342_v7 = vld [vmem:[%s2303_s9 + $0x158] sm:$0xff]  ;;  %339 = vst [vmem:[%s2299_s8 + $0xc8] sm:$0xff] %v338_v5  ;;  %s3530_s9 = smov %s2591_s21 }
  0x52   : >> { %341 = vst [vmem:[%s2299_s8 + $0xd0] sm:$0xff] %v340_v6  ;;  %343 = vst [vmem:[%s2299_s8 + $0xd8] sm:$0xff] %v342_v7  ;;  %s3529_s8 = smov %s2594_s22 }
  0x53 PF: > { %s2704_s23 = sand.u32 7, %s187_s6   ;;  %s1785_s24 = sshll.u32 %s2509_s7, 10 }
  0x54   : > { %s355_s25 = sshra.s32 %s1785_s24, 4  ;;  %p1702_p1 = scmp.le.s32.totalorder %s2704_s23, 0 }
  0x55   : > { %s2708_s26 = scalar_lea.vmem %s2494_s28, %s355_s25   ;;  %s2711_s27 = scalar_lea.vmem %s2498_s4, %s355_s25 [#allocation2]  }
  0x56   : > { %1574 = sbr.rel (%p1702_p1) target bundleno = 99 (0x63), region = 240  ;;  %s3532_s29 = smov (!%p1702_p1), %s2711_s27 }
  0x57   : > { %s3533_s8 = smov (!%p1702_p1), %s2708_s26  ;;  %s2720_s9 = smov (!%p1702_p1), 0  }
  0x58   : > { %s2722_s10 = smov (!%p1702_p1), 0  }
  0x5b LB: >> { %v371_v8 = vld [vmem:[%s2319_s8] sm:$0xff]  ;;  %v375_v10 = vld [vmem:[%s2319_s8 + $0x48] sm:$0xff]  ;;  %s389_s6 = sadd.s32 1, %s2323_s9  ;;  %v379_v12 = vld [vmem:[%s2319_s8 + $0x90] sm:$0xff]  ;;  %s365_s10 = sadd.s32 1, %s2327_s10   ;;  %s2327_s10 = sphi %s2722_s10, %s365_s10   ;;  %s2323_s9 = sphi %s2720_s9, %s3534_s9   ;;  %s2319_s8 = sphi %s3533_s8, %s394_s8   ;;  %s2315_s29 = sphi %s3532_s29, %s395_s29  }
  0x5c   : >> { %v373_v9 = vld [vmem:[%s2319_s8 + $0x24] sm:$0xff]  ;;  %372 = vst [vmem:[%s2315_s29] sm:$0xff] %v371_v8  ;;  %376 = vst [vmem:[%s2315_s29 + $0x28] sm:$0xff] %v375_v10  ;;  %v377_v11 = vld [vmem:[%s2319_s8 + $0x6c] sm:$0xff]  ;;  %p390_p2 = scmp.ge.s32.totalorder %s389_s6, %s2704_s23  ;;  %p364_p3 = scmp.ge.s32.totalorder %s365_s10, %s2704_s23 }
  0x5d   : >> { %374 = vst [vmem:[%s2315_s29 + $0x14] sm:$0xff] %v373_v9  ;;  %v381_v13 = vld [vmem:[%s2319_s8 + $0xb4] sm:$0xff]  ;;  %378 = vst [vmem:[%s2315_s29 + $0x3c] sm:$0xff] %v377_v11  ;;  %v385_v15 = vld [vmem:[%s2319_s8 + $0xfc] sm:$0xff] }
  0x5e   : >> { %380 = vst [vmem:[%s2315_s29 + $0x50] sm:$0xff] %v379_v12  ;;  %382 = vst [vmem:[%s2315_s29 + $0x64] sm:$0xff] %v381_v13  ;;  %v383_v14 = vld [vmem:[%s2319_s8 + $0xd8] sm:$0xff]  ;;  %v387_v16 = vld [vmem:[%s2319_s8 + $0x120] sm:$0xff]  ;;  %s3561_s6 = smov (%p390_p2, %s389_s6), 0  ;;  %367 = sbr.rel (!%p364_p3) target bundleno = 91 (0x5b), region = 246 }
  0x5f   : >> { %384 = vst [vmem:[%s2315_s29 + $0x78] sm:$0xff] %v383_v14  ;;  %386 = vst [vmem:[%s2315_s29 + $0x8c] sm:$0xff] %v385_v15  ;;  %s1703_s7 = sshll.u32 %s3561_s6, 3  ;;  %s3534_s9 = smov %s3561_s6 }
  0x60   : >> { %388 = vst [vmem:[%s2315_s29 + $0xa0] sm:$0xff] %v387_v16  ;;  %s394_s8 = scalar_lea.vmem %s2708_s26, %s1703_s7   ;;  %s395_s29 = scalar_lea.vmem %s2711_s27, %s1703_s7 [#allocation2]  }
  0x63 PF: > { %398 = sbr.rel (%p183_p10) target bundleno = 175 (0xaf), region = 69  ;;  %s400_s11 = ssub.s32 (!%p183_p10), %s2496_s30, %s2502_s5 }
  0x64   : > { %s404_s17 = sshrl.u32 (!%p183_p10), %s2496_s30, 3  ;;  %s2749_s18 = scalar_lea.vmem (!%p183_p10), %s2494_s28, %s400_s11 }
  0x65   : > { %s2752_s21 = scalar_lea.vmem (!%p183_p10), %s2498_s4, %s400_s11 [#allocation2]  ;;  %s2756_s22 = sshrl.u32 (!%p183_p10), %s404_s17, 3 }
  0x66   : > { %p1705_p4 = scmp.le.s32.totalorder (!%p183_p10), %s2756_s22, 0 }
  0x68   : > { %1588 = sbr.rel (%p1705_p4) target bundleno = 146 (0x92), region = 251  ;;  %s3535_s23 = smov (!%p1705_p4), %s2498_s4 }
  0x69   : > { %s3536_s24 = smov (!%p1705_p4), %s2494_s28  ;;  %s2765_s25 = smov (!%p1705_p4), 0  }
  0x6a   : > { %s2767_s26 = smov (!%p1705_p4), 0  }
  0x6d LB: >> { %v429_v17 = vld [vmem:[%s2335_s24 + $0x30] sm:$0xff]  ;;  %v431_v18 = vld [vmem:[%s2335_s24 + $0x38] sm:$0xff]  ;;  %v463_v22 = vld [vmem:[%s2335_s24 + $0x80] sm:$0xff]  ;;  %s561_s27 = sadd.s32 1, %s2339_s25  ;;  %s411_s26 = sadd.s32 1, %s2343_s26   ;;  %s2343_s26 = sphi %s2767_s26, %s411_s26   ;;  %s2339_s25 = sphi %s2765_s25, %s3539_s25   ;;  %s2335_s24 = sphi %s3536_s24, %s3538_s24   ;;  %s2331_s23 = sphi %s3535_s23, %s3537_s23  }
  0x6e   : >> { %v445_v19 = vld [vmem:[%s2335_s24 + $0x54] sm:$0xff]  ;;  %430 = vst [vmem:[%s2331_s23 + $0x30] sm:$0xff] %v429_v17  ;;  %432 = vst [vmem:[%s2331_s23 + $0x38] sm:$0xff] %v431_v18  ;;  %v447_v20 = vld [vmem:[%s2335_s24 + $0x5c] sm:$0xff]  ;;  %p562_p6 = scmp.ge.s32.totalorder %s561_s27, %s2756_s22  ;;  %p410_p7 = scmp.ge.s32.totalorder %s411_s26, %s2756_s22 }
  0x6f   : >> { %446 = vst [vmem:[%s2331_s23 + $0x44] sm:$0xff] %v445_v19  ;;  %v461_v21 = vld [vmem:[%s2335_s24 + $0x78] sm:$0xff]  ;;  %448 = vst [vmem:[%s2331_s23 + $0x4c] sm:$0xff] %v447_v20  ;;  %v479_v24 = vld [vmem:[%s2335_s24 + $0xa4] sm:$0xff] }
  0x70   : >> { %462 = vst [vmem:[%s2331_s23 + $0x58] sm:$0xff] %v461_v21  ;;  %464 = vst [vmem:[%s2331_s23 + $0x60] sm:$0xff] %v463_v22  ;;  %v477_v23 = vld [vmem:[%s2335_s24 + $0x9c] sm:$0xff]  ;;  %v495_v26 = vld [vmem:[%s2335_s24 + $0xc8] sm:$0xff]  ;;  %s3563_s27 = smov (%p562_p6, %s561_s27), 0 }
  0x71   : >> { %v493_v25 = vld [vmem:[%s2335_s24 + $0xc0] sm:$0xff]  ;;  %478 = vst [vmem:[%s2331_s23 + $0x6c] sm:$0xff] %v477_v23  ;;  %480 = vst [vmem:[%s2331_s23 + $0x74] sm:$0xff] %v479_v24  ;;  %v511_v28 = vld [vmem:[%s2335_s24 + $0xec] sm:$0xff]  ;;  %s1706_s29 = sshll.u32 %s3563_s27, 6  ;;  %s3539_s25 = smov %s3563_s27 }
  0x72   : >> { %494 = vst [vmem:[%s2331_s23 + $0x80] sm:$0xff] %v493_v25  ;;  %v509_v27 = vld [vmem:[%s2335_s24 + $0xe4] sm:$0xff]  ;;  %496 = vst [vmem:[%s2331_s23 + $0x88] sm:$0xff] %v495_v26  ;;  %v443_v32 = vld [vmem:[%s2335_s24 + $0x4c] sm:$0xff]  ;;  %s2838_s8 = scalar_lea.vmem %s2494_s28, %s1706_s29   ;;  %s2841_s9 = scalar_lea.vmem %s2498_s4, %s1706_s29 [#allocation2]  }
  0x73   : >> { %510 = vst [vmem:[%s2331_s23 + $0x94] sm:$0xff] %v509_v27  ;;  %512 = vst [vmem:[%s2331_s23 + $0x9c] sm:$0xff] %v511_v28  ;;  %v425_v29 = vld [vmem:[%s2335_s24 + $0x20] sm:$0xff]  ;;  %v427_v30 = vld [vmem:[%s2335_s24 + $0x28] sm:$0xff] }
  0x74   : >> { %v441_v31 = vld [vmem:[%s2335_s24 + $0x44] sm:$0xff]  ;;  %426 = vst [vmem:[%s2331_s23 + $0x20] sm:$0xff] %v425_v29  ;;  %428 = vst [vmem:[%s2331_s23 + $0x28] sm:$0xff] %v427_v30  ;;  %v459_v34 = vld [vmem:[%s2335_s24 + $0x70] sm:$0xff] }
  0x75   : >> { %442 = vst [vmem:[%s2331_s23 + $0x34] sm:$0xff] %v441_v31  ;;  %v457_v33 = vld [vmem:[%s2335_s24 + $0x68] sm:$0xff]  ;;  %444 = vst [vmem:[%s2331_s23 + $0x3c] sm:$0xff] %v443_v32  ;;  %v475_v36 = vld [vmem:[%s2335_s24 + $0x94] sm:$0xff] }
  0x76   : >> { %458 = vst [vmem:[%s2331_s23 + $0x48] sm:$0xff] %v457_v33  ;;  %460 = vst [vmem:[%s2331_s23 + $0x50] sm:$0xff] %v459_v34  ;;  %v473_v35 = vld [vmem:[%s2335_s24 + $0x8c] sm:$0xff]  ;;  %v491_v38 = vld [vmem:[%s2335_s24 + $0xb8] sm:$0xff] }
  0x77   : >> { %v489_v37 = vld [vmem:[%s2335_s24 + $0xb0] sm:$0xff]  ;;  %474 = vst [vmem:[%s2331_s23 + $0x5c] sm:$0xff] %v473_v35  ;;  %476 = vst [vmem:[%s2331_s23 + $0x64] sm:$0xff] %v475_v36  ;;  %v507_v40 = vld [vmem:[%s2335_s24 + $0xdc] sm:$0xff] }
  0x78   : >> { %490 = vst [vmem:[%s2331_s23 + $0x70] sm:$0xff] %v489_v37  ;;  %v505_v39 = vld [vmem:[%s2335_s24 + $0xd4] sm:$0xff]  ;;  %492 = vst [vmem:[%s2331_s23 + $0x78] sm:$0xff] %v491_v38  ;;  %v523_v42 = vld [vmem:[%s2335_s24 + $0x100] sm:$0xff] }
  0x79   : >> { %506 = vst [vmem:[%s2331_s23 + $0x84] sm:$0xff] %v505_v39  ;;  %508 = vst [vmem:[%s2331_s23 + $0x8c] sm:$0xff] %v507_v40  ;;  %v521_v41 = vld [vmem:[%s2335_s24 + $0xf8] sm:$0xff]  ;;  %v525_v43 = vld [vmem:[%s2335_s24 + $0x108] sm:$0xff] }
  0x7a   : >> { %522 = vst [vmem:[%s2331_s23 + $0x98] sm:$0xff] %v521_v41  ;;  %524 = vst [vmem:[%s2331_s23 + $0xa0] sm:$0xff] %v523_v42  ;;  %v527_v44 = vld [vmem:[%s2335_s24 + $0x110] sm:$0xff]  ;;  %v423_v46 = vld [vmem:[%s2335_s24 + $0x18] sm:$0xff] }
  0x7b   : >> { %526 = vst [vmem:[%s2331_s23 + $0xa8] sm:$0xff] %v525_v43  ;;  %v421_v45 = vld [vmem:[%s2335_s24 + $0x10] sm:$0xff]  ;;  %528 = vst [vmem:[%s2331_s23 + $0xb0] sm:$0xff] %v527_v44  ;;  %v439_v48 = vld [vmem:[%s2335_s24 + $0x3c] sm:$0xff] }
  0x7c   : >> { %422 = vst [vmem:[%s2331_s23 + $0x10] sm:$0xff] %v421_v45  ;;  %424 = vst [vmem:[%s2331_s23 + $0x18] sm:$0xff] %v423_v46  ;;  %v437_v47 = vld [vmem:[%s2335_s24 + $0x34] sm:$0xff]  ;;  %v455_v50 = vld [vmem:[%s2335_s24 + $0x60] sm:$0xff] }
  0x7d   : >> { %v453_v49 = vld [vmem:[%s2335_s24 + $0x58] sm:$0xff]  ;;  %438 = vst [vmem:[%s2331_s23 + $0x24] sm:$0xff] %v437_v47  ;;  %440 = vst [vmem:[%s2331_s23 + $0x2c] sm:$0xff] %v439_v48  ;;  %v471_v52 = vld [vmem:[%s2335_s24 + $0x84] sm:$0xff] }
  0x7e   : >> { %454 = vst [vmem:[%s2331_s23 + $0x38] sm:$0xff] %v453_v49  ;;  %v469_v51 = vld [vmem:[%s2335_s24 + $0x7c] sm:$0xff]  ;;  %456 = vst [vmem:[%s2331_s23 + $0x40] sm:$0xff] %v455_v50  ;;  %v487_v54 = vld [vmem:[%s2335_s24 + $0xa8] sm:$0xff] }
  0x7f   : >> { %470 = vst [vmem:[%s2331_s23 + $0x4c] sm:$0xff] %v469_v51  ;;  %472 = vst [vmem:[%s2331_s23 + $0x54] sm:$0xff] %v471_v52  ;;  %v485_v53 = vld [vmem:[%s2335_s24 + $0xa0] sm:$0xff]  ;;  %v503_v56 = vld [vmem:[%s2335_s24 + $0xcc] sm:$0xff] }
  0x80   : >> { %v501_v55 = vld [vmem:[%s2335_s24 + $0xc4] sm:$0xff]  ;;  %486 = vst [vmem:[%s2331_s23 + $0x60] sm:$0xff] %v485_v53  ;;  %488 = vst [vmem:[%s2331_s23 + $0x68] sm:$0xff] %v487_v54  ;;  %v519_v58 = vld [vmem:[%s2335_s24 + $0xf0] sm:$0xff] }
  0x81   : >> { %502 = vst [vmem:[%s2331_s23 + $0x74] sm:$0xff] %v501_v55  ;;  %v517_v57 = vld [vmem:[%s2335_s24 + $0xe8] sm:$0xff]  ;;  %504 = vst [vmem:[%s2331_s23 + $0x7c] sm:$0xff] %v503_v56  ;;  %v535_v60 = vld [vmem:[%s2335_s24 + $0x114] sm:$0xff] }
  0x82   : >> { %518 = vst [vmem:[%s2331_s23 + $0x88] sm:$0xff] %v517_v57  ;;  %520 = vst [vmem:[%s2331_s23 + $0x90] sm:$0xff] %v519_v58  ;;  %v533_v59 = vld [vmem:[%s2335_s24 + $0x10c] sm:$0xff]  ;;  %v537_v61 = vld [vmem:[%s2335_s24 + $0x11c] sm:$0xff] }
  0x83   : >> { %534 = vst [vmem:[%s2331_s23 + $0x9c] sm:$0xff] %v533_v59  ;;  %536 = vst [vmem:[%s2331_s23 + $0xa4] sm:$0xff] %v535_v60  ;;  %v539_v62 = vld [vmem:[%s2335_s24 + $0x124] sm:$0xff]  ;;  %v541_v63 = vld [vmem:[%s2335_s24 + $0x12c] sm:$0xff] }
  0x84   : >> { %538 = vst [vmem:[%s2331_s23 + $0xac] sm:$0xff] %v537_v61  ;;  %v543_v0 = vld [vmem:[%s2335_s24 + $0x134] sm:$0xff]  ;;  %540 = vst [vmem:[%s2331_s23 + $0xb4] sm:$0xff] %v539_v62  ;;  %v417_v1 = vld [vmem:[%s2335_s24] sm:$0xff] }
  0x85   : >> { %542 = vst [vmem:[%s2331_s23 + $0xbc] sm:$0xff] %v541_v63  ;;  %544 = vst [vmem:[%s2331_s23 + $0xc4] sm:$0xff] %v543_v0  ;;  %v419_v2 = vld [vmem:[%s2335_s24 + $0x8] sm:$0xff]  ;;  %v451_v6 = vld [vmem:[%s2335_s24 + $0x50] sm:$0xff] }
  0x86   : >> { %v433_v3 = vld [vmem:[%s2335_s24 + $0x24] sm:$0xff]  ;;  %418 = vst [vmem:[%s2331_s23] sm:$0xff] %v417_v1  ;;  %420 = vst [vmem:[%s2331_s23 + $0x8] sm:$0xff] %v419_v2  ;;  %v435_v4 = vld [vmem:[%s2335_s24 + $0x2c] sm:$0xff] }
  0x87   : >> { %434 = vst [vmem:[%s2331_s23 + $0x14] sm:$0xff] %v433_v3  ;;  %v449_v5 = vld [vmem:[%s2335_s24 + $0x48] sm:$0xff]  ;;  %436 = vst [vmem:[%s2331_s23 + $0x1c] sm:$0xff] %v435_v4  ;;  %v467_v8 = vld [vmem:[%s2335_s24 + $0x74] sm:$0xff] }
  0x88   : >> { %450 = vst [vmem:[%s2331_s23 + $0x28] sm:$0xff] %v449_v5  ;;  %452 = vst [vmem:[%s2331_s23 + $0x30] sm:$0xff] %v451_v6  ;;  %v465_v7 = vld [vmem:[%s2335_s24 + $0x6c] sm:$0xff]  ;;  %v483_v10 = vld [vmem:[%s2335_s24 + $0x98] sm:$0xff] }
  0x89   : >> { %v481_v9 = vld [vmem:[%s2335_s24 + $0x90] sm:$0xff]  ;;  %466 = vst [vmem:[%s2331_s23 + $0x3c] sm:$0xff] %v465_v7  ;;  %468 = vst [vmem:[%s2331_s23 + $0x44] sm:$0xff] %v467_v8  ;;  %v499_v12 = vld [vmem:[%s2335_s24 + $0xbc] sm:$0xff] }
  0x8a   : >> { %482 = vst [vmem:[%s2331_s23 + $0x50] sm:$0xff] %v481_v9  ;;  %v497_v11 = vld [vmem:[%s2335_s24 + $0xb4] sm:$0xff]  ;;  %484 = vst [vmem:[%s2331_s23 + $0x58] sm:$0xff] %v483_v10  ;;  %v515_v14 = vld [vmem:[%s2335_s24 + $0xe0] sm:$0xff] }
  0x8b   : >> { %498 = vst [vmem:[%s2331_s23 + $0x64] sm:$0xff] %v497_v11  ;;  %500 = vst [vmem:[%s2331_s23 + $0x6c] sm:$0xff] %v499_v12  ;;  %v513_v13 = vld [vmem:[%s2335_s24 + $0xd8] sm:$0xff]  ;;  %v531_v16 = vld [vmem:[%s2335_s24 + $0x104] sm:$0xff] }
  0x8c   : >> { %v529_v15 = vld [vmem:[%s2335_s24 + $0xfc] sm:$0xff]  ;;  %514 = vst [vmem:[%s2331_s23 + $0x78] sm:$0xff] %v513_v13  ;;  %516 = vst [vmem:[%s2331_s23 + $0x80] sm:$0xff] %v515_v14  ;;  %v547_v18 = vld [vmem:[%s2335_s24 + $0x128] sm:$0xff] }
  0x8d   : >> { %530 = vst [vmem:[%s2331_s23 + $0x8c] sm:$0xff] %v529_v15  ;;  %v545_v17 = vld [vmem:[%s2335_s24 + $0x120] sm:$0xff]  ;;  %532 = vst [vmem:[%s2331_s23 + $0x94] sm:$0xff] %v531_v16  ;;  %v549_v19 = vld [vmem:[%s2335_s24 + $0x130] sm:$0xff]  ;;  %413 = sbr.rel (!%p410_p7) target bundleno = 109 (0x6d), region = 257 }
  0x8e   : >> { %546 = vst [vmem:[%s2331_s23 + $0xa0] sm:$0xff] %v545_v17  ;;  %548 = vst [vmem:[%s2331_s23 + $0xa8] sm:$0xff] %v547_v18  ;;  %v551_v20 = vld [vmem:[%s2335_s24 + $0x138] sm:$0xff]  ;;  %v553_v21 = vld [vmem:[%s2335_s24 + $0x140] sm:$0xff] }
  0x8f   : >> { %550 = vst [vmem:[%s2331_s23 + $0xb0] sm:$0xff] %v549_v19  ;;  %552 = vst [vmem:[%s2331_s23 + $0xb8] sm:$0xff] %v551_v20  ;;  %v555_v22 = vld [vmem:[%s2335_s24 + $0x148] sm:$0xff]  ;;  %v557_v23 = vld [vmem:[%s2335_s24 + $0x150] sm:$0xff] }
  0x90   : >> { %554 = vst [vmem:[%s2331_s23 + $0xc0] sm:$0xff] %v553_v21  ;;  %v559_v24 = vld [vmem:[%s2335_s24 + $0x158] sm:$0xff]  ;;  %556 = vst [vmem:[%s2331_s23 + $0xc8] sm:$0xff] %v555_v22  ;;  %s3538_s24 = smov %s2838_s8 }
  0x91   : >> { %558 = vst [vmem:[%s2331_s23 + $0xd0] sm:$0xff] %v557_v23  ;;  %560 = vst [vmem:[%s2331_s23 + $0xd8] sm:$0xff] %v559_v24  ;;  %s3537_s23 = smov %s2841_s9 }
  0x92 PF: > { %s2951_s10 = sand.u32 7, %s404_s17   ;;  %s1787_s6 = sshll.u32 %s2756_s22, 10 }
  0x93   : > { %s572_s7 = sshra.s32 %s1787_s6, 4  ;;  %p1711_p8 = scmp.le.s32.totalorder %s2951_s10, 0 }
  0x94   : > { %s2955_s11 = scalar_lea.vmem %s2494_s28, %s572_s7   ;;  %s2958_s29 = scalar_lea.vmem %s2498_s4, %s572_s7 [#allocation2]  }
  0x95   : > { %1602 = sbr.rel (%p1711_p8) target bundleno = 162 (0xa2), region = 262  ;;  %s3540_s23 = smov (!%p1711_p8), %s2958_s29 }
  0x96   : > { %s3541_s24 = smov (!%p1711_p8), %s2955_s11  ;;  %s2967_s25 = smov (!%p1711_p8), 0  }
  0x97   : > { %s2969_s26 = smov (!%p1711_p8), 0  }
  0x9a LB: >> { %v588_v25 = vld [vmem:[%s2351_s24] sm:$0xff]  ;;  %v592_v27 = vld [vmem:[%s2351_s24 + $0x48] sm:$0xff]  ;;  %s606_s17 = sadd.s32 1, %s2355_s25  ;;  %v596_v29 = vld [vmem:[%s2351_s24 + $0x90] sm:$0xff]  ;;  %s582_s26 = sadd.s32 1, %s2359_s26   ;;  %s2359_s26 = sphi %s2969_s26, %s582_s26   ;;  %s2355_s25 = sphi %s2967_s25, %s3542_s25   ;;  %s2351_s24 = sphi %s3541_s24, %s611_s24   ;;  %s2347_s23 = sphi %s3540_s23, %s612_s23  }
  0x9b   : >> { %v590_v26 = vld [vmem:[%s2351_s24 + $0x24] sm:$0xff]  ;;  %589 = vst [vmem:[%s2347_s23] sm:$0xff] %v588_v25  ;;  %593 = vst [vmem:[%s2347_s23 + $0x28] sm:$0xff] %v592_v27  ;;  %v594_v28 = vld [vmem:[%s2351_s24 + $0x6c] sm:$0xff]  ;;  %p607_p9 = scmp.ge.s32.totalorder %s606_s17, %s2951_s10  ;;  %p581_p10 = scmp.ge.s32.totalorder %s582_s26, %s2951_s10 }
  0x9c   : >> { %591 = vst [vmem:[%s2347_s23 + $0x14] sm:$0xff] %v590_v26  ;;  %v598_v30 = vld [vmem:[%s2351_s24 + $0xb4] sm:$0xff]  ;;  %595 = vst [vmem:[%s2347_s23 + $0x3c] sm:$0xff] %v594_v28  ;;  %v602_v32 = vld [vmem:[%s2351_s24 + $0xfc] sm:$0xff] }
  0x9d   : >> { %597 = vst [vmem:[%s2347_s23 + $0x50] sm:$0xff] %v596_v29  ;;  %599 = vst [vmem:[%s2347_s23 + $0x64] sm:$0xff] %v598_v30  ;;  %v600_v31 = vld [vmem:[%s2351_s24 + $0xd8] sm:$0xff]  ;;  %v604_v33 = vld [vmem:[%s2351_s24 + $0x120] sm:$0xff]  ;;  %s3565_s17 = smov (%p607_p9, %s606_s17), 0  ;;  %584 = sbr.rel (!%p581_p10) target bundleno = 154 (0x9a), region = 268 }
  0x9e   : >> { %601 = vst [vmem:[%s2347_s23 + $0x78] sm:$0xff] %v600_v31  ;;  %603 = vst [vmem:[%s2347_s23 + $0x8c] sm:$0xff] %v602_v32  ;;  %s1712_s22 = sshll.u32 %s3565_s17, 3  ;;  %s3542_s25 = smov %s3565_s17 }
  0x9f   : >> { %605 = vst [vmem:[%s2347_s23 + $0xa0] sm:$0xff] %v604_v33  ;;  %s611_s24 = scalar_lea.vmem %s2955_s11, %s1712_s22   ;;  %s612_s23 = scalar_lea.vmem %s2958_s29, %s1712_s22 [#allocation2]  }
  0xa2 PF: > { %s2425_s27 = smov 1  }
  0xa3   : > { %s613_s8 = sshll.u32 %s2425_s27, %s2502_s5 }
  0xa4   : > { %s1714_s9 = sadd.s32 4294967295, %s613_s8 }
  0xa5   : > { %v623_v34 = vld [vmem:[%s2749_s18] sm:%s1714_s9]  ;;  %v627_v36 = vld [vmem:[%s2749_s18 + $0x48] sm:%s1714_s9] }
  0xa6   : > { %v625_v35 = vld [vmem:[%s2749_s18 + $0x24] sm:%s1714_s9]  ;;  %624 = vst [vmem:[%s2752_s21] sm:%s1714_s9] %v623_v34 }
  0xa7   : > { %626 = vst [vmem:[%s2752_s21 + $0x14] sm:%s1714_s9] %v625_v35  ;;  %v629_v37 = vld [vmem:[%s2749_s18 + $0x6c] sm:%s1714_s9] }
  0xa8   : > { %628 = vst [vmem:[%s2752_s21 + $0x28] sm:%s1714_s9] %v627_v36  ;;  %630 = vst [vmem:[%s2752_s21 + $0x3c] sm:%s1714_s9] %v629_v37 }
  0xa9   : > { %v631_v38 = vld [vmem:[%s2749_s18 + $0x90] sm:%s1714_s9]  ;;  %v635_v40 = vld [vmem:[%s2749_s18 + $0xd8] sm:%s1714_s9] }
  0xaa   : > { %v633_v39 = vld [vmem:[%s2749_s18 + $0xb4] sm:%s1714_s9]  ;;  %632 = vst [vmem:[%s2752_s21 + $0x50] sm:%s1714_s9] %v631_v38 }
  0xab   : > { %634 = vst [vmem:[%s2752_s21 + $0x64] sm:%s1714_s9] %v633_v39  ;;  %v637_v41 = vld [vmem:[%s2749_s18 + $0xfc] sm:%s1714_s9] }
  0xac   : > { %636 = vst [vmem:[%s2752_s21 + $0x78] sm:%s1714_s9] %v635_v40  ;;  %638 = vst [vmem:[%s2752_s21 + $0x8c] sm:%s1714_s9] %v637_v41 }
  0xad   : > { %v639_v42 = vld [vmem:[%s2749_s18 + $0x120] sm:%s1714_s9] }
  0xae   : > { %640 = vst [vmem:[%s2752_s21 + $0xa0] sm:%s1714_s9] %v639_v42 }
  0xaf PF: > { %p1715_p11 = scmp.ge.u32.totalorder %s2496_s30, 8 }
  0xb0   : > { %s2426_s5 = smov (!%p1715_p11), 1  }
  0xb1   : > { %153 = sbr.rel (%p1715_p11) target bundleno = 192 (0xc0), region = 40  ;;  %s154_s18 = sshll.u32 (!%p1715_p11), %s2426_s5, %s2496_s30 }
  0xb2   : > { %s1716_s21 = sadd.s32 (!%p1715_p11), 4294967295, %s154_s18 }
  0xb6   : > { %v164_v43 = vld [vmem:[%s2494_s28] sm:%s1716_s21]  ;;  %v168_v45 = vld [vmem:[%s2494_s28 + $0x48] sm:%s1716_s21] }
  0xb7   : > { %v166_v44 = vld [vmem:[%s2494_s28 + $0x24] sm:%s1716_s21]  ;;  %165 = vst [vmem:[%s2498_s4] sm:%s1716_s21] %v164_v43 }
  0xb8   : > { %167 = vst [vmem:[%s2498_s4 + $0x14] sm:%s1716_s21] %v166_v44  ;;  %v170_v46 = vld [vmem:[%s2494_s28 + $0x6c] sm:%s1716_s21] }
  0xb9   : > { %169 = vst [vmem:[%s2498_s4 + $0x28] sm:%s1716_s21] %v168_v45  ;;  %171 = vst [vmem:[%s2498_s4 + $0x3c] sm:%s1716_s21] %v170_v46 }
  0xba   : > { %v172_v47 = vld [vmem:[%s2494_s28 + $0x90] sm:%s1716_s21]  ;;  %v176_v49 = vld [vmem:[%s2494_s28 + $0xd8] sm:%s1716_s21] }
  0xbb   : > { %v174_v48 = vld [vmem:[%s2494_s28 + $0xb4] sm:%s1716_s21]  ;;  %173 = vst [vmem:[%s2498_s4 + $0x50] sm:%s1716_s21] %v172_v47 }
  0xbc   : > { %175 = vst [vmem:[%s2498_s4 + $0x64] sm:%s1716_s21] %v174_v48  ;;  %v178_v50 = vld [vmem:[%s2494_s28 + $0xfc] sm:%s1716_s21] }
  0xbd   : > { %177 = vst [vmem:[%s2498_s4 + $0x78] sm:%s1716_s21] %v176_v49  ;;  %179 = vst [vmem:[%s2498_s4 + $0x8c] sm:%s1716_s21] %v178_v50 }
  0xbe   : > { %v180_v51 = vld [vmem:[%s2494_s28 + $0x120] sm:%s1716_s21] }
  0xbf   : > { %181 = vst [vmem:[%s2498_s4 + $0xa0] sm:%s1716_s21] %v180_v51 }
  0xc0 PF: > { %p1717_p12 = scmp.ge.s32.totalorder %s2295_s14, 1  ;;  %p643_p13 = scmp.lt.s32.totalorder %s2295_s14, 3 }
  0xc2   : > { %p644_p0 = pnand %p1717_p12, %p643_p13 }
  0xc3   : > { %s650_s30 = sand.u32 (!%p644_p0), 1, %s2287_s12  }
  0xc4   : > { %647 = sbr.rel (%p644_p0) target bundleno = 595 (0x253), region = 94 }
  0xc5   : > { %s1821_s10 = smul.u32 (!%p644_p0), 180, %s650_s30 }
  0xc6   : > { %s1822_s23 = smul.u32 (!%p644_p0), 40, %s650_s30 }
  0xc7   : > { %s3040_s14 = scalar_lea.vmem (!%p644_p0), [#allocation2], %s1821_s10 }
  0xc8   : > { %s3078_s24 = scalar_lea.vmem (!%p644_p0), [#allocation3], %s1822_s23  }
  0xc9   : > { %v2427_v52 = vmov 0   ;;  %v712_v53 = vld [vmem:[%s3523_s1] sm:$0xff]  ;;  %v713_v54 = vld [vmem:[%s3523_s1 + $0x8] sm:$0xff]  ;;  %vm850_vm0 = vcmask 1043456   ;;  %vm846_vm1 = vcmask 588800   ;;  %v2428_v17 = vmov 0.0  }
  0xca   : > { %898 = vmatprep.mubr.bf16.mxu0 %v2427_v52  ;;  %941 = vmatprep.mubr.bf16.mxu1 %v2427_v52  ;;  %v709_v55 = vld [vmem:[%s3040_s14 + $0xa0] sm:$0xff]  ;;  %v2113_v58 = vld [vmem:[%s3040_s14 + $0x7c] ss:$20 sps:$4 sm:$0xff]   ;;  %v2115_v60 = vld [vmem:[%s3040_s14 + $0x78] ss:$20 sps:$4 sm:$0xff]   ;;  %vm2429_vm2 = vmmov 0  }
  0xcb   : > { %2110 = vset.pattern.permute.xlu0 %v2427_v52  ;;  %v1740_v56 = vcombine.high %v709_v55, %v709_v55  ;;  %v1739_v57 = vcombine.low %v709_v55, %v709_v55  ;;  %v710_v61 = vld [vmem:[%s3040_s14 + $0xa8] sm:$0xff]  ;;  %v2126_v1 = vld [vmem:[%s3040_s14 + $0x84] ss:$20 sps:$4 sm:$0xff]   ;;  %v2129_v5 = vld [vmem:[%s3040_s14 + $0x80] ss:$20 sps:$4 sm:$0xff]   ;;  %s1048_s12 = smul.u32 (%p2483_p5), 5, %s2468_s15 }
  0xcc   : > { %716 = vperm.xlu0 %2110, %v712_v53   ;;  %v2116_v62 = vld [vmem:[%s3040_s14 + $0x54] ss:$20 sps:$4 sm:$0xff]   ;;  %v1742_v63 = vcombine.high %v710_v61, %v710_v61  ;;  %v1741_v0 = vcombine.low %v710_v61, %v710_v61  ;;  %v2118_v2 = vld [vmem:[%s3040_s14 + $0x50] ss:$20 sps:$4 sm:$0xff]   ;;  %v2119_v4 = vld [vmem:[%s3040_s14 + $0x2c] ss:$20 sps:$4 sm:$0xff]  }
  0xcd   : > { %1744 = vmatprep.subr.msk.bf16.mxu0 %vm850_vm0, %v1740_v56  ;;  %v852_v59 = vsel %vm850_vm0, %v1739_v57, 0  ;;  %v2131_v6 = vld [vmem:[%s3040_s14 + $0x5c] ss:$20 sps:$4 sm:$0xff]   ;;  %v2124_v8 = vld [vmem:[%s3040_s14 + $0x4] ss:$20 sps:$4 sm:$0xff]   ;;  %s1795_s25 = smul.u32 (%p2483_p5), 20, %s2468_s15 }
  0xce   : > { %873 = vmatpush1.bf16.msra.mxu0 %v852_v59  ;;  %1746 = vmatprep.subr.msk.bf16.mxu1 %vm850_vm0, %v1742_v63  ;;  %v858_v3 = vsel %vm850_vm0, %v1741_v0, 0  ;;  %v2122_v7 = vld [vmem:[%s3040_s14 + $0x28] ss:$20 sps:$4 sm:$0xff]   ;;  %v2133_v9 = vld [vmem:[%s3040_s14 + $0x58] ss:$20 sps:$4 sm:$0xff]   ;;  %s1049_s26 = ssub.s32 (%p2483_p5), 9, %s1048_s12 }
  0xcf   : > { %874 = vmatprep.subr.bf16.mxu0 %v2113_v58  ;;  %916 = vmatpush1.bf16.msra.mxu1 %v858_v3  ;;  %v2135_v10 = vld [vmem:[%s3040_s14 + $0x34] ss:$20 sps:$4 sm:$0xff]   ;;  %v2137_v12 = vld [vmem:[%s3040_s14 + $0x30] ss:$20 sps:$4 sm:$0xff]   ;;  %v2139_v14 = vld [vmem:[%s3040_s14 + $0xc] ss:$20 sps:$4 sm:$0xff]   ;;  %s3093_s27 = scalar_lea.vmem (%p2483_p5), %s3525_s3, %s1795_s25  }
  0xd0   : > { %721 = vperm.xlu0 %2110, %v713_v54   ;;  %917 = vmatprep.subr.bf16.mxu1 %v2126_v1  ;;  %v2128_v11 = vld [vmem:[%s3040_s14] ss:$20 sps:$4 sm:$0xff]   ;;  %v2134_v13 = vld [vmem:[%s3040_s14 + $0xb0] ss:$0 sps:$4 sm:$0xff]   ;;  %v2141_v16 = vld [vmem:[%s3040_s14 + $0x8] ss:$20 sps:$4 sm:$0xff]  }
  0xd1   : > { %v2130_v15 = vld [vmem:[%s3522_s0] sm:$0xff]   ;;  %v864_v18 = vsel %vm850_vm0, %v2134_v13, 0  ;;  %v2138_v19 = vld [vmem:[%s3040_s14 + $0x88] ss:$20 sps:$4 sm:$0xff]   ;;  %p1050_p1 = scmp.lt.s32.totalorder (%p2483_p5), %s1049_s26, 5 }
  0xd2   : > { %875 = vmatpush1.bf16.msra.mxu0 %v2115_v60  ;;  %v2142_v20 = vld [vmem:[%s3040_s14 + $0x60] ss:$20 sps:$4 sm:$0xff]   ;;  %v2143_v21 = vld [vmem:[%s3040_s14 + $0x38] ss:$20 sps:$4 sm:$0xff]   ;;  %v2144_v22 = vld [vmem:[%s3040_s14 + $0x10] ss:$20 sps:$4 sm:$0xff]  }
  0xd3   : > { %876 = vmatprep.subr.bf16.mxu0 %v2116_v62  ;;  %918 = vmatpush1.bf16.msra.mxu1 %v2129_v5 }
  0xd4   : > { %919 = vmatprep.subr.bf16.mxu1 %v2131_v6 }
  0xd6   : > { %877 = vmatpush1.bf16.msra.mxu0 %v2118_v2 }
  0xd7   : > { %878 = vmatprep.subr.bf16.mxu0 %v2119_v4  ;;  %920 = vmatpush1.bf16.msra.mxu1 %v2133_v9 }
  0xd8   : > { %921 = vmatprep.subr.bf16.mxu1 %v2135_v10 }
  0xda   : > { %879 = vmatpush1.bf16.msra.mxu0 %v2122_v7 }
  0xdb   : > { %880 = vmatprep.subr.bf16.mxu0 %v2124_v8  ;;  %922 = vmatpush1.bf16.msra.mxu1 %v2137_v12 }
  0xdc   : > { %923 = vmatprep.subr.bf16.mxu1 %v2139_v14 }
  0xde   : > { %881 = vmatpush1.bf16.msra.mxu0 %v2128_v11 }
  0xdf   : > { %1806 = vmatprep.subr.bf16.mxu0 %v2428_v17  ;;  %924 = vmatpush1.bf16.msra.mxu1 %v2141_v16 }
  0xe1   : > { %1745 = vmatmul.mubr.msk.bf16.vlgmr.msra.gmra.mxu0 %vm846_vm1, %v2130_v15 }
  0xe2   : > { %1807 = vmatpush3.bf16.msra.mxu0 %v864_v18  ;;  %1816 = vmatprep.mubr.msk.bf16.mxu0 %vm2429_vm2, %v2428_v17 }
  0xe3   : > { %1808 = vmatprep.subr.bf16.mxu0 %v2428_v17  ;;  %1747 = vmatmul.mubr.msk.bf16.vlgmr.msra.gmra.mxu1 %vm846_vm1, %v2130_v15 }
  0xe6   : > { %1809 = vmatpush3.bf16.msra.mxu0 %v2138_v19 }
  0xe7   : > { %1810 = vmatprep.subr.bf16.mxu0 %v2428_v17 }
  0xea   : > { %1811 = vmatpush3.bf16.msra.mxu0 %v2142_v20 }
  0xeb   : > { %1812 = vmatprep.subr.bf16.mxu0 %v2428_v17 }
  0xee   : > { %1813 = vmatpush3.bf16.msra.mxu0 %v2143_v21 }
  0xef   : > { %1814 = vmatprep.subr.bf16.mxu0 %v2428_v17 }
  0xf2   : > { %1815 = vmatpush3.bf16.msra.mxu0 %v2144_v22 }
  0xf5   : > { %1817 = vmatmul.mubr.msk.bf16.vlgmr.msra.gmra.mxu0 %vm846_vm1, %v2130_v15 }
 0x147   : > { %v717_v23 = vpop.permute.xlu0 %716 }
 0x14b   : > { %v722_v27 = vpop.permute.xlu0 %721 }
 0x1a1   : > { %v900_v24 = vpop.f32.mrf.mxu0 }
 0x1a2   : > { %v901_v25 = vadd.f32 %v900_v24, %v717_v23 }
 0x1a3   : > { %v902_v26 = vpop.f32.mrf.mxu0  ;;  %v943_v31 = vpop.f32.mrf.mxu1 }
 0x1a4   : > { %v993_v28 = vmax.f32 %v901_v25, 0.0  ;;  %v903_v29 = vadd.f32 %v902_v26, %v717_v23  ;;  %v944_v34 = vadd.f32 %v943_v31, %v717_v23 }
 0x1a5   : > { %v904_v30 = vpop.f32.mrf.mxu0  ;;  %v945_v36 = vpop.f32.mrf.mxu1 }
 0x1a6   : > { %v994_v32 = vmax.f32 %v903_v29, 0.0  ;;  %v905_v33 = vadd.f32 %v904_v30, %v722_v27  ;;  %v995_v39 = vmax.f32 %v944_v34, 0.0  ;;  %v946_v40 = vadd.f32 %v945_v36, %v717_v23 }
 0x1a7   : > { %v906_v35 = vpop.f32.mrf.mxu0  ;;  %v947_v41 = vpop.f32.mrf.mxu1 }
 0x1a8   : > { %v1789_v37 = vpack.c.bf16 %v994_v32, %v993_v28  ;;  %v907_v38 = vadd.f32 %v906_v35, %v722_v27  ;;  %v998_v42 = vmax.f32 %v905_v33, 0.0  ;;  %v948_v44 = vadd.f32 %v947_v41, %v722_v27 }
 0x1a9   : > { %v996_v45 = vmax.f32 %v946_v40, 0.0  ;;  %v949_v46 = vpop.f32.mrf.mxu1 }
 0x1aa   : > { %1035 = vst [vmem:[%s3078_s24] sm:$0xff] %v1789_v37  ;;  %v999_v43 = vmax.f32 %v907_v38, 0.0  ;;  %v1000_v48 = vmax.f32 %v948_v44, 0.0  ;;  %v950_v49 = vadd.f32 %v949_v46, %v722_v27 }
 0x1ab   : > { %v1790_v50 = vpack.c.bf16 %v996_v45, %v995_v39 }
 0x1ac   : > { %v1792_v47 = vpack.c.bf16 %v999_v43, %v998_v42  ;;  %v1001_v51 = vmax.f32 %v950_v49, 0.0 }
 0x1ad   : > { %1036 = vst [vmem:[%s3078_s24 + $0x8] sm:$0xff] %v1790_v50 }
 0x1ae   : > { %1038 = vst [vmem:[%s3078_s24 + $0x14] sm:$0xff] %v1792_v47  ;;  %v1793_v52 = vpack.c.bf16 %v1001_v51, %v1000_v48 }
 0x1b0   : > { %1039 = vst [vmem:[%s3078_s24 + $0x1c] sm:$0xff] %v1793_v52 }
 0x1b5   : > { %v986_v53 = vpop.f32.mrf.mxu0 }
 0x1b6   : > { %v987_v54 = vadd.f32 %v986_v53, %v717_v23 }
 0x1b7   : > { %v1818_v55 = vpop.f32.mrf.mxu0 }
 0x1b8   : > { %v997_v56 = vmax.f32 %v987_v54, 0.0 }
 0x1b9   : > { %v989_v57 = vpop.f32.mrf.mxu0 }
 0x1ba   : > { %v1791_v58 = vpack.c.bf16 %v997_v56, %v997_v56  ;;  %v990_v59 = vadd.f32 %v989_v57, %v722_v27 }
 0x1bb   : > { %v1819_v60 = vpop.f32.mrf.mxu0 }
 0x1bc   : > { %1037 = vst [vmem:[%s3078_s24 + $0x10] sm:$0xf] %v1791_v58  ;;  %v1002_v61 = vmax.f32 %v990_v59, 0.0  ;;  %1047 = sbr.rel (!%p2483_p5) target bundleno = 595 (0x253), region = 102 }
 0x1be   : > { %v1794_v62 = vpack.c.bf16 %v1002_v61, %v1002_v61 }
 0x1c0   : > { %1040 = vst [vmem:[%s3078_s24 + $0x24] sm:$0xf] %v1794_v62 }
 0x1c1   : > { %s3567_s26 = smov (!%p1050_p1, %s1049_s26), 5 }
 0x1c2   : > { %s1755_s8 = sshll.u32 %s3567_s26, 7  ;;  %s3095_s9 = sshll.u32 %s3567_s26, 2 }
 0x1c3   : > { %p1759_p2 = scmp.eq.s32.totalorder %s1755_s8, 0 }
 0x1c4   : > { %p1060_p3 = scmp.lt.u32.totalorder (!%p1759_p2), %s3095_s9, 8 }
 0x1c5   : > { %1059 = sbr.rel (%p1759_p2) target bundleno = 595 (0x253), region = 106 }
 0x1ca   : > { %1063 = sbr.rel (%p1060_p3) target bundleno = 586 (0x24a), region = 110  ;;  %s3099_s20 = sand.u32 (!%p1060_p3), 7, %s3095_s9  }
 0x1cb   : > { %p1082_p5 = scmp.eq.s32.totalorder (!%p1060_p3), %s3099_s20, 0  ;;  %p1760_p4 = scmp.ne.s32.totalorder (!%p1060_p3), %s3099_s20, 0 }
 0x1cf   : > { %1085 = sbr.rel (%p1760_p4) target bundleno = 522 (0x20a), region = 125  ;;  %s1086_s15 = sshrl.u32 (!%p1760_p4), %s3095_s9, 3 }
 0x1d0   : > { %s3106_s5 = sshrl.u32 (!%p1760_p4), %s1086_s15, 5 }
 0x1d1   : > { %p1761_p6 = scmp.le.s32.totalorder (!%p1760_p4), %s3106_s5, 0 }
 0x1d4   : > { %1616 = sbr.rel (%p1761_p6) target bundleno = 506 (0x1fa), region = 273  ;;  %s3543_s18 = smov (!%p1761_p6), %s3093_s27 }
 0x1d5   : > { %s3544_s21 = smov (!%p1761_p6), %s3078_s24  ;;  %s3115_s30 = smov (!%p1761_p6), 0  }
 0x1d6   : > { %s3117_s10 = smov (!%p1761_p6), 0  }
 0x1d9 LB: >> { %v1107_v63 = vld [vmem:[%s2367_s21 + $0x20] sm:$0xff]  ;;  %v1109_v0 = vld [vmem:[%s2367_s21 + $0x28] sm:$0xff]  ;;  %v1111_v1 = vld [vmem:[%s2367_s21 + $0x30] sm:$0xff]  ;;  %s1227_s28 = sadd.s32 1, %s2371_s30  ;;  %s1093_s10 = sadd.s32 1, %s2375_s10   ;;  %s2375_s10 = sphi %s3117_s10, %s1093_s10   ;;  %s2371_s30 = sphi %s3115_s30, %s3547_s30   ;;  %s2367_s21 = sphi %s3544_s21, %s3546_s21   ;;  %s2363_s18 = sphi %s3543_s18, %s3545_s18  }
 0x1da   : >> { %1108 = vst [vmem:[%s2363_s18 + $0x20] sm:$0xff] %v1107_v63  ;;  %1110 = vst [vmem:[%s2363_s18 + $0x28] sm:$0xff] %v1109_v0  ;;  %v1113_v2 = vld [vmem:[%s2367_s21 + $0x38] sm:$0xff]  ;;  %v1115_v3 = vld [vmem:[%s2367_s21 + $0x40] sm:$0xff]  ;;  %p1228_p7 = scmp.ge.s32.totalorder %s1227_s28, %s3106_s5  ;;  %p1092_p8 = scmp.ge.s32.totalorder %s1093_s10, %s3106_s5 }
 0x1db   : >> { %1112 = vst [vmem:[%s2363_s18 + $0x30] sm:$0xff] %v1111_v1  ;;  %v1117_v4 = vld [vmem:[%s2367_s21 + $0x48] sm:$0xff]  ;;  %1114 = vst [vmem:[%s2363_s18 + $0x38] sm:$0xff] %v1113_v2  ;;  %v1119_v5 = vld [vmem:[%s2367_s21 + $0x50] sm:$0xff] }
 0x1dc   : >> { %1116 = vst [vmem:[%s2363_s18 + $0x40] sm:$0xff] %v1115_v3  ;;  %1118 = vst [vmem:[%s2363_s18 + $0x48] sm:$0xff] %v1117_v4  ;;  %v1121_v6 = vld [vmem:[%s2367_s21 + $0x58] sm:$0xff]  ;;  %v1123_v7 = vld [vmem:[%s2367_s21 + $0x60] sm:$0xff]  ;;  %s3569_s28 = smov (%p1228_p7, %s1227_s28), 0 }
 0x1dd   : >> { %1120 = vst [vmem:[%s2363_s18 + $0x50] sm:$0xff] %v1119_v5  ;;  %1122 = vst [vmem:[%s2363_s18 + $0x58] sm:$0xff] %v1121_v6  ;;  %v1125_v8 = vld [vmem:[%s2367_s21 + $0x68] sm:$0xff]  ;;  %v1127_v9 = vld [vmem:[%s2367_s21 + $0x70] sm:$0xff]  ;;  %s1762_s4 = sshll.u32 %s3569_s28, 8  ;;  %s3547_s30 = smov %s3569_s28 }
 0x1de   : >> { %1124 = vst [vmem:[%s2363_s18 + $0x60] sm:$0xff] %v1123_v7  ;;  %v1129_v10 = vld [vmem:[%s2367_s21 + $0x78] sm:$0xff]  ;;  %1126 = vst [vmem:[%s2363_s18 + $0x68] sm:$0xff] %v1125_v8  ;;  %v1131_v11 = vld [vmem:[%s2367_s21 + $0x80] sm:$0xff]  ;;  %s3188_s6 = scalar_lea.vmem %s3078_s24, %s1762_s4 [#allocation3]   ;;  %s3191_s7 = scalar_lea.vmem %s3093_s27, %s1762_s4  }
 0x1df   : >> { %1128 = vst [vmem:[%s2363_s18 + $0x70] sm:$0xff] %v1127_v9  ;;  %1130 = vst [vmem:[%s2363_s18 + $0x78] sm:$0xff] %v1129_v10  ;;  %v1133_v12 = vld [vmem:[%s2367_s21 + $0x88] sm:$0xff]  ;;  %v1135_v13 = vld [vmem:[%s2367_s21 + $0x90] sm:$0xff] }
 0x1e0   : >> { %1132 = vst [vmem:[%s2363_s18 + $0x80] sm:$0xff] %v1131_v11  ;;  %1134 = vst [vmem:[%s2363_s18 + $0x88] sm:$0xff] %v1133_v12  ;;  %v1137_v14 = vld [vmem:[%s2367_s21 + $0x98] sm:$0xff]  ;;  %v1139_v15 = vld [vmem:[%s2367_s21 + $0xa0] sm:$0xff] }
 0x1e1   : >> { %1136 = vst [vmem:[%s2363_s18 + $0x90] sm:$0xff] %v1135_v13  ;;  %v1141_v16 = vld [vmem:[%s2367_s21 + $0xa8] sm:$0xff]  ;;  %1138 = vst [vmem:[%s2363_s18 + $0x98] sm:$0xff] %v1137_v14  ;;  %v1143_v17 = vld [vmem:[%s2367_s21 + $0xb0] sm:$0xff] }
 0x1e2   : >> { %1140 = vst [vmem:[%s2363_s18 + $0xa0] sm:$0xff] %v1139_v15  ;;  %1142 = vst [vmem:[%s2363_s18 + $0xa8] sm:$0xff] %v1141_v16  ;;  %v1145_v18 = vld [vmem:[%s2367_s21 + $0xb8] sm:$0xff]  ;;  %v1147_v19 = vld [vmem:[%s2367_s21 + $0xc0] sm:$0xff] }
 0x1e3   : >> { %1144 = vst [vmem:[%s2363_s18 + $0xb0] sm:$0xff] %v1143_v17  ;;  %1146 = vst [vmem:[%s2363_s18 + $0xb8] sm:$0xff] %v1145_v18  ;;  %v1149_v20 = vld [vmem:[%s2367_s21 + $0xc8] sm:$0xff]  ;;  %v1151_v21 = vld [vmem:[%s2367_s21 + $0xd0] sm:$0xff] }
 0x1e4   : >> { %1148 = vst [vmem:[%s2363_s18 + $0xc0] sm:$0xff] %v1147_v19  ;;  %v1153_v22 = vld [vmem:[%s2367_s21 + $0xd8] sm:$0xff]  ;;  %1150 = vst [vmem:[%s2363_s18 + $0xc8] sm:$0xff] %v1149_v20  ;;  %v1155_v23 = vld [vmem:[%s2367_s21 + $0xe0] sm:$0xff] }
 0x1e5   : >> { %1152 = vst [vmem:[%s2363_s18 + $0xd0] sm:$0xff] %v1151_v21  ;;  %1154 = vst [vmem:[%s2363_s18 + $0xd8] sm:$0xff] %v1153_v22  ;;  %v1157_v24 = vld [vmem:[%s2367_s21 + $0xe8] sm:$0xff]  ;;  %v1159_v25 = vld [vmem:[%s2367_s21 + $0xf0] sm:$0xff] }
 0x1e6   : >> { %1156 = vst [vmem:[%s2363_s18 + $0xe0] sm:$0xff] %v1155_v23  ;;  %1158 = vst [vmem:[%s2363_s18 + $0xe8] sm:$0xff] %v1157_v24  ;;  %v1161_v26 = vld [vmem:[%s2367_s21 + $0xf8] sm:$0xff]  ;;  %v1099_v27 = vld [vmem:[%s2367_s21] sm:$0xff] }
 0x1e7   : >> { %1160 = vst [vmem:[%s2363_s18 + $0xf0] sm:$0xff] %v1159_v25  ;;  %v1101_v28 = vld [vmem:[%s2367_s21 + $0x8] sm:$0xff]  ;;  %1162 = vst [vmem:[%s2363_s18 + $0xf8] sm:$0xff] %v1161_v26  ;;  %v1103_v29 = vld [vmem:[%s2367_s21 + $0x10] sm:$0xff] }
 0x1e8   : >> { %1100 = vst [vmem:[%s2363_s18] sm:$0xff] %v1099_v27  ;;  %1102 = vst [vmem:[%s2363_s18 + $0x8] sm:$0xff] %v1101_v28  ;;  %v1105_v30 = vld [vmem:[%s2367_s21 + $0x18] sm:$0xff]  ;;  %v1167_v33 = vld [vmem:[%s2367_s21 + $0x24] sm:$0xff] }
 0x1e9   : >> { %v1163_v31 = vld [vmem:[%s2367_s21 + $0x14] sm:$0xff]  ;;  %1104 = vst [vmem:[%s2363_s18 + $0x10] sm:$0xff] %v1103_v29  ;;  %1106 = vst [vmem:[%s2363_s18 + $0x18] sm:$0xff] %v1105_v30  ;;  %v1165_v32 = vld [vmem:[%s2367_s21 + $0x1c] sm:$0xff] }
 0x1ea   : >> { %1164 = vst [vmem:[%s2363_s18 + $0x24] sm:$0xff] %v1163_v31  ;;  %v1169_v34 = vld [vmem:[%s2367_s21 + $0x2c] sm:$0xff]  ;;  %1166 = vst [vmem:[%s2363_s18 + $0x2c] sm:$0xff] %v1165_v32  ;;  %v1171_v35 = vld [vmem:[%s2367_s21 + $0x34] sm:$0xff] }
 0x1eb   : >> { %1168 = vst [vmem:[%s2363_s18 + $0x34] sm:$0xff] %v1167_v33  ;;  %1170 = vst [vmem:[%s2363_s18 + $0x3c] sm:$0xff] %v1169_v34  ;;  %v1173_v36 = vld [vmem:[%s2367_s21 + $0x3c] sm:$0xff]  ;;  %v1175_v37 = vld [vmem:[%s2367_s21 + $0x44] sm:$0xff] }
 0x1ec   : >> { %1172 = vst [vmem:[%s2363_s18 + $0x44] sm:$0xff] %v1171_v35  ;;  %1174 = vst [vmem:[%s2363_s18 + $0x4c] sm:$0xff] %v1173_v36  ;;  %v1177_v38 = vld [vmem:[%s2367_s21 + $0x4c] sm:$0xff]  ;;  %v1179_v39 = vld [vmem:[%s2367_s21 + $0x54] sm:$0xff] }
 0x1ed   : >> { %1176 = vst [vmem:[%s2363_s18 + $0x54] sm:$0xff] %v1175_v37  ;;  %v1181_v40 = vld [vmem:[%s2367_s21 + $0x5c] sm:$0xff]  ;;  %1178 = vst [vmem:[%s2363_s18 + $0x5c] sm:$0xff] %v1177_v38  ;;  %v1183_v41 = vld [vmem:[%s2367_s21 + $0x64] sm:$0xff] }
 0x1ee   : >> { %1180 = vst [vmem:[%s2363_s18 + $0x64] sm:$0xff] %v1179_v39  ;;  %1182 = vst [vmem:[%s2363_s18 + $0x6c] sm:$0xff] %v1181_v40  ;;  %v1185_v42 = vld [vmem:[%s2367_s21 + $0x6c] sm:$0xff]  ;;  %v1187_v43 = vld [vmem:[%s2367_s21 + $0x74] sm:$0xff] }
 0x1ef   : >> { %1184 = vst [vmem:[%s2363_s18 + $0x74] sm:$0xff] %v1183_v41  ;;  %1186 = vst [vmem:[%s2363_s18 + $0x7c] sm:$0xff] %v1185_v42  ;;  %v1189_v44 = vld [vmem:[%s2367_s21 + $0x7c] sm:$0xff]  ;;  %v1191_v45 = vld [vmem:[%s2367_s21 + $0x84] sm:$0xff] }
 0x1f0   : >> { %1188 = vst [vmem:[%s2363_s18 + $0x84] sm:$0xff] %v1187_v43  ;;  %v1193_v46 = vld [vmem:[%s2367_s21 + $0x8c] sm:$0xff]  ;;  %1190 = vst [vmem:[%s2363_s18 + $0x8c] sm:$0xff] %v1189_v44  ;;  %v1195_v47 = vld [vmem:[%s2367_s21 + $0x94] sm:$0xff] }
 0x1f1   : >> { %1192 = vst [vmem:[%s2363_s18 + $0x94] sm:$0xff] %v1191_v45  ;;  %1194 = vst [vmem:[%s2363_s18 + $0x9c] sm:$0xff] %v1193_v46  ;;  %v1197_v48 = vld [vmem:[%s2367_s21 + $0x9c] sm:$0xff]  ;;  %v1199_v49 = vld [vmem:[%s2367_s21 + $0xa4] sm:$0xff] }
 0x1f2   : >> { %1196 = vst [vmem:[%s2363_s18 + $0xa4] sm:$0xff] %v1195_v47  ;;  %1198 = vst [vmem:[%s2363_s18 + $0xac] sm:$0xff] %v1197_v48  ;;  %v1201_v50 = vld [vmem:[%s2367_s21 + $0xac] sm:$0xff]  ;;  %v1203_v51 = vld [vmem:[%s2367_s21 + $0xb4] sm:$0xff] }
 0x1f3   : >> { %1200 = vst [vmem:[%s2363_s18 + $0xb4] sm:$0xff] %v1199_v49  ;;  %v1205_v52 = vld [vmem:[%s2367_s21 + $0xbc] sm:$0xff]  ;;  %1202 = vst [vmem:[%s2363_s18 + $0xbc] sm:$0xff] %v1201_v50  ;;  %v1207_v53 = vld [vmem:[%s2367_s21 + $0xc4] sm:$0xff] }
 0x1f4   : >> { %1204 = vst [vmem:[%s2363_s18 + $0xc4] sm:$0xff] %v1203_v51  ;;  %1206 = vst [vmem:[%s2363_s18 + $0xcc] sm:$0xff] %v1205_v52  ;;  %v1209_v54 = vld [vmem:[%s2367_s21 + $0xcc] sm:$0xff]  ;;  %v1211_v55 = vld [vmem:[%s2367_s21 + $0xd4] sm:$0xff] }
 0x1f5   : >> { %1208 = vst [vmem:[%s2363_s18 + $0xd4] sm:$0xff] %v1207_v53  ;;  %1210 = vst [vmem:[%s2363_s18 + $0xdc] sm:$0xff] %v1209_v54  ;;  %v1213_v56 = vld [vmem:[%s2367_s21 + $0xdc] sm:$0xff]  ;;  %v1215_v57 = vld [vmem:[%s2367_s21 + $0xe4] sm:$0xff]  ;;  %1095 = sbr.rel (!%p1092_p8) target bundleno = 473 (0x1d9), region = 279 }
 0x1f6   : >> { %1212 = vst [vmem:[%s2363_s18 + $0xe4] sm:$0xff] %v1211_v55  ;;  %v1217_v58 = vld [vmem:[%s2367_s21 + $0xec] sm:$0xff]  ;;  %1214 = vst [vmem:[%s2363_s18 + $0xec] sm:$0xff] %v1213_v56  ;;  %v1219_v59 = vld [vmem:[%s2367_s21 + $0xf4] sm:$0xff] }
 0x1f7   : >> { %1216 = vst [vmem:[%s2363_s18 + $0xf4] sm:$0xff] %v1215_v57  ;;  %1218 = vst [vmem:[%s2363_s18 + $0xfc] sm:$0xff] %v1217_v58  ;;  %v1221_v60 = vld [vmem:[%s2367_s21 + $0xfc] sm:$0xff]  ;;  %v1223_v61 = vld [vmem:[%s2367_s21 + $0x104] sm:$0xff] }
 0x1f8   : >> { %1220 = vst [vmem:[%s2363_s18 + $0x104] sm:$0xff] %v1219_v59  ;;  %1222 = vst [vmem:[%s2363_s18 + $0x10c] sm:$0xff] %v1221_v60  ;;  %v1225_v62 = vld [vmem:[%s2367_s21 + $0x10c] sm:$0xff]  ;;  %s3546_s21 = smov %s3188_s6 }
 0x1f9   : >> { %1224 = vst [vmem:[%s2363_s18 + $0x114] sm:$0xff] %v1223_v61  ;;  %1226 = vst [vmem:[%s2363_s18 + $0x11c] sm:$0xff] %v1225_v62  ;;  %s3545_s18 = smov %s3191_s7 }
 0x1fa PF: > { %s3285_s14 = sand.u32 31, %s1086_s15   ;;  %s1796_s11 = sshll.u32 %s3106_s5, 12 }
 0x1fb   : > { %s1238_s29 = sshra.s32 %s1796_s11, 4  ;;  %p1767_p9 = scmp.le.s32.totalorder %s3285_s14, 0 }
 0x1fc   : > { %s3289_s23 = scalar_lea.vmem %s3078_s24, %s1238_s29 [#allocation3]   ;;  %s1242_s12 = scalar_lea.vmem %s3093_s27, %s1238_s29  }
 0x1fd   : > { %1630 = sbr.rel (%p1767_p9) target bundleno = 522 (0x20a), region = 284  ;;  %s2377_s25 = smov (!%p1767_p9), %s1242_s12  }
 0x1fe   : > { %s2381_s26 = smov (!%p1767_p9), %s3289_s23   ;;  %s2385_s17 = smov (!%p1767_p9), 0  }
 0x1ff   : > { %s2389_s22 = smov (!%p1767_p9), 0  }
 0x202 LB: >> { %v1254_v63 = vld [vmem:[%s2383_s26] sm:$0xff]  ;;  %v1256_v0 = vld [vmem:[%s2383_s26 + $0x14] sm:$0xff]  ;;  %s1258_s8 = sadd.s32 1, %s2387_s17  ;;  %s1248_s22 = sadd.s32 1, %s2391_s22   ;;  %s2391_s22 = sphi %s2389_s22, %s1248_s22   ;;  %s2387_s17 = sphi %s2385_s17, %s2386_s17   ;;  %s2383_s26 = sphi %s2381_s26, %s1263_s26   ;;  %s2379_s25 = sphi %s2377_s25, %s1264_s25  }
 0x203   : >> { %1255 = vst [vmem:[%s2379_s25] sm:$0xff] %v1254_v63  ;;  %1257 = vst [vmem:[%s2379_s25 + $0x24] sm:$0xff] %v1256_v0  ;;  %p1259_p10 = scmp.ge.s32.totalorder %s1258_s8, %s3285_s14  ;;  %p1247_p11 = scmp.ge.s32.totalorder %s1248_s22, %s3285_s14 }
 0x205   : >> { %s3571_s8 = smov (%p1259_p10, %s1258_s8), 0  ;;  %1250 = sbr.rel (!%p1247_p11) target bundleno = 514 (0x202), region = 290 }
 0x206   : >> { %s1768_s15 = sshll.u32 %s3571_s8, 3  ;;  %s2386_s17 = smov %s3571_s8  }
 0x207   : >> { %s1263_s26 = scalar_lea.vmem %s3289_s23, %s1768_s15 [#allocation3]   ;;  %s1264_s25 = scalar_lea.vmem %s1242_s12, %s1768_s15  }
 0x20a PF: > { %1267 = sbr.rel (%p1082_p5) target bundleno = 586 (0x24a), region = 143  ;;  %s1269_s5 = ssub.s32 (!%p1082_p5), %s3095_s9, %s3099_s20 }
 0x20b   : > { %s1273_s18 = sshrl.u32 (!%p1082_p5), %s3095_s9, 3  ;;  %s3303_s21 = scalar_lea.vmem (!%p1082_p5), %s3078_s24, %s1269_s5 [#allocation3] }
 0x20c   : > { %s3306_s30 = scalar_lea.vmem (!%p1082_p5), %s3093_s27, %s1269_s5  ;;  %s3310_s10 = sshrl.u32 (!%p1082_p5), %s1273_s18, 5 }
 0x20d   : > { %p1770_p12 = scmp.le.s32.totalorder (!%p1082_p5), %s3310_s10, 0 }
 0x20f   : > { %1644 = sbr.rel (%p1770_p12) target bundleno = 565 (0x235), region = 295  ;;  %s3548_s28 = smov (!%p1770_p12), %s3093_s27 }
 0x210   : > { %s3549_s4 = smov (!%p1770_p12), %s3078_s24  ;;  %s3319_s6 = smov (!%p1770_p12), 0  }
 0x211   : > { %s3321_s7 = smov (!%p1770_p12), 0  }
 0x214 LB: >> { %v1294_v1 = vld [vmem:[%s2399_s4 + $0x20] sm:$0xff]  ;;  %v1296_v2 = vld [vmem:[%s2399_s4 + $0x28] sm:$0xff]  ;;  %v1298_v3 = vld [vmem:[%s2399_s4 + $0x30] sm:$0xff]  ;;  %s1414_s14 = sadd.s32 1, %s2403_s6  ;;  %s1280_s7 = sadd.s32 1, %s2407_s7   ;;  %s2407_s7 = sphi %s3321_s7, %s1280_s7   ;;  %s2403_s6 = sphi %s3319_s6, %s3552_s6   ;;  %s2399_s4 = sphi %s3549_s4, %s3551_s4   ;;  %s2395_s28 = sphi %s3548_s28, %s3550_s28  }
 0x215   : >> { %1295 = vst [vmem:[%s2395_s28 + $0x20] sm:$0xff] %v1294_v1  ;;  %1297 = vst [vmem:[%s2395_s28 + $0x28] sm:$0xff] %v1296_v2  ;;  %v1300_v4 = vld [vmem:[%s2399_s4 + $0x38] sm:$0xff]  ;;  %v1302_v5 = vld [vmem:[%s2399_s4 + $0x40] sm:$0xff]  ;;  %p1415_p13 = scmp.ge.s32.totalorder %s1414_s14, %s3310_s10  ;;  %p1279_p0 = scmp.ge.s32.totalorder %s1280_s7, %s3310_s10 }
 0x216   : >> { %1299 = vst [vmem:[%s2395_s28 + $0x30] sm:$0xff] %v1298_v3  ;;  %v1304_v6 = vld [vmem:[%s2399_s4 + $0x48] sm:$0xff]  ;;  %1301 = vst [vmem:[%s2395_s28 + $0x38] sm:$0xff] %v1300_v4  ;;  %v1306_v7 = vld [vmem:[%s2399_s4 + $0x50] sm:$0xff] }
 0x217   : >> { %1303 = vst [vmem:[%s2395_s28 + $0x40] sm:$0xff] %v1302_v5  ;;  %1305 = vst [vmem:[%s2395_s28 + $0x48] sm:$0xff] %v1304_v6  ;;  %v1308_v8 = vld [vmem:[%s2399_s4 + $0x58] sm:$0xff]  ;;  %v1310_v9 = vld [vmem:[%s2399_s4 + $0x60] sm:$0xff]  ;;  %s3573_s14 = smov (%p1415_p13, %s1414_s14), 0 }
 0x218   : >> { %1307 = vst [vmem:[%s2395_s28 + $0x50] sm:$0xff] %v1306_v7  ;;  %1309 = vst [vmem:[%s2395_s28 + $0x58] sm:$0xff] %v1308_v8  ;;  %v1312_v10 = vld [vmem:[%s2399_s4 + $0x68] sm:$0xff]  ;;  %v1314_v11 = vld [vmem:[%s2399_s4 + $0x70] sm:$0xff]  ;;  %s1771_s11 = sshll.u32 %s3573_s14, 8  ;;  %s3552_s6 = smov %s3573_s14 }
 0x219   : >> { %1311 = vst [vmem:[%s2395_s28 + $0x60] sm:$0xff] %v1310_v9  ;;  %v1316_v12 = vld [vmem:[%s2399_s4 + $0x78] sm:$0xff]  ;;  %1313 = vst [vmem:[%s2395_s28 + $0x68] sm:$0xff] %v1312_v10  ;;  %v1318_v13 = vld [vmem:[%s2399_s4 + $0x80] sm:$0xff]  ;;  %s3392_s29 = scalar_lea.vmem %s3078_s24, %s1771_s11 [#allocation3]   ;;  %s3395_s23 = scalar_lea.vmem %s3093_s27, %s1771_s11  }
 0x21a   : >> { %1315 = vst [vmem:[%s2395_s28 + $0x70] sm:$0xff] %v1314_v11  ;;  %1317 = vst [vmem:[%s2395_s28 + $0x78] sm:$0xff] %v1316_v12  ;;  %v1320_v14 = vld [vmem:[%s2399_s4 + $0x88] sm:$0xff]  ;;  %v1322_v15 = vld [vmem:[%s2399_s4 + $0x90] sm:$0xff] }
 0x21b   : >> { %1319 = vst [vmem:[%s2395_s28 + $0x80] sm:$0xff] %v1318_v13  ;;  %1321 = vst [vmem:[%s2395_s28 + $0x88] sm:$0xff] %v1320_v14  ;;  %v1324_v16 = vld [vmem:[%s2399_s4 + $0x98] sm:$0xff]  ;;  %v1326_v17 = vld [vmem:[%s2399_s4 + $0xa0] sm:$0xff] }
 0x21c   : >> { %1323 = vst [vmem:[%s2395_s28 + $0x90] sm:$0xff] %v1322_v15  ;;  %v1328_v18 = vld [vmem:[%s2399_s4 + $0xa8] sm:$0xff]  ;;  %1325 = vst [vmem:[%s2395_s28 + $0x98] sm:$0xff] %v1324_v16  ;;  %v1330_v19 = vld [vmem:[%s2399_s4 + $0xb0] sm:$0xff] }
 0x21d   : >> { %1327 = vst [vmem:[%s2395_s28 + $0xa0] sm:$0xff] %v1326_v17  ;;  %1329 = vst [vmem:[%s2395_s28 + $0xa8] sm:$0xff] %v1328_v18  ;;  %v1332_v20 = vld [vmem:[%s2399_s4 + $0xb8] sm:$0xff]  ;;  %v1334_v21 = vld [vmem:[%s2399_s4 + $0xc0] sm:$0xff] }
 0x21e   : >> { %1331 = vst [vmem:[%s2395_s28 + $0xb0] sm:$0xff] %v1330_v19  ;;  %1333 = vst [vmem:[%s2395_s28 + $0xb8] sm:$0xff] %v1332_v20  ;;  %v1336_v22 = vld [vmem:[%s2399_s4 + $0xc8] sm:$0xff]  ;;  %v1338_v23 = vld [vmem:[%s2399_s4 + $0xd0] sm:$0xff] }
 0x21f   : >> { %1335 = vst [vmem:[%s2395_s28 + $0xc0] sm:$0xff] %v1334_v21  ;;  %v1340_v24 = vld [vmem:[%s2399_s4 + $0xd8] sm:$0xff]  ;;  %1337 = vst [vmem:[%s2395_s28 + $0xc8] sm:$0xff] %v1336_v22  ;;  %v1342_v25 = vld [vmem:[%s2399_s4 + $0xe0] sm:$0xff] }
 0x220   : >> { %1339 = vst [vmem:[%s2395_s28 + $0xd0] sm:$0xff] %v1338_v23  ;;  %1341 = vst [vmem:[%s2395_s28 + $0xd8] sm:$0xff] %v1340_v24  ;;  %v1344_v26 = vld [vmem:[%s2399_s4 + $0xe8] sm:$0xff]  ;;  %v1346_v27 = vld [vmem:[%s2399_s4 + $0xf0] sm:$0xff] }
 0x221   : >> { %1343 = vst [vmem:[%s2395_s28 + $0xe0] sm:$0xff] %v1342_v25  ;;  %1345 = vst [vmem:[%s2395_s28 + $0xe8] sm:$0xff] %v1344_v26  ;;  %v1348_v28 = vld [vmem:[%s2399_s4 + $0xf8] sm:$0xff]  ;;  %v1286_v29 = vld [vmem:[%s2399_s4] sm:$0xff] }
 0x222   : >> { %1347 = vst [vmem:[%s2395_s28 + $0xf0] sm:$0xff] %v1346_v27  ;;  %v1288_v30 = vld [vmem:[%s2399_s4 + $0x8] sm:$0xff]  ;;  %1349 = vst [vmem:[%s2395_s28 + $0xf8] sm:$0xff] %v1348_v28  ;;  %v1290_v31 = vld [vmem:[%s2399_s4 + $0x10] sm:$0xff] }
 0x223   : >> { %1287 = vst [vmem:[%s2395_s28] sm:$0xff] %v1286_v29  ;;  %1289 = vst [vmem:[%s2395_s28 + $0x8] sm:$0xff] %v1288_v30  ;;  %v1292_v32 = vld [vmem:[%s2399_s4 + $0x18] sm:$0xff]  ;;  %v1354_v35 = vld [vmem:[%s2399_s4 + $0x24] sm:$0xff] }
 0x224   : >> { %v1350_v33 = vld [vmem:[%s2399_s4 + $0x14] sm:$0xff]  ;;  %1291 = vst [vmem:[%s2395_s28 + $0x10] sm:$0xff] %v1290_v31  ;;  %1293 = vst [vmem:[%s2395_s28 + $0x18] sm:$0xff] %v1292_v32  ;;  %v1352_v34 = vld [vmem:[%s2399_s4 + $0x1c] sm:$0xff] }
 0x225   : >> { %1351 = vst [vmem:[%s2395_s28 + $0x24] sm:$0xff] %v1350_v33  ;;  %v1356_v36 = vld [vmem:[%s2399_s4 + $0x2c] sm:$0xff]  ;;  %1353 = vst [vmem:[%s2395_s28 + $0x2c] sm:$0xff] %v1352_v34  ;;  %v1358_v37 = vld [vmem:[%s2399_s4 + $0x34] sm:$0xff] }
 0x226   : >> { %1355 = vst [vmem:[%s2395_s28 + $0x34] sm:$0xff] %v1354_v35  ;;  %1357 = vst [vmem:[%s2395_s28 + $0x3c] sm:$0xff] %v1356_v36  ;;  %v1360_v38 = vld [vmem:[%s2399_s4 + $0x3c] sm:$0xff]  ;;  %v1362_v39 = vld [vmem:[%s2399_s4 + $0x44] sm:$0xff] }
 0x227   : >> { %1359 = vst [vmem:[%s2395_s28 + $0x44] sm:$0xff] %v1358_v37  ;;  %1361 = vst [vmem:[%s2395_s28 + $0x4c] sm:$0xff] %v1360_v38  ;;  %v1364_v40 = vld [vmem:[%s2399_s4 + $0x4c] sm:$0xff]  ;;  %v1366_v41 = vld [vmem:[%s2399_s4 + $0x54] sm:$0xff] }
 0x228   : >> { %1363 = vst [vmem:[%s2395_s28 + $0x54] sm:$0xff] %v1362_v39  ;;  %v1368_v42 = vld [vmem:[%s2399_s4 + $0x5c] sm:$0xff]  ;;  %1365 = vst [vmem:[%s2395_s28 + $0x5c] sm:$0xff] %v1364_v40  ;;  %v1370_v43 = vld [vmem:[%s2399_s4 + $0x64] sm:$0xff] }
 0x229   : >> { %1367 = vst [vmem:[%s2395_s28 + $0x64] sm:$0xff] %v1366_v41  ;;  %1369 = vst [vmem:[%s2395_s28 + $0x6c] sm:$0xff] %v1368_v42  ;;  %v1372_v44 = vld [vmem:[%s2399_s4 + $0x6c] sm:$0xff]  ;;  %v1374_v45 = vld [vmem:[%s2399_s4 + $0x74] sm:$0xff] }
 0x22a   : >> { %1371 = vst [vmem:[%s2395_s28 + $0x74] sm:$0xff] %v1370_v43  ;;  %1373 = vst [vmem:[%s2395_s28 + $0x7c] sm:$0xff] %v1372_v44  ;;  %v1376_v46 = vld [vmem:[%s2399_s4 + $0x7c] sm:$0xff]  ;;  %v1378_v47 = vld [vmem:[%s2399_s4 + $0x84] sm:$0xff] }
 0x22b   : >> { %1375 = vst [vmem:[%s2395_s28 + $0x84] sm:$0xff] %v1374_v45  ;;  %v1380_v48 = vld [vmem:[%s2399_s4 + $0x8c] sm:$0xff]  ;;  %1377 = vst [vmem:[%s2395_s28 + $0x8c] sm:$0xff] %v1376_v46  ;;  %v1382_v49 = vld [vmem:[%s2399_s4 + $0x94] sm:$0xff] }
 0x22c   : >> { %1379 = vst [vmem:[%s2395_s28 + $0x94] sm:$0xff] %v1378_v47  ;;  %1381 = vst [vmem:[%s2395_s28 + $0x9c] sm:$0xff] %v1380_v48  ;;  %v1384_v50 = vld [vmem:[%s2399_s4 + $0x9c] sm:$0xff]  ;;  %v1386_v51 = vld [vmem:[%s2399_s4 + $0xa4] sm:$0xff] }
 0x22d   : >> { %1383 = vst [vmem:[%s2395_s28 + $0xa4] sm:$0xff] %v1382_v49  ;;  %1385 = vst [vmem:[%s2395_s28 + $0xac] sm:$0xff] %v1384_v50  ;;  %v1388_v52 = vld [vmem:[%s2399_s4 + $0xac] sm:$0xff]  ;;  %v1390_v53 = vld [vmem:[%s2399_s4 + $0xb4] sm:$0xff] }
 0x22e   : >> { %1387 = vst [vmem:[%s2395_s28 + $0xb4] sm:$0xff] %v1386_v51  ;;  %v1392_v54 = vld [vmem:[%s2399_s4 + $0xbc] sm:$0xff]  ;;  %1389 = vst [vmem:[%s2395_s28 + $0xbc] sm:$0xff] %v1388_v52  ;;  %v1394_v55 = vld [vmem:[%s2399_s4 + $0xc4] sm:$0xff] }
 0x22f   : >> { %1391 = vst [vmem:[%s2395_s28 + $0xc4] sm:$0xff] %v1390_v53  ;;  %1393 = vst [vmem:[%s2395_s28 + $0xcc] sm:$0xff] %v1392_v54  ;;  %v1396_v56 = vld [vmem:[%s2399_s4 + $0xcc] sm:$0xff]  ;;  %v1398_v57 = vld [vmem:[%s2399_s4 + $0xd4] sm:$0xff] }
 0x230   : >> { %1395 = vst [vmem:[%s2395_s28 + $0xd4] sm:$0xff] %v1394_v55  ;;  %1397 = vst [vmem:[%s2395_s28 + $0xdc] sm:$0xff] %v1396_v56  ;;  %v1400_v58 = vld [vmem:[%s2399_s4 + $0xdc] sm:$0xff]  ;;  %v1402_v59 = vld [vmem:[%s2399_s4 + $0xe4] sm:$0xff]  ;;  %1282 = sbr.rel (!%p1279_p0) target bundleno = 532 (0x214), region = 301 }
 0x231   : >> { %1399 = vst [vmem:[%s2395_s28 + $0xe4] sm:$0xff] %v1398_v57  ;;  %v1404_v60 = vld [vmem:[%s2399_s4 + $0xec] sm:$0xff]  ;;  %1401 = vst [vmem:[%s2395_s28 + $0xec] sm:$0xff] %v1400_v58  ;;  %v1406_v61 = vld [vmem:[%s2399_s4 + $0xf4] sm:$0xff] }
 0x232   : >> { %1403 = vst [vmem:[%s2395_s28 + $0xf4] sm:$0xff] %v1402_v59  ;;  %1405 = vst [vmem:[%s2395_s28 + $0xfc] sm:$0xff] %v1404_v60  ;;  %v1408_v62 = vld [vmem:[%s2399_s4 + $0xfc] sm:$0xff]  ;;  %v1410_v63 = vld [vmem:[%s2399_s4 + $0x104] sm:$0xff] }
 0x233   : >> { %1407 = vst [vmem:[%s2395_s28 + $0x104] sm:$0xff] %v1406_v61  ;;  %1409 = vst [vmem:[%s2395_s28 + $0x10c] sm:$0xff] %v1408_v62  ;;  %v1412_v0 = vld [vmem:[%s2399_s4 + $0x10c] sm:$0xff]  ;;  %s3551_s4 = smov %s3392_s29 }
 0x234   : >> { %1411 = vst [vmem:[%s2395_s28 + $0x114] sm:$0xff] %v1410_v63  ;;  %1413 = vst [vmem:[%s2395_s28 + $0x11c] sm:$0xff] %v1412_v0  ;;  %s3550_s28 = smov %s3395_s23 }
 0x235 PF: > { %s3489_s12 = sand.u32 31, %s1273_s18   ;;  %s1798_s25 = sshll.u32 %s3310_s10, 12 }
 0x236   : > { %s1425_s26 = sshra.s32 %s1798_s25, 4  ;;  %p1776_p1 = scmp.le.s32.totalorder %s3489_s12, 0 }
 0x237   : > { %s3493_s17 = scalar_lea.vmem %s3078_s24, %s1425_s26 [#allocation3]   ;;  %s1429_s22 = scalar_lea.vmem %s3093_s27, %s1425_s26  }
 0x238   : > { %1658 = sbr.rel (%p1776_p1) target bundleno = 581 (0x245), region = 306  ;;  %s2409_s8 = smov (!%p1776_p1), %s1429_s22  }
 0x239   : > { %s2413_s15 = smov (!%p1776_p1), %s3493_s17   ;;  %s2417_s5 = smov (!%p1776_p1), 0  }
 0x23a   : > { %s2421_s28 = smov (!%p1776_p1), 0  }
 0x23d LB: >> { %v1441_v1 = vld [vmem:[%s2415_s15] sm:$0xff]  ;;  %v1443_v2 = vld [vmem:[%s2415_s15 + $0x14] sm:$0xff]  ;;  %s1445_s18 = sadd.s32 1, %s2419_s5  ;;  %s1435_s28 = sadd.s32 1, %s2423_s28   ;;  %s2423_s28 = sphi %s2421_s28, %s1435_s28   ;;  %s2419_s5 = sphi %s2417_s5, %s2418_s5   ;;  %s2415_s15 = sphi %s2413_s15, %s1450_s15   ;;  %s2411_s8 = sphi %s2409_s8, %s1451_s8  }
 0x23e   : >> { %1442 = vst [vmem:[%s2411_s8] sm:$0xff] %v1441_v1  ;;  %1444 = vst [vmem:[%s2411_s8 + $0x24] sm:$0xff] %v1443_v2  ;;  %p1446_p2 = scmp.ge.s32.totalorder %s1445_s18, %s3489_s12  ;;  %p1434_p3 = scmp.ge.s32.totalorder %s1435_s28, %s3489_s12 }
 0x240   : >> { %s3575_s18 = smov (%p1446_p2, %s1445_s18), 0  ;;  %1437 = sbr.rel (!%p1434_p3) target bundleno = 573 (0x23d), region = 312 }
 0x241   : >> { %s1777_s10 = sshll.u32 %s3575_s18, 3  ;;  %s2418_s5 = smov %s3575_s18  }
 0x242   : >> { %s1450_s15 = scalar_lea.vmem %s3493_s17, %s1777_s10 [#allocation3]   ;;  %s1451_s8 = scalar_lea.vmem %s1429_s22, %s1777_s10  }
 0x245 PF: > { %s2430_s4 = smov 1  }
 0x246   : > { %s1452_s6 = sshll.u32 %s2430_s4, %s3099_s20 }
 0x247   : > { %s1779_s7 = sadd.s32 4294967295, %s1452_s6 }
 0x248   : > { %v1462_v3 = vld [vmem:[%s3303_s21] sm:%s1779_s7]  ;;  %v1464_v4 = vld [vmem:[%s3303_s21 + $0x14] sm:%s1779_s7] }
 0x249   : > { %1463 = vst [vmem:[%s3306_s30] sm:%s1779_s7] %v1462_v3  ;;  %1465 = vst [vmem:[%s3306_s30 + $0x24] sm:%s1779_s7] %v1464_v4 }
 0x24a PF: > { %p1780_p5 = scmp.ge.u32.totalorder %s3095_s9, 8 }
 0x24b   : > { %s2431_s14 = smov (!%p1780_p5), 1  }
 0x24c   : > { %1066 = sbr.rel (%p1780_p5) target bundleno = 595 (0x253), region = 114  ;;  %s1067_s11 = sshll.u32 (!%p1780_p5), %s2431_s14, %s3095_s9 }
 0x24d   : > { %s1781_s29 = sadd.s32 (!%p1780_p5), 4294967295, %s1067_s11 }
 0x251   : > { %v1077_v5 = vld [vmem:[%s3078_s24] sm:%s1781_s29]  ;;  %v1079_v6 = vld [vmem:[%s3078_s24 + $0x14] sm:%s1781_s29] }
 0x252   : > { %1078 = vst [vmem:[%s3093_s27] sm:%s1781_s29] %v1077_v5  ;;  %1080 = vst [vmem:[%s3093_s27 + $0x24] sm:%s1781_s29] %v1079_v6 }
 0x253 PF: > { %p10_p4 = scmp.ge.s32.totalorder %s2471_s16, 4   ;;  %s3553_s12 = smov %s2291_s13 }
 0x254   : > { %s3554_s13 = smov %s2481_s19  ;;  %s3555_s14 = smov %s2471_s16 }
 0x255   :  { %12 = sbr.rel (!%p10_p4) target bundleno = 2 (0x2), region = 323 }

// kernel: net_forward.7
= control target key start
LH: loop header
LB: loop body
LE: loop exit
PB: predicated region body
PF: predicated region fallthrough
CT: control target
= control target key end

     0   :  { %v358_v1 = vmov 0   ;;  %vm169_vm0 = vcmask 130048   ;;  %vm261_vm1 = vcmask 1043456   ;;  %vm262_vm2 = vcmask 932868   ;;  %s481_s2 = inlined_call_operand.vmem [shape: bf16[144,242], index: 2, kind: input, shape index: {}]   ;;  %s482_s0 = inlined_call_operand.vmem [shape: bf16[32,144], index: 0, kind: input, shape index: {}]   ;;  %s483_s1 = inlined_call_operand.vmem [shape: f32[32,1], index: 1, kind: input, shape index: {}]   ;;  %s484_s3 = inlined_call_operand.vmem [shape: bf16[32,242], index: 3, kind: output, shape index: {}]  }
   0x1   :  { %v325_v0 = vld [vmem:[%s481_s2 + $0x74] ss:$8 sps:$4 sm:$0xff]   ;;  %324 = vset.pattern.permute.xlu1 %v358_v1  ;;  %323 = vset.pattern.permute.xlu0 %v358_v1  ;;  %v327_v2 = vld [vmem:[%s481_s2 + $0x70] ss:$8 sps:$4 sm:$0xff]   ;;  %v328_v3 = vld [vmem:[%s481_s2 + $0x64] ss:$8 sps:$4 sm:$0xff]  }
   0x2   :  { %176 = vmatprep.subr.bf16.mxu0 %v325_v0  ;;  %304 = vmatprep.subr.bf16.mxu1 %v325_v0  ;;  %v330_v4 = vld [vmem:[%s481_s2 + $0x60] ss:$8 sps:$4 sm:$0xff]   ;;  %v331_v5 = vld [vmem:[%s481_s2 + $0x54] ss:$8 sps:$4 sm:$0xff]   ;;  %v333_v6 = vld [vmem:[%s481_s2 + $0x50] ss:$8 sps:$4 sm:$0xff]  }
   0x3   :  { %177 = vmatpush1.bf16.msra.mxu0 %v327_v2  ;;  %313 = vmatpush1.bf16.msra.mxu1 %v327_v2  ;;  %v334_v7 = vld [vmem:[%s481_s2 + $0x44] ss:$8 sps:$4 sm:$0xff]   ;;  %v336_v8 = vld [vmem:[%s481_s2 + $0x40] ss:$8 sps:$4 sm:$0xff]   ;;  %v337_v9 = vld [vmem:[%s481_s2 + $0x34] ss:$8 sps:$4 sm:$0xff]  }
   0x4   :  { %178 = vmatprep.subr.bf16.mxu0 %v328_v3  ;;  %305 = vmatprep.subr.bf16.mxu1 %v328_v3  ;;  %v354_v10 = vld [vmem:[%s482_s0 + $0x4] ss:$8 sps:$4 sm:$0xff]   ;;  %v357_v11 = vld [vmem:[%s482_s0 + $0x14] ss:$8 sps:$4 sm:$0xff]   ;;  %v339_v12 = vld [vmem:[%s481_s2 + $0x30] ss:$8 sps:$4 sm:$0xff]  }
   0x5   :  { %v39_v13 = vld [vmem:[%s483_s1 + $0x10] sm:$0xff]  ;;  %v37_v14 = vld [vmem:[%s483_s1] sm:$0xff]  ;;  %294 = vmatprep.mubr.msk.bf16.mxu0 %vm169_vm0, %v354_v10  ;;  %295 = vmatprep.mubr.msk.bf16.mxu1 %vm169_vm0, %v357_v11  ;;  %v40_v17 = vld [vmem:[%s483_s1 + $0x18] sm:$0xff] }
   0x6   :  { %v340_v15 = vld [vmem:[%s481_s2 + $0x24] ss:$8 sps:$4 sm:$0xff]   ;;  %53 = vperm.xlu1 %324, %v39_v13   ;;  %43 = vperm.xlu0 %323, %v37_v14   ;;  %v342_v16 = vld [vmem:[%s481_s2 + $0x20] ss:$8 sps:$4 sm:$0xff]   ;;  %v343_v19 = vld [vmem:[%s481_s2 + $0x14] ss:$8 sps:$4 sm:$0xff]  }
   0x7   :  { %179 = vmatpush1.bf16.msra.mxu0 %v330_v4  ;;  %314 = vmatpush1.bf16.msra.mxu1 %v330_v4  ;;  %v38_v18 = vld [vmem:[%s483_s1 + $0x8] sm:$0xff]  ;;  %v345_v20 = vld [vmem:[%s481_s2 + $0x10] ss:$8 sps:$4 sm:$0xff]   ;;  %vm457_vm3 = vmor %vm262_vm2, %vm261_vm1 }
   0x8   :  { %180 = vmatprep.subr.bf16.mxu0 %v331_v5  ;;  %306 = vmatprep.subr.bf16.mxu1 %v331_v5  ;;  %v346_v21 = vld [vmem:[%s481_s2 + $0x4] ss:$8 sps:$4 sm:$0xff]   ;;  %v348_v22 = vld [vmem:[%s481_s2] ss:$8 sps:$4 sm:$0xff]   ;;  %v355_v26 = vld [vmem:[%s482_s0 + $0x10] ss:$8 sps:$4 sm:$0xff]  }
   0x9   :  { %v349_v23 = vld [vmem:[%s481_s2 + $0x84] ss:$8 sps:$4 sm:$0xff]   ;;  %v351_v24 = vld [vmem:[%s481_s2 + $0x80] ss:$8 sps:$4 sm:$0xff]  }
   0xa   :  { %58 = vperm.xlu1 %324, %v40_v17   ;;  %48 = vperm.xlu0 %323, %v38_v18   ;;  %v352_v25 = vld [vmem:[%s482_s0] ss:$8 sps:$4 sm:$0xff]  }
   0xb   :  { %181 = vmatpush1.bf16.msra.mxu0 %v333_v6  ;;  %315 = vmatpush1.bf16.msra.mxu1 %v333_v6 }
   0xc   :  { %182 = vmatprep.subr.bf16.mxu0 %v334_v7  ;;  %307 = vmatprep.subr.bf16.mxu1 %v334_v7 }
   0xf   :  { %183 = vmatpush1.bf16.msra.mxu0 %v336_v8  ;;  %316 = vmatpush1.bf16.msra.mxu1 %v336_v8 }
  0x10   :  { %184 = vmatprep.subr.bf16.mxu0 %v337_v9  ;;  %308 = vmatprep.subr.bf16.mxu1 %v337_v9 }
  0x13   :  { %185 = vmatpush1.bf16.msra.mxu0 %v339_v12  ;;  %317 = vmatpush1.bf16.msra.mxu1 %v339_v12 }
  0x14   :  { %186 = vmatprep.subr.bf16.mxu0 %v340_v15  ;;  %309 = vmatprep.subr.bf16.mxu1 %v340_v15 }
  0x17   :  { %187 = vmatpush1.bf16.msra.mxu0 %v342_v16  ;;  %318 = vmatpush1.bf16.msra.mxu1 %v342_v16 }
  0x18   :  { %188 = vmatprep.subr.bf16.mxu0 %v343_v19  ;;  %310 = vmatprep.subr.bf16.mxu1 %v343_v19 }
  0x1b   :  { %189 = vmatpush1.bf16.msra.mxu0 %v345_v20  ;;  %319 = vmatpush1.bf16.msra.mxu1 %v345_v20 }
  0x1c   :  { %190 = vmatprep.subr.bf16.mxu0 %v346_v21  ;;  %311 = vmatprep.subr.bf16.mxu1 %v346_v21 }
  0x1f   :  { %191 = vmatpush1.bf16.msra.mxu0 %v348_v22  ;;  %320 = vmatpush1.bf16.msra.mxu1 %v348_v22 }
  0x20   :  { %206 = vmatprep.subr.bf16.mxu0 %v349_v23  ;;  %312 = vmatprep.subr.bf16.mxu1 %v349_v23 }
  0x23   :  { %207 = vmatpush2.bf16.msra.mxu0 %v351_v24  ;;  %321 = vmatpush2.bf16.msra.mxu1 %v351_v24 }
  0x26   :  { %209 = vmatmul.mubr.bf16.vlgmr.msra.gmra.mxu0 %v352_v25  ;;  %219 = vmatmul.mubr.bf16.vlgmr.msra.gmra.mxu1 %v355_v26 }
  0x81   :  { %v54_v27 = vpop.permute.xlu1 %53  ;;  %v44_v28 = vpop.permute.xlu0 %43 }
  0x85   :  { %v59_v41 = vpop.permute.xlu1 %58  ;;  %v49_v42 = vpop.permute.xlu0 %48 }
  0xe6   :  { %v210_v29 = vpop.f32.mrf.mxu0  ;;  %v220_v30 = vpop.f32.mrf.mxu1 }
  0xe7   :  { %v211_v31 = vadd.f32 %v210_v29, %v44_v28  ;;  %v221_v32 = vadd.f32 %v220_v30, %v54_v27 }
  0xe8   :  { %v212_v33 = vpop.f32.mrf.mxu0  ;;  %v222_v34 = vpop.f32.mrf.mxu1 }
  0xe9   :  { %v213_v35 = vadd.f32 %v212_v33, %v44_v28  ;;  %v223_v36 = vadd.f32 %v222_v34, %v54_v27  ;;  %v229_v39 = vmax.f32 %v211_v31, 0.0  ;;  %v233_v40 = vmax.f32 %v221_v32, 0.0 }
  0xea   :  { %v214_v37 = vpop.f32.mrf.mxu0  ;;  %v224_v38 = vpop.f32.mrf.mxu1 }
  0xeb   :  { %v230_v43 = vmax.f32 %v213_v35, 0.0  ;;  %v234_v44 = vmax.f32 %v223_v36, 0.0  ;;  %v215_v46 = vadd.f32 %v214_v37, %v49_v42  ;;  %v225_v47 = vadd.f32 %v224_v38, %v59_v41 }
  0xec   :  { %v216_v48 = vpop.f32.mrf.mxu0  ;;  %v226_v49 = vpop.f32.mrf.mxu1 }
  0xed   :  { %v300_v50 = vpack.c.bf16 %v230_v43, %v229_v39  ;;  %v302_v51 = vpack.c.bf16 %v234_v44, %v233_v40  ;;  %v217_v52 = vadd.f32 %v216_v48, %v49_v42  ;;  %v227_v53 = vadd.f32 %v226_v49, %v59_v41 }
  0xee   :  { %v231_v54 = vmax.f32 %v215_v46, 0.0  ;;  %v235_v55 = vmax.f32 %v225_v47, 0.0 }
  0xef   :  { %264 = vst.msk [vmem:[%s484_s3] sm:$0xff] %vm457_vm3, %v300_v50  ;;  %266 = vst.msk [vmem:[%s484_s3 + $0x10] sm:$0xff] %vm457_vm3, %v302_v51  ;;  %v232_v56 = vmax.f32 %v217_v52, 0.0  ;;  %v236_v57 = vmax.f32 %v227_v53, 0.0 }
  0xf1   :  { %v301_v58 = vpack.c.bf16 %v232_v56, %v231_v54  ;;  %v303_v59 = vpack.c.bf16 %v236_v57, %v235_v55 }
  0xf3   :  { %265 = vst.msk [vmem:[%s484_s3 + $0x8] sm:$0xff] %vm457_vm3, %v301_v58  ;;  %267 = vst.msk [vmem:[%s484_s3 + $0x18] sm:$0xff] %vm457_vm3, %v303_v59 }

// kernel: net_forward.8
= control target key start
LH: loop header
LB: loop body
LE: loop exit
PB: predicated region body
PF: predicated region fallthrough
CT: control target
= control target key end

     0   :  { %v640_v1 = vmov 0   ;;  %vm283_vm0 = vcmask 261120   ;;  %vm466_vm1 = vcmask 404480   ;;  %s811_s2 = inlined_call_operand.vmem [shape: bf16[288,50], index: 2, kind: input, shape index: {}]   ;;  %s812_s0 = inlined_call_operand.vmem [shape: bf16[64,288], index: 0, kind: input, shape index: {}]   ;;  %s813_s1 = inlined_call_operand.vmem [shape: f32[64,1], index: 1, kind: input, shape index: {}]   ;;  %s814_s3 = inlined_call_operand.vmem [shape: bf16[64,50], index: 3, kind: output, shape index: {}]  }
   0x1   :  { %v606_v0 = vld [vmem:[%s811_s2 + $0x78] sm:$0xff]   ;;  %604 = vset.pattern.permute.xlu0 %v640_v1  ;;  %605 = vset.pattern.permute.xlu1 %v640_v1  ;;  %v608_v3 = vld [vmem:[%s811_s2 + $0x70] sm:$0xff]   ;;  %v610_v5 = vld [vmem:[%s811_s2 + $0x68] sm:$0xff]  }
   0x2   :  { %v607_v2 = vld [vmem:[%s811_s2 + $0x38] sm:$0xff]   ;;  %529 = vmatprep.subr.bf16.mxu0 %v606_v0  ;;  %587 = vmatprep.subr.bf16.mxu1 %v606_v0  ;;  %v609_v4 = vld [vmem:[%s811_s2 + $0x30] sm:$0xff]   ;;  %v611_v6 = vld [vmem:[%s811_s2 + $0x28] sm:$0xff]  }
   0x3   :  { %530 = vmatpush3.bf16.msra.mxu0 %v607_v2  ;;  %595 = vmatpush3.bf16.msra.mxu1 %v607_v2  ;;  %v612_v7 = vld [vmem:[%s811_s2 + $0x60] sm:$0xff]   ;;  %v614_v9 = vld [vmem:[%s811_s2 + $0x58] sm:$0xff]   ;;  %v616_v11 = vld [vmem:[%s811_s2 + $0x50] sm:$0xff]  }
   0x4   :  { %531 = vmatprep.subr.bf16.mxu0 %v608_v3  ;;  %588 = vmatprep.subr.bf16.mxu1 %v608_v3  ;;  %v613_v8 = vld [vmem:[%s811_s2 + $0x20] sm:$0xff]   ;;  %v615_v10 = vld [vmem:[%s811_s2 + $0x18] sm:$0xff]   ;;  %v617_v14 = vld [vmem:[%s811_s2 + $0x10] sm:$0xff]  }
   0x5   :  { %v624_v12 = vld [vmem:[%s812_s0 + $0x4] ss:$12 sps:$4 sm:$0xff]   ;;  %v627_v13 = vld [vmem:[%s812_s0 + $0x4c] ss:$12 sps:$4 sm:$0xff]   ;;  %v625_v23 = vld [vmem:[%s812_s0 + $0x48] ss:$12 sps:$4 sm:$0xff]  }
   0x6   :  { %v618_v15 = vld [vmem:[%s811_s2 + $0x48] sm:$0xff]   ;;  %328 = vmatprep.mubr.bf16.mxu0 %v624_v12  ;;  %352 = vmatprep.mubr.bf16.mxu1 %v627_v13  ;;  %v620_v17 = vld [vmem:[%s811_s2 + $0x40] sm:$0xff]   ;;  %v69_v20 = vld [vmem:[%s813_s1 + $0x10] sm:$0xff] }
   0x7   :  { %532 = vmatpush3.bf16.msra.mxu0 %v609_v4  ;;  %596 = vmatpush3.bf16.msra.mxu1 %v609_v4  ;;  %v619_v16 = vld [vmem:[%s811_s2 + $0x8] sm:$0xff]   ;;  %v621_v18 = vld [vmem:[%s811_s2] sm:$0xff]   ;;  %v70_v25 = vld [vmem:[%s813_s1 + $0x18] sm:$0xff] }
   0x8   :  { %533 = vmatprep.subr.bf16.mxu0 %v610_v5  ;;  %589 = vmatprep.subr.bf16.mxu1 %v610_v5  ;;  %v67_v19 = vld [vmem:[%s813_s1] sm:$0xff]  ;;  %v628_v21 = vld [vmem:[%s811_s2 + $0x88] sm:$0xff]   ;;  %v73_v33 = vld [vmem:[%s813_s1 + $0x30] sm:$0xff] }
   0x9   :  { %v622_v22 = vld [vmem:[%s812_s0] ss:$12 sps:$4 sm:$0xff]   ;;  %77 = vperm.xlu0 %604, %v67_v19   ;;  %87 = vperm.xlu1 %605, %v69_v20   ;;  %v630_v26 = vld [vmem:[%s812_s0 + $0x1c] ss:$12 sps:$4 sm:$0xff]   ;;  %v633_v31 = vld [vmem:[%s812_s0 + $0x18] ss:$12 sps:$4 sm:$0xff]  }
   0xa   :  { %v68_v24 = vld [vmem:[%s813_s1 + $0x8] sm:$0xff]  ;;  %v629_v27 = vld [vmem:[%s811_s2 + $0x80] sm:$0xff]   ;;  %v74_v34 = vld [vmem:[%s813_s1 + $0x38] sm:$0xff] }
   0xb   :  { %534 = vmatpush3.bf16.msra.mxu0 %v611_v6  ;;  %597 = vmatpush3.bf16.msra.mxu1 %v611_v6  ;;  %v632_v28 = vld [vmem:[%s812_s0 + $0x8] ss:$12 sps:$4 sm:$0xff]   ;;  %v71_v29 = vld [vmem:[%s813_s1 + $0x20] sm:$0xff]  ;;  %v638_v37 = vld [vmem:[%s812_s0 + $0x30] ss:$12 sps:$4 sm:$0xff]  }
   0xc   :  { %535 = vmatprep.subr.bf16.mxu0 %v612_v7  ;;  %590 = vmatprep.subr.bf16.mxu1 %v612_v7  ;;  %v72_v30 = vld [vmem:[%s813_s1 + $0x28] sm:$0xff]  ;;  %v635_v35 = vld [vmem:[%s812_s0 + $0x34] ss:$12 sps:$4 sm:$0xff]   ;;  %v637_v36 = vld [vmem:[%s812_s0 + $0x38] ss:$12 sps:$4 sm:$0xff]  }
   0xd   :  { %82 = vperm.xlu0 %604, %v68_v24   ;;  %92 = vperm.xlu1 %605, %v70_v25   ;;  %v634_v32 = vld [vmem:[%s812_s0 + $0x20] ss:$12 sps:$4 sm:$0xff]   ;;  %v639_v38 = vld [vmem:[%s812_s0 + $0x50] ss:$12 sps:$4 sm:$0xff]  }
   0xf   :  { %536 = vmatpush3.bf16.msra.mxu0 %v613_v8  ;;  %598 = vmatpush3.bf16.msra.mxu1 %v613_v8 }
  0x10   :  { %537 = vmatprep.subr.bf16.mxu0 %v614_v9  ;;  %591 = vmatprep.subr.bf16.mxu1 %v614_v9 }
  0x11   :  { %97 = vperm.xlu0 %604, %v71_v29   ;;  %102 = vperm.xlu1 %605, %v72_v30  }
  0x13   :  { %538 = vmatpush3.bf16.msra.mxu0 %v615_v10  ;;  %599 = vmatpush3.bf16.msra.mxu1 %v615_v10 }
  0x14   :  { %539 = vmatprep.subr.bf16.mxu0 %v616_v11  ;;  %592 = vmatprep.subr.bf16.mxu1 %v616_v11 }
  0x15   :  { %107 = vperm.xlu0 %604, %v73_v33   ;;  %112 = vperm.xlu1 %605, %v74_v34  }
  0x17   :  { %540 = vmatpush3.bf16.msra.mxu0 %v617_v14  ;;  %600 = vmatpush3.bf16.msra.mxu1 %v617_v14 }
  0x18   :  { %541 = vmatprep.subr.bf16.mxu0 %v618_v15  ;;  %593 = vmatprep.subr.bf16.mxu1 %v618_v15 }
  0x1b   :  { %542 = vmatpush3.bf16.msra.mxu0 %v619_v16  ;;  %601 = vmatpush3.bf16.msra.mxu1 %v619_v16 }
  0x1c   :  { %543 = vmatprep.subr.bf16.mxu0 %v620_v17  ;;  %594 = vmatprep.subr.bf16.mxu1 %v620_v17 }
  0x1f   :  { %544 = vmatpush3.bf16.msra.mxu0 %v621_v18  ;;  %602 = vmatpush3.bf16.msra.mxu1 %v621_v18 }
  0x20   :  { %575 = vmatprep.subr.bf16.mxu1 %v628_v21 }
  0x22   :  { %329 = vmatmul.mubr.bf16.vlgmr.msra.gmra.mxu0 %v622_v22  ;;  %353 = vmatmul.mubr.bf16.vlgmr.msra.gmra.mxu1 %v625_v23 }
  0x23   :  { %576 = vmatpush3.bf16.msra.mxu1 %v628_v21  ;;  %336 = vmatprep.mubr.bf16.mxu0 %v630_v26 }
  0x24   :  { %577 = vmatprep.subr.bf16.mxu1 %v629_v27  ;;  %579 = vmatprep.mubr.msk.bf16.mxu1 %vm283_vm0, %v632_v28 }
  0x27   :  { %578 = vmatpush3.bf16.msra.mxu1 %v629_v27 }
  0x2a   :  { %337 = vmatmul.mubr.bf16.gmra.mxu0 %v633_v31  ;;  %580 = vmatmul.mubr.msk.bf16.vlgmr.msra.gmra.mxu1 %vm283_vm0, %v634_v32 }
  0x2b   :  { %344 = vmatprep.mubr.bf16.mxu0 %v635_v35  ;;  %583 = vmatprep.mubr.msk.bf16.mxu1 %vm283_vm0, %v637_v36 }
  0x32   :  { %345 = vmatmul.mubr.bf16.gmra.mxu0 %v638_v37  ;;  %584 = vmatmul.mubr.msk.bf16.gmra.mxu1 %vm283_vm0, %v639_v38 }
  0x84   :  { %v78_v39 = vpop.permute.xlu0 %77  ;;  %v88_v40 = vpop.permute.xlu1 %87 }
  0x88   :  { %v83_v41 = vpop.permute.xlu0 %82  ;;  %v93_v46 = vpop.permute.xlu1 %92 }
  0x8c   :  { %v98_v49 = vpop.permute.xlu0 %97  ;;  %v103_v55 = vpop.permute.xlu1 %102 }
  0x90   :  { %v108_v61 = vpop.permute.xlu0 %107  ;;  %v113_v9 = vpop.permute.xlu1 %112 }
  0xe2   :  { %v545_v42 = vpop.f32.mrf.mxu0  ;;  %v563_v43 = vpop.f32.mrf.mxu1 }
  0xe4   :  { %v546_v44 = vpop.f32.mrf.mxu0  ;;  %v564_v45 = vpop.f32.mrf.mxu1 }
  0xe5   :  { %v547_v50 = vadd.f32 %v546_v44, %v545_v42  ;;  %v565_v58 = vadd.f32 %v564_v45, %v563_v43 }
  0xe6   :  { %v548_v47 = vpop.f32.mrf.mxu0  ;;  %v566_v48 = vpop.f32.mrf.mxu1 }
  0xe7   :  { %v331_v57 = vadd.f32 %v547_v50, %v78_v39  ;;  %v355_v5 = vadd.f32 %v565_v58, %v108_v61 }
  0xe8   :  { %v549_v51 = vpop.f32.mrf.mxu0  ;;  %v567_v52 = vpop.f32.mrf.mxu1 }
  0xe9   :  { %v550_v56 = vadd.f32 %v549_v51, %v548_v47  ;;  %v568_v6 = vadd.f32 %v567_v52, %v566_v48 }
  0xea   :  { %v551_v53 = vpop.f32.mrf.mxu0  ;;  %v581_v54 = vpop.f32.mrf.mxu1 }
  0xeb   :  { %v334_v4 = vadd.f32 %v550_v56, %v83_v41  ;;  %v358_v20 = vadd.f32 %v568_v6, %v113_v9 }
  0xec   :  { %v552_v59 = vpop.f32.mrf.mxu0  ;;  %v395_v60 = vpop.f32.mrf.mxu1 }
  0xed   :  { %v553_v62 = vadd.f32 %v552_v59, %v551_v53  ;;  %v396_v63 = vadd.f32 %v395_v60, %v331_v57 }
  0xee   :  { %v554_v0 = vpop.f32.mrf.mxu0  ;;  %v582_v1 = vpop.f32.mrf.mxu1 }
  0xef   :  { %v339_v2 = vadd.f32 %v553_v62, %v88_v40  ;;  %v426_v3 = vmax.f32 %v396_v63, 0.0 }
  0xf0   :  { %v555_v7 = vpop.f32.mrf.mxu0  ;;  %v398_v8 = vpop.f32.mrf.mxu1 }
  0xf1   :  { %v404_v10 = vadd.f32 %v581_v54, %v339_v2  ;;  %v521_v11 = vpack.c.bf16 %v426_v3, %v426_v3  ;;  %v556_v12 = vadd.f32 %v555_v7, %v554_v0  ;;  %v399_v13 = vadd.f32 %v398_v8, %v334_v4 }
  0xf2   :  { %v557_v14 = vpop.f32.mrf.mxu0  ;;  %v585_v15 = vpop.f32.mrf.mxu1 }
  0xf3   :  { %v428_v16 = vmax.f32 %v404_v10, 0.0  ;;  %467 = vst.msk [vmem:[%s814_s3] sm:$0xf] %vm466_vm1, %v521_v11  ;;  %v342_v17 = vadd.f32 %v556_v12, %v93_v46  ;;  %v427_v18 = vmax.f32 %v399_v13, 0.0  ;;  %v420_v19 = vadd.f32 %v585_v15, %v355_v5 }
  0xf4   :  { %v558_v21 = vpop.f32.mrf.mxu0  ;;  %v411_v22 = vpop.f32.mrf.mxu1 }
  0xf5   :  { %v523_v23 = vpack.c.bf16 %v428_v16, %v428_v16  ;;  %v407_v24 = vadd.f32 %v582_v1, %v342_v17  ;;  %v522_v25 = vpack.c.bf16 %v427_v18, %v427_v18  ;;  %v432_v26 = vmax.f32 %v420_v19, 0.0 }
  0xf6   :  { %v559_v27 = vadd.f32 %v558_v21, %v557_v14  ;;  %v560_v28 = vpop.f32.mrf.mxu0  ;;  %v586_v29 = vpop.f32.mrf.mxu1 }
  0xf7   :  { %469 = vst.msk [vmem:[%s814_s3 + $0x8] sm:$0xf] %vm466_vm1, %v523_v23  ;;  %v429_v30 = vmax.f32 %v407_v24, 0.0  ;;  %468 = vst.msk [vmem:[%s814_s3 + $0x4] sm:$0xf] %vm466_vm1, %v522_v25  ;;  %v527_v31 = vpack.c.bf16 %v432_v26, %v432_v26  ;;  %v423_v32 = vadd.f32 %v586_v29, %v358_v20 }
  0xf8   :  { %v347_v33 = vadd.f32 %v559_v27, %v98_v49  ;;  %v561_v34 = vpop.f32.mrf.mxu0  ;;  %v414_v42 = vpop.f32.mrf.mxu1 }
  0xf9   :  { %v524_v35 = vpack.c.bf16 %v429_v30, %v429_v30  ;;  %473 = vst.msk [vmem:[%s814_s3 + $0x18] sm:$0xf] %vm466_vm1, %v527_v31  ;;  %v433_v36 = vmax.f32 %v423_v32, 0.0  ;;  %v562_v37 = vadd.f32 %v561_v34, %v560_v28 }
  0xfa   :  { %v412_v38 = vadd.f32 %v411_v22, %v347_v33 }
  0xfb   :  { %470 = vst.msk [vmem:[%s814_s3 + $0xc] sm:$0xf] %vm466_vm1, %v524_v35  ;;  %v528_v39 = vpack.c.bf16 %v433_v36, %v433_v36  ;;  %v350_v40 = vadd.f32 %v562_v37, %v103_v55 }
  0xfc   :  { %v430_v41 = vmax.f32 %v412_v38, 0.0 }
  0xfd   :  { %474 = vst.msk [vmem:[%s814_s3 + $0x1c] sm:$0xf] %vm466_vm1, %v528_v39  ;;  %v415_v43 = vadd.f32 %v414_v42, %v350_v40 }
  0xfe   :  { %v525_v44 = vpack.c.bf16 %v430_v41, %v430_v41 }
  0xff   :  { %v431_v45 = vmax.f32 %v415_v43, 0.0 }
 0x100   :  { %471 = vst.msk [vmem:[%s814_s3 + $0x10] sm:$0xf] %vm466_vm1, %v525_v44 }
 0x101   :  { %v526_v46 = vpack.c.bf16 %v431_v45, %v431_v45 }
 0x103   :  { %472 = vst.msk [vmem:[%s814_s3 + $0x14] sm:$0xf] %vm466_vm1, %v526_v46 }

// kernel: net_forward.9
= control target key start
LH: loop header
LB: loop body
LE: loop exit
PB: predicated region body
PF: predicated region fallthrough
CT: control target
= control target key end

     0   :  { %vm161_vm0 = vcmask 1041409   ;;  %v6560_v44 = vmov 0.0   ;;  %vm4829_vm1 = vmmov 0   ;;  %vm396_vm2 = vcmask 523264   ;;  %s6550_s1 = inlined_call_operand.vmem [shape: bf16[576,128], index: 1, kind: input, shape index: {}]   ;;  %s6551_s0 = inlined_call_operand.vmem [shape: bf16[2,9,576], index: 0, kind: input, shape index: {}]   ;;  %s6552_s3 = inlined_call_operand.vmem [shape: bf16[9,128,256], index: 3, kind: input, shape index: {}]   ;;  %s6553_s2 = inlined_call_operand.vmem [shape: f32[1,128], index: 2, kind: input, shape index: {}]   ;;  %s6554_s5 = inlined_call_operand.vmem [shape: bf16[256,256], index: 5, kind: input, shape index: {}]   ;;  %s6555_s7 = inlined_call_operand.vmem [shape: bf16[256,8], index: 7, kind: input, shape index: {}]   ;;  %s6556_s4 = inlined_call_operand.vmem [shape: f32[1,256], index: 4, kind: input, shape index: {}]   ;;  %s6557_s6 = inlined_call_operand.vmem [shape: f32[1,256], index: 6, kind: input, shape index: {}]   ;;  %s6558_s8 = inlined_call_operand.vmem [shape: f32[1,8], index: 8, kind: input, shape index: {}]   ;;  %s6559_s9 = inlined_call_operand.vmem [shape: f32[2,8], index: 9, kind: output, shape index: {}]  }
   0x1   :  { %v4884_v0 = vld [vmem:[%s6550_s1 + $0x78] sm:$0xff]   ;;  %v4907_v4 = vld [vmem:[%s6550_s1 + $0x70] sm:$0xff]   ;;  %v4931_v8 = vld [vmem:[%s6550_s1 + $0x68] sm:$0xff]   ;;  %vm3457_vm5 = vcmask 58368  }
   0x2   :  { %v4889_v1 = vld [vmem:[%s6550_s1 + $0xf8] sm:$0xff]   ;;  %3850 = vmatprep.subr.bf16.mxu0 %v4884_v0  ;;  %v4913_v5 = vld [vmem:[%s6550_s1 + $0xf0] sm:$0xff]   ;;  %v4937_v9 = vld [vmem:[%s6550_s1 + $0xe8] sm:$0xff]  }
   0x3   :  { %v4895_v2 = vld [vmem:[%s6550_s1 + $0x38] sm:$0xff]   ;;  %3872 = vmatprep.subr.bf16.mxu1 %v4889_v1  ;;  %v4919_v6 = vld [vmem:[%s6550_s1 + $0x30] sm:$0xff]   ;;  %v4943_v10 = vld [vmem:[%s6550_s1 + $0x28] sm:$0xff]  }
   0x4   :  { %v4901_v3 = vld [vmem:[%s6550_s1 + $0xb8] sm:$0xff]   ;;  %3851 = vmatpush3.bf16.msra.mxu0 %v4895_v2  ;;  %v4925_v7 = vld [vmem:[%s6550_s1 + $0xb0] sm:$0xff]   ;;  %v4949_v11 = vld [vmem:[%s6550_s1 + $0xa8] sm:$0xff]  }
   0x5   :  { %3873 = vmatpush3.bf16.msra.mxu1 %v4901_v3  ;;  %3852 = vmatprep.subr.bf16.mxu0 %v4907_v4  ;;  %v4955_v12 = vld [vmem:[%s6550_s1 + $0x60] sm:$0xff]   ;;  %v4979_v16 = vld [vmem:[%s6550_s1 + $0x58] sm:$0xff]   ;;  %v5003_v20 = vld [vmem:[%s6550_s1 + $0x50] sm:$0xff]  }
   0x6   :  { %3874 = vmatprep.subr.bf16.mxu1 %v4913_v5  ;;  %v4961_v13 = vld [vmem:[%s6550_s1 + $0xe0] sm:$0xff]   ;;  %v4985_v17 = vld [vmem:[%s6550_s1 + $0xd8] sm:$0xff]   ;;  %v5009_v21 = vld [vmem:[%s6550_s1 + $0xd0] sm:$0xff]  }
   0x7   :  { %v4967_v14 = vld [vmem:[%s6550_s1 + $0x20] sm:$0xff]   ;;  %v4991_v18 = vld [vmem:[%s6550_s1 + $0x18] sm:$0xff]   ;;  %v5015_v22 = vld [vmem:[%s6550_s1 + $0x10] sm:$0xff]  }
   0x8   :  { %3853 = vmatpush3.bf16.msra.mxu0 %v4919_v6  ;;  %v4973_v15 = vld [vmem:[%s6550_s1 + $0xa0] sm:$0xff]   ;;  %v4997_v19 = vld [vmem:[%s6550_s1 + $0x98] sm:$0xff]   ;;  %v5021_v23 = vld [vmem:[%s6550_s1 + $0x90] sm:$0xff]  }
   0x9   :  { %3875 = vmatpush3.bf16.msra.mxu1 %v4925_v7  ;;  %3854 = vmatprep.subr.bf16.mxu0 %v4931_v8  ;;  %v5027_v24 = vld [vmem:[%s6550_s1 + $0x48] sm:$0xff]   ;;  %v5051_v28 = vld [vmem:[%s6550_s1 + $0x40] sm:$0xff]   ;;  %v40_v39 = vld [vmem:[%s6551_s0 + $0x30] sm:$0xff] }
   0xa   :  { %3876 = vmatprep.subr.bf16.mxu1 %v4937_v9  ;;  %v5033_v25 = vld [vmem:[%s6550_s1 + $0xc8] sm:$0xff]   ;;  %v5057_v29 = vld [vmem:[%s6550_s1 + $0xc0] sm:$0xff]   ;;  %v3471_v42 = vcombine.low %v40_v39, %v40_v39  ;;  %v3472_v43 = vcombine.high %v40_v39, %v40_v39 }
   0xb   :  { %v5039_v26 = vld [vmem:[%s6550_s1 + $0x8] sm:$0xff]   ;;  %v5063_v30 = vld [vmem:[%s6550_s1] sm:$0xff]  }
   0xc   :  { %3855 = vmatpush3.bf16.msra.mxu0 %v4943_v10  ;;  %v5045_v27 = vld [vmem:[%s6550_s1 + $0x88] sm:$0xff]   ;;  %v5069_v31 = vld [vmem:[%s6550_s1 + $0x80] sm:$0xff]   ;;  %v5099_v51 = vunpack.c.l.b16 %v3471_v42  ;;  %v5101_v52 = vunpack.c.l.b16 %v3472_v43 }
   0xd   :  { %3877 = vmatpush3.bf16.msra.mxu1 %v4949_v11  ;;  %3856 = vmatprep.subr.bf16.mxu0 %v4955_v12  ;;  %v33_v32 = vld [vmem:[%s6551_s0] sm:$0xff]  ;;  %v39_v33 = vld [vmem:[%s6551_s0 + $0x28] sm:$0xff] }
   0xe   :  { %3878 = vmatprep.subr.bf16.mxu1 %v4961_v13  ;;  %v34_v34 = vld [vmem:[%s6551_s0 + $0x8] sm:$0xff]  ;;  %v3464_v35 = vcombine.low %v33_v32, %v33_v32  ;;  %v3465_v36 = vcombine.high %v33_v32, %v33_v32  ;;  %v3469_v37 = vcombine.low %v39_v33, %v39_v33  ;;  %v3470_v38 = vcombine.high %v39_v33, %v39_v33  ;;  %v5121_v33 = vld [vmem:[%s6550_s1 + $0x118] sm:$0xff]   ;;  %v5158_v43 = vld [vmem:[%s6550_s1 + $0x100] sm:$0xff]  }
   0xf   :  { %v3466_v40 = vcombine.low %v34_v34, %v34_v34  ;;  %v3467_v41 = vcombine.high %v34_v34, %v34_v34  ;;  %v167_v56 = vrot.slane %v5101_v52, 7  ;;  %v165_v57 = vrot.slane %v5099_v51, 7  ;;  %v4469_v34 = vld [vmem:[%s6551_s0 + $0x38] ss:$0 sps:$4 sm:$0xff]  }
  0x10   :  { %3857 = vmatpush3.bf16.msra.mxu0 %v4967_v14  ;;  %v5086_v45 = vunpack.c.l.b16 %v3464_v35  ;;  %v5088_v46 = vunpack.c.l.b16 %v3465_v36  ;;  %v5090_v47 = vunpack.c.l.b16 %v3469_v37  ;;  %v5092_v48 = vunpack.c.l.b16 %v3470_v38  ;;  %v5129_v37 = vld [vmem:[%s6550_s1 + $0x110] sm:$0xff]  }
  0x11   :  { %3879 = vmatpush3.bf16.msra.mxu1 %v4973_v15  ;;  %3858 = vmatprep.subr.bf16.mxu0 %v4979_v16  ;;  %v5095_v49 = vunpack.c.l.b16 %v3466_v40  ;;  %v5097_v50 = vunpack.c.l.b16 %v3467_v41  ;;  %v4468_v38 = vld [vmem:[%s6551_s0 + $0x10] ss:$0 sps:$4 sm:$0xff]   ;;  %v5135_v40 = vunpack.c.l.b16 %v4469_v34  ;;  %v5143_v41 = vld [vmem:[%s6550_s1 + $0x108] sm:$0xff]  }
  0x12   :  { %3880 = vmatprep.subr.bf16.mxu1 %v4985_v17  ;;  %v163_v53 = vrot.slane %v5092_v48, 7  ;;  %v160_v54 = vrot.slane %v5090_v47, 7  ;;  %v540_v55 = vrot.slane %v5088_v46, 1  ;;  %v5148_v42 = vunpack.c.l.b16 %v4468_v38  ;;  %v4475_v34 = vld [vmem:[%s6552_s3 + $0x64] ss:$8 sps:$4 sm:$0xff]  }
  0x13   :  { %v168_v63 = vsel %vm161_vm0, %v167_v56, %v5097_v50  ;;  %v166_v32 = vsel %vm161_vm0, %v165_v57, %v5095_v49  ;;  %6570 = vst [vmem:[#allocation2_spill] sm:$0xff] %v5135_v40  ;;  %v542_v57 = vrot.slane %v5095_v49, 1  ;;  %v4476_v38 = vld [vmem:[%s6552_s3 + $0x50] ss:$8 sps:$4 sm:$0xff]  }
  0x14   :  { %3859 = vmatpush3.bf16.msra.mxu0 %v4991_v18  ;;  %v164_v58 = vsel %vm161_vm0, %v163_v53, %v5088_v46  ;;  %v162_v59 = vsel %vm161_vm0, %v160_v54, %v5086_v45  ;;  %v541_v60 = vsel %vm161_vm0, %v5092_v48, %v540_v55  ;;  %v174_v35 = vpack.c.b16 %v168_v63, %v168_v63  ;;  %v4470_v63 = vld [vmem:[%s6552_s3 + $0x70] ss:$8 sps:$4 sm:$0xff]  }
  0x15   :  { %3881 = vmatpush3.bf16.msra.mxu1 %v4997_v19  ;;  %3860 = vmatprep.subr.bf16.mxu0 %v5003_v20  ;;  %v172_v61 = vpack.c.b16 %v164_v58, %v164_v58  ;;  %v171_v62 = vpack.c.b16 %v162_v59, %v162_v59  ;;  %v173_v36 = vpack.c.b16 %v166_v32, %v166_v32  ;;  %v546_v58 = vrot.slane %v5148_v42, 1 }
  0x16   :  { %3882 = vmatprep.subr.bf16.mxu1 %v5009_v21  ;;  %472 = vmatprep.mubr.bf16.mxu1 %v174_v35  ;;  %v549_v39 = vpack.c.b16 %v541_v60, %v541_v60  ;;  %6571 = vst [vmem:[#allocation3_spill] sm:$0xff] %v5148_v42  ;;  %v543_v59 = vsel %vm161_vm0, %v5099_v51, %v542_v57  ;;  %v4472_v60 = vld [vmem:[%s6552_s3 + $0x74] ss:$8 sps:$4 sm:$0xff]   ;;  %v4473_v35 = vld [vmem:[%s6552_s3 + $0x60] ss:$8 sps:$4 sm:$0xff]   ;;  %v6562_v57 = vmov 0  }
  0x17   :  { %432 = vmatprep.mubr.bf16.mxu0 %v172_v61  ;;  %v547_v61 = vsel %vm161_vm0, %v5135_v40, %v546_v58  ;;  %v4494_v58 = vld [vmem:[%s6552_s3 + $0xf0] ss:$8 sps:$4 sm:$0xff]  }
  0x18   :  { %3861 = vmatpush3.bf16.msra.mxu0 %v5015_v22  ;;  %v552_v32 = vpack.c.b16 %v547_v61, %v547_v61  ;;  %v4502_v61 = vld [vmem:[%s6552_s3 + $0xd4] ss:$8 sps:$4 sm:$0xff]  }
  0x19   :  { %3883 = vmatpush3.bf16.msra.mxu1 %v5021_v23  ;;  %3862 = vmatprep.subr.bf16.mxu0 %v5027_v24 }
  0x1a   :  { %3884 = vmatprep.subr.bf16.mxu1 %v5033_v25 }
  0x1c   :  { %3863 = vmatpush3.bf16.msra.mxu0 %v5039_v26 }
  0x1d   :  { %3885 = vmatpush3.bf16.msra.mxu1 %v5045_v27  ;;  %3864 = vmatprep.subr.bf16.mxu0 %v5051_v28 }
  0x1e   :  { %3886 = vmatprep.subr.bf16.mxu1 %v5057_v29 }
  0x20   :  { %3865 = vmatpush3.bf16.msra.mxu0 %v5063_v30 }
  0x21   :  { %3887 = vmatpush3.bf16.msra.mxu1 %v5069_v31  ;;  %4313 = vmatprep.subr.bf16.mxu0 %v6560_v44 }
  0x22   :  { %3899 = vmatprep.subr.bf16.mxu1 %v4884_v0 }
  0x23   :  { %433 = vmatmul.mubr.bf16.vlgmr.msra.gmra.mxu0 %v171_v62  ;;  %v550_v62 = vpack.c.b16 %v543_v59, %v543_v59  ;;  %v4496_v59 = vld [vmem:[%s6552_s3 + $0xf4] ss:$8 sps:$4 sm:$0xff]  }
  0x24   :  { %473 = vmatmul.mubr.bf16.vlgmr.msra.gmra.mxu1 %v173_v36  ;;  %4314 = vmatpush3.bf16.msra.mxu0 %v5121_v33  ;;  %v4478_v36 = vld [vmem:[%s6552_s3 + $0x54] ss:$8 sps:$4 sm:$0xff]  }
  0x25   :  { %3900 = vmatpush3.bf16.msra.mxu1 %v4895_v2  ;;  %4315 = vmatprep.subr.bf16.mxu0 %v6560_v44  ;;  %v169_v2 = vrot.slane %v5135_v40, 7 }
  0x26   :  { %3901 = vmatprep.subr.bf16.mxu1 %v4907_v4  ;;  %4321 = vmatprep.mubr.msk.bf16.mxu0 %vm4829_vm1, %v6560_v44  ;;  %v544_v4 = vrot.slane %v5097_v50, 1 }
  0x27   :  { %592 = vmatprep.mubr.bf16.mxu1 %v549_v39  ;;  %v170_v53 = vsel %vm161_vm0, %v169_v2, %v5148_v42  ;;  %v4481_v39 = vld [vmem:[%s6552_s3 + $0x44] ss:$8 sps:$4 sm:$0xff]   ;;  %v4479_v2 = vld [vmem:[%s6552_s3 + $0x40] ss:$8 sps:$4 sm:$0xff]  }
  0x28   :  { %4316 = vmatpush3.bf16.msra.mxu0 %v5129_v37 }
  0x29   :  { %3902 = vmatpush3.bf16.msra.mxu1 %v4919_v6  ;;  %4317 = vmatprep.subr.bf16.mxu0 %v6560_v44  ;;  %v545_v6 = vsel %vm161_vm0, %v5101_v52, %v544_v4  ;;  %v4484_v4 = vld [vmem:[%s6552_s3 + $0x34] ss:$8 sps:$4 sm:$0xff]  }
  0x2a   :  { %3903 = vmatprep.subr.bf16.mxu1 %v4931_v8  ;;  %v175_v8 = vpack.c.b16 %v170_v53, %v170_v53  ;;  %v551_v54 = vpack.c.b16 %v545_v6, %v545_v6  ;;  %v4482_v53 = vld [vmem:[%s6552_s3 + $0x30] ss:$8 sps:$4 sm:$0xff]   ;;  %v4487_v6 = vld [vmem:[%s6552_s3 + $0x24] ss:$8 sps:$4 sm:$0xff]  }
  0x2c   :  { %4318 = vmatpush3.bf16.msra.mxu0 %v5143_v41 }
  0x2d   :  { %3904 = vmatpush3.bf16.msra.mxu1 %v4943_v10  ;;  %4319 = vmatprep.subr.bf16.mxu0 %v6560_v44  ;;  %v538_v10 = vrot.slane %v5086_v45, 1 }
  0x2e   :  { %3905 = vmatprep.subr.bf16.mxu1 %v4955_v12 }
  0x2f   :  { %v539_v55 = vsel %vm161_vm0, %v5090_v47, %v538_v10  ;;  %v4488_v10 = vld [vmem:[%s6552_s3 + $0x10] ss:$8 sps:$4 sm:$0xff]  }
  0x30   :  { %4320 = vmatpush3.bf16.msra.mxu0 %v5158_v43  ;;  %v548_v56 = vpack.c.b16 %v539_v55, %v539_v55  ;;  %v4493_v55 = vld [vmem:[%s6552_s3 + $0x4] ss:$8 sps:$4 sm:$0xff]  }
  0x31   :  { %3906 = vmatpush3.bf16.msra.mxu1 %v4967_v14  ;;  %3921 = vmatprep.subr.bf16.mxu0 %v4889_v1 }
  0x32   :  { %3907 = vmatprep.subr.bf16.mxu1 %v4979_v16 }
  0x33   :  { %4322 = vmatmul.mubr.msk.bf16.vlgmr.msra.gmra.mxu0 %vm396_vm2, %v175_v8  ;;  %v4485_v8 = vld [vmem:[%s6552_s3 + $0x20] ss:$8 sps:$4 sm:$0xff]  }
  0x34   :  { %3922 = vmatpush3.bf16.msra.mxu0 %v4901_v3  ;;  %632 = vmatprep.mubr.bf16.mxu0 %v551_v54  ;;  %v4490_v54 = vld [vmem:[%s6552_s3 + $0x14] ss:$8 sps:$4 sm:$0xff]  }
  0x35   :  { %3908 = vmatpush3.bf16.msra.mxu1 %v4991_v18  ;;  %3923 = vmatprep.subr.bf16.mxu0 %v4913_v5 }
  0x36   :  { %3909 = vmatprep.subr.bf16.mxu1 %v5003_v20 }
  0x38   :  { %3924 = vmatpush3.bf16.msra.mxu0 %v4925_v7 }
  0x39   :  { %3910 = vmatpush3.bf16.msra.mxu1 %v5015_v22  ;;  %3925 = vmatprep.subr.bf16.mxu0 %v4937_v9 }
  0x3a   :  { %3911 = vmatprep.subr.bf16.mxu1 %v5027_v24 }
  0x3c   :  { %3926 = vmatpush3.bf16.msra.mxu0 %v4949_v11 }
  0x3d   :  { %3912 = vmatpush3.bf16.msra.mxu1 %v5039_v26  ;;  %3927 = vmatprep.subr.bf16.mxu0 %v4961_v13 }
  0x3e   :  { %3913 = vmatprep.subr.bf16.mxu1 %v5051_v28 }
  0x40   :  { %3928 = vmatpush3.bf16.msra.mxu0 %v4973_v15 }
  0x41   :  { %3914 = vmatpush3.bf16.msra.mxu1 %v5063_v30  ;;  %3929 = vmatprep.subr.bf16.mxu0 %v4985_v17 }
  0x42   :  { %4325 = vmatprep.subr.bf16.mxu1 %v6560_v44 }
  0x44   :  { %593 = vmatmul.mubr.bf16.vlgmr.msra.gmra.mxu1 %v548_v56  ;;  %3930 = vmatpush3.bf16.msra.mxu0 %v4997_v19  ;;  %v4491_v56 = vld [vmem:[%s6552_s3] ss:$8 sps:$4 sm:$0xff]  }
  0x45   :  { %4326 = vmatpush3.bf16.msra.mxu1 %v5121_v33  ;;  %3931 = vmatprep.subr.bf16.mxu0 %v5009_v21 }
  0x46   :  { %4327 = vmatprep.subr.bf16.mxu1 %v6560_v44  ;;  %4333 = vmatprep.mubr.msk.bf16.mxu1 %vm4829_vm1, %v6560_v44 }
  0x48   :  { %3932 = vmatpush3.bf16.msra.mxu0 %v5021_v23 }
  0x49   :  { %4328 = vmatpush3.bf16.msra.mxu1 %v5129_v37  ;;  %3933 = vmatprep.subr.bf16.mxu0 %v5033_v25 }
  0x4a   :  { %4329 = vmatprep.subr.bf16.mxu1 %v6560_v44 }
  0x4c   :  { %3934 = vmatpush3.bf16.msra.mxu0 %v5045_v27 }
  0x4d   :  { %4330 = vmatpush3.bf16.msra.mxu1 %v5143_v41  ;;  %3935 = vmatprep.subr.bf16.mxu0 %v5057_v29 }
  0x4e   :  { %4331 = vmatprep.subr.bf16.mxu1 %v6560_v44 }
  0x50   :  { %3936 = vmatpush3.bf16.msra.mxu0 %v5069_v31 }
  0x51   :  { %4332 = vmatpush3.bf16.msra.mxu1 %v5158_v43  ;;  %779 = vmatprep.subr.bf16.mxu0 %v4496_v59 }
  0x52   :  { %900 = vmatprep.subr.bf16.mxu1 %v4472_v60  ;;  %v4499_v60 = vld [vmem:[%s6552_s3 + $0xe4] ss:$8 sps:$4 sm:$0xff]  }
  0x53   :  { %633 = vmatmul.mubr.bf16.vlgmr.msra.gmra.mxu0 %v550_v62  ;;  %v4500_v62 = vld [vmem:[%s6552_s3 + $0xd0] ss:$8 sps:$4 sm:$0xff]  }
  0x54   :  { %4334 = vmatmul.mubr.msk.bf16.vlgmr.msra.gmra.mxu1 %vm396_vm2, %v552_v32  ;;  %811 = vmatprep.mubr.bf16.mxu0 %v6562_v57  ;;  %v4505_v32 = vld [vmem:[%s6552_s3 + $0xc4] ss:$8 sps:$4 sm:$0xff]  }
  0x55   :  { %901 = vmatpush1.bf16.msra.mxu1 %v4470_v63  ;;  %932 = vmatprep.mubr.bf16.mxu1 %v6562_v57  ;;  %v4503_v63 = vld [vmem:[%s6552_s3 + $0xc0] ss:$8 sps:$4 sm:$0xff]  }
  0x56   :  { %902 = vmatprep.subr.bf16.mxu1 %v4475_v34  ;;  %780 = vmatpush1.bf16.msra.mxu0 %v4494_v58  ;;  %v4508_v34 = vld [vmem:[%s6552_s3 + $0xb4] ss:$8 sps:$4 sm:$0xff]  }
  0x57   :  { %781 = vmatprep.subr.bf16.mxu0 %v4499_v60 }
  0x59   :  { %903 = vmatpush1.bf16.msra.mxu1 %v4473_v35  ;;  %v4506_v35 = vld [vmem:[%s6552_s3 + $0xb0] ss:$8 sps:$4 sm:$0xff]  }
  0x5a   :  { %904 = vmatprep.subr.bf16.mxu1 %v4478_v36  ;;  %v4511_v36 = vld [vmem:[%s6552_s3 + $0xa4] ss:$8 sps:$4 sm:$0xff]  }
  0x5d   :  { %905 = vmatpush1.bf16.msra.mxu1 %v4476_v38  ;;  %v4509_v38 = vld [vmem:[%s6552_s3 + $0xa0] ss:$8 sps:$4 sm:$0xff]  }
  0x5e   :  { %906 = vmatprep.subr.bf16.mxu1 %v4481_v39  ;;  %v4514_v39 = vld [vmem:[%s6552_s3 + $0x94] ss:$8 sps:$4 sm:$0xff]  }
  0x61   :  { %907 = vmatpush1.bf16.msra.mxu1 %v4479_v2  ;;  %v4512_v2 = vld [vmem:[%s6552_s3 + $0x90] ss:$8 sps:$4 sm:$0xff]  }
  0x62   :  { %908 = vmatprep.subr.bf16.mxu1 %v4484_v4  ;;  %v4517_v4 = vld [vmem:[%s6552_s3 + $0x84] ss:$8 sps:$4 sm:$0xff]  }
  0x65   :  { %909 = vmatpush1.bf16.msra.mxu1 %v4482_v53  ;;  %v4515_v53 = vld [vmem:[%s6552_s3 + $0x80] ss:$8 sps:$4 sm:$0xff]  }
  0x66   :  { %910 = vmatprep.subr.bf16.mxu1 %v4487_v6 }
  0x69   :  { %911 = vmatpush1.bf16.msra.mxu1 %v4485_v8 }
  0x6a   :  { %912 = vmatprep.subr.bf16.mxu1 %v4490_v54 }
  0x6d   :  { %913 = vmatpush1.bf16.msra.mxu1 %v4488_v10 }
  0x6e   :  { %914 = vmatprep.subr.bf16.mxu1 %v4493_v55 }
  0x71   :  { %915 = vmatpush1.bf16.msra.mxu1 %v4491_v56 }
  0x72   :  { %3970 = vmatprep.subr.bf16.mxu1 %v4889_v1  ;;  %v4497_v1 = vld [vmem:[%s6552_s3 + $0xe0] ss:$8 sps:$4 sm:$0xff]  }
  0x73   :  { %782 = vmatpush1.bf16.msra.mxu0 %v4497_v1  ;;  %v5318_v1 = vld [vmem:[%s6553_s2] ss:$0 sm:$0xff] }
  0x74   :  { %783 = vmatprep.subr.bf16.mxu0 %v4502_v61 }
  0x77   :  { %784 = vmatpush1.bf16.msra.mxu0 %v4500_v62 }
  0x78   :  { %785 = vmatprep.subr.bf16.mxu0 %v4505_v32 }
  0x7b   :  { %786 = vmatpush1.bf16.msra.mxu0 %v4503_v63  ;;  %v950_v63 = vrot.slane %v5097_v50, 2 }
  0x7c   :  { %787 = vmatprep.subr.bf16.mxu0 %v4508_v34 }
  0x7f   :  { %788 = vmatpush1.bf16.msra.mxu0 %v4506_v35 }
  0x80   :  { %789 = vmatprep.subr.bf16.mxu0 %v4511_v36 }
  0x83   :  { %790 = vmatpush1.bf16.msra.mxu0 %v4509_v38 }
  0x84   :  { %791 = vmatprep.subr.bf16.mxu0 %v4514_v39 }
  0x87   :  { %792 = vmatpush1.bf16.msra.mxu0 %v4512_v2 }
  0x88   :  { %793 = vmatprep.subr.bf16.mxu0 %v4517_v4 }
  0x8b   :  { %794 = vmatpush1.bf16.msra.mxu0 %v4515_v53 }
  0x8c   :  { %3948 = vmatprep.subr.bf16.mxu0 %v4884_v0  ;;  %v951_v0 = vrot.slane %v5101_v52, 1 }
  0x8e   :  { %v952_v36 = vsel %vm161_vm0, %v951_v0, %v950_v63 }
  0x8f   :  { %v959_v4 = vpack.c.b16 %v952_v36, %v952_v36  ;;  %v5368_v36 = vld [vmem:[%s6550_s1 + $0x68] sm:$0xff]  }
  0xe3   :  { %v3866_v6 = vpop.f32.mrf.mxu0 }
  0xe4   :  { %v3888_v8 = vpop.f32.mrf.mxu1 }
  0xe5   :  { %v3867_v54 = vpop.f32.mrf.mxu0 }
  0xe6   :  { %v3889_v10 = vpop.f32.mrf.mxu1  ;;  %v3868_v59 = vadd.f32 %v3867_v54, %v3866_v6 }
  0xe7   :  { %v3869_v55 = vpop.f32.mrf.mxu0  ;;  %v3890_v62 = vadd.f32 %v3889_v10, %v3888_v8 }
  0xe8   :  { %v3891_v56 = vpop.f32.mrf.mxu1  ;;  %v435_v61 = vadd.f32 %v3868_v59, %v5318_v1 }
  0xe9   :  { %v3870_v58 = vpop.f32.mrf.mxu0  ;;  %v945_v56 = vrot.slane %v5092_v48, 1 }
  0xea   :  { %v3892_v60 = vpop.f32.mrf.mxu1  ;;  %v475_v32 = vadd.f32 %v3890_v62, %v435_v61 }
  0xf3   :  { %v514_v34 = vpop.f32.mrf.mxu0 }
  0xf4   :  { %v515_v35 = vadd.f32 %v514_v34, %v475_v32  ;;  %v5350_v34 = vld [vmem:[%s6550_s1 + $0x38] sm:$0xff]  }
  0xf5   :  { %v4323_v38 = vpop.f32.mrf.mxu0 }
  0xf6   :  { %v520_v39 = vmax.f32 %v515_v35, 0.0  ;;  %v5362_v35 = vld [vmem:[%s6550_s1 + $0x30] sm:$0xff]   ;;  %v5374_v38 = vld [vmem:[%s6550_s1 + $0x28] sm:$0xff]  }
  0xf7   :  { %v517_v2 = vpop.f32.mrf.mxu0 }
  0xf8   :  { %v521_v53 = vpack.c.bf16 %v520_v39, %v520_v39  ;;  %v941_v39 = vrot.slane %v5086_v45, 2  ;;  %v942_v2 = vrot.slane %v5090_v47, 1 }
  0xf9   :  { %v4324_v6 = vpop.f32.mrf.mxu0 }
  0xfa   :  { %933 = vmatmul.mubr.bf16.vlgmr.msra.gmra.mxu1 %v521_v53  ;;  %v5406_v53 = vld [vmem:[%s6550_s1 + $0x78] sm:$0xff]   ;;  %v5418_v6 = vld [vmem:[%s6550_s1 + $0x60] sm:$0xff]  }
  0xfb   :  { %3971 = vmatpush3.bf16.msra.mxu1 %v4901_v3  ;;  %1040 = vmatprep.mubr.bf16.mxu1 %v959_v4  ;;  %v947_v3 = vrot.slane %v5095_v49, 2 }
  0xfc   :  { %3972 = vmatprep.subr.bf16.mxu1 %v4913_v5  ;;  %v948_v5 = vrot.slane %v5099_v51, 1 }
  0xff   :  { %3973 = vmatpush3.bf16.msra.mxu1 %v4925_v7 }
 0x100   :  { %3974 = vmatprep.subr.bf16.mxu1 %v4937_v9 }
 0x103   :  { %3975 = vmatpush3.bf16.msra.mxu1 %v4949_v11  ;;  %v949_v11 = vsel %vm161_vm0, %v948_v5, %v947_v3  ;;  %v4518_v3 = vld [vmem:[%s6552_s3 + $0x170] ss:$8 sps:$4 sm:$0xff]   ;;  %v4520_v5 = vld [vmem:[%s6552_s3 + $0x174] ss:$8 sps:$4 sm:$0xff]  }
 0x104   :  { %v3915_v8 = vpop.f32.mrf.mxu1  ;;  %3976 = vmatprep.subr.bf16.mxu1 %v4961_v13  ;;  %v958_v58 = vpack.c.b16 %v949_v11, %v949_v11  ;;  %v4527_v11 = vld [vmem:[%s6552_s3 + $0x140] ss:$8 sps:$4 sm:$0xff]  }
 0x106   :  { %v3916_v54 = vpop.f32.mrf.mxu1 }
 0x107   :  { %3977 = vmatpush3.bf16.msra.mxu1 %v4973_v15  ;;  %v3917_v7 = vadd.f32 %v3916_v54, %v3915_v8  ;;  %v5424_v8 = vld [vmem:[%s6550_s1 + $0x20] sm:$0xff]   ;;  %v5430_v54 = vld [vmem:[%s6550_s1 + $0x58] sm:$0xff]  }
 0x108   :  { %v3918_v10 = vpop.f32.mrf.mxu1  ;;  %3978 = vmatprep.subr.bf16.mxu1 %v4985_v17  ;;  %v944_v17 = vrot.slane %v5088_v46, 2 }
 0x109   :  { %v5436_v10 = vld [vmem:[%s6550_s1 + $0x18] sm:$0xff]  }
 0x10a   :  { %v3919_v55 = vpop.f32.mrf.mxu1 }
 0x10b   :  { %3979 = vmatpush3.bf16.msra.mxu1 %v4997_v19  ;;  %v595_v19 = vadd.f32 %v3917_v7, %v5318_v1  ;;  %v5442_v55 = vld [vmem:[%s6550_s1 + $0x50] sm:$0xff]   ;;  %v4523_v7 = vld [vmem:[%s6552_s3 + $0x164] ss:$8 sps:$4 sm:$0xff]  }
 0x10c   :  { %3980 = vmatprep.subr.bf16.mxu1 %v5009_v21 }
 0x10f   :  { %3981 = vmatpush3.bf16.msra.mxu1 %v5021_v23 }
 0x110   :  { %3982 = vmatprep.subr.bf16.mxu1 %v5033_v25 }
 0x113   :  { %v3937_v9 = vpop.f32.mrf.mxu0  ;;  %3983 = vmatpush3.bf16.msra.mxu1 %v5045_v27 }
 0x114   :  { %v674_v13 = vpop.f32.mrf.mxu1  ;;  %3984 = vmatprep.subr.bf16.mxu1 %v5057_v29  ;;  %v946_v29 = vsel %vm161_vm0, %v945_v56, %v944_v17  ;;  %v4538_v17 = vld [vmem:[%s6552_s3 + $0x114] ss:$8 sps:$4 sm:$0xff]  }
 0x115   :  { %v3938_v15 = vpop.f32.mrf.mxu0  ;;  %v957_v0 = vpack.c.b16 %v946_v29, %v946_v29  ;;  %v5502_v56 = vld [vmem:[%s6550_s1 + $0xf8] sm:$0xff]  }
 0x116   :  { %v3939_v21 = vadd.f32 %v3938_v15, %v3937_v9  ;;  %v4335_v23 = vpop.f32.mrf.mxu1  ;;  %v4526_v9 = vld [vmem:[%s6552_s3 + $0x154] ss:$8 sps:$4 sm:$0xff]   ;;  %v4533_v15 = vld [vmem:[%s6552_s3 + $0x120] ss:$8 sps:$4 sm:$0xff]  }
 0x117   :  { %v3940_v25 = vpop.f32.mrf.mxu0  ;;  %3985 = vmatpush3.bf16.msra.mxu1 %v5069_v31  ;;  %v5356_v31 = vld [vmem:[%s6550_s1 + $0x70] sm:$0xff]   ;;  %v4539_v23 = vld [vmem:[%s6552_s3 + $0x100] ss:$8 sps:$4 sm:$0xff]  }
 0x118   :  { %v635_v59 = vadd.f32 %v3939_v21, %v595_v19  ;;  %v677_v27 = vpop.f32.mrf.mxu1  ;;  %1187 = vmatprep.subr.bf16.mxu1 %v4520_v5  ;;  %v4536_v19 = vld [vmem:[%s6552_s3 + $0x110] ss:$8 sps:$4 sm:$0xff]   ;;  %v4541_v21 = vld [vmem:[%s6552_s3 + $0x104] ss:$8 sps:$4 sm:$0xff]   ;;  %v1234_v25 = vrot.slane %v5092_v48, 2 }
 0x119   :  { %v3941_v60 = vpop.f32.mrf.mxu0  ;;  %v1231_v27 = vrot.slane %v5090_v47, 2 }
 0x11a   :  { %v675_v61 = vadd.f32 %v674_v13, %v635_v59  ;;  %v4336_v62 = vpop.f32.mrf.mxu1  ;;  %1041 = vmatmul.mubr.bf16.vlgmr.msra.gmra.mxu1 %v958_v58  ;;  %v4535_v13 = vld [vmem:[%s6552_s3 + $0x124] ss:$8 sps:$4 sm:$0xff]   ;;  %v1233_v58 = vrot.slane %v5088_v46, 3  ;;  %v1230_v59 = vrot.slane %v5086_v45, 3 }
 0x11b   :  { %1219 = vmatprep.mubr.bf16.mxu1 %v6562_v57  ;;  %1188 = vmatpush1.bf16.msra.mxu1 %v4518_v3 }
 0x11c   :  { %v680_v63 = vmax.f32 %v675_v61, 0.0  ;;  %1189 = vmatprep.subr.bf16.mxu1 %v4523_v7  ;;  %v1235_v60 = vsel %vm161_vm0, %v1234_v25, %v1233_v58  ;;  %v1232_v62 = vsel %vm161_vm0, %v1231_v27, %v1230_v59 }
 0x11d   :  { %v1246_v61 = vpack.c.b16 %v1235_v60, %v1235_v60  ;;  %v1245_v29 = vpack.c.b16 %v1232_v62, %v1232_v62  ;;  %v5536_v62 = vld [vmem:[%s6550_s1 + $0xb8] sm:$0xff]  }
 0x11e   :  { %v681_v32 = vpack.c.bf16 %v680_v63, %v680_v63  ;;  %v1242_v63 = vrot.slane %v5148_v42, 3 }
 0x120   :  { %812 = vmatmul.mubr.bf16.vlgmr.msra.gmra.mxu0 %v681_v32 }
 0x121   :  { %3949 = vmatpush3.bf16.msra.mxu0 %v5350_v34  ;;  %1000 = vmatprep.mubr.bf16.mxu0 %v957_v0  ;;  %v1243_v0 = vrot.slane %v5135_v40, 2 }
 0x122   :  { %3950 = vmatprep.subr.bf16.mxu0 %v5356_v31 }
 0x123   :  { %v1244_v32 = vsel %vm161_vm0, %v1243_v0, %v1242_v63  ;;  %v5548_v63 = vld [vmem:[%s6550_s1 + $0xb0] sm:$0xff]   ;;  %v5554_v0 = vld [vmem:[%s6550_s1 + $0xe8] sm:$0xff]  }
 0x125   :  { %3951 = vmatpush3.bf16.msra.mxu0 %v5362_v35 }
 0x126   :  { %3952 = vmatprep.subr.bf16.mxu0 %v5368_v36 }
 0x129   :  { %3953 = vmatpush3.bf16.msra.mxu0 %v5374_v38 }
 0x12a   :  { %3954 = vmatprep.subr.bf16.mxu0 %v4955_v12  ;;  %v943_v12 = vsel %vm161_vm0, %v942_v2, %v941_v39 }
 0x12d   :  { %3955 = vmatpush3.bf16.msra.mxu0 %v4967_v14  ;;  %v956_v14 = vpack.c.b16 %v943_v12, %v943_v12 }
 0x12e   :  { %3956 = vmatprep.subr.bf16.mxu0 %v4979_v16  ;;  %v953_v16 = vrot.slane %v5148_v42, 2 }
 0x131   :  { %3957 = vmatpush3.bf16.msra.mxu0 %v4991_v18  ;;  %v954_v18 = vrot.slane %v5135_v40, 1 }
 0x132   :  { %3958 = vmatprep.subr.bf16.mxu0 %v5003_v20 }
 0x133   :  { %v955_v20 = vsel %vm161_vm0, %v954_v18, %v953_v16 }
 0x134   :  { %v960_v4 = vpack.c.b16 %v955_v20, %v955_v20 }
 0x135   :  { %3959 = vmatpush3.bf16.msra.mxu0 %v5015_v22 }
 0x136   :  { %3960 = vmatprep.subr.bf16.mxu0 %v5027_v24 }
 0x139   :  { %3961 = vmatpush3.bf16.msra.mxu0 %v5039_v26 }
 0x13a   :  { %3962 = vmatprep.subr.bf16.mxu0 %v5051_v28 }
 0x13d   :  { %3963 = vmatpush3.bf16.msra.mxu0 %v5063_v30 }
 0x13e   :  { %4337 = vmatprep.subr.bf16.mxu0 %v6560_v44 }
 0x140   :  { %1001 = vmatmul.mubr.bf16.vlgmr.msra.gmra.mxu0 %v956_v14 }
 0x141   :  { %4338 = vmatpush3.bf16.msra.mxu0 %v5121_v33  ;;  %4345 = vmatprep.mubr.msk.bf16.mxu0 %vm4829_vm1, %v6560_v44 }
 0x142   :  { %4339 = vmatprep.subr.bf16.mxu0 %v6560_v44 }
 0x145   :  { %4340 = vmatpush3.bf16.msra.mxu0 %v5129_v37 }
 0x146   :  { %4341 = vmatprep.subr.bf16.mxu0 %v6560_v44 }
 0x149   :  { %4342 = vmatpush3.bf16.msra.mxu0 %v5143_v41 }
 0x14a   :  { %4343 = vmatprep.subr.bf16.mxu0 %v6560_v44 }
 0x14d   :  { %4344 = vmatpush3.bf16.msra.mxu0 %v5158_v43 }
 0x14e   :  { %3997 = vmatprep.subr.bf16.mxu0 %v5406_v53 }
 0x150   :  { %4346 = vmatmul.mubr.msk.bf16.vlgmr.msra.gmra.mxu0 %vm396_vm2, %v960_v4 }
 0x151   :  { %3998 = vmatpush3.bf16.msra.mxu0 %v5350_v34  ;;  %1289 = vmatprep.mubr.bf16.mxu0 %v1246_v61 }
 0x152   :  { %3999 = vmatprep.subr.bf16.mxu0 %v5356_v31 }
 0x155   :  { %4000 = vmatpush3.bf16.msra.mxu0 %v5362_v35 }
 0x156   :  { %4001 = vmatprep.subr.bf16.mxu0 %v5368_v36 }
 0x159   :  { %4002 = vmatpush3.bf16.msra.mxu0 %v5374_v38 }
 0x15a   :  { %4003 = vmatprep.subr.bf16.mxu0 %v5418_v6 }
 0x15d   :  { %4004 = vmatpush3.bf16.msra.mxu0 %v5424_v8 }
 0x15e   :  { %4005 = vmatprep.subr.bf16.mxu0 %v5430_v54 }
 0x161   :  { %4006 = vmatpush3.bf16.msra.mxu0 %v5436_v10 }
 0x162   :  { %4007 = vmatprep.subr.bf16.mxu0 %v5442_v55 }
 0x165   :  { %4008 = vmatpush3.bf16.msra.mxu0 %v5015_v22  ;;  %v4521_v22 = vld [vmem:[%s6552_s3 + $0x160] ss:$8 sps:$4 sm:$0xff]  }
 0x166   :  { %4009 = vmatprep.subr.bf16.mxu0 %v5027_v24  ;;  %1190 = vmatpush1.bf16.msra.mxu1 %v4521_v22  ;;  %v4524_v24 = vld [vmem:[%s6552_s3 + $0x150] ss:$8 sps:$4 sm:$0xff]  }
 0x167   :  { %1191 = vmatprep.subr.bf16.mxu1 %v4526_v9 }
 0x169   :  { %4010 = vmatpush3.bf16.msra.mxu0 %v5039_v26  ;;  %v4529_v26 = vld [vmem:[%s6552_s3 + $0x144] ss:$8 sps:$4 sm:$0xff]  }
 0x16a   :  { %4011 = vmatprep.subr.bf16.mxu0 %v5051_v28  ;;  %1192 = vmatpush1.bf16.msra.mxu1 %v4524_v24  ;;  %v4532_v28 = vld [vmem:[%s6552_s3 + $0x134] ss:$8 sps:$4 sm:$0xff]  }
 0x16b   :  { %1193 = vmatprep.subr.bf16.mxu1 %v4529_v26 }
 0x16d   :  { %4012 = vmatpush3.bf16.msra.mxu0 %v5063_v30  ;;  %v4530_v30 = vld [vmem:[%s6552_s3 + $0x130] ss:$8 sps:$4 sm:$0xff]  }
 0x16e   :  { %4349 = vmatprep.subr.bf16.mxu0 %v6560_v44  ;;  %1194 = vmatpush1.bf16.msra.mxu1 %v4527_v11 }
 0x16f   :  { %1195 = vmatprep.subr.bf16.mxu1 %v4532_v28 }
 0x170   :  { %1290 = vmatmul.mubr.bf16.vlgmr.msra.gmra.mxu0 %v1245_v29  ;;  %v5542_v29 = vld [vmem:[%s6550_s1 + $0xf0] sm:$0xff]  }
 0x171   :  { %4350 = vmatpush3.bf16.msra.mxu0 %v5121_v33  ;;  %4357 = vmatprep.mubr.msk.bf16.mxu0 %vm4829_vm1, %v6560_v44  ;;  %v1249_v33 = vpack.c.b16 %v1244_v32, %v1244_v32  ;;  %v5560_v32 = vld [vmem:[%s6550_s1 + $0xa8] sm:$0xff]  }
 0x172   :  { %1196 = vmatpush1.bf16.msra.mxu1 %v4530_v30  ;;  %4351 = vmatprep.subr.bf16.mxu0 %v6560_v44 }
 0x173   :  { %1197 = vmatprep.subr.bf16.mxu1 %v4535_v13  ;;  %v1239_v13 = vrot.slane %v5097_v50, 3 }
 0x175   :  { %4352 = vmatpush3.bf16.msra.mxu0 %v5129_v37 }
 0x176   :  { %1198 = vmatpush1.bf16.msra.mxu1 %v4533_v15  ;;  %4353 = vmatprep.subr.bf16.mxu0 %v6560_v44  ;;  %v1240_v15 = vrot.slane %v5101_v52, 2 }
 0x177   :  { %1199 = vmatprep.subr.bf16.mxu1 %v4538_v17 }
 0x179   :  { %4354 = vmatpush3.bf16.msra.mxu0 %v5143_v41 }
 0x17a   :  { %1200 = vmatpush1.bf16.msra.mxu1 %v4536_v19  ;;  %4355 = vmatprep.subr.bf16.mxu0 %v6560_v44 }
 0x17b   :  { %1201 = vmatprep.subr.bf16.mxu1 %v4541_v21 }
 0x17d   :  { %4356 = vmatpush3.bf16.msra.mxu0 %v5158_v43 }
 0x17e   :  { %1202 = vmatpush1.bf16.msra.mxu1 %v4539_v23  ;;  %v1241_v23 = vsel %vm161_vm0, %v1240_v15, %v1239_v13  ;;  %v4544_v13 = vld [vmem:[%s6552_s3 + $0x1f4] ss:$8 sps:$4 sm:$0xff]   ;;  %v4547_v15 = vld [vmem:[%s6552_s3 + $0x1e4] ss:$8 sps:$4 sm:$0xff]  }
 0x17f   :  { %4019 = vmatprep.subr.bf16.mxu1 %v5502_v56  ;;  %v1248_v27 = vpack.c.b16 %v1241_v23, %v1241_v23  ;;  %1476 = vmatprep.subr.bf16.mxu0 %v4544_v13  ;;  %v4553_v23 = vld [vmem:[%s6552_s3 + $0x1c4] ss:$8 sps:$4 sm:$0xff]   ;;  %v4562_v13 = vld [vmem:[%s6552_s3 + $0x194] ss:$8 sps:$4 sm:$0xff]  }
 0x180   :  { %4358 = vmatmul.mubr.msk.bf16.vlgmr.msra.gmra.mxu0 %vm396_vm2, %v1249_v33  ;;  %v5566_v33 = vld [vmem:[%s6550_s1 + $0xe0] sm:$0xff]  }
 0x181   :  { %1508 = vmatprep.mubr.bf16.mxu0 %v6562_v57 }
 0x1ba   :  { %v934_v37 = vpop.f32.mrf.mxu1 }
 0x1bc   :  { %v936_v39 = vpop.f32.mrf.mxu1 }
 0x1be   :  { %v938_v2 = vpop.f32.mrf.mxu1 }
 0x1bf   :  { %v5584_v2 = vld [vmem:[%s6550_s1 + $0x98] sm:$0xff]  }
 0x1c0   :  { %v939_v12 = vpop.f32.mrf.mxu1 }
 0x1c1   :  { %v5590_v12 = vld [vmem:[%s6550_s1 + $0xd0] sm:$0xff]  }
 0x1da   :  { %v3986_v41 = vpop.f32.mrf.mxu1 }
 0x1dc   :  { %v3987_v14 = vpop.f32.mrf.mxu1 }
 0x1dd   :  { %v3988_v30 = vadd.f32 %v3987_v14, %v3986_v41  ;;  %v5596_v41 = vld [vmem:[%s6550_s1 + $0x90] sm:$0xff]   ;;  %v1236_v14 = vrot.slane %v5095_v49, 3 }
 0x1de   :  { %v3989_v16 = vpop.f32.mrf.mxu1 }
 0x1df   :  { %v1237_v16 = vrot.slane %v5099_v51, 2 }
 0x1e0   :  { %v813_v18 = vpop.f32.mrf.mxu0  ;;  %v3990_v20 = vpop.f32.mrf.mxu1 }
 0x1e1   :  { %v5525_v4 = vadd.f32 %v934_v37, %v813_v18  ;;  %v5572_v37 = vld [vmem:[%s6550_s1 + $0xa0] sm:$0xff]   ;;  %v5604_v18 = vld [vmem:[%s6550_s1 + $0xc8] sm:$0xff]  }
 0x1e2   :  { %v815_v3 = vpop.f32.mrf.mxu0  ;;  %v5610_v20 = vld [vmem:[%s6550_s1 + $0x88] sm:$0xff]  }
 0x1e3   :  { %v5527_v5 = vadd.f32 %v936_v39, %v815_v3  ;;  %v5578_v39 = vld [vmem:[%s6550_s1 + $0xd8] sm:$0xff]   ;;  %v1238_v3 = vsel %vm161_vm0, %v1237_v16, %v1236_v14 }
 0x1e4   :  { %v817_v43 = vpop.f32.mrf.mxu0  ;;  %v4554_v14 = vld [vmem:[%s6552_s3 + $0x1b0] ss:$8 sps:$4 sm:$0xff]  }
 0x1e5   :  { %v5617_v43 = vld [vmem:[%s6550_s1 + $0xc0] sm:$0xff]  }
 0x1e6   :  { %v818_v7 = vpop.f32.mrf.mxu0 }
 0x1e7   :  { %v1247_v7 = vpack.c.b16 %v1238_v3, %v1238_v3  ;;  %v4559_v3 = vld [vmem:[%s6552_s3 + $0x1a4] ss:$8 sps:$4 sm:$0xff]  }
 0x200   :  { %v3964_v22 = vpop.f32.mrf.mxu0 }
 0x202   :  { %v3965_v9 = vpop.f32.mrf.mxu0 }
 0x203   :  { %v3966_v11 = vadd.f32 %v3965_v9, %v3964_v22  ;;  %v5623_v22 = vld [vmem:[%s6550_s1 + $0x80] sm:$0xff]   ;;  %v5640_v9 = vld [vmem:[%s6550_s1 + $0x10] sm:$0xff]  }
 0x204   :  { %v3967_v24 = vpop.f32.mrf.mxu0 }
 0x205   :  { %v1003_v28 = vadd.f32 %v3966_v11, %v5318_v1  ;;  %v5646_v24 = vld [vmem:[%s6550_s1 + $0x48] sm:$0xff]   ;;  %v5658_v11 = vld [vmem:[%s6550_s1 + $0x40] sm:$0xff]  }
 0x206   :  { %v3968_v26 = vpop.f32.mrf.mxu0 }
 0x207   :  { %v1043_v17 = vadd.f32 %v3988_v30, %v1003_v28  ;;  %v5652_v26 = vld [vmem:[%s6550_s1 + $0x8] sm:$0xff]   ;;  %v5664_v28 = vld [vmem:[%s6550_s1] sm:$0xff]   ;;  %v4542_v30 = vld [vmem:[%s6552_s3 + $0x1f0] ss:$8 sps:$4 sm:$0xff]  }
 0x208   :  { %1477 = vmatpush1.bf16.msra.mxu0 %v4542_v30 }
 0x209   :  { %1478 = vmatprep.subr.bf16.mxu0 %v4547_v15 }
 0x210   :  { %v1082_v19 = vpop.f32.mrf.mxu0 }
 0x211   :  { %v1083_v21 = vadd.f32 %v1082_v19, %v1043_v17  ;;  %v4545_v17 = vld [vmem:[%s6552_s3 + $0x1e0] ss:$8 sps:$4 sm:$0xff]   ;;  %v4550_v19 = vld [vmem:[%s6552_s3 + $0x1d4] ss:$8 sps:$4 sm:$0xff]  }
 0x212   :  { %v4347_v58 = vpop.f32.mrf.mxu0  ;;  %1479 = vmatpush1.bf16.msra.mxu0 %v4545_v17  ;;  %v4560_v17 = vld [vmem:[%s6552_s3 + $0x190] ss:$8 sps:$4 sm:$0xff]  }
 0x213   :  { %v1088_v25 = vmax.f32 %v1083_v21, 0.0  ;;  %v4548_v21 = vld [vmem:[%s6552_s3 + $0x1d0] ss:$8 sps:$4 sm:$0xff]   ;;  %1480 = vmatprep.subr.bf16.mxu0 %v4550_v19 }
 0x214   :  { %v1085_v59 = vpop.f32.mrf.mxu0 }
 0x215   :  { %v1089_v60 = vpack.c.bf16 %v1088_v25, %v1088_v25  ;;  %v4551_v25 = vld [vmem:[%s6552_s3 + $0x1c0] ss:$8 sps:$4 sm:$0xff]   ;;  %v4556_v59 = vld [vmem:[%s6552_s3 + $0x1b4] ss:$8 sps:$4 sm:$0xff]  }
 0x216   :  { %v4348_v61 = vpop.f32.mrf.mxu0  ;;  %1481 = vmatpush1.bf16.msra.mxu0 %v4548_v21  ;;  %v4565_v21 = vld [vmem:[%s6552_s3 + $0x184] ss:$8 sps:$4 sm:$0xff]  }
 0x217   :  { %1220 = vmatmul.mubr.bf16.vlgmr.msra.gmra.mxu1 %v1089_v60  ;;  %1482 = vmatprep.subr.bf16.mxu0 %v4553_v23 }
 0x218   :  { %4020 = vmatpush3.bf16.msra.mxu1 %v5536_v62  ;;  %1329 = vmatprep.mubr.bf16.mxu1 %v1248_v27 }
 0x219   :  { %4021 = vmatprep.subr.bf16.mxu1 %v5542_v29 }
 0x21a   :  { %1483 = vmatpush1.bf16.msra.mxu0 %v4551_v25  ;;  %v1522_v25 = vrot.slane %v5088_v46, 4 }
 0x21b   :  { %1484 = vmatprep.subr.bf16.mxu0 %v4556_v59  ;;  %v1523_v59 = vrot.slane %v5092_v48, 3 }
 0x21c   :  { %4022 = vmatpush3.bf16.msra.mxu1 %v5548_v63 }
 0x21d   :  { %4023 = vmatprep.subr.bf16.mxu1 %v5554_v0 }
 0x21e   :  { %1485 = vmatpush1.bf16.msra.mxu0 %v4554_v14  ;;  %v1524_v14 = vsel %vm161_vm0, %v1523_v59, %v1522_v25 }
 0x21f   :  { %1486 = vmatprep.subr.bf16.mxu0 %v4559_v3 }
 0x220   :  { %4024 = vmatpush3.bf16.msra.mxu1 %v5560_v32 }
 0x221   :  { %4025 = vmatprep.subr.bf16.mxu1 %v5566_v33 }
 0x224   :  { %4026 = vmatpush3.bf16.msra.mxu1 %v5572_v37 }
 0x225   :  { %4027 = vmatprep.subr.bf16.mxu1 %v5578_v39 }
 0x228   :  { %4028 = vmatpush3.bf16.msra.mxu1 %v5584_v2 }
 0x229   :  { %4029 = vmatprep.subr.bf16.mxu1 %v5590_v12 }
 0x22c   :  { %4030 = vmatpush3.bf16.msra.mxu1 %v5596_v41 }
 0x22d   :  { %4031 = vmatprep.subr.bf16.mxu1 %v5604_v18 }
 0x230   :  { %4032 = vmatpush3.bf16.msra.mxu1 %v5610_v20  ;;  %v4013_v58 = vpop.f32.mrf.mxu0 }
 0x231   :  { %4033 = vmatprep.subr.bf16.mxu1 %v5617_v43 }
 0x232   :  { %v4014_v27 = vpop.f32.mrf.mxu0 }
 0x233   :  { %v4015_v60 = vadd.f32 %v4014_v27, %v4013_v58  ;;  %v4563_v58 = vld [vmem:[%s6552_s3 + $0x180] ss:$8 sps:$4 sm:$0xff]   ;;  %v1519_v27 = vrot.slane %v5086_v45, 4 }
 0x234   :  { %4034 = vmatpush3.bf16.msra.mxu1 %v5623_v22  ;;  %v4016_v61 = vpop.f32.mrf.mxu0 }
 0x235   :  { %4046 = vmatprep.subr.bf16.mxu1 %v5406_v53  ;;  %v1520_v61 = vrot.slane %v5090_v47, 3 }
 0x236   :  { %v4017_v16 = vpop.f32.mrf.mxu0 }
 0x237   :  { %1330 = vmatmul.mubr.bf16.vlgmr.msra.gmra.mxu1 %v1247_v7  ;;  %v4557_v7 = vld [vmem:[%s6552_s3 + $0x1a0] ss:$8 sps:$4 sm:$0xff]   ;;  %v1535_v16 = vpack.c.b16 %v1524_v14, %v1524_v14  ;;  %v1521_v3 = vsel %vm161_vm0, %v1520_v61, %v1519_v27 }
 0x238   :  { %4047 = vmatpush3.bf16.msra.mxu1 %v5350_v34  ;;  %1487 = vmatpush1.bf16.msra.mxu0 %v4557_v7  ;;  %v1534_v7 = vpack.c.b16 %v1521_v3, %v1521_v3 }
 0x239   :  { %4048 = vmatprep.subr.bf16.mxu1 %v5356_v31  ;;  %1488 = vmatprep.subr.bf16.mxu0 %v4562_v13  ;;  %v5726_v13 = vld [vmem:[%s6550_s1 + $0x118] sm:$0xff]  }
 0x23a   :  { %1578 = vmatprep.mubr.bf16.mxu1 %v1535_v16 }
 0x23c   :  { %4049 = vmatpush3.bf16.msra.mxu1 %v5362_v35  ;;  %1489 = vmatpush1.bf16.msra.mxu0 %v4560_v17  ;;  %v5742_v17 = vld [vmem:[%s6550_s1 + $0x108] sm:$0xff]  }
 0x23d   :  { %4050 = vmatprep.subr.bf16.mxu1 %v5368_v36  ;;  %1490 = vmatprep.subr.bf16.mxu0 %v4565_v21  ;;  %v1532_v21 = vrot.slane %v5135_v40, 3 }
 0x240   :  { %4051 = vmatpush3.bf16.msra.mxu1 %v5374_v38  ;;  %v1371_v30 = vpop.f32.mrf.mxu0  ;;  %1491 = vmatpush1.bf16.msra.mxu0 %v4563_v58  ;;  %v5752_v58 = vld [vmem:[%s6550_s1 + $0x100] sm:$0xff]  }
 0x241   :  { %4052 = vmatprep.subr.bf16.mxu1 %v5418_v6  ;;  %4068 = vmatprep.subr.bf16.mxu0 %v5502_v56  ;;  %6572 = vst [vmem:[#allocation4_spill] sm:$0xff] %v5752_v58 }
 0x242   :  { %v4359_v15 = vpop.f32.mrf.mxu0 }
 0x243   :  { %v5735_v15 = vld [vmem:[%s6550_s1 + $0x110] sm:$0xff]  }
 0x244   :  { %4053 = vmatpush3.bf16.msra.mxu1 %v5424_v8  ;;  %v1374_v19 = vpop.f32.mrf.mxu0 }
 0x245   :  { %4054 = vmatprep.subr.bf16.mxu1 %v5430_v54  ;;  %v1531_v19 = vrot.slane %v5148_v42, 4 }
 0x246   :  { %v4360_v23 = vpop.f32.mrf.mxu0 }
 0x247   :  { %v1533_v23 = vsel %vm161_vm0, %v1532_v21, %v1531_v19  ;;  %v1292_v21 = vadd.f32 %v4015_v60, %v5318_v1 }
 0x248   :  { %4055 = vmatpush3.bf16.msra.mxu1 %v5436_v10  ;;  %v1538_v25 = vpack.c.b16 %v1533_v23, %v1533_v23  ;;  %v1528_v23 = vrot.slane %v5097_v50, 4 }
 0x249   :  { %4056 = vmatprep.subr.bf16.mxu1 %v5442_v55 }
 0x24c   :  { %4057 = vmatpush3.bf16.msra.mxu1 %v5640_v9 }
 0x24d   :  { %4058 = vmatprep.subr.bf16.mxu1 %v5646_v24 }
 0x250   :  { %4059 = vmatpush3.bf16.msra.mxu1 %v5652_v26 }
 0x251   :  { %4060 = vmatprep.subr.bf16.mxu1 %v5658_v11 }
 0x254   :  { %4061 = vmatpush3.bf16.msra.mxu1 %v5664_v28 }
 0x255   :  { %4361 = vmatprep.subr.bf16.mxu1 %v6560_v44 }
 0x257   :  { %1579 = vmatmul.mubr.bf16.vlgmr.msra.gmra.mxu1 %v1534_v7 }
 0x258   :  { %4362 = vmatpush3.bf16.msra.mxu1 %v5726_v13  ;;  %4369 = vmatprep.mubr.msk.bf16.mxu1 %vm4829_vm1, %v6560_v44 }
 0x259   :  { %4363 = vmatprep.subr.bf16.mxu1 %v6560_v44 }
 0x25c   :  { %4364 = vmatpush3.bf16.msra.mxu1 %v5735_v15 }
 0x25d   :  { %4365 = vmatprep.subr.bf16.mxu1 %v6560_v44 }
 0x260   :  { %4366 = vmatpush3.bf16.msra.mxu1 %v5742_v17 }
 0x261   :  { %4367 = vmatprep.subr.bf16.mxu1 %v6560_v44 }
 0x264   :  { %4368 = vmatpush3.bf16.msra.mxu1 %v5752_v58 }
 0x267   :  { %4370 = vmatmul.mubr.msk.bf16.vlgmr.msra.gmra.mxu1 %vm396_vm2, %v1538_v25  ;;  %v1529_v25 = vrot.slane %v5101_v52, 3 }
 0x268   :  { %1797 = vmatprep.mubr.bf16.mxu1 %v6562_v57 }
 0x2d7   :  { %v1221_v59 = vpop.f32.mrf.mxu1 }
 0x2d8   :  { %v5758_v27 = vadd.f32 %v1221_v59, %v5525_v4  ;;  %v1530_v59 = vsel %vm161_vm0, %v1529_v25, %v1528_v23  ;;  %v4575_v25 = vld [vmem:[%s6552_s3 + $0x240] ss:$8 sps:$4 sm:$0xff]  }
 0x2d9   :  { %v1223_v61 = vpop.f32.mrf.mxu1 }
 0x2da   :  { %6573 = vst [vmem:[#allocation5_spill] sm:$0xff] %v5758_v27  ;;  %v5761_v14 = vadd.f32 %v1223_v61, %v5527_v5  ;;  %v1537_v5 = vpack.c.b16 %v1530_v59, %v1530_v59 }
 0x2db   :  { %v1225_v16 = vpop.f32.mrf.mxu1 }
 0x2dc   :  { %v4571_v16 = vld [vmem:[%s6552_s3 + $0x264] ss:$8 sps:$4 sm:$0xff]  }
 0x2dd   :  { %v1226_v3 = vpop.f32.mrf.mxu1 }
 0x2de   :  { %v4569_v3 = vld [vmem:[%s6552_s3 + $0x260] ss:$8 sps:$4 sm:$0xff]  }
 0x2f7   :  { %v4035_v7 = vpop.f32.mrf.mxu1 }
 0x2f9   :  { %v4036_v19 = vpop.f32.mrf.mxu1 }
 0x2fa   :  { %v4037_v44 = vadd.f32 %v4036_v19, %v4035_v7  ;;  %v4574_v7 = vld [vmem:[%s6552_s3 + $0x254] ss:$8 sps:$4 sm:$0xff]   ;;  %v4572_v19 = vld [vmem:[%s6552_s3 + $0x250] ss:$8 sps:$4 sm:$0xff]  }
 0x2fb   :  { %v4038_v57 = vpop.f32.mrf.mxu1 }
 0x2fc   :  { %v1332_v58 = vadd.f32 %v4037_v44, %v1292_v21  ;;  %v1525_v44 = vrot.slane %v5095_v49, 4  ;;  %v4577_v21 = vld [vmem:[%s6552_s3 + $0x244] ss:$8 sps:$4 sm:$0xff]  }
 0x2fd   :  { %v4039_v40 = vpop.f32.mrf.mxu1 }
 0x2fe   :  { %v1372_v4 = vadd.f32 %v1371_v30, %v1332_v58  ;;  %v1526_v40 = vrot.slane %v5099_v51, 3  ;;  %v6574_v30 = vmov 0.0   ;;  %v4566_v58 = vld [vmem:[%s6552_s3 + $0x270] ss:$8 sps:$4 sm:$0xff]  }
 0x300   :  { %v1377_v27 = vmax.f32 %v1372_v4, 0.0  ;;  %v1527_v57 = vsel %vm161_vm0, %v1526_v40, %v1525_v44  ;;  %v4580_v4 = vld [vmem:[%s6552_s3 + $0x234] ss:$8 sps:$4 sm:$0xff]   ;;  %v4578_v44 = vld [vmem:[%s6552_s3 + $0x230] ss:$8 sps:$4 sm:$0xff]  }
 0x301   :  { %v1536_v60 = vpack.c.b16 %v1527_v57, %v1527_v57  ;;  %v4583_v57 = vld [vmem:[%s6552_s3 + $0x224] ss:$8 sps:$4 sm:$0xff]  }
 0x302   :  { %v1378_v61 = vpack.c.bf16 %v1377_v27, %v1377_v27  ;;  %v4568_v27 = vld [vmem:[%s6552_s3 + $0x274] ss:$8 sps:$4 sm:$0xff]  }
 0x303   :  { %1765 = vmatprep.subr.bf16.mxu1 %v4568_v27  ;;  %v4586_v27 = vld [vmem:[%s6552_s3 + $0x214] ss:$8 sps:$4 sm:$0xff]  }
 0x304   :  { %1509 = vmatmul.mubr.bf16.vlgmr.msra.gmra.mxu0 %v1378_v61  ;;  %1766 = vmatpush1.bf16.msra.mxu1 %v4566_v58 }
 0x305   :  { %4069 = vmatpush3.bf16.msra.mxu0 %v5536_v62  ;;  %1618 = vmatprep.mubr.bf16.mxu0 %v1537_v5 }
 0x306   :  { %4070 = vmatprep.subr.bf16.mxu0 %v5542_v29  ;;  %1767 = vmatprep.subr.bf16.mxu1 %v4571_v16 }
 0x308   :  { %1768 = vmatpush1.bf16.msra.mxu1 %v4569_v3  ;;  %v4584_v3 = vld [vmem:[%s6552_s3 + $0x210] ss:$8 sps:$4 sm:$0xff]  }
 0x309   :  { %4071 = vmatpush3.bf16.msra.mxu0 %v5548_v63  ;;  %1769 = vmatprep.subr.bf16.mxu1 %v4574_v7 }
 0x30a   :  { %4072 = vmatprep.subr.bf16.mxu0 %v5554_v0 }
 0x30c   :  { %1770 = vmatpush1.bf16.msra.mxu1 %v4572_v19  ;;  %v4589_v19 = vld [vmem:[%s6552_s3 + $0x204] ss:$8 sps:$4 sm:$0xff]  }
 0x30d   :  { %4073 = vmatpush3.bf16.msra.mxu0 %v5560_v32  ;;  %1771 = vmatprep.subr.bf16.mxu1 %v4577_v21 }
 0x30e   :  { %4074 = vmatprep.subr.bf16.mxu0 %v5566_v33 }
 0x310   :  { %1772 = vmatpush1.bf16.msra.mxu1 %v4575_v25  ;;  %v1811_v25 = vrot.slane %v5088_v46, 5 }
 0x311   :  { %4075 = vmatpush3.bf16.msra.mxu0 %v5572_v37  ;;  %1773 = vmatprep.subr.bf16.mxu1 %v4580_v4  ;;  %v1812_v4 = vrot.slane %v5092_v48, 4 }
 0x312   :  { %4076 = vmatprep.subr.bf16.mxu0 %v5578_v39 }
 0x314   :  { %1774 = vmatpush1.bf16.msra.mxu1 %v4578_v44  ;;  %v1813_v44 = vsel %vm161_vm0, %v1812_v4, %v1811_v25  ;;  %v6578_v4 = vld [vmem:[#allocation5_spill] sm:$0xff] }
 0x315   :  { %4077 = vmatpush3.bf16.msra.mxu0 %v5584_v2  ;;  %1775 = vmatprep.subr.bf16.mxu1 %v4583_v57 }
 0x316   :  { %4078 = vmatprep.subr.bf16.mxu0 %v5590_v12 }
 0x317   :  { %v4062_v23 = vpop.f32.mrf.mxu1 }
 0x319   :  { %4079 = vmatpush3.bf16.msra.mxu0 %v5596_v41  ;;  %v4063_v59 = vpop.f32.mrf.mxu1 }
 0x31a   :  { %4080 = vmatprep.subr.bf16.mxu0 %v5604_v18  ;;  %v4064_v5 = vadd.f32 %v4063_v59, %v4062_v23  ;;  %v4587_v23 = vld [vmem:[%s6552_s3 + $0x200] ss:$8 sps:$4 sm:$0xff]   ;;  %v1808_v59 = vrot.slane %v5086_v45, 5 }
 0x31b   :  { %v4065_v61 = vpop.f32.mrf.mxu1 }
 0x31c   :  { %v1809_v61 = vrot.slane %v5090_v47, 4 }
 0x31d   :  { %4081 = vmatpush3.bf16.msra.mxu0 %v5610_v20  ;;  %v4066_v40 = vpop.f32.mrf.mxu1 }
 0x31e   :  { %4082 = vmatprep.subr.bf16.mxu0 %v5617_v43  ;;  %v1824_v40 = vpack.c.b16 %v1813_v44, %v1813_v44  ;;  %v1810_v57 = vsel %vm161_vm0, %v1809_v61, %v1808_v59 }
 0x321   :  { %4083 = vmatpush3.bf16.msra.mxu0 %v5623_v22 }
 0x322   :  { %4095 = vmatprep.subr.bf16.mxu0 %v5406_v53 }
 0x324   :  { %1619 = vmatmul.mubr.bf16.vlgmr.msra.gmra.mxu0 %v1536_v60  ;;  %v4581_v60 = vld [vmem:[%s6552_s3 + $0x220] ss:$8 sps:$4 sm:$0xff]  }
 0x325   :  { %4096 = vmatpush3.bf16.msra.mxu0 %v5350_v34  ;;  %1776 = vmatpush1.bf16.msra.mxu1 %v4581_v60  ;;  %v1823_v60 = vpack.c.b16 %v1810_v57, %v1810_v57 }
 0x326   :  { %4097 = vmatprep.subr.bf16.mxu0 %v5356_v31  ;;  %1777 = vmatprep.subr.bf16.mxu1 %v4586_v27  ;;  %v1820_v27 = vrot.slane %v5148_v42, 5 }
 0x327   :  { %v1660_v58 = vpop.f32.mrf.mxu1  ;;  %1867 = vmatprep.mubr.bf16.mxu0 %v1824_v40 }
 0x329   :  { %4098 = vmatpush3.bf16.msra.mxu0 %v5362_v35  ;;  %v4371_v16 = vpop.f32.mrf.mxu1  ;;  %1778 = vmatpush1.bf16.msra.mxu1 %v4584_v3 }
 0x32a   :  { %4099 = vmatprep.subr.bf16.mxu0 %v5368_v36  ;;  %1779 = vmatprep.subr.bf16.mxu1 %v4589_v19  ;;  %v6575_v16 = vld [vmem:[#allocation2_spill] sm:$0xff]  ;;  %v6576_v19 = vld [vmem:[#allocation4_spill] sm:$0xff] }
 0x32b   :  { %v1663_v7 = vpop.f32.mrf.mxu1  ;;  %v1821_v3 = vrot.slane %v6575_v16, 4 }
 0x32d   :  { %4100 = vmatpush3.bf16.msra.mxu0 %v5374_v38  ;;  %v4372_v21 = vpop.f32.mrf.mxu1  ;;  %1780 = vmatpush1.bf16.msra.mxu1 %v4587_v23  ;;  %v1822_v7 = vsel %vm161_vm0, %v1821_v3, %v1820_v27  ;;  %v6577_v23 = vmov 0   ;;  %v1581_v27 = vadd.f32 %v4064_v5, %v5318_v1  ;;  %v1815_v1 = vrot.slane %v5099_v51, 4 }
 0x32e   :  { %4101 = vmatprep.subr.bf16.mxu0 %v5418_v6  ;;  %4117 = vmatprep.subr.bf16.mxu1 %v5502_v56  ;;  %v1827_v21 = vpack.c.b16 %v1822_v7, %v1822_v7  ;;  %v1817_v7 = vrot.slane %v5097_v50, 5 }
 0x331   :  { %4102 = vmatpush3.bf16.msra.mxu0 %v5424_v8 }
 0x332   :  { %4103 = vmatprep.subr.bf16.mxu0 %v5430_v54 }
 0x335   :  { %4104 = vmatpush3.bf16.msra.mxu0 %v5436_v10 }
 0x336   :  { %4105 = vmatprep.subr.bf16.mxu0 %v5442_v55 }
 0x339   :  { %4106 = vmatpush3.bf16.msra.mxu0 %v5640_v9 }
 0x33a   :  { %4107 = vmatprep.subr.bf16.mxu0 %v5646_v24 }
 0x33d   :  { %4108 = vmatpush3.bf16.msra.mxu0 %v5652_v26 }
 0x33e   :  { %4109 = vmatprep.subr.bf16.mxu0 %v5658_v11 }
 0x341   :  { %4110 = vmatpush3.bf16.msra.mxu0 %v5664_v28 }
 0x342   :  { %4373 = vmatprep.subr.bf16.mxu0 %v6574_v30 }
 0x344   :  { %1868 = vmatmul.mubr.bf16.vlgmr.msra.gmra.mxu0 %v1823_v60 }
 0x345   :  { %4374 = vmatpush3.bf16.msra.mxu0 %v5726_v13  ;;  %4381 = vmatprep.mubr.msk.bf16.mxu0 %vm4829_vm1, %v6574_v30 }
 0x346   :  { %4375 = vmatprep.subr.bf16.mxu0 %v6574_v30 }
 0x349   :  { %4376 = vmatpush3.bf16.msra.mxu0 %v5735_v15 }
 0x34a   :  { %4377 = vmatprep.subr.bf16.mxu0 %v6574_v30 }
 0x34d   :  { %4378 = vmatpush3.bf16.msra.mxu0 %v5742_v17 }
 0x34e   :  { %4379 = vmatprep.subr.bf16.mxu0 %v6574_v30 }
 0x351   :  { %4380 = vmatpush3.bf16.msra.mxu0 %v6576_v19 }
 0x354   :  { %4382 = vmatmul.mubr.msk.bf16.vlgmr.msra.gmra.mxu0 %vm396_vm2, %v1827_v21  ;;  %v1818_v21 = vrot.slane %v5101_v52, 4 }
 0x355   :  { %2086 = vmatprep.mubr.bf16.mxu0 %v6577_v23 }
 0x3c4   :  { %v1510_v25 = vpop.f32.mrf.mxu0 }
 0x3c5   :  { %v5872_v59 = vadd.f32 %v1510_v25, %v6578_v4  ;;  %v1819_v4 = vsel %vm161_vm0, %v1818_v21, %v1817_v7  ;;  %v4607_v21 = vld [vmem:[%s6552_s3 + $0x2a4] ss:$8 sps:$4 sm:$0xff]  }
 0x3c6   :  { %v1512_v61 = vpop.f32.mrf.mxu0 }
 0x3c7   :  { %6579 = vst [vmem:[#allocation5_spill] sm:$0xff] %v5872_v59  ;;  %v5875_v44 = vadd.f32 %v1512_v61, %v5761_v14  ;;  %v1826_v14 = vpack.c.b16 %v1819_v4, %v1819_v4 }
 0x3c8   :  { %v1514_v40 = vpop.f32.mrf.mxu0 }
 0x3c9   :  { %v4604_v40 = vld [vmem:[%s6552_s3 + $0x2b4] ss:$8 sps:$4 sm:$0xff]  }
 0x3ca   :  { %v1515_v57 = vpop.f32.mrf.mxu0 }
 0x3e4   :  { %v4084_v60 = vpop.f32.mrf.mxu0 }
 0x3e6   :  { %v4085_v16 = vpop.f32.mrf.mxu0 }
 0x3e7   :  { %v4086_v3 = vadd.f32 %v4085_v16, %v4084_v60  ;;  %v4596_v16 = vld [vmem:[%s6552_s3 + $0x2d0] ss:$8 sps:$4 sm:$0xff]  }
 0x3e8   :  { %v4087_v23 = vpop.f32.mrf.mxu0 }
 0x3e9   :  { %v1621_v19 = vadd.f32 %v4086_v3, %v1581_v27  ;;  %v4602_v3 = vld [vmem:[%s6552_s3 + $0x2b0] ss:$8 sps:$4 sm:$0xff]  }
 0x3ea   :  { %v4088_v42 = vpop.f32.mrf.mxu0 }
 0x3eb   :  { %v1661_v25 = vadd.f32 %v1660_v58, %v1621_v19  ;;  %v1814_v42 = vrot.slane %v5095_v49, 5  ;;  %v4601_v19 = vld [vmem:[%s6552_s3 + $0x2c4] ss:$8 sps:$4 sm:$0xff]  }
 0x3ed   :  { %v1666_v59 = vmax.f32 %v1661_v25, 0.0  ;;  %v1816_v5 = vsel %vm161_vm0, %v1815_v1, %v1814_v42  ;;  %v4605_v25 = vld [vmem:[%s6552_s3 + $0x2a0] ss:$8 sps:$4 sm:$0xff]   ;;  %v4608_v42 = vld [vmem:[%s6552_s3 + $0x290] ss:$8 sps:$4 sm:$0xff]  }
 0x3ee   :  { %v1825_v58 = vpack.c.b16 %v1816_v5, %v1816_v5  ;;  %v4613_v5 = vld [vmem:[%s6552_s3 + $0x284] ss:$8 sps:$4 sm:$0xff]  }
 0x3ef   :  { %v1667_v61 = vpack.c.bf16 %v1666_v59, %v1666_v59  ;;  %v4599_v59 = vld [vmem:[%s6552_s3 + $0x2c0] ss:$8 sps:$4 sm:$0xff]  }
 0x3f1   :  { %1798 = vmatmul.mubr.bf16.vlgmr.msra.gmra.mxu1 %v1667_v61 }
 0x3f2   :  { %4118 = vmatpush3.bf16.msra.mxu1 %v5536_v62  ;;  %1907 = vmatprep.mubr.bf16.mxu1 %v1826_v14  ;;  %v4610_v14 = vld [vmem:[%s6552_s3 + $0x294] ss:$8 sps:$4 sm:$0xff]  }
 0x3f3   :  { %4119 = vmatprep.subr.bf16.mxu1 %v5542_v29 }
 0x3f6   :  { %4120 = vmatpush3.bf16.msra.mxu1 %v5548_v63 }
 0x3f7   :  { %4121 = vmatprep.subr.bf16.mxu1 %v5554_v0 }
 0x3fa   :  { %4122 = vmatpush3.bf16.msra.mxu1 %v5560_v32 }
 0x3fb   :  { %4123 = vmatprep.subr.bf16.mxu1 %v5566_v33 }
 0x3fe   :  { %4124 = vmatpush3.bf16.msra.mxu1 %v5572_v37 }
 0x3ff   :  { %4125 = vmatprep.subr.bf16.mxu1 %v5578_v39 }
 0x402   :  { %4126 = vmatpush3.bf16.msra.mxu1 %v5584_v2 }
 0x403   :  { %4127 = vmatprep.subr.bf16.mxu1 %v5590_v12 }
 0x404   :  { %v4111_v23 = vpop.f32.mrf.mxu0 }
 0x406   :  { %4128 = vmatpush3.bf16.msra.mxu1 %v5596_v41  ;;  %v4112_v57 = vpop.f32.mrf.mxu0 }
 0x407   :  { %4129 = vmatprep.subr.bf16.mxu1 %v5604_v18  ;;  %v4113_v60 = vadd.f32 %v4112_v57, %v4111_v23  ;;  %v6581_v57 = vld [vmem:[#allocation2_spill] sm:$0xff] }
 0x408   :  { %v4114_v27 = vpop.f32.mrf.mxu0 }
 0x409   :  { %v2110_v27 = vrot.slane %v6581_v57, 5 }
 0x40a   :  { %4130 = vmatpush3.bf16.msra.mxu1 %v5610_v20  ;;  %v4115_v7 = vpop.f32.mrf.mxu0 }
 0x40b   :  { %4131 = vmatprep.subr.bf16.mxu1 %v5617_v43  ;;  %v6582_v7 = vld [vmem:[#allocation4_spill] sm:$0xff] }
 0x40e   :  { %4132 = vmatpush3.bf16.msra.mxu1 %v5623_v22 }
 0x40f   :  { %4144 = vmatprep.subr.bf16.mxu1 %v5406_v53 }
 0x411   :  { %1908 = vmatmul.mubr.bf16.vlgmr.msra.gmra.mxu1 %v1825_v58 }
 0x412   :  { %4145 = vmatpush3.bf16.msra.mxu1 %v5350_v34  ;;  %v4590_v34 = vld [vmem:[%s6552_s3 + $0x2f0] ss:$8 sps:$4 sm:$0xff]  }
 0x413   :  { %4146 = vmatprep.subr.bf16.mxu1 %v5356_v31  ;;  %v4592_v31 = vld [vmem:[%s6552_s3 + $0x2f4] ss:$8 sps:$4 sm:$0xff]  }
 0x414   :  { %2054 = vmatprep.subr.bf16.mxu0 %v4592_v31  ;;  %v1949_v4 = vpop.f32.mrf.mxu0  ;;  %v2100_v31 = vrot.slane %v5088_v46, 6 }
 0x415   :  { %2055 = vmatpush1.bf16.msra.mxu0 %v4590_v34  ;;  %v4611_v34 = vld [vmem:[%s6552_s3 + $0x280] ss:$8 sps:$4 sm:$0xff]  }
 0x416   :  { %4147 = vmatpush3.bf16.msra.mxu1 %v5362_v35  ;;  %v4595_v35 = vld [vmem:[%s6552_s3 + $0x2e4] ss:$8 sps:$4 sm:$0xff]   ;;  %v4383_v61 = vpop.f32.mrf.mxu0 }
 0x417   :  { %4148 = vmatprep.subr.bf16.mxu1 %v5368_v36  ;;  %v4593_v36 = vld [vmem:[%s6552_s3 + $0x2e0] ss:$8 sps:$4 sm:$0xff]   ;;  %2056 = vmatprep.subr.bf16.mxu0 %v4595_v35  ;;  %v2101_v35 = vrot.slane %v5092_v48, 5  ;;  %v6584_v61 = vld [vmem:[#allocation5_spill] sm:$0xff] }
 0x418   :  { %v1952_v1 = vpop.f32.mrf.mxu0 }
 0x419   :  { %2057 = vmatpush1.bf16.msra.mxu0 %v4593_v36  ;;  %v2097_v36 = vrot.slane %v5086_v45, 6 }
 0x41a   :  { %4149 = vmatpush3.bf16.msra.mxu1 %v5374_v38  ;;  %v4598_v38 = vld [vmem:[%s6552_s3 + $0x2d4] ss:$8 sps:$4 sm:$0xff]   ;;  %v4384_v58 = vpop.f32.mrf.mxu0 }
 0x41b   :  { %4150 = vmatprep.subr.bf16.mxu1 %v5418_v6  ;;  %2058 = vmatprep.subr.bf16.mxu0 %v4598_v38  ;;  %v2098_v38 = vrot.slane %v5090_v47, 5 }
 0x41d   :  { %2059 = vmatpush1.bf16.msra.mxu0 %v4596_v16  ;;  %v2102_v16 = vsel %vm161_vm0, %v2101_v35, %v2100_v31  ;;  %v2099_v23 = vsel %vm161_vm0, %v2098_v38, %v2097_v36  ;;  %v5994_v36 = vld [vmem:[%s6553_s2] ss:$0 sm:$0xff] }
 0x41e   :  { %4151 = vmatpush3.bf16.msra.mxu1 %v5424_v8  ;;  %2060 = vmatprep.subr.bf16.mxu0 %v4601_v19  ;;  %v2113_v19 = vpack.c.b16 %v2102_v16, %v2102_v16  ;;  %v1870_v38 = vadd.f32 %v5994_v36, %v4113_v60  ;;  %v2103_v60 = vrot.slane %v5095_v49, 6 }
 0x41f   :  { %4152 = vmatprep.subr.bf16.mxu1 %v5430_v54 }
 0x420   :  { %2156 = vmatprep.mubr.bf16.mxu1 %v2113_v19  ;;  %v2106_v19 = vrot.slane %v5097_v50, 6 }
 0x421   :  { %2061 = vmatpush1.bf16.msra.mxu0 %v4599_v59  ;;  %v2112_v59 = vpack.c.b16 %v2099_v23, %v2099_v23  ;;  %v2107_v23 = vrot.slane %v5101_v52, 5 }
 0x422   :  { %4153 = vmatpush3.bf16.msra.mxu1 %v5436_v10  ;;  %2062 = vmatprep.subr.bf16.mxu0 %v4604_v40 }
 0x423   :  { %4154 = vmatprep.subr.bf16.mxu1 %v5442_v55 }
 0x425   :  { %2063 = vmatpush1.bf16.msra.mxu0 %v4602_v3 }
 0x426   :  { %4155 = vmatpush3.bf16.msra.mxu1 %v5640_v9  ;;  %2064 = vmatprep.subr.bf16.mxu0 %v4607_v21 }
 0x427   :  { %4156 = vmatprep.subr.bf16.mxu1 %v5646_v24 }
 0x429   :  { %2065 = vmatpush1.bf16.msra.mxu0 %v4605_v25  ;;  %v6583_v25 = vmov 0  }
 0x42a   :  { %4157 = vmatpush3.bf16.msra.mxu1 %v5652_v26  ;;  %2066 = vmatprep.subr.bf16.mxu0 %v4610_v14 }
 0x42b   :  { %4158 = vmatprep.subr.bf16.mxu1 %v5658_v11 }
 0x42d   :  { %2067 = vmatpush1.bf16.msra.mxu0 %v4608_v42 }
 0x42e   :  { %4159 = vmatpush3.bf16.msra.mxu1 %v5664_v28  ;;  %2068 = vmatprep.subr.bf16.mxu0 %v4613_v5 }
 0x42f   :  { %4385 = vmatprep.subr.bf16.mxu1 %v6574_v30 }
 0x431   :  { %2069 = vmatpush1.bf16.msra.mxu0 %v4611_v34  ;;  %2157 = vmatmul.mubr.bf16.vlgmr.msra.gmra.mxu1 %v2112_v59 }
 0x432   :  { %4166 = vmatprep.subr.bf16.mxu0 %v5502_v56  ;;  %4386 = vmatpush3.bf16.msra.mxu1 %v5726_v13  ;;  %v6580_v56 = vld [vmem:[#allocation3_spill] sm:$0xff] }
 0x433   :  { %4393 = vmatprep.mubr.msk.bf16.mxu1 %vm4829_vm1, %v6574_v30  ;;  %4387 = vmatprep.subr.bf16.mxu1 %v6574_v30  ;;  %v2109_v40 = vrot.slane %v6580_v56, 6 }
 0x435   :  { %v2111_v3 = vsel %vm161_vm0, %v2110_v27, %v2109_v40 }
 0x436   :  { %4388 = vmatpush3.bf16.msra.mxu1 %v5735_v15  ;;  %v2116_v21 = vpack.c.b16 %v2111_v3, %v2111_v3  ;;  %v2108_v3 = vsel %vm161_vm0, %v2107_v23, %v2106_v19  ;;  %v4625_v19 = vld [vmem:[%s6552_s3 + $0x344] ss:$8 sps:$4 sm:$0xff]  }
 0x437   :  { %4389 = vmatprep.subr.bf16.mxu1 %v6574_v30 }
 0x43a   :  { %4390 = vmatpush3.bf16.msra.mxu1 %v5742_v17 }
 0x43b   :  { %4391 = vmatprep.subr.bf16.mxu1 %v6574_v30 }
 0x43e   :  { %4392 = vmatpush3.bf16.msra.mxu1 %v6582_v7 }
 0x441   :  { %4394 = vmatmul.mubr.msk.bf16.vlgmr.msra.gmra.mxu1 %vm396_vm2, %v2116_v21 }
 0x442   :  { %2375 = vmatprep.mubr.bf16.mxu1 %v6583_v25 }
 0x4b1   :  { %v1799_v14 = vpop.f32.mrf.mxu1 }
 0x4b2   :  { %v5986_v42 = vadd.f32 %v1799_v14, %v6584_v61  ;;  %v2115_v14 = vpack.c.b16 %v2108_v3, %v2108_v3 }
 0x4b3   :  { %v1801_v1 = vpop.f32.mrf.mxu1 }
 0x4b4   :  { %v5989_v5 = vadd.f32 %v1801_v1, %v5875_v44 }
 0x4b5   :  { %v1803_v58 = vpop.f32.mrf.mxu1 }
 0x4b7   :  { %v1804_v34 = vpop.f32.mrf.mxu1 }
 0x4b8   :  { %v6022_v34 = vld [vmem:[%s6550_s1 + $0x38] sm:$0xff]  }
 0x4d1   :  { %v4133_v31 = vpop.f32.mrf.mxu1 }
 0x4d3   :  { %v4134_v35 = vpop.f32.mrf.mxu1 }
 0x4d4   :  { %v4135_v16 = vadd.f32 %v4134_v35, %v4133_v31  ;;  %v6028_v31 = vld [vmem:[%s6550_s1 + $0x70] sm:$0xff]  }
 0x4d5   :  { %v4136_v59 = vpop.f32.mrf.mxu1  ;;  %v6034_v35 = vld [vmem:[%s6550_s1 + $0x30] sm:$0xff]  }
 0x4d6   :  { %v1910_v40 = vadd.f32 %v4135_v16, %v1870_v38  ;;  %v6046_v38 = vld [vmem:[%s6550_s1 + $0x28] sm:$0xff]   ;;  %v4620_v16 = vld [vmem:[%s6552_s3 + $0x350] ss:$8 sps:$4 sm:$0xff]  }
 0x4d7   :  { %v4137_v44 = vpop.f32.mrf.mxu1  ;;  %v4623_v59 = vld [vmem:[%s6552_s3 + $0x340] ss:$8 sps:$4 sm:$0xff]  }
 0x4d8   :  { %v1950_v27 = vadd.f32 %v1949_v4, %v1910_v40  ;;  %v2104_v4 = vrot.slane %v5099_v51, 5  ;;  %v4628_v40 = vld [vmem:[%s6552_s3 + $0x334] ss:$8 sps:$4 sm:$0xff]  }
 0x4da   :  { %v1955_v21 = vmax.f32 %v1950_v27, 0.0  ;;  %v2105_v1 = vsel %vm161_vm0, %v2104_v4, %v2103_v60  ;;  %v4629_v60 = vld [vmem:[%s6552_s3 + $0x320] ss:$8 sps:$4 sm:$0xff]  }
 0x4db   :  { %v2114_v58 = vpack.c.b16 %v2105_v1, %v2105_v1  ;;  %v4634_v1 = vld [vmem:[%s6552_s3 + $0x314] ss:$8 sps:$4 sm:$0xff]  }
 0x4dc   :  { %v1956_v61 = vpack.c.bf16 %v1955_v21, %v1955_v21  ;;  %v4626_v21 = vld [vmem:[%s6552_s3 + $0x330] ss:$8 sps:$4 sm:$0xff]  }
 0x4de   :  { %2087 = vmatmul.mubr.bf16.vlgmr.msra.gmra.mxu0 %v1956_v61  ;;  %v4631_v61 = vld [vmem:[%s6552_s3 + $0x324] ss:$8 sps:$4 sm:$0xff]  }
 0x4df   :  { %4167 = vmatpush3.bf16.msra.mxu0 %v5536_v62  ;;  %2196 = vmatprep.mubr.bf16.mxu0 %v2115_v14 }
 0x4e0   :  { %4168 = vmatprep.subr.bf16.mxu0 %v5542_v29 }
 0x4e3   :  { %4169 = vmatpush3.bf16.msra.mxu0 %v5548_v63 }
 0x4e4   :  { %4170 = vmatprep.subr.bf16.mxu0 %v5554_v0 }
 0x4e7   :  { %4171 = vmatpush3.bf16.msra.mxu0 %v5560_v32 }
 0x4e8   :  { %4172 = vmatprep.subr.bf16.mxu0 %v5566_v33 }
 0x4eb   :  { %4173 = vmatpush3.bf16.msra.mxu0 %v5572_v37 }
 0x4ec   :  { %4174 = vmatprep.subr.bf16.mxu0 %v5578_v39 }
 0x4ef   :  { %4175 = vmatpush3.bf16.msra.mxu0 %v5584_v2 }
 0x4f0   :  { %4176 = vmatprep.subr.bf16.mxu0 %v5590_v12 }
 0x4f1   :  { %v4160_v23 = vpop.f32.mrf.mxu1 }
 0x4f3   :  { %4177 = vmatpush3.bf16.msra.mxu0 %v5596_v41  ;;  %v4161_v44 = vpop.f32.mrf.mxu1 }
 0x4f4   :  { %4178 = vmatprep.subr.bf16.mxu0 %v5604_v18  ;;  %v4162_v27 = vadd.f32 %v4161_v44, %v4160_v23  ;;  %v2390_v23 = vrot.slane %v5092_v48, 6 }
 0x4f5   :  { %v4163_v3 = vpop.f32.mrf.mxu1 }
 0x4f7   :  { %4179 = vmatpush3.bf16.msra.mxu0 %v5610_v20  ;;  %v4164_v14 = vpop.f32.mrf.mxu1 }
 0x4f8   :  { %4180 = vmatprep.subr.bf16.mxu0 %v5617_v43 }
 0x4fb   :  { %4181 = vmatpush3.bf16.msra.mxu0 %v5623_v22 }
 0x4fc   :  { %4193 = vmatprep.subr.bf16.mxu0 %v5406_v53  ;;  %v6040_v53 = vld [vmem:[%s6550_s1 + $0x68] sm:$0xff]  }
 0x4fe   :  { %2197 = vmatmul.mubr.bf16.vlgmr.msra.gmra.mxu0 %v2114_v58 }
 0x4ff   :  { %4194 = vmatpush3.bf16.msra.mxu0 %v6022_v34 }
 0x500   :  { %4195 = vmatprep.subr.bf16.mxu0 %v6028_v31 }
 0x501   :  { %v2238_v4 = vpop.f32.mrf.mxu1 }
 0x503   :  { %4196 = vmatpush3.bf16.msra.mxu0 %v6034_v35  ;;  %v4395_v58 = vpop.f32.mrf.mxu1 }
 0x504   :  { %4197 = vmatprep.subr.bf16.mxu0 %v6040_v53 }
 0x507   :  { %4198 = vmatpush3.bf16.msra.mxu0 %v6046_v38 }
 0x508   :  { %4199 = vmatprep.subr.bf16.mxu0 %v5418_v6  ;;  %v4614_v6 = vld [vmem:[%s6552_s3 + $0x370] ss:$8 sps:$4 sm:$0xff]  }
 0x50b   :  { %4200 = vmatpush3.bf16.msra.mxu0 %v5424_v8  ;;  %v4616_v8 = vld [vmem:[%s6552_s3 + $0x374] ss:$8 sps:$4 sm:$0xff]  }
 0x50c   :  { %4201 = vmatprep.subr.bf16.mxu0 %v5430_v54  ;;  %v4619_v54 = vld [vmem:[%s6552_s3 + $0x364] ss:$8 sps:$4 sm:$0xff]   ;;  %2343 = vmatprep.subr.bf16.mxu1 %v4616_v8  ;;  %v2241_v8 = vpop.f32.mrf.mxu1 }
 0x50d   :  { %2344 = vmatpush1.bf16.msra.mxu1 %v4614_v6  ;;  %v4632_v6 = vld [vmem:[%s6552_s3 + $0x310] ss:$8 sps:$4 sm:$0xff]  }
 0x50e   :  { %2345 = vmatprep.subr.bf16.mxu1 %v4619_v54  ;;  %v4637_v54 = vld [vmem:[%s6552_s3 + $0x304] ss:$8 sps:$4 sm:$0xff]  }
 0x50f   :  { %4202 = vmatpush3.bf16.msra.mxu0 %v5436_v10  ;;  %v4617_v10 = vld [vmem:[%s6552_s3 + $0x360] ss:$8 sps:$4 sm:$0xff]  }
 0x510   :  { %4203 = vmatprep.subr.bf16.mxu0 %v5442_v55  ;;  %v4622_v55 = vld [vmem:[%s6552_s3 + $0x354] ss:$8 sps:$4 sm:$0xff]  }
 0x511   :  { %2346 = vmatpush1.bf16.msra.mxu1 %v4617_v10  ;;  %v4396_v10 = vpop.f32.mrf.mxu1 }
 0x512   :  { %2347 = vmatprep.subr.bf16.mxu1 %v4622_v55  ;;  %v4635_v55 = vld [vmem:[%s6552_s3 + $0x300] ss:$8 sps:$4 sm:$0xff]  }
 0x513   :  { %4204 = vmatpush3.bf16.msra.mxu0 %v5640_v9 }
 0x514   :  { %4205 = vmatprep.subr.bf16.mxu0 %v5646_v24 }
 0x515   :  { %2348 = vmatpush1.bf16.msra.mxu1 %v4620_v16  ;;  %v6111_v16 = vld [vmem:[%s6550_s1 + $0xf8] sm:$0xff]  }
 0x516   :  { %2349 = vmatprep.subr.bf16.mxu1 %v4625_v19  ;;  %v2389_v19 = vrot.slane %v5088_v46, 7  ;;  %v2399_v46 = vrot.slane %v6581_v57, 6 }
 0x517   :  { %4206 = vmatpush3.bf16.msra.mxu0 %v5652_v26 }
 0x518   :  { %4207 = vmatprep.subr.bf16.mxu0 %v5658_v11  ;;  %v2391_v44 = vsel %vm161_vm0, %v2390_v23, %v2389_v19  ;;  %v2396_v19 = vrot.slane %v5101_v52, 6  ;;  %v2393_v52 = vrot.slane %v5099_v51, 6  ;;  %v4809_v51 = vld [vmem:[%s6550_s1 + $0x20] sm:$0xff]  }
 0x519   :  { %2350 = vmatpush1.bf16.msra.mxu1 %v4623_v59  ;;  %v2386_v59 = vrot.slane %v5086_v45, 7  ;;  %v2402_v3 = vpack.c.b16 %v2391_v44, %v2391_v44  ;;  %v2398_v45 = vrot.slane %v6580_v56, 7 }
 0x51a   :  { %2351 = vmatprep.subr.bf16.mxu1 %v4628_v40  ;;  %v2387_v40 = vrot.slane %v5090_v47, 6 }
 0x51b   :  { %4208 = vmatpush3.bf16.msra.mxu0 %v5664_v28  ;;  %2445 = vmatprep.mubr.bf16.mxu0 %v2402_v3  ;;  %v2400_v47 = vsel %vm161_vm0, %v2399_v46, %v2398_v45  ;;  %v4661_v45 = vld [vmem:[%s6552_s3 + $0x384] ss:$8 sps:$4 sm:$0xff]  }
 0x51c   :  { %4397 = vmatprep.subr.bf16.mxu0 %v6574_v30  ;;  %v2405_v48 = vpack.c.b16 %v2400_v47, %v2400_v47  ;;  %v4659_v47 = vld [vmem:[%s6552_s3 + $0x380] ss:$8 sps:$4 sm:$0xff]  }
 0x51d   :  { %2352 = vmatpush1.bf16.msra.mxu1 %v4626_v21  ;;  %v2388_v21 = vsel %vm161_vm0, %v2387_v40, %v2386_v59 }
 0x51e   :  { %2353 = vmatprep.subr.bf16.mxu1 %v4631_v61  ;;  %v2401_v14 = vpack.c.b16 %v2388_v21, %v2388_v21 }
 0x520   :  { %2446 = vmatmul.mubr.bf16.vlgmr.msra.gmra.mxu0 %v2401_v14 }
 0x521   :  { %2354 = vmatpush1.bf16.msra.mxu1 %v4629_v60  ;;  %4398 = vmatpush3.bf16.msra.mxu0 %v5726_v13 }
 0x522   :  { %2355 = vmatprep.subr.bf16.mxu1 %v4634_v1  ;;  %4405 = vmatprep.mubr.msk.bf16.mxu0 %vm4829_vm1, %v6574_v30 }
 0x523   :  { %4399 = vmatprep.subr.bf16.mxu0 %v6574_v30 }
 0x525   :  { %2356 = vmatpush1.bf16.msra.mxu1 %v4632_v6  ;;  %4400 = vmatpush3.bf16.msra.mxu0 %v5735_v15 }
 0x526   :  { %2357 = vmatprep.subr.bf16.mxu1 %v4637_v54  ;;  %4401 = vmatprep.subr.bf16.mxu0 %v6574_v30  ;;  %v2159_v54 = vadd.f32 %v5994_v36, %v4162_v27 }
 0x529   :  { %2358 = vmatpush1.bf16.msra.mxu1 %v4635_v55  ;;  %4402 = vmatpush3.bf16.msra.mxu0 %v5742_v17  ;;  %v2395_v55 = vrot.slane %v5097_v50, 7  ;;  %v2392_v50 = vrot.slane %v5095_v49, 7  ;;  %v4808_v49 = vld [vmem:[%s6550_s1 + $0x60] sm:$0xff]  }
 0x52a   :  { %4215 = vmatprep.subr.bf16.mxu1 %v6111_v16  ;;  %4403 = vmatprep.subr.bf16.mxu0 %v6574_v30 }
 0x52b   :  { %v2397_v44 = vsel %vm161_vm0, %v2396_v19, %v2395_v55 }
 0x52d   :  { %4404 = vmatpush3.bf16.msra.mxu0 %v6582_v7 }
 0x530   :  { %4406 = vmatmul.mubr.msk.bf16.vlgmr.msra.gmra.mxu0 %vm396_vm2, %v2405_v48  ;;  %v42_v48 = vld [vmem:[%s6551_s0 + $0x3c] sm:$0x11] }
 0x531   :  { %2664 = vmatprep.mubr.bf16.mxu0 %v6583_v25 }
 0x59e   :  { %v2088_v61 = vpop.f32.mrf.mxu0 }
 0x59f   :  { %v6135_v60 = vadd.f32 %v2088_v61, %v5986_v42  ;;  %v3764_v61 = vcombine.high %v42_v48, %v42_v48 }
 0x5a0   :  { %v2090_v1 = vpop.f32.mrf.mxu0 }
 0x5a1   :  { %v6138_v58 = vadd.f32 %v2090_v1, %v5989_v5  ;;  %v2404_v5 = vpack.c.b16 %v2397_v44, %v2397_v44  ;;  %v36_v1 = vld [vmem:[%s6551_s0 + $0x14] sm:$0x11]  ;;  %v4671_v44 = vld [vmem:[%s6551_s0 + $0x4c] ss:$0 sps:$4 sm:$0x11]  }
 0x5a2   :  { %v2092_v56 = vpop.f32.mrf.mxu0 }
 0x5a3   :  { %v3763_v56 = vcombine.low %v42_v48, %v42_v48 }
 0x5a4   :  { %v2093_v6 = vpop.f32.mrf.mxu0 }
 0x5a5   :  { %v3759_v6 = vcombine.high %v36_v1, %v36_v1 }
 0x5be   :  { %v4182_v57 = vpop.f32.mrf.mxu0 }
 0x5c0   :  { %v4183_v8 = vpop.f32.mrf.mxu0 }
 0x5c1   :  { %v4184_v10 = vadd.f32 %v4183_v8, %v4182_v57  ;;  %v2707_v57 = vunpack.c.l.b16 %v3764_v61  ;;  %v3758_v8 = vcombine.low %v36_v1, %v36_v1  ;;  %v4824_v61 = vld [vmem:[%s6550_s1 + $0xc8] sm:$0xff]  }
 0x5c2   :  { %v4185_v23 = vpop.f32.mrf.mxu0  ;;  %v4825_v1 = vld [vmem:[%s6550_s1 + $0x88] sm:$0xff]  }
 0x5c3   :  { %v2199_v59 = vadd.f32 %v4184_v10, %v2159_v54  ;;  %v2706_v54 = vunpack.c.l.b16 %v3763_v56  ;;  %v2702_v10 = vunpack.c.l.b16 %v3759_v6  ;;  %v2713_v55 = vrot.slane %v2707_v57, 7  ;;  %v4826_v6 = vld [vmem:[%s6550_s1 + $0xc0] sm:$0xff]  }
 0x5c4   :  { %v4186_v40 = vpop.f32.mrf.mxu0  ;;  %v2701_v19 = vunpack.c.l.b16 %v3758_v8  ;;  %v4827_v8 = vld [vmem:[%s6550_s1 + $0x80] sm:$0xff]  }
 0x5c5   :  { %v2239_v42 = vadd.f32 %v2238_v4, %v2199_v59  ;;  %v4656_v4 = vld [vmem:[%s6552_s3 + $0x390] ss:$8 sps:$4 sm:$0xff]   ;;  %v2711_v23 = vrot.slane %v2706_v54, 7 }
 0x5c6   :  { %v4672_v54 = vld [vmem:[%s6552_s3 + $0x470] ss:$8 sps:$4 sm:$0xff]  }
 0x5c7   :  { %v2244_v3 = vmax.f32 %v2239_v42, 0.0  ;;  %v2712_v40 = vsel %vm161_vm0, %v2711_v23, %v2701_v19  ;;  %v4675_v19 = vld [vmem:[%s6552_s3 + $0x460] ss:$8 sps:$4 sm:$0xff]   ;;  %v4680_v23 = vld [vmem:[%s6552_s3 + $0x454] ss:$8 sps:$4 sm:$0xff]  }
 0x5c8   :  { %v2721_v42 = vpack.c.b16 %v2712_v40, %v2712_v40 }
 0x5c9   :  { %v2245_v21 = vpack.c.bf16 %v2244_v3, %v2244_v3  ;;  %v4670_v3 = vld [vmem:[%s6551_s0 + $0x24] ss:$0 sps:$4 sm:$0x11]  }
 0x5cb   :  { %2376 = vmatmul.mubr.bf16.vlgmr.msra.gmra.mxu1 %v2245_v21 }
 0x5cc   :  { %4216 = vmatpush3.bf16.msra.mxu1 %v5536_v62  ;;  %2485 = vmatprep.mubr.bf16.mxu1 %v2404_v5  ;;  %v2394_v62 = vsel %vm161_vm0, %v2393_v52, %v2392_v50  ;;  %v2710_v5 = vunpack.c.l.b16 %v4671_v44  ;;  %v4686_v44 = vld [vmem:[%s6552_s3 + $0x434] ss:$8 sps:$4 sm:$0xff]  }
 0x5cd   :  { %4217 = vmatprep.subr.bf16.mxu1 %v5542_v29  ;;  %v2403_v29 = vpack.c.b16 %v2394_v62, %v2394_v62 }
 0x5ce   :  { %v2719_v21 = vrot.slane %v2710_v5, 7 }
 0x5d0   :  { %4218 = vmatpush3.bf16.msra.mxu1 %v5548_v63  ;;  %v4807_v63 = vld [vmem:[%s6550_s1 + $0x78] sm:$0xff]  }
 0x5d1   :  { %4219 = vmatprep.subr.bf16.mxu1 %v5554_v0  ;;  %v4810_v0 = vld [vmem:[%s6550_s1 + $0x58] sm:$0xff]  }
 0x5d4   :  { %4220 = vmatpush3.bf16.msra.mxu1 %v5560_v32  ;;  %v4811_v32 = vld [vmem:[%s6550_s1 + $0x18] sm:$0xff]  }
 0x5d5   :  { %4221 = vmatprep.subr.bf16.mxu1 %v5566_v33  ;;  %v4812_v33 = vld [vmem:[%s6550_s1 + $0x50] sm:$0xff]  }
 0x5d8   :  { %4222 = vmatpush3.bf16.msra.mxu1 %v5572_v37  ;;  %v4638_v37 = vld [vmem:[%s6552_s3 + $0x3f0] ss:$8 sps:$4 sm:$0xff]  }
 0x5d9   :  { %4223 = vmatprep.subr.bf16.mxu1 %v5578_v39  ;;  %v4640_v39 = vld [vmem:[%s6552_s3 + $0x3f4] ss:$8 sps:$4 sm:$0xff]  }
 0x5da   :  { %2632 = vmatprep.subr.bf16.mxu0 %v4640_v39 }
 0x5db   :  { %2633 = vmatpush1.bf16.msra.mxu0 %v4638_v37 }
 0x5dc   :  { %4224 = vmatpush3.bf16.msra.mxu1 %v5584_v2  ;;  %v4643_v2 = vld [vmem:[%s6552_s3 + $0x3e4] ss:$8 sps:$4 sm:$0xff]  }
 0x5dd   :  { %4225 = vmatprep.subr.bf16.mxu1 %v5590_v12  ;;  %v4641_v12 = vld [vmem:[%s6552_s3 + $0x3e0] ss:$8 sps:$4 sm:$0xff]   ;;  %2634 = vmatprep.subr.bf16.mxu0 %v4643_v2 }
 0x5df   :  { %2635 = vmatpush1.bf16.msra.mxu0 %v4641_v12 }
 0x5e0   :  { %4226 = vmatpush3.bf16.msra.mxu1 %v5596_v41  ;;  %v4646_v41 = vld [vmem:[%s6552_s3 + $0x3d4] ss:$8 sps:$4 sm:$0xff]  }
 0x5e1   :  { %4227 = vmatprep.subr.bf16.mxu1 %v5604_v18  ;;  %v4644_v18 = vld [vmem:[%s6552_s3 + $0x3d0] ss:$8 sps:$4 sm:$0xff]   ;;  %2636 = vmatprep.subr.bf16.mxu0 %v4646_v41 }
 0x5e3   :  { %2637 = vmatpush1.bf16.msra.mxu0 %v4644_v18 }
 0x5e4   :  { %4228 = vmatpush3.bf16.msra.mxu1 %v5610_v20  ;;  %v4649_v20 = vld [vmem:[%s6552_s3 + $0x3c4] ss:$8 sps:$4 sm:$0xff]  }
 0x5e5   :  { %4229 = vmatprep.subr.bf16.mxu1 %v5617_v43  ;;  %v4209_v43 = vpop.f32.mrf.mxu0  ;;  %2638 = vmatprep.subr.bf16.mxu0 %v4649_v20 }
 0x5e8   :  { %4230 = vmatpush3.bf16.msra.mxu1 %v5623_v22  ;;  %v4647_v22 = vld [vmem:[%s6552_s3 + $0x3c0] ss:$8 sps:$4 sm:$0xff]  }
 0x5e9   :  { %4242 = vmatprep.subr.bf16.mxu1 %v4807_v63  ;;  %2639 = vmatpush1.bf16.msra.mxu0 %v4647_v22 }
 0x5eb   :  { %2486 = vmatmul.mubr.bf16.vlgmr.msra.gmra.mxu1 %v2403_v29 }
 0x5ec   :  { %4243 = vmatpush3.bf16.msra.mxu1 %v6022_v34 }
 0x5ed   :  { %4244 = vmatprep.subr.bf16.mxu1 %v6028_v31  ;;  %v4655_v31 = vld [vmem:[%s6552_s3 + $0x3a4] ss:$8 sps:$4 sm:$0xff]  }
 0x5f0   :  { %4245 = vmatpush3.bf16.msra.mxu1 %v6034_v35  ;;  %v4653_v35 = vld [vmem:[%s6552_s3 + $0x3a0] ss:$8 sps:$4 sm:$0xff]  }
 0x5f1   :  { %4246 = vmatprep.subr.bf16.mxu1 %v6040_v53 }
 0x5f4   :  { %4247 = vmatpush3.bf16.msra.mxu1 %v6046_v38  ;;  %v4658_v38 = vld [vmem:[%s6552_s3 + $0x394] ss:$8 sps:$4 sm:$0xff]  }
 0x5f5   :  { %4248 = vmatprep.subr.bf16.mxu1 %v4808_v49  ;;  %v43_v49 = vld [vmem:[%s6551_s0 + $0x44] sm:$0x11] }
 0x5f8   :  { %4249 = vmatpush3.bf16.msra.mxu1 %v4809_v51  ;;  %v37_v51 = vld [vmem:[%s6551_s0 + $0x1c] sm:$0x11] }
 0x5f9   :  { %4250 = vmatprep.subr.bf16.mxu1 %v4810_v0 }
 0x5fc   :  { %4251 = vmatpush3.bf16.msra.mxu1 %v4811_v32 }
 0x5fd   :  { %4252 = vmatprep.subr.bf16.mxu1 %v4812_v33 }
 0x600   :  { %4253 = vmatpush3.bf16.msra.mxu1 %v5640_v9  ;;  %v4652_v9 = vld [vmem:[%s6552_s3 + $0x3b4] ss:$8 sps:$4 sm:$0xff]  }
 0x601   :  { %4254 = vmatprep.subr.bf16.mxu1 %v5646_v24  ;;  %v4210_v24 = vpop.f32.mrf.mxu0  ;;  %2640 = vmatprep.subr.bf16.mxu0 %v4652_v9 }
 0x604   :  { %4255 = vmatpush3.bf16.msra.mxu1 %v5652_v26  ;;  %v6218_v26 = vadd.f32 %v4210_v24, %v4209_v43  ;;  %v4813_v24 = vld [vmem:[%s6550_s1 + $0xb8] sm:$0xff]  }
 0x605   :  { %4256 = vmatprep.subr.bf16.mxu1 %v5658_v11  ;;  %v4212_v11 = vpop.f32.mrf.mxu0 }
 0x606   :  { %v2448_v33 = vadd.f32 %v5994_v36, %v6218_v26  ;;  %v4814_v26 = vld [vmem:[%s6550_s1 + $0xf0] sm:$0xff]  }
 0x607   :  { %v4213_v34 = vpop.f32.mrf.mxu0  ;;  %v4815_v11 = vld [vmem:[%s6550_s1 + $0xb0] sm:$0xff]  }
 0x608   :  { %4257 = vmatpush3.bf16.msra.mxu1 %v5664_v28  ;;  %v4650_v28 = vld [vmem:[%s6552_s3 + $0x3b0] ss:$8 sps:$4 sm:$0xff]   ;;  %v4817_v34 = vld [vmem:[%s6550_s1 + $0xa8] sm:$0xff]  }
 0x609   :  { %4409 = vmatprep.subr.bf16.mxu1 %v6574_v30  ;;  %2641 = vmatpush1.bf16.msra.mxu0 %v4650_v28  ;;  %v6229_v53 = vpop.f32.mrf.mxu0  ;;  %v4816_v28 = vld [vmem:[%s6550_s1 + $0xe8] sm:$0xff]  }
 0x60a   :  { %2642 = vmatprep.subr.bf16.mxu0 %v4655_v31  ;;  %v4818_v31 = vld [vmem:[%s6550_s1 + $0xe0] sm:$0xff]  }
 0x60b   :  { %v4407_v27 = vpop.f32.mrf.mxu0 }
 0x60c   :  { %v4821_v27 = vld [vmem:[%s6550_s1 + $0x98] sm:$0xff]  }
 0x60d   :  { %2643 = vmatpush1.bf16.msra.mxu0 %v4653_v35  ;;  %v2530_v14 = vpop.f32.mrf.mxu0  ;;  %v4819_v35 = vld [vmem:[%s6550_s1 + $0xa0] sm:$0xff]  }
 0x60e   :  { %2644 = vmatprep.subr.bf16.mxu0 %v4658_v38  ;;  %v4820_v38 = vld [vmem:[%s6550_s1 + $0xd8] sm:$0xff]  }
 0x60f   :  { %v4408_v46 = vpop.f32.mrf.mxu0 }
 0x610   :  { %v4823_v46 = vld [vmem:[%s6550_s1 + $0x90] sm:$0xff]  }
 0x611   :  { %2645 = vmatpush1.bf16.msra.mxu0 %v4656_v4  ;;  %v3760_v4 = vcombine.low %v37_v51, %v37_v51 }
 0x612   :  { %2646 = vmatprep.subr.bf16.mxu0 %v4661_v45  ;;  %v4822_v45 = vld [vmem:[%s6550_s1 + $0xd0] sm:$0xff]  }
 0x615   :  { %2647 = vmatpush1.bf16.msra.mxu0 %v4659_v47  ;;  %v2703_v47 = vunpack.c.l.b16 %v3760_v4  ;;  %v4734_v4 = vld [vmem:[%s6554_s5 + $0xb4] ss:$8 sps:$4 sm:$0xff]  }
 0x616   :  { %4264 = vmatprep.subr.bf16.mxu0 %v6111_v16  ;;  %v2714_v16 = vsel %vm161_vm0, %v2713_v55, %v2702_v10  ;;  %v4674_v10 = vld [vmem:[%s6552_s3 + $0x474] ss:$8 sps:$4 sm:$0xff]   ;;  %v4677_v55 = vld [vmem:[%s6552_s3 + $0x464] ss:$8 sps:$4 sm:$0xff]  }
 0x617   :  { %v2722_v59 = vpack.c.b16 %v2714_v16, %v2714_v16  ;;  %v4678_v16 = vld [vmem:[%s6552_s3 + $0x450] ss:$8 sps:$4 sm:$0xff]  }
 0x619   :  { %2765 = vmatprep.mubr.bf16.mxu1 %v2722_v59  ;;  %v4683_v59 = vld [vmem:[%s6552_s3 + $0x444] ss:$8 sps:$4 sm:$0xff]  }
 0x61a   :  { %2766 = vmatmul.mubr.bf16.vlgmr.msra.gmra.mxu1 %v2721_v42  ;;  %v4681_v42 = vld [vmem:[%s6552_s3 + $0x440] ss:$8 sps:$4 sm:$0xff]  }
 0x61b   :  { %4410 = vmatpush3.bf16.msra.mxu1 %v5726_v13  ;;  %4417 = vmatprep.mubr.msk.bf16.mxu1 %vm4829_vm1, %v6574_v30  ;;  %v2705_v13 = vunpack.c.l.b16 %v4670_v3 }
 0x61c   :  { %4411 = vmatprep.subr.bf16.mxu1 %v6574_v30 }
 0x61d   :  { %v2720_v50 = vsel %vm161_vm0, %v2719_v21, %v2705_v13  ;;  %v4684_v21 = vld [vmem:[%s6552_s3 + $0x430] ss:$8 sps:$4 sm:$0xff]  }
 0x61f   :  { %4412 = vmatpush3.bf16.msra.mxu1 %v5735_v15  ;;  %v2725_v15 = vpack.c.b16 %v2720_v50, %v2720_v50 }
 0x620   :  { %4413 = vmatprep.subr.bf16.mxu1 %v6574_v30 }
 0x623   :  { %4414 = vmatpush3.bf16.msra.mxu1 %v5742_v17 }
 0x624   :  { %4415 = vmatprep.subr.bf16.mxu1 %v6574_v30 }
 0x627   :  { %4416 = vmatpush3.bf16.msra.mxu1 %v6582_v7  ;;  %v3766_v7 = vcombine.high %v43_v49, %v43_v49 }
 0x628   :  { %2952 = vmatprep.subr.bf16.mxu1 %v4674_v10 }
 0x629   :  { %v2709_v0 = vunpack.c.l.b16 %v3766_v7 }
 0x62a   :  { %4418 = vmatmul.mubr.msk.bf16.vlgmr.msra.gmra.mxu1 %vm396_vm2, %v2725_v15  ;;  %v4689_v15 = vld [vmem:[%s6552_s3 + $0x424] ss:$8 sps:$4 sm:$0xff]  }
 0x62b   :  { %2984 = vmatprep.mubr.bf16.mxu1 %v6583_v25  ;;  %v3761_v25 = vcombine.high %v37_v51, %v37_v51  ;;  %v2717_v39 = vrot.slane %v2709_v0, 7  ;;  %2953 = vmatpush1.bf16.msra.mxu1 %v4672_v54  ;;  %v4693_v0 = vld [vmem:[%s6552_s3 + $0x400] ss:$8 sps:$4 sm:$0xff]  }
 0x62c   :  { %2954 = vmatprep.subr.bf16.mxu1 %v4677_v55 }
 0x62d   :  { %v2704_v37 = vunpack.c.l.b16 %v3761_v25  ;;  %v4695_v25 = vld [vmem:[%s6552_s3 + $0x404] ss:$8 sps:$4 sm:$0xff]  }
 0x62f   :  { %v2718_v20 = vsel %vm161_vm0, %v2717_v39, %v2704_v37  ;;  %2955 = vmatpush1.bf16.msra.mxu1 %v4675_v19  ;;  %v4704_v37 = vld [vmem:[%s6554_s5 + $0x54] ss:$8 sps:$4 sm:$0xff]   ;;  %v4702_v39 = vld [vmem:[%s6554_s5 + $0x50] ss:$8 sps:$4 sm:$0xff]  }
 0x630   :  { %v2724_v22 = vpack.c.b16 %v2718_v20, %v2718_v20  ;;  %2956 = vmatprep.subr.bf16.mxu1 %v4680_v23  ;;  %v4713_v20 = vld [vmem:[%s6554_s5 + $0x24] ss:$8 sps:$4 sm:$0xff]  }
 0x633   :  { %2957 = vmatpush1.bf16.msra.mxu1 %v4678_v16 }
 0x634   :  { %2958 = vmatprep.subr.bf16.mxu1 %v4683_v59  ;;  %v4738_v59 = vld [vmem:[%s6554_s5 + $0x90] ss:$8 sps:$4 sm:$0xff]  }
 0x637   :  { %2959 = vmatpush1.bf16.msra.mxu1 %v4681_v42  ;;  %v4741_v42 = vld [vmem:[%s6554_s5 + $0x80] ss:$8 sps:$4 sm:$0xff]  }
 0x638   :  { %2960 = vmatprep.subr.bf16.mxu1 %v4686_v44  ;;  %v4744_v44 = vld [vmem:[%s6555_s7 + $0x78] sm:$0xff]  }
 0x63b   :  { %2961 = vmatpush1.bf16.msra.mxu1 %v4684_v21  ;;  %v4748_v21 = vld [vmem:[%s6555_s7 + $0x68] sm:$0xff]  }
 0x63c   :  { %2962 = vmatprep.subr.bf16.mxu1 %v4689_v15  ;;  %v4750_v15 = vld [vmem:[%s6555_s7 + $0x60] sm:$0xff]  }
 0x68b   :  { %v2377_v52 = vpop.f32.mrf.mxu1 }
 0x68c   :  { %v6271_v62 = vadd.f32 %v2377_v52, %v6135_v60  ;;  %v4687_v52 = vld [vmem:[%s6552_s3 + $0x420] ss:$8 sps:$4 sm:$0xff]  }
 0x68d   :  { %v2379_v29 = vpop.f32.mrf.mxu1  ;;  %2963 = vmatpush1.bf16.msra.mxu1 %v4687_v52  ;;  %v4751_v52 = vld [vmem:[%s6555_s7 + $0x20] sm:$0xff]  }
 0x68e   :  { %v6274_v17 = vadd.f32 %v2379_v29, %v6138_v58 }
 0x68f   :  { %v2381_v30 = vpop.f32.mrf.mxu1 }
 0x691   :  { %v2382_v63 = vpop.f32.mrf.mxu1 }
 0x692   :  { %v4692_v63 = vld [vmem:[%s6552_s3 + $0x414] ss:$8 sps:$4 sm:$0xff]  }
 0x693   :  { %2964 = vmatprep.subr.bf16.mxu1 %v4692_v63  ;;  %v4754_v63 = vld [vmem:[%s6555_s7 + $0x50] sm:$0xff]  }
 0x6ab   :  { %v4231_v32 = vpop.f32.mrf.mxu1 }
 0x6ad   :  { %v4232_v60 = vpop.f32.mrf.mxu1 }
 0x6ae   :  { %v4233_v58 = vadd.f32 %v4232_v60, %v4231_v32  ;;  %v4696_v32 = vld [vmem:[%s6554_s5 + $0x70] ss:$8 sps:$4 sm:$0xff]   ;;  %v4698_v60 = vld [vmem:[%s6554_s5 + $0x74] ss:$8 sps:$4 sm:$0xff]  }
 0x6af   :  { %v4234_v2 = vpop.f32.mrf.mxu1 }
 0x6b0   :  { %v2488_v12 = vadd.f32 %v4233_v58, %v2448_v33  ;;  %v4701_v33 = vld [vmem:[%s6554_s5 + $0x64] ss:$8 sps:$4 sm:$0xff]   ;;  %v4699_v58 = vld [vmem:[%s6554_s5 + $0x60] ss:$8 sps:$4 sm:$0xff]  }
 0x6b1   :  { %v4235_v41 = vpop.f32.mrf.mxu1  ;;  %v4707_v2 = vld [vmem:[%s6554_s5 + $0x44] ss:$8 sps:$4 sm:$0xff]  }
 0x6b2   :  { %v2528_v18 = vadd.f32 %v6229_v53, %v2488_v12  ;;  %v3765_v53 = vcombine.low %v43_v49, %v43_v49  ;;  %v4690_v49 = vld [vmem:[%s6552_s3 + $0x410] ss:$8 sps:$4 sm:$0xff]   ;;  %v4705_v12 = vld [vmem:[%s6554_s5 + $0x40] ss:$8 sps:$4 sm:$0xff]   ;;  %v4710_v41 = vld [vmem:[%s6554_s5 + $0x34] ss:$8 sps:$4 sm:$0xff]  }
 0x6b3   :  { %2965 = vmatpush1.bf16.msra.mxu1 %v4690_v49  ;;  %v4755_v49 = vld [vmem:[%s6555_s7 + $0x10] sm:$0xff]  }
 0x6b4   :  { %v2533_v43 = vmax.f32 %v2528_v18, 0.0  ;;  %v2708_v14 = vunpack.c.l.b16 %v3765_v53  ;;  %2966 = vmatprep.subr.bf16.mxu1 %v4695_v25  ;;  %v4708_v18 = vld [vmem:[%s6554_s5 + $0x30] ss:$8 sps:$4 sm:$0xff]  }
 0x6b5   :  { %v4726_v53 = vld [vmem:[%s6554_s5 + $0xd0] ss:$8 sps:$4 sm:$0xff]  }
 0x6b6   :  { %v2534_v9 = vpack.c.bf16 %v2533_v43, %v2533_v43  ;;  %v2715_v48 = vrot.slane %v2708_v14, 7  ;;  %v4711_v43 = vld [vmem:[%s6554_s5 + $0x20] ss:$8 sps:$4 sm:$0xff]   ;;  %v4732_v14 = vld [vmem:[%s6554_s5 + $0xb0] ss:$8 sps:$4 sm:$0xff]  }
 0x6b7   :  { %2967 = vmatpush1.bf16.msra.mxu1 %v4693_v0  ;;  %v2995_v0 = vld [vmem:[%s6556_s4] sm:$0x3] }
 0x6b8   :  { %2665 = vmatmul.mubr.bf16.vlgmr.msra.gmra.mxu0 %v2534_v9  ;;  %v2716_v56 = vsel %vm161_vm0, %v2715_v48, %v2703_v47  ;;  %v4714_v9 = vld [vmem:[%s6554_s5 + $0x10] ss:$8 sps:$4 sm:$0xff]   ;;  %4291 = vmatprep.subr.bf16.mxu1 %v4744_v44 }
 0x6b9   :  { %4265 = vmatpush3.bf16.msra.mxu0 %v4813_v24  ;;  %2805 = vmatprep.mubr.bf16.mxu0 %v2724_v22  ;;  %v2723_v57 = vpack.c.b16 %v2716_v56, %v2716_v56  ;;  %v4716_v22 = vld [vmem:[%s6554_s5 + $0x14] ss:$8 sps:$4 sm:$0xff]   ;;  %v4719_v24 = vld [vmem:[%s6554_s5 + $0x4] ss:$8 sps:$4 sm:$0xff]  }
 0x6ba   :  { %4266 = vmatprep.subr.bf16.mxu0 %v4814_v26  ;;  %v4717_v26 = vld [vmem:[%s6554_s5] ss:$8 sps:$4 sm:$0xff]  }
 0x6bd   :  { %4267 = vmatpush3.bf16.msra.mxu0 %v4815_v11  ;;  %v4722_v11 = vld [vmem:[%s6554_s5 + $0xf4] ss:$8 sps:$4 sm:$0xff]  }
 0x6be   :  { %4268 = vmatprep.subr.bf16.mxu0 %v4816_v28  ;;  %v4720_v28 = vld [vmem:[%s6554_s5 + $0xf0] ss:$8 sps:$4 sm:$0xff]  }
 0x6c1   :  { %4269 = vmatpush3.bf16.msra.mxu0 %v4817_v34  ;;  %v4725_v34 = vld [vmem:[%s6554_s5 + $0xe4] ss:$8 sps:$4 sm:$0xff]  }
 0x6c2   :  { %4270 = vmatprep.subr.bf16.mxu0 %v4818_v31  ;;  %v4723_v31 = vld [vmem:[%s6554_s5 + $0xe0] ss:$8 sps:$4 sm:$0xff]  }
 0x6c5   :  { %4271 = vmatpush3.bf16.msra.mxu0 %v4819_v35  ;;  %v4728_v35 = vld [vmem:[%s6554_s5 + $0xd4] ss:$8 sps:$4 sm:$0xff]  }
 0x6c6   :  { %4272 = vmatprep.subr.bf16.mxu0 %v4820_v38  ;;  %v4731_v38 = vld [vmem:[%s6554_s5 + $0xc4] ss:$8 sps:$4 sm:$0xff]  }
 0x6c9   :  { %4273 = vmatpush3.bf16.msra.mxu0 %v4821_v27  ;;  %v4729_v27 = vld [vmem:[%s6554_s5 + $0xc0] ss:$8 sps:$4 sm:$0xff]  }
 0x6ca   :  { %4274 = vmatprep.subr.bf16.mxu0 %v4822_v45 }
 0x6cd   :  { %4275 = vmatpush3.bf16.msra.mxu0 %v4823_v46 }
 0x6ce   :  { %4276 = vmatprep.subr.bf16.mxu0 %v4824_v61 }
 0x6d1   :  { %4277 = vmatpush3.bf16.msra.mxu0 %v4825_v1 }
 0x6d2   :  { %4278 = vmatprep.subr.bf16.mxu0 %v4826_v6 }
 0x6d5   :  { %4279 = vmatpush3.bf16.msra.mxu0 %v4827_v8 }
 0x6d6   :  { %3217 = vmatprep.subr.bf16.mxu0 %v4698_v60 }
 0x6d8   :  { %2806 = vmatmul.mubr.bf16.vlgmr.msra.gmra.mxu0 %v2723_v57 }
 0x6d9   :  { %3218 = vmatpush1.bf16.msra.mxu0 %v4696_v32 }
 0x6da   :  { %v4258_v40 = vpop.f32.mrf.mxu1  ;;  %3219 = vmatprep.subr.bf16.mxu0 %v4701_v33 }
 0x6dc   :  { %v4259_v3 = vpop.f32.mrf.mxu1 }
 0x6dd   :  { %v6359_v5 = vadd.f32 %v4259_v3, %v4258_v40  ;;  %3220 = vmatpush1.bf16.msra.mxu0 %v4699_v58  ;;  %v4743_v40 = vld [vmem:[%s6554_s5 + $0x84] ss:$8 sps:$4 sm:$0xff]   ;;  %v4745_v3 = vld [vmem:[%s6555_s7 + $0x38] sm:$0xff]  }
 0x6de   :  { %v4261_v13 = vpop.f32.mrf.mxu1  ;;  %3221 = vmatprep.subr.bf16.mxu0 %v4704_v37 }
 0x6df   :  { %v2768_v57 = vadd.f32 %v5994_v36, %v6359_v5  ;;  %v4740_v36 = vld [vmem:[%s6554_s5 + $0x94] ss:$8 sps:$4 sm:$0xff]  }
 0x6e0   :  { %v4262_v50 = vpop.f32.mrf.mxu1  ;;  %v4746_v5 = vld [vmem:[%s6555_s7 + $0x70] sm:$0xff]  }
 0x6e1   :  { %3222 = vmatpush1.bf16.msra.mxu0 %v4702_v39  ;;  %v4747_v13 = vld [vmem:[%s6555_s7 + $0x30] sm:$0xff]   ;;  %v4749_v50 = vld [vmem:[%s6555_s7 + $0x28] sm:$0xff]  }
 0x6e2   :  { %3223 = vmatprep.subr.bf16.mxu0 %v4707_v2 }
 0x6e5   :  { %3224 = vmatpush1.bf16.msra.mxu0 %v4705_v12 }
 0x6e6   :  { %3225 = vmatprep.subr.bf16.mxu0 %v4710_v41 }
 0x6e9   :  { %3226 = vmatpush1.bf16.msra.mxu0 %v4708_v18 }
 0x6ea   :  { %v6370_v29 = vpop.f32.mrf.mxu1  ;;  %3227 = vmatprep.subr.bf16.mxu0 %v4713_v20 }
 0x6ec   :  { %v4419_v30 = vpop.f32.mrf.mxu1 }
 0x6ed   :  { %3228 = vmatpush1.bf16.msra.mxu0 %v4711_v43  ;;  %v4753_v30 = vld [vmem:[%s6555_s7 + $0x18] sm:$0xff]  }
 0x6ee   :  { %v2850_v7 = vpop.f32.mrf.mxu1  ;;  %3229 = vmatprep.subr.bf16.mxu0 %v4716_v22 }
 0x6ef   :  { %v2997_v7 = vlaneseq }
 0x6f0   :  { %v4420_v51 = vpop.f32.mrf.mxu1 }
 0x6f1   :  { %3230 = vmatpush1.bf16.msra.mxu0 %v4714_v9  ;;  %v2998_v51 = vshrl.u32 %v2997_v7, 7 }
 0x6f2   :  { %3231 = vmatprep.subr.bf16.mxu0 %v4719_v24 }
 0x6f3   :  { %v2999_v25 = vsub.s32 0, %v2998_v51  ;;  %v3003_v32 = vsub.s32 1, %v2998_v51 }
 0x6f5   :  { %3232 = vmatpush1.bf16.msra.mxu0 %v4717_v26  ;;  %v3000_v60 = vrot.slane %v2995_v0, %v2999_v25  ;;  %v3004_v37 = vrot.slane %v2995_v0, %v3003_v32  ;;  %v4756_v26 = vld [vmem:[%s6555_s7 + $0x48] sm:$0xff]  }
 0x6f6   :  { %3233 = vmatprep.subr.bf16.mxu0 %v4722_v11  ;;  %v4757_v11 = vld [vmem:[%s6555_s7 + $0x8] sm:$0xff]  }
 0x6f9   :  { %3234 = vmatpush2.bf16.msra.mxu0 %v4720_v28  ;;  %v4758_v28 = vld [vmem:[%s6555_s7 + $0x40] sm:$0xff]  }
 0x6fa   :  { %3235 = vmatprep.subr.bf16.mxu0 %v4725_v34  ;;  %v4759_v34 = vld [vmem:[%s6555_s7] sm:$0xff]  }
 0x6fd   :  { %3236 = vmatpush2.bf16.msra.mxu0 %v4723_v31  ;;  %v3045_v31 = vld [vmem:[%s6557_s6] sm:$0x3] }
 0x6fe   :  { %3237 = vmatprep.subr.bf16.mxu0 %v4728_v35  ;;  %v3050_v35 = vrot.slane %v3045_v31, %v2999_v25 }
 0x701   :  { %3238 = vmatpush2.bf16.msra.mxu0 %v4726_v53  ;;  %v3054_v53 = vrot.slane %v3045_v31, %v3003_v32 }
 0x702   :  { %3239 = vmatprep.subr.bf16.mxu0 %v4731_v38 }
 0x705   :  { %3240 = vmatpush2.bf16.msra.mxu0 %v4729_v27 }
 0x706   :  { %3241 = vmatprep.subr.bf16.mxu0 %v4734_v4 }
 0x709   :  { %3242 = vmatpush2.bf16.msra.mxu0 %v4732_v14 }
 0x778   :  { %v2666_v45 = vpop.f32.mrf.mxu0 }
 0x779   :  { %v2673_v46 = vadd.f32 %v2666_v45, %v6271_v62  ;;  %v4737_v62 = vld [vmem:[%s6554_s5 + $0xa4] ss:$8 sps:$4 sm:$0xff]  }
 0x77a   :  { %v2668_v47 = vpop.f32.mrf.mxu0  ;;  %3243 = vmatprep.subr.bf16.mxu0 %v4737_v62 }
 0x77b   :  { %v6464_v48 = vadd.f32 %v2668_v47, %v6274_v17  ;;  %v4735_v17 = vld [vmem:[%s6554_s5 + $0xa0] ss:$8 sps:$4 sm:$0xff]  }
 0x77c   :  { %v2670_v61 = vpop.f32.mrf.mxu0  ;;  %3244 = vmatpush2.bf16.msra.mxu0 %v4735_v17 }
 0x77d   :  { %3245 = vmatprep.subr.bf16.mxu0 %v4740_v36 }
 0x77e   :  { %v2671_v1 = vpop.f32.mrf.mxu0 }
 0x780   :  { %3246 = vmatpush2.bf16.msra.mxu0 %v4738_v59 }
 0x781   :  { %3247 = vmatprep.subr.bf16.mxu0 %v4743_v40 }
 0x784   :  { %3248 = vmatpush2.bf16.msra.mxu0 %v4741_v42 }
 0x798   :  { %v4280_v56 = vpop.f32.mrf.mxu0 }
 0x79a   :  { %v4281_v6 = vpop.f32.mrf.mxu0 }
 0x79b   :  { %v4282_v8 = vadd.f32 %v4281_v6, %v4280_v56  ;;  %v3833_v6 = vld [vmem:[%s6558_s8] ss:$0 sm:$0xff] }
 0x79c   :  { %v4283_v54 = vpop.f32.mrf.mxu0 }
 0x79d   :  { %v2808_v10 = vadd.f32 %v4282_v8, %v2768_v57 }
 0x79e   :  { %v4284_v55 = vpop.f32.mrf.mxu0 }
 0x79f   :  { %v2848_v19 = vadd.f32 %v6370_v29, %v2808_v10  ;;  %v4752_v29 = vld [vmem:[%s6555_s7 + $0x58] sm:$0xff]  }
 0x7a1   :  { %v2853_v23 = vmax.f32 %v2848_v19, 0.0 }
 0x7a3   :  { %v2854_v16 = vpack.c.bf16 %v2853_v23, %v2853_v23 }
 0x7a5   :  { %2985 = vmatmul.mubr.bf16.vlgmr.msra.gmra.mxu1 %v2854_v16 }
 0x7a6   :  { %4292 = vmatpush3.bf16.msra.mxu1 %v4745_v3 }
 0x7a7   :  { %4293 = vmatprep.subr.bf16.mxu1 %v4746_v5  ;;  %v3454_v5 = vand.u32 127, %v2997_v7 }
 0x7a9   :  { %vm3455_vm4 = vcmp.ge.s32.totalorder %v3454_v5, 1 }
 0x7aa   :  { %4294 = vmatpush3.bf16.msra.mxu1 %v4747_v13 }
 0x7ab   :  { %4295 = vmatprep.subr.bf16.mxu1 %v4748_v21 }
 0x7ae   :  { %4296 = vmatpush3.bf16.msra.mxu1 %v4749_v50 }
 0x7af   :  { %4297 = vmatprep.subr.bf16.mxu1 %v4750_v15 }
 0x7b2   :  { %4298 = vmatpush3.bf16.msra.mxu1 %v4751_v52 }
 0x7b3   :  { %4299 = vmatprep.subr.bf16.mxu1 %v4752_v29 }
 0x7b6   :  { %4300 = vmatpush3.bf16.msra.mxu1 %v4753_v30 }
 0x7b7   :  { %4301 = vmatprep.subr.bf16.mxu1 %v4754_v63 }
 0x7ba   :  { %4302 = vmatpush3.bf16.msra.mxu1 %v4755_v49 }
 0x7bb   :  { %4303 = vmatprep.subr.bf16.mxu1 %v4756_v26 }
 0x7be   :  { %4304 = vmatpush3.bf16.msra.mxu1 %v4757_v11 }
 0x7bf   :  { %4305 = vmatprep.subr.bf16.mxu1 %v4758_v28 }
 0x7c2   :  { %4306 = vmatpush3.bf16.msra.mxu1 %v4759_v34 }
 0x865   :  { %v2986_v33 = vpop.f32.mrf.mxu1 }
 0x866   :  { %v2993_v58 = vadd.f32 %v2986_v33, %v2673_v46 }
 0x867   :  { %v2988_v39 = vpop.f32.mrf.mxu1 }
 0x868   :  { %v3007_v2 = vadd.f32 %v3000_v60, %v2993_v58  ;;  %v2994_v12 = vadd.f32 %v2988_v39, %v6464_v48 }
 0x869   :  { %v2990_v41 = vpop.f32.mrf.mxu1 }
 0x86a   :  { %v3008_v18 = vadd.f32 %v3004_v37, %v2994_v12  ;;  %v3009_v20 = vmax.f32 %v3007_v2, 0.0 }
 0x86b   :  { %v2991_v43 = vpop.f32.mrf.mxu1 }
 0x86c   :  { %v3010_v22 = vmax.f32 %v3008_v18, 0.0  ;;  %v3011_v24 = vpack.c.bf16 %v3009_v20, %v3009_v20 }
 0x86e   :  { %v3012_v9 = vpack.c.bf16 %v3010_v22, %v3010_v22 }
 0x870   :  { %3249 = vmatprep.mubr.bf16.mxu0 %v3012_v9 }
 0x871   :  { %3250 = vmatmul.mubr.bf16.vlgmr.msra.gmra.mxu0 %v3011_v24 }
 0x931   :  { %v3251_v38 = vpop.f32.mrf.mxu0 }
 0x932   :  { %v3252_v27 = vadd.f32 %v3251_v38, %v3050_v35 }
 0x933   :  { %v3253_v4 = vpop.f32.mrf.mxu0 }
 0x934   :  { %v3254_v14 = vadd.f32 %v3253_v4, %v3054_v53  ;;  %v3258_v45 = vmax.f32 %v3252_v27, 0.0 }
 0x935   :  { %v3255_v46 = vpop.f32.mrf.mxu0 }
 0x936   :  { %v3259_v47 = vmax.f32 %v3254_v14, 0.0  ;;  %v3260_v1 = vpack.c.bf16 %v3258_v45, %v3258_v45 }
 0x937   :  { %v3256_v48 = vpop.f32.mrf.mxu0 }
 0x938   :  { %v3261_v61 = vpack.c.bf16 %v3259_v47, %v3259_v47 }
 0x93a   :  { %3429 = vmatprep.mubr.bf16.mxu1 %v3261_v61 }
 0x93b   :  { %3430 = vmatmul.mubr.bf16.vlgmr.msra.gmra.mxu1 %v3260_v1 }
 0x9fb   :  { %v4307_v56 = vpop.f32.mrf.mxu1 }
 0x9fd   :  { %v4308_v57 = vpop.f32.mrf.mxu1 }
 0x9fe   :  { %v4309_v8 = vadd.f32 %v4308_v57, %v4307_v56 }
 0x9ff   :  { %v4310_v54 = vpop.f32.mrf.mxu1 }
 0xa00   :  { %v3432_v10 = vadd.f32 %v4309_v8, %v3833_v6 }
 0xa01   :  { %v4311_v55 = vpop.f32.mrf.mxu1 }
 0xa02   :  { %v3438_v19 = vand.u32 2147483647, %v3432_v10  ;;  %v3437_v13 = vmax.f32 %v3432_v10, 0.0 }
 0xa04   :  { %v3439_v23 = vsub.f32 0.0, %v3438_v19 }
 0xa06   :  { %v3440_v16 = vmul.f32 1.442695, %v3439_v23 }
 0xa08   :  { %4760 = vpow2.f32 %v3440_v16 }
 0xa15   :  { %v4761_v62 = vpop.eup %4760 }
 0xa16   :  { %v3442_v17 = vadd.f32 1.0, %v4761_v62  ;;  %v3445_v36 = vmul.f32 -0.5, %v4761_v62  ;;  %v3448_v40 = vand.u32 2147483647, %v4761_v62 }
 0xa18   :  { %4762 = vlog2.f32 %v3442_v17  ;;  %v3446_v59 = vadd.f32 1.0, %v3445_v36  ;;  %vm3449_vm3 = vcmp.lt.f32.partialorder %v3448_v40, 0.0004427343 }
 0xa1a   :  { %v3447_v3 = vmul.f32 %v4761_v62, %v3446_v59 }
 0xa25   :  { %v4763_v42 = vpop.eup %4762 }
 0xa26   :  { %v3444_v44 = vmul.f32 0.6931472, %v4763_v42 }
 0xa28   :  { %v3450_v21 = vsel %vm3449_vm3, %v3447_v3, %v3444_v44 }
 0xa29   :  { %v3451_v50 = vadd.f32 %v3450_v21, %v3437_v13 }
 0xa2b   :  { %v3452_v15 = vadd.f32 1.0, %v3451_v50 }
 0xa2d   :  { %v3456_v52 = vsel %vm3455_vm4, %v3452_v15, %v3432_v10 }
 0xa2e   :  { %3458 = vst.msk [vmem:[%s6559_s9] sm:$0x3] %vm3457_vm5, %v3456_v52 }

</bundles_post_ra>
